<compile_context>
chip_gen: v5e
topology: v5e:2x2
jax: 0.10.0
libtpu: 0.0.40
codegen_flags: <defaults>
</compile_context>

<pallas_src>
import functools

import jax
import jax.numpy as jnp
from jax import lax
from jax.experimental import pallas as pl
from jax.experimental.pallas import tpu as pltpu

_BN_EPS = 1e-5
_VMEM_LIMIT = 32 * 1024 * 1024


# ----------------------------------------------------------------------------
# Pallas kernels
# ----------------------------------------------------------------------------
def _conv_bn_relu_kernel(a_ref, w_ref, g_ref, b_ref, o_ref):
    # a: (M, K) bf16 im2col patches, w: (K, C) bf16, g/b: (1, C) f32 -> o: (M, C) f32
    # Fused conv-as-matmul + batch-norm (batch statistics) + affine + ReLU.
    y = jnp.dot(a_ref[...], w_ref[...], preferred_element_type=jnp.float32)
    inv_m = 1.0 / y.shape[0]
    mean = jnp.sum(y, axis=0, keepdims=True) * inv_m
    centered = y - mean
    var = jnp.sum(centered * centered, axis=0, keepdims=True) * inv_m
    scale = g_ref[...] * lax.rsqrt(var + _BN_EPS)
    o_ref[...] = jnp.maximum(centered * scale + b_ref[...], 0.0)


def _mm_bias_kernel(a_ref, w_ref, b_ref, o_ref):
    # a: (M, K) bf16, w: (K, N) bf16, b: (1, N) f32 -> o: (M, N) f32
    o_ref[...] = (
        jnp.dot(a_ref[...], w_ref[...], preferred_element_type=jnp.float32)
        + b_ref[...]
    )


# ----------------------------------------------------------------------------
# Pallas wrappers (single full-array VMEM block, no padding / no slicing on rows)
# ----------------------------------------------------------------------------
def fused_conv_bn_relu_pallas(patches, w, gamma, beta):
    """relu(BN(patches @ w)) with batch stats computed in-kernel.

    patches: (M, K) bf16, w: (K, C) bf16, gamma/beta: (1, C) f32 -> (M, C) f32.
    """
    M, K = patches.shape
    C = w.shape[1]
    cost = pl.CostEstimate(
        flops=2 * M * K * C + 8 * M * C,
        transcendentals=C,
        bytes_accessed=2 * M * K + 2 * K * C + 4 * M * C + 8 * C,
    )
    return pl.pallas_call(
        _conv_bn_relu_kernel,
        out_shape=jax.ShapeDtypeStruct((M, C), jnp.float32),
        grid_spec=pltpu.PrefetchScalarGridSpec(
            num_scalar_prefetch=0,
            grid=(1,),
            in_specs=[
                pl.BlockSpec((M, K), lambda i: (0, 0)),
                pl.BlockSpec((K, C), lambda i: (0, 0)),
                pl.BlockSpec((1, C), lambda i: (0, 0)),
                pl.BlockSpec((1, C), lambda i: (0, 0)),
            ],
            out_specs=pl.BlockSpec((M, C), lambda i: (0, 0)),
        ),
        compiler_params=pltpu.CompilerParams(
            dimension_semantics=("arbitrary",),
            vmem_limit_bytes=_VMEM_LIMIT,
        ),
        cost_estimate=cost,
    )(patches, w, gamma, beta)


def matmul_bias_pallas(patches, w, b):
    """(M,K) bf16 @ (K,N) bf16 + b (1,N) f32 -> (M,N) f32, single VMEM block."""
    M, K = patches.shape
    N = w.shape[1]
    cost = pl.CostEstimate(
        flops=2 * M * K * N + M * N,
        transcendentals=0,
        bytes_accessed=2 * M * K + 2 * K * N + 4 * M * N + 4 * N,
    )
    return pl.pallas_call(
        _mm_bias_kernel,
        out_shape=jax.ShapeDtypeStruct((M, N), jnp.float32),
        grid_spec=pltpu.PrefetchScalarGridSpec(
            num_scalar_prefetch=0,
            grid=(1,),
            in_specs=[
                pl.BlockSpec((M, K), lambda i: (0, 0)),
                pl.BlockSpec((K, N), lambda i: (0, 0)),
                pl.BlockSpec((1, N), lambda i: (0, 0)),
            ],
            out_specs=pl.BlockSpec((M, N), lambda i: (0, 0)),
        ),
        compiler_params=pltpu.CompilerParams(
            dimension_semantics=("arbitrary",),
            vmem_limit_bytes=_VMEM_LIMIT,
        ),
        cost_estimate=cost,
    )(patches, w, b)


# ----------------------------------------------------------------------------
# JAX glue: im2col (bf16), conv wrappers, pool/unpool, dropout
# ----------------------------------------------------------------------------
def _im2col_3x3(x_bf16):
    # (N,H,W,C) bf16 -> (N*H*W, 9*C) bf16, patch order [kh, kw, cin] matching the
    # (3,3,Cin,Cout) -> (9*Cin, Cout) weight reshape.
    N, H, W, C = x_bf16.shape
    xp = jnp.pad(x_bf16, ((0, 0), (1, 1), (1, 1), (0, 0)))
    cols = [xp[:, dh:dh + H, dw:dw + W, :] for dh in range(3) for dw in range(3)]
    return jnp.concatenate(cols, axis=-1).reshape(N * H * W, 9 * C)


def conv_bn_relu(x, w_mat, gamma, beta):
    # Conv bias omitted: a per-channel constant cancels exactly under the
    # BatchNorm mean subtraction that immediately follows each conv.
    N, H, W, _ = x.shape
    Cout = w_mat.shape[1]
    patches = _im2col_3x3(x.astype(jnp.bfloat16))
    y = fused_conv_bn_relu_pallas(patches, w_mat, gamma, beta)
    return y.reshape(N, H, W, Cout)


def conv3x3_bias(x, w_mat, b, n_valid_out):
    # Classifier conv (no BN/ReLU); weights were lane-padded once at prepare time.
    N, H, W, _ = x.shape
    patches = _im2col_3x3(x.astype(jnp.bfloat16))
    y = matmul_bias_pallas(patches, w_mat, b)
    return y[:, :n_valid_out].reshape(N, H, W, n_valid_out)


def max_pool_with_idx(x):
    # 2x2 / stride 2 max pool; keep the argmax window slot (first-max tie-break).
    N, H, W, C = x.shape
    xw = (x.reshape(N, H // 2, 2, W // 2, 2, C)
            .transpose(0, 1, 3, 2, 4, 5)
            .reshape(N, H // 2, W // 2, 4, C))
    pooled = jnp.max(xw, axis=3)
    idx = jnp.argmax(xw, axis=3).astype(jnp.int32)   # (N,h,w,C)
    return pooled, idx


def max_unpool(x, idx):
    # F.max_unpool2d(x, indices, 2, 2, 0, size): scatter values back to max slots.
    N, h, w, C = x.shape
    slots = jnp.arange(4, dtype=jnp.int32).reshape(1, 1, 1, 4, 1)
    y = jnp.where(idx[:, :, :, None, :] == slots, x[:, :, :, None, :], 0.0)
    y = y.reshape(N, h, w, 2, 2, C).transpose(0, 1, 3, 2, 4, 5)
    return y.reshape(N, 2 * h, 2 * w, C)


def dropout(x, p, key):
    # F.dropout(..., training=True); deterministic via fixed JAX key.
    if p <= 0.0:
        return x
    keep = jax.random.bernoulli(key, 1.0 - p, x.shape)
    return jnp.where(keep, x / (1.0 - p), 0.0)


# ----------------------------------------------------------------------------
# Model: parameters + forward
# ----------------------------------------------------------------------------
_BN_LAYERS = ("e0c0", "e0c1", "e1c0", "e1c1", "d0c0", "d0c1", "d1c0", "d1c1")


def init_params(key, in_channels):
    f0, f1 = 64, 128
    shapes = {
        # encoder 0: in -> 64, 64 -> 64
        "e0c0": (in_channels, f0), "e0c1": (f0, f0),
        # encoder 1: 64 -> 128, 128 -> 128
        "e1c0": (f0, f1), "e1c1": (f1, f1),
        # decoder 0: 128 -> 128, 128 -> 64
        "d0c0": (f1, f1), "d0c1": (f1, f0),
        # decoder 1: 64 -> 64, 64 -> 64
        "d1c0": (f0, f0), "d1c1": (f0, f0),
        # classifier: 64 -> in_channels
        "cls": (f0, in_channels),
    }
    params = {}
    keys = jax.random.split(key, 2 * len(shapes))
    for i, (name, (cin, cout)) in enumerate(shapes.items()):
        kw, kb = keys[2 * i], keys[2 * i + 1]
        fan_in = 9 * cin
        params[name + "_w"] = (jax.random.normal(kw, (3, 3, cin, cout), jnp.float32)
                               / jnp.sqrt(float(fan_in)))
        params[name + "_b"] = jax.random.normal(kb, (cout,), jnp.float32) * 0.01
        if name != "cls":
            # BatchNorm2d defaults: gamma=1, beta=0
            params[name + "_g"] = jnp.ones((cout,), jnp.float32)
            params[name + "_beta"] = jnp.zeros((cout,), jnp.float32)
    return params


def prepare_params(params):
    """One-time reshape / bf16-cast / pad of parameters (out of the per-call path)."""
    prep = {}
    for name in _BN_LAYERS:
        w = params[name + "_w"]
        cin, cout = w.shape[2], w.shape[3]
        prep[name + "_w"] = w.reshape(9 * cin, cout).astype(jnp.bfloat16)
        prep[name + "_g"] = params[name + "_g"].reshape(1, cout).astype(jnp.float32)
        prep[name + "_beta"] = params[name + "_beta"].reshape(1, cout).astype(jnp.float32)
        # conv bias dropped (cancels exactly under the following BatchNorm).
    w = params["cls_w"]
    cin, cout = w.shape[2], w.shape[3]
    cpad = 128  # lane-pad the tiny classifier output ONCE here, not per call
    wm = w.reshape(9 * cin, cout).astype(jnp.bfloat16)
    prep["cls_w"] = jnp.pad(wm, ((0, 0), (0, cpad - cout)))
    prep["cls_b"] = jnp.pad(params["cls_b"].astype(jnp.float32),
                            (0, cpad - cout)).reshape(1, cpad)
    return prep


@functools.partial(jax.jit, static_argnames=("drop_rate",))
def epistemic_forward(prep, x_nchw, drop_key, drop_rate=0.3):
    # NCHW at the API boundary (PyTorch convention) -> NHWC internally.
    n_out = x_nchw.shape[1]
    x = jnp.transpose(x_nchw, (0, 2, 3, 1)).astype(jnp.float32)

    def cbr(name, t):
        return conv_bn_relu(t, prep[name + "_w"], prep[name + "_g"],
                            prep[name + "_beta"])

    # ---- encoders ----
    f = cbr("e0c0", x)
    f = cbr("e0c1", f)
    f, idx0 = max_pool_with_idx(f)            # 16x16 -> 8x8, 64 ch

    f = cbr("e1c0", f)
    f = cbr("e1c1", f)
    f, idx1 = max_pool_with_idx(f)            # 8x8 -> 4x4, 128 ch

    k1, k2 = jax.random.split(drop_key)
    f = dropout(f, drop_rate, k1)             # dropout after encoder 1

    # ---- decoders ----
    f = max_unpool(f, idx1)                   # 4x4 -> 8x8
    f = cbr("d0c0", f)
    f = cbr("d0c1", f)
    f = dropout(f, drop_rate, k2)             # dropout after decoder 0

    f = max_unpool(f, idx0)                   # 8x8 -> 16x16
    f = cbr("d1c0", f)
    f = cbr("d1c1", f)

    # ---- classifier (conv only, no BN/ReLU) ----
    out = conv3x3_bias(f, prep["cls_w"], prep["cls_b"], n_out)
    return {"mean": jnp.transpose(out, (0, 3, 1, 2))}


# ----------------------------------------------------------------------------
if __name__ == "__main__":
    key = jax.random.PRNGKey(0)
    k_params, k_input, k_drop = jax.random.split(key, 3)

    in_channels = 4
    N, H, W = 2, 16, 16
    drop_rate = 0.3

    params = init_params(k_params, in_channels)
    prep = prepare_params(params)
    x = jax.random.normal(k_input, (N, in_channels, H, W), jnp.float32)

    results = epistemic_forward(prep, x, k_drop, drop_rate=drop_rate)
    mean = jax.block_until_ready(results["mean"])
    assert mean.shape == (N, in_channels, H, W), mean.shape
    assert bool(jnp.all(jnp.isfinite(mean)))
    print("KERNEL_OK")
</pallas_src>

<mosaic_0001>
module attributes {stable_mosaic.version = 11 : i64} {
  func.func @_conv_bn_relu_kernel(%arg0: i32, %arg1: memref<512x36xbf16, #tpu.memory_space<vmem>>, %arg2: memref<36x64xbf16, #tpu.memory_space<vmem>>, %arg3: memref<1x64xf32, #tpu.memory_space<vmem>>, %arg4: memref<1x64xf32, #tpu.memory_space<vmem>>, %arg5: memref<512x64xf32, #tpu.memory_space<vmem>>) attributes {dimension_semantics = [#tpu.dimension_semantics<arbitrary>], iteration_bounds = array<i64: 1>, scalar_prefetch = 0 : i64, scratch_operands = 0 : i64, tpu.core_type = #tpu.core_type<tc>, window_params = [{pipeline_mode = #tpu.pipeline_mode<synchronous>, transform_indices = @transform_0, window_bounds = array<i64: 512, 36>}, {pipeline_mode = #tpu.pipeline_mode<synchronous>, transform_indices = @transform_1, window_bounds = array<i64: 36, 64>}, {pipeline_mode = #tpu.pipeline_mode<synchronous>, transform_indices = @transform_2, window_bounds = array<i64: 1, 64>}, {pipeline_mode = #tpu.pipeline_mode<synchronous>, transform_indices = @transform_3, window_bounds = array<i64: 1, 64>}, {pipeline_mode = #tpu.pipeline_mode<synchronous>, transform_indices = @transform_4, window_bounds = array<i64: 512, 64>}]} {
    %c0 = arith.constant 0 : index
    %c0_0 = arith.constant 0 : index
    %0 = vector.load %arg1[%c0, %c0_0] : memref<512x36xbf16, #tpu.memory_space<vmem>>, vector<512x36xbf16>
    %c0_1 = arith.constant 0 : index
    %c0_2 = arith.constant 0 : index
    %1 = vector.load %arg2[%c0_1, %c0_2] : memref<36x64xbf16, #tpu.memory_space<vmem>>, vector<36x64xbf16>
    %cst = arith.constant dense<0.000000e+00> : vector<512x64xf32>
    %2 = tpu.matmul %0, %1, %cst {dimension_numbers = #tpu.dot_dimension_numbers<[1], [0], [0], [1], [0, 0, 1, 1], [], []>} : vector<512x36xbf16>, vector<36x64xbf16>, vector<512x64xf32> -> vector<512x64xf32>
    %cst_3 = arith.constant dense<0.000000e+00> : vector<64xf32>
    %3 = vector.multi_reduction <add>, %2, %cst_3 [0] : vector<512x64xf32> to vector<64xf32>
    %4 = vector.shape_cast %3 : vector<64xf32> to vector<1x64xf32>
    %cst_4 = arith.constant 0.001953125 : f32
    %5 = vector.broadcast %cst_4 : f32 to vector<1x64xf32>
    %6 = arith.mulf %4, %5 : vector<1x64xf32>
    %7 = vector.broadcast %6 : vector<1x64xf32> to vector<512x64xf32>
    %8 = arith.subf %2, %7 : vector<512x64xf32>
    %9 = arith.mulf %8, %8 : vector<512x64xf32>
    %cst_5 = arith.constant dense<0.000000e+00> : vector<64xf32>
    %10 = vector.multi_reduction <add>, %9, %cst_5 [0] : vector<512x64xf32> to vector<64xf32>
    %11 = vector.shape_cast %10 : vector<64xf32> to vector<1x64xf32>
    %cst_6 = arith.constant 0.001953125 : f32
    %12 = vector.broadcast %cst_6 : f32 to vector<1x64xf32>
    %13 = arith.mulf %11, %12 : vector<1x64xf32>
    %c0_7 = arith.constant 0 : index
    %c0_8 = arith.constant 0 : index
    %14 = vector.load %arg3[%c0_7, %c0_8] : memref<1x64xf32, #tpu.memory_space<vmem>>, vector<1x64xf32>
    %cst_9 = arith.constant 9.99999974E-6 : f32
    %15 = vector.broadcast %cst_9 : f32 to vector<1x64xf32>
    %16 = arith.addf %13, %15 : vector<1x64xf32>
    %17 = math.rsqrt %16 : vector<1x64xf32>
    %18 = arith.mulf %14, %17 : vector<1x64xf32>
    %19 = vector.broadcast %18 : vector<1x64xf32> to vector<512x64xf32>
    %20 = arith.mulf %8, %19 : vector<512x64xf32>
    %c0_10 = arith.constant 0 : index
    %c0_11 = arith.constant 0 : index
    %21 = vector.load %arg4[%c0_10, %c0_11] : memref<1x64xf32, #tpu.memory_space<vmem>>, vector<1x64xf32>
    %22 = vector.broadcast %21 : vector<1x64xf32> to vector<512x64xf32>
    %23 = arith.addf %20, %22 : vector<512x64xf32>
    %cst_12 = arith.constant 0.000000e+00 : f32
    %24 = vector.broadcast %cst_12 : f32 to vector<512x64xf32>
    %25 = arith.maximumf %23, %24 : vector<512x64xf32>
    %c0_13 = arith.constant 0 : index
    %c0_14 = arith.constant 0 : index
    %26 = vector.load %arg5[%c0_13, %c0_14] : memref<512x64xf32, #tpu.memory_space<vmem>>, vector<512x64xf32>
    tpu.vector_store %arg5[%c0_13, %c0_14], %25 {strides = array<i32>} : memref<512x64xf32, #tpu.memory_space<vmem>>, vector<512x64xf32>,
    return
  }
  func.func @transform_0(%arg0: i32) -> (i32, i32) {
    %c0_i32 = arith.constant 0 : i32
    %c0_i32_0 = arith.constant 0 : i32
    %c0_i32_1 = arith.constant 0 : i32
    return %c0_i32, %c0_i32_0 : i32, i32
  }
  func.func @transform_1(%arg0: i32) -> (i32, i32) {
    %c0_i32 = arith.constant 0 : i32
    %c0_i32_0 = arith.constant 0 : i32
    %c0_i32_1 = arith.constant 0 : i32
    return %c0_i32, %c0_i32_0 : i32, i32
  }
  func.func @transform_2(%arg0: i32) -> (i32, i32) {
    %c0_i32 = arith.constant 0 : i32
    %c0_i32_0 = arith.constant 0 : i32
    %c0_i32_1 = arith.constant 0 : i32
    return %c0_i32, %c0_i32_0 : i32, i32
  }
  func.func @transform_3(%arg0: i32) -> (i32, i32) {
    %c0_i32 = arith.constant 0 : i32
    %c0_i32_0 = arith.constant 0 : i32
    %c0_i32_1 = arith.constant 0 : i32
    return %c0_i32, %c0_i32_0 : i32, i32
  }
  func.func @transform_4(%arg0: i32) -> (i32, i32) {
    %c0_i32 = arith.constant 0 : i32
    %c0_i32_0 = arith.constant 0 : i32
    %c0_i32_1 = arith.constant 0 : i32
    return %c0_i32, %c0_i32_0 : i32, i32
  }
}

module attributes {stable_mosaic.version = 11 : i64} {
  func.func @_conv_bn_relu_kernel(%arg0: i32, %arg1: memref<512x576xbf16, #tpu.memory_space<vmem>>, %arg2: memref<576x64xbf16, #tpu.memory_space<vmem>>, %arg3: memref<1x64xf32, #tpu.memory_space<vmem>>, %arg4: memref<1x64xf32, #tpu.memory_space<vmem>>, %arg5: memref<512x64xf32, #tpu.memory_space<vmem>>) attributes {dimension_semantics = [#tpu.dimension_semantics<arbitrary>], iteration_bounds = array<i64: 1>, scalar_prefetch = 0 : i64, scratch_operands = 0 : i64, tpu.core_type = #tpu.core_type<tc>, window_params = [{pipeline_mode = #tpu.pipeline_mode<synchronous>, transform_indices = @transform_0, window_bounds = array<i64: 512, 576>}, {pipeline_mode = #tpu.pipeline_mode<synchronous>, transform_indices = @transform_1, window_bounds = array<i64: 576, 64>}, {pipeline_mode = #tpu.pipeline_mode<synchronous>, transform_indices = @transform_2, window_bounds = array<i64: 1, 64>}, {pipeline_mode = #tpu.pipeline_mode<synchronous>, transform_indices = @transform_3, window_bounds = array<i64: 1, 64>}, {pipeline_mode = #tpu.pipeline_mode<synchronous>, transform_indices = @transform_4, window_bounds = array<i64: 512, 64>}]} {
    %c0 = arith.constant 0 : index
    %c0_0 = arith.constant 0 : index
    %0 = vector.load %arg1[%c0, %c0_0] : memref<512x576xbf16, #tpu.memory_space<vmem>>, vector<512x576xbf16>
    %c0_1 = arith.constant 0 : index
    %c0_2 = arith.constant 0 : index
    %1 = vector.load %arg2[%c0_1, %c0_2] : memref<576x64xbf16, #tpu.memory_space<vmem>>, vector<576x64xbf16>
    %cst = arith.constant dense<0.000000e+00> : vector<512x64xf32>
    %2 = tpu.matmul %0, %1, %cst {dimension_numbers = #tpu.dot_dimension_numbers<[1], [0], [0], [1], [0, 0, 1, 1], [], []>} : vector<512x576xbf16>, vector<576x64xbf16>, vector<512x64xf32> -> vector<512x64xf32>
    %cst_3 = arith.constant dense<0.000000e+00> : vector<64xf32>
    %3 = vector.multi_reduction <add>, %2, %cst_3 [0] : vector<512x64xf32> to vector<64xf32>
    %4 = vector.shape_cast %3 : vector<64xf32> to vector<1x64xf32>
    %cst_4 = arith.constant 0.001953125 : f32
    %5 = vector.broadcast %cst_4 : f32 to vector<1x64xf32>
    %6 = arith.mulf %4, %5 : vector<1x64xf32>
    %7 = vector.broadcast %6 : vector<1x64xf32> to vector<512x64xf32>
    %8 = arith.subf %2, %7 : vector<512x64xf32>
    %9 = arith.mulf %8, %8 : vector<512x64xf32>
    %cst_5 = arith.constant dense<0.000000e+00> : vector<64xf32>
    %10 = vector.multi_reduction <add>, %9, %cst_5 [0] : vector<512x64xf32> to vector<64xf32>
    %11 = vector.shape_cast %10 : vector<64xf32> to vector<1x64xf32>
    %cst_6 = arith.constant 0.001953125 : f32
    %12 = vector.broadcast %cst_6 : f32 to vector<1x64xf32>
    %13 = arith.mulf %11, %12 : vector<1x64xf32>
    %c0_7 = arith.constant 0 : index
    %c0_8 = arith.constant 0 : index
    %14 = vector.load %arg3[%c0_7, %c0_8] : memref<1x64xf32, #tpu.memory_space<vmem>>, vector<1x64xf32>
    %cst_9 = arith.constant 9.99999974E-6 : f32
    %15 = vector.broadcast %cst_9 : f32 to vector<1x64xf32>
    %16 = arith.addf %13, %15 : vector<1x64xf32>
    %17 = math.rsqrt %16 : vector<1x64xf32>
    %18 = arith.mulf %14, %17 : vector<1x64xf32>
    %19 = vector.broadcast %18 : vector<1x64xf32> to vector<512x64xf32>
    %20 = arith.mulf %8, %19 : vector<512x64xf32>
    %c0_10 = arith.constant 0 : index
    %c0_11 = arith.constant 0 : index
    %21 = vector.load %arg4[%c0_10, %c0_11] : memref<1x64xf32, #tpu.memory_space<vmem>>, vector<1x64xf32>
    %22 = vector.broadcast %21 : vector<1x64xf32> to vector<512x64xf32>
    %23 = arith.addf %20, %22 : vector<512x64xf32>
    %cst_12 = arith.constant 0.000000e+00 : f32
    %24 = vector.broadcast %cst_12 : f32 to vector<512x64xf32>
    %25 = arith.maximumf %23, %24 : vector<512x64xf32>
    %c0_13 = arith.constant 0 : index
    %c0_14 = arith.constant 0 : index
    %26 = vector.load %arg5[%c0_13, %c0_14] : memref<512x64xf32, #tpu.memory_space<vmem>>, vector<512x64xf32>
    tpu.vector_store %arg5[%c0_13, %c0_14], %25 {strides = array<i32>} : memref<512x64xf32, #tpu.memory_space<vmem>>, vector<512x64xf32>,
    return
  }
  func.func @transform_0(%arg0: i32) -> (i32, i32) {
    %c0_i32 = arith.constant 0 : i32
    %c0_i32_0 = arith.constant 0 : i32
    %c0_i32_1 = arith.constant 0 : i32
    return %c0_i32, %c0_i32_0 : i32, i32
  }
  func.func @transform_1(%arg0: i32) -> (i32, i32) {
    %c0_i32 = arith.constant 0 : i32
    %c0_i32_0 = arith.constant 0 : i32
    %c0_i32_1 = arith.constant 0 : i32
    return %c0_i32, %c0_i32_0 : i32, i32
  }
  func.func @transform_2(%arg0: i32) -> (i32, i32) {
    %c0_i32 = arith.constant 0 : i32
    %c0_i32_0 = arith.constant 0 : i32
    %c0_i32_1 = arith.constant 0 : i32
    return %c0_i32, %c0_i32_0 : i32, i32
  }
  func.func @transform_3(%arg0: i32) -> (i32, i32) {
    %c0_i32 = arith.constant 0 : i32
    %c0_i32_0 = arith.constant 0 : i32
    %c0_i32_1 = arith.constant 0 : i32
    return %c0_i32, %c0_i32_0 : i32, i32
  }
  func.func @transform_4(%arg0: i32) -> (i32, i32) {
    %c0_i32 = arith.constant 0 : i32
    %c0_i32_0 = arith.constant 0 : i32
    %c0_i32_1 = arith.constant 0 : i32
    return %c0_i32, %c0_i32_0 : i32, i32
  }
}

module attributes {stable_mosaic.version = 11 : i64} {
  func.func @_conv_bn_relu_kernel(%arg0: i32, %arg1: memref<128x576xbf16, #tpu.memory_space<vmem>>, %arg2: memref<576x128xbf16, #tpu.memory_space<vmem>>, %arg3: memref<1x128xf32, #tpu.memory_space<vmem>>, %arg4: memref<1x128xf32, #tpu.memory_space<vmem>>, %arg5: memref<128x128xf32, #tpu.memory_space<vmem>>) attributes {dimension_semantics = [#tpu.dimension_semantics<arbitrary>], iteration_bounds = array<i64: 1>, scalar_prefetch = 0 : i64, scratch_operands = 0 : i64, tpu.core_type = #tpu.core_type<tc>, window_params = [{pipeline_mode = #tpu.pipeline_mode<synchronous>, transform_indices = @transform_0, window_bounds = array<i64: 128, 576>}, {pipeline_mode = #tpu.pipeline_mode<synchronous>, transform_indices = @transform_1, window_bounds = array<i64: 576, 128>}, {pipeline_mode = #tpu.pipeline_mode<synchronous>, transform_indices = @transform_2, window_bounds = array<i64: 1, 128>}, {pipeline_mode = #tpu.pipeline_mode<synchronous>, transform_indices = @transform_3, window_bounds = array<i64: 1, 128>}, {pipeline_mode = #tpu.pipeline_mode<synchronous>, transform_indices = @transform_4, window_bounds = array<i64: 128, 128>}]} {
    %c0 = arith.constant 0 : index
    %c0_0 = arith.constant 0 : index
    %0 = vector.load %arg1[%c0, %c0_0] : memref<128x576xbf16, #tpu.memory_space<vmem>>, vector<128x576xbf16>
    %c0_1 = arith.constant 0 : index
    %c0_2 = arith.constant 0 : index
    %1 = vector.load %arg2[%c0_1, %c0_2] : memref<576x128xbf16, #tpu.memory_space<vmem>>, vector<576x128xbf16>
    %cst = arith.constant dense<0.000000e+00> : vector<128x128xf32>
    %2 = tpu.matmul %0, %1, %cst {dimension_numbers = #tpu.dot_dimension_numbers<[1], [0], [0], [1], [0, 0, 1, 1], [], []>} : vector<128x576xbf16>, vector<576x128xbf16>, vector<128x128xf32> -> vector<128x128xf32>
    %cst_3 = arith.constant dense<0.000000e+00> : vector<128xf32>
    %3 = vector.multi_reduction <add>, %2, %cst_3 [0] : vector<128x128xf32> to vector<128xf32>
    %4 = vector.shape_cast %3 : vector<128xf32> to vector<1x128xf32>
    %cst_4 = arith.constant 7.812500e-03 : f32
    %5 = vector.broadcast %cst_4 : f32 to vector<1x128xf32>
    %6 = arith.mulf %4, %5 : vector<1x128xf32>
    %7 = vector.broadcast %6 : vector<1x128xf32> to vector<128x128xf32>
    %8 = arith.subf %2, %7 : vector<128x128xf32>
    %9 = arith.mulf %8, %8 : vector<128x128xf32>
    %cst_5 = arith.constant dense<0.000000e+00> : vector<128xf32>
    %10 = vector.multi_reduction <add>, %9, %cst_5 [0] : vector<128x128xf32> to vector<128xf32>
    %11 = vector.shape_cast %10 : vector<128xf32> to vector<1x128xf32>
    %cst_6 = arith.constant 7.812500e-03 : f32
    %12 = vector.broadcast %cst_6 : f32 to vector<1x128xf32>
    %13 = arith.mulf %11, %12 : vector<1x128xf32>
    %c0_7 = arith.constant 0 : index
    %c0_8 = arith.constant 0 : index
    %14 = vector.load %arg3[%c0_7, %c0_8] : memref<1x128xf32, #tpu.memory_space<vmem>>, vector<1x128xf32>
    %cst_9 = arith.constant 9.99999974E-6 : f32
    %15 = vector.broadcast %cst_9 : f32 to vector<1x128xf32>
    %16 = arith.addf %13, %15 : vector<1x128xf32>
    %17 = math.rsqrt %16 : vector<1x128xf32>
    %18 = arith.mulf %14, %17 : vector<1x128xf32>
    %19 = vector.broadcast %18 : vector<1x128xf32> to vector<128x128xf32>
    %20 = arith.mulf %8, %19 : vector<128x128xf32>
    %c0_10 = arith.constant 0 : index
    %c0_11 = arith.constant 0 : index
    %21 = vector.load %arg4[%c0_10, %c0_11] : memref<1x128xf32, #tpu.memory_space<vmem>>, vector<1x128xf32>
    %22 = vector.broadcast %21 : vector<1x128xf32> to vector<128x128xf32>
    %23 = arith.addf %20, %22 : vector<128x128xf32>
    %cst_12 = arith.constant 0.000000e+00 : f32
    %24 = vector.broadcast %cst_12 : f32 to vector<128x128xf32>
    %25 = arith.maximumf %23, %24 : vector<128x128xf32>
    %c0_13 = arith.constant 0 : index
    %c0_14 = arith.constant 0 : index
    %26 = vector.load %arg5[%c0_13, %c0_14] : memref<128x128xf32, #tpu.memory_space<vmem>>, vector<128x128xf32>
    tpu.vector_store %arg5[%c0_13, %c0_14], %25 {strides = array<i32>} : memref<128x128xf32, #tpu.memory_space<vmem>>, vector<128x128xf32>,
    return
  }
  func.func @transform_0(%arg0: i32) -> (i32, i32) {
    %c0_i32 = arith.constant 0 : i32
    %c0_i32_0 = arith.constant 0 : i32
    %c0_i32_1 = arith.constant 0 : i32
    return %c0_i32, %c0_i32_0 : i32, i32
  }
  func.func @transform_1(%arg0: i32) -> (i32, i32) {
    %c0_i32 = arith.constant 0 : i32
    %c0_i32_0 = arith.constant 0 : i32
    %c0_i32_1 = arith.constant 0 : i32
    return %c0_i32, %c0_i32_0 : i32, i32
  }
  func.func @transform_2(%arg0: i32) -> (i32, i32) {
    %c0_i32 = arith.constant 0 : i32
    %c0_i32_0 = arith.constant 0 : i32
    %c0_i32_1 = arith.constant 0 : i32
    return %c0_i32, %c0_i32_0 : i32, i32
  }
  func.func @transform_3(%arg0: i32) -> (i32, i32) {
    %c0_i32 = arith.constant 0 : i32
    %c0_i32_0 = arith.constant 0 : i32
    %c0_i32_1 = arith.constant 0 : i32
    return %c0_i32, %c0_i32_0 : i32, i32
  }
  func.func @transform_4(%arg0: i32) -> (i32, i32) {
    %c0_i32 = arith.constant 0 : i32
    %c0_i32_0 = arith.constant 0 : i32
    %c0_i32_1 = arith.constant 0 : i32
    return %c0_i32, %c0_i32_0 : i32, i32
  }
}

module attributes {stable_mosaic.version = 11 : i64} {
  func.func @_conv_bn_relu_kernel(%arg0: i32, %arg1: memref<128x1152xbf16, #tpu.memory_space<vmem>>, %arg2: memref<1152x128xbf16, #tpu.memory_space<vmem>>, %arg3: memref<1x128xf32, #tpu.memory_space<vmem>>, %arg4: memref<1x128xf32, #tpu.memory_space<vmem>>, %arg5: memref<128x128xf32, #tpu.memory_space<vmem>>) attributes {dimension_semantics = [#tpu.dimension_semantics<arbitrary>], iteration_bounds = array<i64: 1>, scalar_prefetch = 0 : i64, scratch_operands = 0 : i64, tpu.core_type = #tpu.core_type<tc>, window_params = [{pipeline_mode = #tpu.pipeline_mode<synchronous>, transform_indices = @transform_0, window_bounds = array<i64: 128, 1152>}, {pipeline_mode = #tpu.pipeline_mode<synchronous>, transform_indices = @transform_1, window_bounds = array<i64: 1152, 128>}, {pipeline_mode = #tpu.pipeline_mode<synchronous>, transform_indices = @transform_2, window_bounds = array<i64: 1, 128>}, {pipeline_mode = #tpu.pipeline_mode<synchronous>, transform_indices = @transform_3, window_bounds = array<i64: 1, 128>}, {pipeline_mode = #tpu.pipeline_mode<synchronous>, transform_indices = @transform_4, window_bounds = array<i64: 128, 128>}]} {
    %c0 = arith.constant 0 : index
    %c0_0 = arith.constant 0 : index
    %0 = vector.load %arg1[%c0, %c0_0] : memref<128x1152xbf16, #tpu.memory_space<vmem>>, vector<128x1152xbf16>
    %c0_1 = arith.constant 0 : index
    %c0_2 = arith.constant 0 : index
    %1 = vector.load %arg2[%c0_1, %c0_2] : memref<1152x128xbf16, #tpu.memory_space<vmem>>, vector<1152x128xbf16>
    %cst = arith.constant dense<0.000000e+00> : vector<128x128xf32>
    %2 = tpu.matmul %0, %1, %cst {dimension_numbers = #tpu.dot_dimension_numbers<[1], [0], [0], [1], [0, 0, 1, 1], [], []>} : vector<128x1152xbf16>, vector<1152x128xbf16>, vector<128x128xf32> -> vector<128x128xf32>
    %cst_3 = arith.constant dense<0.000000e+00> : vector<128xf32>
    %3 = vector.multi_reduction <add>, %2, %cst_3 [0] : vector<128x128xf32> to vector<128xf32>
    %4 = vector.shape_cast %3 : vector<128xf32> to vector<1x128xf32>
    %cst_4 = arith.constant 7.812500e-03 : f32
    %5 = vector.broadcast %cst_4 : f32 to vector<1x128xf32>
    %6 = arith.mulf %4, %5 : vector<1x128xf32>
    %7 = vector.broadcast %6 : vector<1x128xf32> to vector<128x128xf32>
    %8 = arith.subf %2, %7 : vector<128x128xf32>
    %9 = arith.mulf %8, %8 : vector<128x128xf32>
    %cst_5 = arith.constant dense<0.000000e+00> : vector<128xf32>
    %10 = vector.multi_reduction <add>, %9, %cst_5 [0] : vector<128x128xf32> to vector<128xf32>
    %11 = vector.shape_cast %10 : vector<128xf32> to vector<1x128xf32>
    %cst_6 = arith.constant 7.812500e-03 : f32
    %12 = vector.broadcast %cst_6 : f32 to vector<1x128xf32>
    %13 = arith.mulf %11, %12 : vector<1x128xf32>
    %c0_7 = arith.constant 0 : index
    %c0_8 = arith.constant 0 : index
    %14 = vector.load %arg3[%c0_7, %c0_8] : memref<1x128xf32, #tpu.memory_space<vmem>>, vector<1x128xf32>
    %cst_9 = arith.constant 9.99999974E-6 : f32
    %15 = vector.broadcast %cst_9 : f32 to vector<1x128xf32>
    %16 = arith.addf %13, %15 : vector<1x128xf32>
    %17 = math.rsqrt %16 : vector<1x128xf32>
    %18 = arith.mulf %14, %17 : vector<1x128xf32>
    %19 = vector.broadcast %18 : vector<1x128xf32> to vector<128x128xf32>
    %20 = arith.mulf %8, %19 : vector<128x128xf32>
    %c0_10 = arith.constant 0 : index
    %c0_11 = arith.constant 0 : index
    %21 = vector.load %arg4[%c0_10, %c0_11] : memref<1x128xf32, #tpu.memory_space<vmem>>, vector<1x128xf32>
    %22 = vector.broadcast %21 : vector<1x128xf32> to vector<128x128xf32>
    %23 = arith.addf %20, %22 : vector<128x128xf32>
    %cst_12 = arith.constant 0.000000e+00 : f32
    %24 = vector.broadcast %cst_12 : f32 to vector<128x128xf32>
    %25 = arith.maximumf %23, %24 : vector<128x128xf32>
    %c0_13 = arith.constant 0 : index
    %c0_14 = arith.constant 0 : index
    %26 = vector.load %arg5[%c0_13, %c0_14] : memref<128x128xf32, #tpu.memory_space<vmem>>, vector<128x128xf32>
    tpu.vector_store %arg5[%c0_13, %c0_14], %25 {strides = array<i32>} : memref<128x128xf32, #tpu.memory_space<vmem>>, vector<128x128xf32>,
    return
  }
  func.func @transform_0(%arg0: i32) -> (i32, i32) {
    %c0_i32 = arith.constant 0 : i32
    %c0_i32_0 = arith.constant 0 : i32
    %c0_i32_1 = arith.constant 0 : i32
    return %c0_i32, %c0_i32_0 : i32, i32
  }
  func.func @transform_1(%arg0: i32) -> (i32, i32) {
    %c0_i32 = arith.constant 0 : i32
    %c0_i32_0 = arith.constant 0 : i32
    %c0_i32_1 = arith.constant 0 : i32
    return %c0_i32, %c0_i32_0 : i32, i32
  }
  func.func @transform_2(%arg0: i32) -> (i32, i32) {
    %c0_i32 = arith.constant 0 : i32
    %c0_i32_0 = arith.constant 0 : i32
    %c0_i32_1 = arith.constant 0 : i32
    return %c0_i32, %c0_i32_0 : i32, i32
  }
  func.func @transform_3(%arg0: i32) -> (i32, i32) {
    %c0_i32 = arith.constant 0 : i32
    %c0_i32_0 = arith.constant 0 : i32
    %c0_i32_1 = arith.constant 0 : i32
    return %c0_i32, %c0_i32_0 : i32, i32
  }
  func.func @transform_4(%arg0: i32) -> (i32, i32) {
    %c0_i32 = arith.constant 0 : i32
    %c0_i32_0 = arith.constant 0 : i32
    %c0_i32_1 = arith.constant 0 : i32
    return %c0_i32, %c0_i32_0 : i32, i32
  }
}

module attributes {stable_mosaic.version = 11 : i64} {
  func.func @_conv_bn_relu_kernel(%arg0: i32, %arg1: memref<128x1152xbf16, #tpu.memory_space<vmem>>, %arg2: memref<1152x64xbf16, #tpu.memory_space<vmem>>, %arg3: memref<1x64xf32, #tpu.memory_space<vmem>>, %arg4: memref<1x64xf32, #tpu.memory_space<vmem>>, %arg5: memref<128x64xf32, #tpu.memory_space<vmem>>) attributes {dimension_semantics = [#tpu.dimension_semantics<arbitrary>], iteration_bounds = array<i64: 1>, scalar_prefetch = 0 : i64, scratch_operands = 0 : i64, tpu.core_type = #tpu.core_type<tc>, window_params = [{pipeline_mode = #tpu.pipeline_mode<synchronous>, transform_indices = @transform_0, window_bounds = array<i64: 128, 1152>}, {pipeline_mode = #tpu.pipeline_mode<synchronous>, transform_indices = @transform_1, window_bounds = array<i64: 1152, 64>}, {pipeline_mode = #tpu.pipeline_mode<synchronous>, transform_indices = @transform_2, window_bounds = array<i64: 1, 64>}, {pipeline_mode = #tpu.pipeline_mode<synchronous>, transform_indices = @transform_3, window_bounds = array<i64: 1, 64>}, {pipeline_mode = #tpu.pipeline_mode<synchronous>, transform_indices = @transform_4, window_bounds = array<i64: 128, 64>}]} {
    %c0 = arith.constant 0 : index
    %c0_0 = arith.constant 0 : index
    %0 = vector.load %arg1[%c0, %c0_0] : memref<128x1152xbf16, #tpu.memory_space<vmem>>, vector<128x1152xbf16>
    %c0_1 = arith.constant 0 : index
    %c0_2 = arith.constant 0 : index
    %1 = vector.load %arg2[%c0_1, %c0_2] : memref<1152x64xbf16, #tpu.memory_space<vmem>>, vector<1152x64xbf16>
    %cst = arith.constant dense<0.000000e+00> : vector<128x64xf32>
    %2 = tpu.matmul %0, %1, %cst {dimension_numbers = #tpu.dot_dimension_numbers<[1], [0], [0], [1], [0, 0, 1, 1], [], []>} : vector<128x1152xbf16>, vector<1152x64xbf16>, vector<128x64xf32> -> vector<128x64xf32>
    %cst_3 = arith.constant dense<0.000000e+00> : vector<64xf32>
    %3 = vector.multi_reduction <add>, %2, %cst_3 [0] : vector<128x64xf32> to vector<64xf32>
    %4 = vector.shape_cast %3 : vector<64xf32> to vector<1x64xf32>
    %cst_4 = arith.constant 7.812500e-03 : f32
    %5 = vector.broadcast %cst_4 : f32 to vector<1x64xf32>
    %6 = arith.mulf %4, %5 : vector<1x64xf32>
    %7 = vector.broadcast %6 : vector<1x64xf32> to vector<128x64xf32>
    %8 = arith.subf %2, %7 : vector<128x64xf32>
    %9 = arith.mulf %8, %8 : vector<128x64xf32>
    %cst_5 = arith.constant dense<0.000000e+00> : vector<64xf32>
    %10 = vector.multi_reduction <add>, %9, %cst_5 [0] : vector<128x64xf32> to vector<64xf32>
    %11 = vector.shape_cast %10 : vector<64xf32> to vector<1x64xf32>
    %cst_6 = arith.constant 7.812500e-03 : f32
    %12 = vector.broadcast %cst_6 : f32 to vector<1x64xf32>
    %13 = arith.mulf %11, %12 : vector<1x64xf32>
    %c0_7 = arith.constant 0 : index
    %c0_8 = arith.constant 0 : index
    %14 = vector.load %arg3[%c0_7, %c0_8] : memref<1x64xf32, #tpu.memory_space<vmem>>, vector<1x64xf32>
    %cst_9 = arith.constant 9.99999974E-6 : f32
    %15 = vector.broadcast %cst_9 : f32 to vector<1x64xf32>
    %16 = arith.addf %13, %15 : vector<1x64xf32>
    %17 = math.rsqrt %16 : vector<1x64xf32>
    %18 = arith.mulf %14, %17 : vector<1x64xf32>
    %19 = vector.broadcast %18 : vector<1x64xf32> to vector<128x64xf32>
    %20 = arith.mulf %8, %19 : vector<128x64xf32>
    %c0_10 = arith.constant 0 : index
    %c0_11 = arith.constant 0 : index
    %21 = vector.load %arg4[%c0_10, %c0_11] : memref<1x64xf32, #tpu.memory_space<vmem>>, vector<1x64xf32>
    %22 = vector.broadcast %21 : vector<1x64xf32> to vector<128x64xf32>
    %23 = arith.addf %20, %22 : vector<128x64xf32>
    %cst_12 = arith.constant 0.000000e+00 : f32
    %24 = vector.broadcast %cst_12 : f32 to vector<128x64xf32>
    %25 = arith.maximumf %23, %24 : vector<128x64xf32>
    %c0_13 = arith.constant 0 : index
    %c0_14 = arith.constant 0 : index
    %26 = vector.load %arg5[%c0_13, %c0_14] : memref<128x64xf32, #tpu.memory_space<vmem>>, vector<128x64xf32>
    tpu.vector_store %arg5[%c0_13, %c0_14], %25 {strides = array<i32>} : memref<128x64xf32, #tpu.memory_space<vmem>>, vector<128x64xf32>,
    return
  }
  func.func @transform_0(%arg0: i32) -> (i32, i32) {
    %c0_i32 = arith.constant 0 : i32
    %c0_i32_0 = arith.constant 0 : i32
    %c0_i32_1 = arith.constant 0 : i32
    return %c0_i32, %c0_i32_0 : i32, i32
  }
  func.func @transform_1(%arg0: i32) -> (i32, i32) {
    %c0_i32 = arith.constant 0 : i32
    %c0_i32_0 = arith.constant 0 : i32
    %c0_i32_1 = arith.constant 0 : i32
    return %c0_i32, %c0_i32_0 : i32, i32
  }
  func.func @transform_2(%arg0: i32) -> (i32, i32) {
    %c0_i32 = arith.constant 0 : i32
    %c0_i32_0 = arith.constant 0 : i32
    %c0_i32_1 = arith.constant 0 : i32
    return %c0_i32, %c0_i32_0 : i32, i32
  }
  func.func @transform_3(%arg0: i32) -> (i32, i32) {
    %c0_i32 = arith.constant 0 : i32
    %c0_i32_0 = arith.constant 0 : i32
    %c0_i32_1 = arith.constant 0 : i32
    return %c0_i32, %c0_i32_0 : i32, i32
  }
  func.func @transform_4(%arg0: i32) -> (i32, i32) {
    %c0_i32 = arith.constant 0 : i32
    %c0_i32_0 = arith.constant 0 : i32
    %c0_i32_1 = arith.constant 0 : i32
    return %c0_i32, %c0_i32_0 : i32, i32
  }
}

module attributes {stable_mosaic.version = 11 : i64} {
  func.func @_mm_bias_kernel(%arg0: i32, %arg1: memref<512x576xbf16, #tpu.memory_space<vmem>>, %arg2: memref<576x128xbf16, #tpu.memory_space<vmem>>, %arg3: memref<1x128xf32, #tpu.memory_space<vmem>>, %arg4: memref<512x128xf32, #tpu.memory_space<vmem>>) attributes {dimension_semantics = [#tpu.dimension_semantics<arbitrary>], iteration_bounds = array<i64: 1>, scalar_prefetch = 0 : i64, scratch_operands = 0 : i64, tpu.core_type = #tpu.core_type<tc>, window_params = [{pipeline_mode = #tpu.pipeline_mode<synchronous>, transform_indices = @transform_0, window_bounds = array<i64: 512, 576>}, {pipeline_mode = #tpu.pipeline_mode<synchronous>, transform_indices = @transform_1, window_bounds = array<i64: 576, 128>}, {pipeline_mode = #tpu.pipeline_mode<synchronous>, transform_indices = @transform_2, window_bounds = array<i64: 1, 128>}, {pipeline_mode = #tpu.pipeline_mode<synchronous>, transform_indices = @transform_3, window_bounds = array<i64: 512, 128>}]} {
    %c0 = arith.constant 0 : index
    %c0_0 = arith.constant 0 : index
    %0 = vector.load %arg1[%c0, %c0_0] : memref<512x576xbf16, #tpu.memory_space<vmem>>, vector<512x576xbf16>
    %c0_1 = arith.constant 0 : index
    %c0_2 = arith.constant 0 : index
    %1 = vector.load %arg2[%c0_1, %c0_2] : memref<576x128xbf16, #tpu.memory_space<vmem>>, vector<576x128xbf16>
    %cst = arith.constant dense<0.000000e+00> : vector<512x128xf32>
    %2 = tpu.matmul %0, %1, %cst {dimension_numbers = #tpu.dot_dimension_numbers<[1], [0], [0], [1], [0, 0, 1, 1], [], []>} : vector<512x576xbf16>, vector<576x128xbf16>, vector<512x128xf32> -> vector<512x128xf32>
    %c0_3 = arith.constant 0 : index
    %c0_4 = arith.constant 0 : index
    %3 = vector.load %arg3[%c0_3, %c0_4] : memref<1x128xf32, #tpu.memory_space<vmem>>, vector<1x128xf32>
    %4 = vector.broadcast %3 : vector<1x128xf32> to vector<512x128xf32>
    %5 = arith.addf %2, %4 : vector<512x128xf32>
    %c0_5 = arith.constant 0 : index
    %c0_6 = arith.constant 0 : index
    %6 = vector.load %arg4[%c0_5, %c0_6] : memref<512x128xf32, #tpu.memory_space<vmem>>, vector<512x128xf32>
    tpu.vector_store %arg4[%c0_5, %c0_6], %5 {strides = array<i32>} : memref<512x128xf32, #tpu.memory_space<vmem>>, vector<512x128xf32>,
    return
  }
  func.func @transform_0(%arg0: i32) -> (i32, i32) {
    %c0_i32 = arith.constant 0 : i32
    %c0_i32_0 = arith.constant 0 : i32
    %c0_i32_1 = arith.constant 0 : i32
    return %c0_i32, %c0_i32_0 : i32, i32
  }
  func.func @transform_1(%arg0: i32) -> (i32, i32) {
    %c0_i32 = arith.constant 0 : i32
    %c0_i32_0 = arith.constant 0 : i32
    %c0_i32_1 = arith.constant 0 : i32
    return %c0_i32, %c0_i32_0 : i32, i32
  }
  func.func @transform_2(%arg0: i32) -> (i32, i32) {
    %c0_i32 = arith.constant 0 : i32
    %c0_i32_0 = arith.constant 0 : i32
    %c0_i32_1 = arith.constant 0 : i32
    return %c0_i32, %c0_i32_0 : i32, i32
  }
  func.func @transform_3(%arg0: i32) -> (i32, i32) {
    %c0_i32 = arith.constant 0 : i32
    %c0_i32_0 = arith.constant 0 : i32
    %c0_i32_1 = arith.constant 0 : i32
    return %c0_i32, %c0_i32_0 : i32, i32
  }
}

</mosaic_0001>

<bundles_post_ra>
// kernel: epistemic_forward.11
= control target key start
LH: loop header
LB: loop body
LE: loop exit
PB: predicated region body
PF: predicated region fallthrough
CT: control target
= control target key end

     0   :  { %vm359_vm0 = vcmask 1041408   ;;  %vm262_vm1 = vcmask 293888   ;;  %vm532_vm2 = vcmask 523264   ;;  %s2747_s1 = inlined_call_operand.vmem [shape: bf16[36,64], index: 1, kind: input, shape index: {}]   ;;  %s2748_s0 = inlined_call_operand.vmem [shape: bf16[512,36], index: 0, kind: input, shape index: {}]   ;;  %s2749_s3 = inlined_call_operand.vmem [shape: f32[1,64], index: 3, kind: input, shape index: {}]   ;;  %s2750_s2 = inlined_call_operand.vmem [shape: f32[1,64], index: 2, kind: input, shape index: {}]   ;;  %s2751_s4 = inlined_call_operand.vmem [shape: f32[512,64], index: 4, kind: output, shape index: {}]  }
   0x1   :  { %v86_v0 = vld [vmem:[%s2747_s1 + $0x10] sm:$0x3]  ;;  %v1410_v4 = vld [vmem:[%s2747_s1 + $0x8] sm:$0xff]  ;;  %v1409_v5 = vld [vmem:[%s2747_s1] sm:$0xff] }
   0x2   :  { %v256_v1 = vunpack.c.l.b16 %v86_v0  ;;  %v1377_v6 = vld [vmem:[%s2748_s0] sm:$0xff]  ;;  %v1378_v8 = vld [vmem:[%s2748_s0 + $0x8] sm:$0xff]  ;;  %v1379_v11 = vld [vmem:[%s2748_s0 + $0x10] sm:$0xff] }
   0x3   :  { %v1385_v7 = vld [vmem:[%s2748_s0 + $0x40] sm:$0xff]  ;;  %v1386_v9 = vld [vmem:[%s2748_s0 + $0x48] sm:$0xff]  ;;  %v1387_v12 = vld [vmem:[%s2748_s0 + $0x50] sm:$0xff] }
   0x4   :  { %v259_v2 = vpack.c.b16 %v256_v1, %v256_v1  ;;  %v1393_v10 = vld [vmem:[%s2748_s0 + $0x80] sm:$0xff]  ;;  %v1394_v13 = vld [vmem:[%s2748_s0 + $0x88] sm:$0xff]  ;;  %v1380_v14 = vld [vmem:[%s2748_s0 + $0x18] sm:$0xff] }
   0x5   :  { %v1388_v15 = vld [vmem:[%s2748_s0 + $0x58] sm:$0xff]  ;;  %v1395_v16 = vld [vmem:[%s2748_s0 + $0x90] sm:$0xff]  ;;  %v1401_v17 = vld [vmem:[%s2748_s0 + $0xc0] sm:$0xff] }
   0x6   :  { %v361_v3 = vsel %vm359_vm0, %v259_v2, 0  ;;  %v1381_v18 = vld [vmem:[%s2748_s0 + $0x20] sm:$0xff]  ;;  %v1396_v20 = vld [vmem:[%s2748_s0 + $0x98] sm:$0xff]  ;;  %v1402_v21 = vld [vmem:[%s2748_s0 + $0xc8] sm:$0xff] }
   0x7   :  { %368 = vmatpush.bf16.msra.mxu0 %v361_v3  ;;  %1411 = vmatpush.bf16.msra.mxu1 %v361_v3  ;;  %v1389_v19 = vld [vmem:[%s2748_s0 + $0x60] sm:$0xff]  ;;  %v1382_v22 = vld [vmem:[%s2748_s0 + $0x28] sm:$0xff]  ;;  %v1403_v25 = vld [vmem:[%s2748_s0 + $0xd0] sm:$0xff] }
   0x8   :  { %1412 = vmatpush.bf16.msra.mxu2 %v361_v3  ;;  %1413 = vmatpush.bf16.msra.mxu3 %v361_v3  ;;  %v1390_v23 = vld [vmem:[%s2748_s0 + $0x68] sm:$0xff]  ;;  %v1397_v24 = vld [vmem:[%s2748_s0 + $0xa0] sm:$0xff]  ;;  %v1383_v26 = vld [vmem:[%s2748_s0 + $0x30] sm:$0xff] }
   0x9   :  { %v1391_v27 = vld [vmem:[%s2748_s0 + $0x70] sm:$0xff]  ;;  %v1398_v28 = vld [vmem:[%s2748_s0 + $0xa8] sm:$0xff]  ;;  %v1404_v29 = vld [vmem:[%s2748_s0 + $0xd8] sm:$0xff] }
   0xa   :  { %v1384_v30 = vld [vmem:[%s2748_s0 + $0x38] sm:$0xff]  ;;  %v1399_v32 = vld [vmem:[%s2748_s0 + $0xb0] sm:$0xff]  ;;  %v1405_v33 = vld [vmem:[%s2748_s0 + $0xe0] sm:$0xff] }
   0xb   :  { %369 = vmatpush.bf16.msra.mxu0 %v1410_v4  ;;  %1414 = vmatpush.bf16.msra.mxu1 %v1410_v4  ;;  %v1392_v31 = vld [vmem:[%s2748_s0 + $0x78] sm:$0xff]  ;;  %v1406_v37 = vld [vmem:[%s2748_s0 + $0xe8] sm:$0xff]  ;;  %v1407_v41 = vld [vmem:[%s2748_s0 + $0xf0] sm:$0xff] }
   0xc   :  { %1415 = vmatpush.bf16.msra.mxu2 %v1410_v4  ;;  %1416 = vmatpush.bf16.msra.mxu3 %v1410_v4  ;;  %v1400_v36 = vld [vmem:[%s2748_s0 + $0xb8] sm:$0xff] }
   0xd   :  { %v1408_v47 = vld [vmem:[%s2748_s0 + $0xf8] sm:$0xff] }
   0xf   :  { %370 = vmatpush.bf16.msra.mxu0 %v1409_v5  ;;  %1417 = vmatpush.bf16.msra.mxu1 %v1409_v5 }
  0x10   :  { %1418 = vmatpush.bf16.msra.mxu2 %v1409_v5  ;;  %1419 = vmatpush.bf16.msra.mxu3 %v1409_v5 }
  0x12   :  { %1345 = vmatmul.msk.bf16.vlgmr.msra.gmra.mxu0 %vm262_vm1, %v1377_v6  ;;  %1353 = vmatmul.msk.bf16.vlgmr.msra.gmra.mxu1 %vm262_vm1, %v1385_v7 }
  0x13   :  { %1361 = vmatmul.msk.bf16.vlgmr.msra.gmra.mxu2 %vm262_vm1, %v1393_v10  ;;  %1369 = vmatmul.msk.bf16.vlgmr.msra.gmra.mxu3 %vm262_vm1, %v1401_v17 }
  0x22   :  { %1346 = vmatmul.msk.bf16.gmra.mxu0 %vm262_vm1, %v1378_v8  ;;  %1354 = vmatmul.msk.bf16.gmra.mxu1 %vm262_vm1, %v1386_v9 }
  0x23   :  { %1362 = vmatmul.msk.bf16.gmra.mxu2 %vm262_vm1, %v1394_v13  ;;  %1370 = vmatmul.msk.bf16.gmra.mxu3 %vm262_vm1, %v1402_v21 }
  0x32   :  { %1347 = vmatmul.msk.bf16.gmra.mxu0 %vm262_vm1, %v1379_v11  ;;  %1355 = vmatmul.msk.bf16.gmra.mxu1 %vm262_vm1, %v1387_v12 }
  0x33   :  { %1363 = vmatmul.msk.bf16.gmra.mxu2 %vm262_vm1, %v1395_v16  ;;  %1371 = vmatmul.msk.bf16.gmra.mxu3 %vm262_vm1, %v1403_v25 }
  0x42   :  { %1348 = vmatmul.msk.bf16.gmra.mxu0 %vm262_vm1, %v1380_v14  ;;  %1356 = vmatmul.msk.bf16.gmra.mxu1 %vm262_vm1, %v1388_v15 }
  0x43   :  { %1364 = vmatmul.msk.bf16.gmra.mxu2 %vm262_vm1, %v1396_v20  ;;  %1372 = vmatmul.msk.bf16.gmra.mxu3 %vm262_vm1, %v1404_v29 }
  0x52   :  { %1349 = vmatmul.msk.bf16.gmra.mxu0 %vm262_vm1, %v1381_v18  ;;  %1357 = vmatmul.msk.bf16.gmra.mxu1 %vm262_vm1, %v1389_v19 }
  0x53   :  { %1365 = vmatmul.msk.bf16.gmra.mxu2 %vm262_vm1, %v1397_v24  ;;  %1373 = vmatmul.msk.bf16.gmra.mxu3 %vm262_vm1, %v1405_v33 }
  0x62   :  { %1350 = vmatmul.msk.bf16.gmra.mxu0 %vm262_vm1, %v1382_v22  ;;  %1358 = vmatmul.msk.bf16.gmra.mxu1 %vm262_vm1, %v1390_v23 }
  0x63   :  { %1366 = vmatmul.msk.bf16.gmra.mxu2 %vm262_vm1, %v1398_v28  ;;  %1374 = vmatmul.msk.bf16.gmra.mxu3 %vm262_vm1, %v1406_v37 }
  0x72   :  { %1351 = vmatmul.msk.bf16.gmra.mxu0 %vm262_vm1, %v1383_v26  ;;  %1359 = vmatmul.msk.bf16.gmra.mxu1 %vm262_vm1, %v1391_v27 }
  0x73   :  { %1367 = vmatmul.msk.bf16.gmra.mxu2 %vm262_vm1, %v1399_v32  ;;  %1375 = vmatmul.msk.bf16.gmra.mxu3 %vm262_vm1, %v1407_v41 }
  0x82   :  { %1352 = vmatmul.msk.bf16.gmra.mxu0 %vm262_vm1, %v1384_v30  ;;  %1360 = vmatmul.msk.bf16.gmra.mxu1 %vm262_vm1, %v1392_v31 }
  0x83   :  { %1368 = vmatmul.msk.bf16.gmra.mxu2 %vm262_vm1, %v1400_v36  ;;  %1376 = vmatmul.msk.bf16.gmra.mxu3 %vm262_vm1, %v1408_v47 }
  0x8f   :  { %v1569_v34 = vpop.f32.mrf.mxu0  ;;  %v1571_v35 = vpop.f32.mrf.mxu1 }
  0x90   :  { %v533_v7 = vsel %vm532_vm2, %v1569_v34, 0.0 }
  0x96   :  { %v1597_v45 = vpop.f32.mrf.mxu2  ;;  %v1631_v61 = vpop.f32.mrf.mxu3 }
  0x97   :  { %v1581_v38 = vpop.f32.mrf.mxu0  ;;  %v1583_v39 = vpop.f32.mrf.mxu1 }
  0x98   :  { %v534_v4 = vsel %vm532_vm2, %v1581_v38, 0.0 }
  0x99   :  { %v535_v9 = vadd.f32 %v534_v4, %v533_v7 }
  0x9e   :  { %v1609_v50 = vpop.f32.mrf.mxu2  ;;  %v1639_v1 = vpop.f32.mrf.mxu3 }
  0x9f   :  { %v1585_v40 = vpop.f32.mrf.mxu0  ;;  %v1590_v42 = vpop.f32.mrf.mxu1 }
  0xa0   :  { %v536_v8 = vsel %vm532_vm2, %v1585_v40, 0.0 }
  0xa1   :  { %v537_v11 = vadd.f32 %v536_v8, %v535_v9 }
  0xa6   :  { %v1615_v53 = vpop.f32.mrf.mxu2  ;;  %v1649_v6 = vpop.f32.mrf.mxu3 }
  0xa7   :  { %v1593_v43 = vpop.f32.mrf.mxu0  ;;  %v1595_v44 = vpop.f32.mrf.mxu1  ;;  %2789 = vst [vmem:[#allocation4_spill] sm:$0xff] %v1649_v6 }
  0xa8   :  { %v538_v10 = vsel %vm532_vm2, %v1593_v43, 0.0 }
  0xa9   :  { %v539_v14 = vadd.f32 %v538_v10, %v537_v11 }
  0xae   :  { %v1621_v56 = vpop.f32.mrf.mxu2  ;;  %v1669_v21 = vpop.f32.mrf.mxu3 }
  0xaf   :  { %v1599_v46 = vpop.f32.mrf.mxu0  ;;  %v1607_v49 = vpop.f32.mrf.mxu1  ;;  %2787 = vst [vmem:[#allocation2_spill] sm:$0xff] %v1621_v56 }
  0xb0   :  { %v540_v13 = vsel %vm532_vm2, %v1599_v46, 0.0 }
  0xb1   :  { %v541_v16 = vadd.f32 %v540_v13, %v539_v14 }
  0xb6   :  { %v1627_v59 = vpop.f32.mrf.mxu2  ;;  %v1689_v41 = vpop.f32.mrf.mxu3 }
  0xb7   :  { %v1605_v48 = vpop.f32.mrf.mxu0  ;;  %v1613_v52 = vpop.f32.mrf.mxu1  ;;  %2788 = vst [vmem:[#allocation3_spill] sm:$0xff] %v1627_v59 }
  0xb8   :  { %v542_v15 = vsel %vm532_vm2, %v1605_v48, 0.0 }
  0xb9   :  { %v543_v20 = vadd.f32 %v542_v15, %v541_v16 }
  0xbe   :  { %v1637_v0 = vpop.f32.mrf.mxu2 }
  0xbf   :  { %v1611_v51 = vpop.f32.mrf.mxu0  ;;  %v1619_v55 = vpop.f32.mrf.mxu1 }
  0xc0   :  { %v544_v18 = vsel %vm532_vm2, %v1611_v51, 0.0 }
  0xc1   :  { %v545_v23 = vadd.f32 %v544_v18, %v543_v20  ;;  %v1705_v20 = vpop.f32.mrf.mxu3 }
  0xc6   :  { %v1647_v5 = vpop.f32.mrf.mxu2 }
  0xc7   :  { %v1617_v54 = vpop.f32.mrf.mxu0  ;;  %v1625_v58 = vpop.f32.mrf.mxu1 }
  0xc8   :  { %v546_v22 = vsel %vm532_vm2, %v1617_v54, 0.0 }
  0xc9   :  { %v547_v26 = vadd.f32 %v546_v22, %v545_v23  ;;  %v564_v22 = vsel %vm532_vm2, %v1571_v35, 0.0 }
  0xce   :  { %v1667_v19 = vpop.f32.mrf.mxu2 }
  0xcf   :  { %v1623_v57 = vpop.f32.mrf.mxu0  ;;  %v1635_v63 = vpop.f32.mrf.mxu1 }
  0xd0   :  { %v548_v25 = vsel %vm532_vm2, %v1623_v57, 0.0 }
  0xd1   :  { %v549_v28 = vadd.f32 %v548_v25, %v547_v26  ;;  %v566_v25 = vsel %vm532_vm2, %v1583_v39, 0.0 }
  0xd6   :  { %v1685_v33 = vpop.f32.mrf.mxu2 }
  0xd7   :  { %v1629_v60 = vpop.f32.mrf.mxu0  ;;  %v1643_v3 = vpop.f32.mrf.mxu1  ;;  %2790 = vst [vmem:[#allocation5_spill] sm:$0xff] %v1685_v33 }
  0xd8   :  { %v550_v27 = vsel %vm532_vm2, %v1629_v60, 0.0 }
  0xd9   :  { %v551_v30 = vadd.f32 %v550_v27, %v549_v28  ;;  %v568_v27 = vsel %vm532_vm2, %v1590_v42, 0.0 }
  0xde   :  { %v1703_v18 = vpop.f32.mrf.mxu2 }
  0xdf   :  { %v1633_v62 = vpop.f32.mrf.mxu0  ;;  %v1663_v17 = vpop.f32.mrf.mxu1  ;;  %2791 = vst [vmem:[#allocation6_spill] sm:$0xff] %v1703_v18 }
  0xe0   :  { %v552_v29 = vsel %vm532_vm2, %v1633_v62, 0.0 }
  0xe1   :  { %v553_v36 = vadd.f32 %v552_v29, %v551_v30  ;;  %v570_v29 = vsel %vm532_vm2, %v1595_v44, 0.0 }
  0xe7   :  { %v1641_v2 = vpop.f32.mrf.mxu0  ;;  %v1681_v31 = vpop.f32.mrf.mxu1 }
  0xe8   :  { %v554_v32 = vsel %vm532_vm2, %v1641_v2, 0.0 }
  0xe9   :  { %v555_v4 = vadd.f32 %v554_v32, %v553_v36  ;;  %v572_v36 = vsel %vm532_vm2, %v1607_v49, 0.0 }
  0xef   :  { %v1657_v12 = vpop.f32.mrf.mxu0  ;;  %v1699_v14 = vpop.f32.mrf.mxu1 }
  0xf0   :  { %v556_v47 = vsel %vm532_vm2, %v1657_v12, 0.0 }
  0xf1   :  { %v557_v8 = vadd.f32 %v556_v47, %v555_v4  ;;  %v1719_v4 = vpop.f32.mrf.mxu2 }
  0xf7   :  { %v1673_v24 = vpop.f32.mrf.mxu0  ;;  %v1715_v32 = vpop.f32.mrf.mxu1 }
  0xf8   :  { %v558_v7 = vsel %vm532_vm2, %v1673_v24, 0.0  ;;  %2792 = vst [vmem:[#allocation7_spill] sm:$0xff] %v1715_v32 }
  0xf9   :  { %v559_v10 = vadd.f32 %v558_v7, %v557_v8  ;;  %v1721_v7 = vpop.f32.mrf.mxu3  ;;  %v574_v8 = vsel %vm532_vm2, %v1613_v52, 0.0 }
  0xff   :  { %v1687_v37 = vpop.f32.mrf.mxu0 }
 0x100   :  { %v560_v9 = vsel %vm532_vm2, %v1687_v37, 0.0 }
 0x101   :  { %v561_v11 = vadd.f32 %v560_v9, %v559_v10  ;;  %v576_v10 = vsel %vm532_vm2, %v1619_v55, 0.0 }
 0x107   :  { %v1697_v13 = vpop.f32.mrf.mxu0 }
 0x108   :  { %v562_v15 = vsel %vm532_vm2, %v1697_v13, 0.0 }
 0x109   :  { %v563_v16 = vadd.f32 %v562_v15, %v561_v11  ;;  %v578_v15 = vsel %vm532_vm2, %v1625_v58, 0.0 }
 0x10b   :  { %v565_v23 = vadd.f32 %v564_v22, %v563_v16  ;;  %v580_v22 = vsel %vm532_vm2, %v1635_v63, 0.0 }
 0x10d   :  { %v567_v26 = vadd.f32 %v566_v25, %v565_v23  ;;  %v1731_v25 = vpop.f32.mrf.mxu1 }
 0x10e   :  { %2793 = vst [vmem:[#allocation8_spill] sm:$0xff] %v1731_v25 }
 0x10f   :  { %v569_v28 = vadd.f32 %v568_v27, %v567_v26  ;;  %v582_v26 = vsel %vm532_vm2, %v1643_v3, 0.0 }
 0x111   :  { %v571_v30 = vadd.f32 %v570_v29, %v569_v28  ;;  %v1735_v28 = vpop.f32.mrf.mxu2  ;;  %v1737_v29 = vpop.f32.mrf.mxu3 }
 0x112   :  { %2794 = vst [vmem:[#allocation9_spill] sm:$0xff] %v1737_v29 }
 0x113   :  { %v573_v47 = vadd.f32 %v572_v36, %v571_v30  ;;  %v584_v30 = vsel %vm532_vm2, %v1663_v17, 0.0 }
 0x115   :  { %v575_v9 = vadd.f32 %v574_v8, %v573_v47  ;;  %v586_v47 = vsel %vm532_vm2, %v1681_v31, 0.0 }
 0x117   :  { %v577_v11 = vadd.f32 %v576_v10, %v575_v9  ;;  %v588_v9 = vsel %vm532_vm2, %v1699_v14, 0.0 }
 0x119   :  { %v579_v16 = vadd.f32 %v578_v15, %v577_v11  ;;  %v590_v11 = vsel %vm532_vm2, %v1715_v32, 0.0 }
 0x11b   :  { %v581_v23 = vadd.f32 %v580_v22, %v579_v16  ;;  %v1747_v16 = vpop.f32.mrf.mxu1  ;;  %v592_v22 = vsel %vm532_vm2, %v1731_v25, 0.0 }
 0x11c   :  { %2795 = vst [vmem:[#allocation10_spill] sm:$0xff] %v1747_v16 }
 0x11d   :  { %v583_v27 = vadd.f32 %v582_v26, %v581_v23  ;;  %v1751_v26 = vpop.f32.mrf.mxu2 }
 0x11f   :  { %v585_v36 = vadd.f32 %v584_v30, %v583_v27  ;;  %v1753_v27 = vpop.f32.mrf.mxu3  ;;  %v594_v30 = vsel %vm532_vm2, %v1747_v16, 0.0 }
 0x121   :  { %v587_v8 = vadd.f32 %v586_v47, %v585_v36  ;;  %v596_v47 = vsel %vm532_vm2, %v1597_v45, 0.0 }
 0x123   :  { %v589_v10 = vadd.f32 %v588_v9, %v587_v8  ;;  %v598_v9 = vsel %vm532_vm2, %v1609_v50, 0.0 }
 0x125   :  { %v591_v15 = vadd.f32 %v590_v11, %v589_v10  ;;  %v600_v11 = vsel %vm532_vm2, %v1615_v53, 0.0  ;;  %v1765_v32 = vpop.f32.mrf.mxu2 }
 0x126   :  { %2796 = vst [vmem:[#allocation11_spill] sm:$0xff] %v1765_v32 }
 0x127   :  { %v593_v23 = vadd.f32 %v592_v22, %v591_v15  ;;  %v602_v22 = vsel %vm532_vm2, %v1621_v56, 0.0  ;;  %v1767_v16 = vpop.f32.mrf.mxu3 }
 0x128   :  { %2797 = vst [vmem:[#allocation12_spill] sm:$0xff] %v1767_v16 }
 0x129   :  { %v595_v36 = vadd.f32 %v594_v30, %v593_v23  ;;  %v604_v23 = vsel %vm532_vm2, %v1627_v59, 0.0 }
 0x12b   :  { %v597_v8 = vadd.f32 %v596_v47, %v595_v36  ;;  %v606_v36 = vsel %vm532_vm2, %v1637_v0, 0.0 }
 0x12d   :  { %v599_v10 = vadd.f32 %v598_v9, %v597_v8  ;;  %v608_v8 = vsel %vm532_vm2, %v1647_v5, 0.0  ;;  %v1779_v56 = vpop.f32.mrf.mxu2 }
 0x12f   :  { %v601_v15 = vadd.f32 %v600_v11, %v599_v10  ;;  %v610_v10 = vsel %vm532_vm2, %v1667_v19, 0.0  ;;  %v1781_v59 = vpop.f32.mrf.mxu3 }
 0x130   :  { %2798 = vst [vmem:[#allocation13_spill] sm:$0xff] %v1781_v59 }
 0x131   :  { %v603_v25 = vadd.f32 %v602_v22, %v601_v15  ;;  %v612_v15 = vsel %vm532_vm2, %v1685_v33, 0.0 }
 0x133   :  { %v605_v30 = vadd.f32 %v604_v23, %v603_v25  ;;  %v614_v25 = vsel %vm532_vm2, %v1703_v18, 0.0 }
 0x135   :  { %v607_v47 = vadd.f32 %v606_v36, %v605_v30  ;;  %v616_v30 = vsel %vm532_vm2, %v1719_v4, 0.0  ;;  %v1793_v33 = vpop.f32.mrf.mxu2 }
 0x137   :  { %v609_v9 = vadd.f32 %v608_v8, %v607_v47  ;;  %v618_v47 = vsel %vm532_vm2, %v1735_v28, 0.0  ;;  %v1795_v18 = vpop.f32.mrf.mxu3 }
 0x138   :  { %2799 = vst [vmem:[#allocation14_spill] sm:$0xff] %v1795_v18 }
 0x139   :  { %v611_v11 = vadd.f32 %v610_v10, %v609_v9  ;;  %v620_v9 = vsel %vm532_vm2, %v1751_v26, 0.0 }
 0x13b   :  { %v613_v22 = vadd.f32 %v612_v15, %v611_v11  ;;  %v622_v11 = vsel %vm532_vm2, %v1765_v32, 0.0 }
 0x13d   :  { %v615_v23 = vadd.f32 %v614_v25, %v613_v22  ;;  %v624_v22 = vsel %vm532_vm2, %v1779_v56, 0.0 }
 0x13f   :  { %v617_v36 = vadd.f32 %v616_v30, %v615_v23  ;;  %v626_v23 = vsel %vm532_vm2, %v1793_v33, 0.0  ;;  %v1807_v32 = vpop.f32.mrf.mxu3 }
 0x140   :  { %2800 = vst [vmem:[#allocation15_spill] sm:$0xff] %v1807_v32 }
 0x141   :  { %v619_v8 = vadd.f32 %v618_v47, %v617_v36  ;;  %v628_v36 = vsel %vm532_vm2, %v1631_v61, 0.0 }
 0x143   :  { %v621_v10 = vadd.f32 %v620_v9, %v619_v8  ;;  %v630_v8 = vsel %vm532_vm2, %v1639_v1, 0.0 }
 0x145   :  { %v623_v15 = vadd.f32 %v622_v11, %v621_v10  ;;  %v632_v10 = vsel %vm532_vm2, %v1649_v6, 0.0 }
 0x147   :  { %v625_v25 = vadd.f32 %v624_v22, %v623_v15  ;;  %v634_v15 = vsel %vm532_vm2, %v1669_v21, 0.0  ;;  %v1819_v6 = vpop.f32.mrf.mxu3 }
 0x149   :  { %v627_v30 = vadd.f32 %v626_v23, %v625_v25  ;;  %v636_v25 = vsel %vm532_vm2, %v1689_v41, 0.0 }
 0x14b   :  { %v629_v47 = vadd.f32 %v628_v36, %v627_v30  ;;  %v638_v30 = vsel %vm532_vm2, %v1705_v20, 0.0 }
 0x14d   :  { %v631_v9 = vadd.f32 %v630_v8, %v629_v47  ;;  %v640_v47 = vsel %vm532_vm2, %v1721_v7, 0.0 }
 0x14f   :  { %v633_v11 = vadd.f32 %v632_v10, %v631_v9  ;;  %v642_v9 = vsel %vm532_vm2, %v1737_v29, 0.0  ;;  %v1829_v29 = vpop.f32.mrf.mxu3 }
 0x151   :  { %v635_v22 = vadd.f32 %v634_v15, %v633_v11  ;;  %v644_v11 = vsel %vm532_vm2, %v1753_v27, 0.0 }
 0x153   :  { %v637_v23 = vadd.f32 %v636_v25, %v635_v22  ;;  %v646_v22 = vsel %vm532_vm2, %v1767_v16, 0.0 }
 0x155   :  { %v639_v36 = vadd.f32 %v638_v30, %v637_v23  ;;  %v648_v23 = vsel %vm532_vm2, %v1781_v59, 0.0 }
 0x157   :  { %v641_v8 = vadd.f32 %v640_v47, %v639_v36  ;;  %v650_v36 = vsel %vm532_vm2, %v1795_v18, 0.0  ;;  %v1837_v59 = vpop.f32.mrf.mxu3 }
 0x159   :  { %v643_v10 = vadd.f32 %v642_v9, %v641_v8  ;;  %v652_v8 = vsel %vm532_vm2, %v1807_v32, 0.0 }
 0x15b   :  { %v645_v15 = vadd.f32 %v644_v11, %v643_v10  ;;  %v654_v10 = vsel %vm532_vm2, %v1819_v6, 0.0 }
 0x15d   :  { %v647_v25 = vadd.f32 %v646_v22, %v645_v15  ;;  %v656_v15 = vsel %vm532_vm2, %v1829_v29, 0.0 }
 0x15f   :  { %v649_v30 = vadd.f32 %v648_v23, %v647_v25  ;;  %v658_v25 = vsel %vm532_vm2, %v1837_v59, 0.0 }
 0x161   :  { %v651_v47 = vadd.f32 %v650_v36, %v649_v30 }
 0x163   :  { %v653_v9 = vadd.f32 %v652_v8, %v651_v47 }
 0x165   :  { %v655_v11 = vadd.f32 %v654_v10, %v653_v9 }
 0x167   :  { %v657_v22 = vadd.f32 %v656_v15, %v655_v11 }
 0x169   :  { %v659_v23 = vadd.f32 %v658_v25, %v657_v22 }
 0x16b   :  { %v660_v30 = vrot.slane %v659_v23, 4 }
 0x16d   :  { %v661_v36 = vadd.f32 %v660_v30, %v659_v23 }
 0x16f   :  { %v662_v18 = vrot.slane %v661_v36, 2 }
 0x171   :  { %v663_v16 = vadd.f32 %v662_v18, %v661_v36 }
 0x173   :  { %v664_v32 = vrot.slane %v663_v16, 1 }
 0x175   :  { %v665_v47 = vadd.f32 %v664_v32, %v663_v16 }
 0x177   :  { %v1841_v8 = vmul.f32 0.001953125, %v665_v47 }
 0x179   :  { %v1845_v9 = vsub.f32 %v1569_v34, %v1841_v8  ;;  %v1849_v10 = vsub.f32 %v1581_v38, %v1841_v8  ;;  %v1853_v11 = vsub.f32 %v1585_v40, %v1841_v8  ;;  %v1857_v15 = vsub.f32 %v1593_v43, %v1841_v8 }
 0x17a   :  { %v1865_v34 = vsub.f32 %v1599_v46, %v1841_v8  ;;  %v1871_v40 = vsub.f32 %v1605_v48, %v1841_v8  ;;  %v1879_v23 = vsub.f32 %v1611_v51, %v1841_v8  ;;  %v1886_v48 = vsub.f32 %v1617_v54, %v1841_v8 }
 0x17b   :  { %v731_v18 = vmul.f32 %v1845_v9, %v1845_v9  ;;  %v732_v32 = vmul.f32 %v1849_v10, %v1849_v10  ;;  %v733_v38 = vmul.f32 %v1853_v11, %v1853_v11  ;;  %v734_v43 = vmul.f32 %v1857_v15, %v1857_v15 }
 0x17c   :  { %v735_v46 = vmul.f32 %v1865_v34, %v1865_v34  ;;  %v736_v47 = vmul.f32 %v1871_v40, %v1871_v40  ;;  %v1893_v51 = vsub.f32 %v1623_v57, %v1841_v8  ;;  %v1900_v54 = vsub.f32 %v1629_v60, %v1841_v8 }
 0x17d   :  { %v795_v16 = vsel %vm532_vm2, %v731_v18, 0.0  ;;  %v796_v22 = vsel %vm532_vm2, %v732_v32, 0.0  ;;  %v798_v30 = vsel %vm532_vm2, %v733_v38, 0.0  ;;  %v800_v18 = vsel %vm532_vm2, %v734_v43, 0.0 }
 0x17e   :  { %v797_v25 = vadd.f32 %v796_v22, %v795_v16  ;;  %v737_v16 = vmul.f32 %v1879_v23, %v1879_v23  ;;  %v802_v38 = vsel %vm532_vm2, %v735_v46, 0.0  ;;  %v804_v43 = vsel %vm532_vm2, %v736_v47, 0.0 }
 0x17f   :  { %v1907_v57 = vsub.f32 %v1633_v62, %v1841_v8  ;;  %v1914_v60 = vsub.f32 %v1641_v2, %v1841_v8  ;;  %v1921_v62 = vsub.f32 %v1657_v12, %v1841_v8  ;;  %v1928_v2 = vsub.f32 %v1673_v24, %v1841_v8 }
 0x180   :  { %v799_v36 = vadd.f32 %v798_v30, %v797_v25  ;;  %v738_v25 = vmul.f32 %v1886_v48, %v1886_v48  ;;  %v806_v46 = vsel %vm532_vm2, %v737_v16, 0.0  ;;  %v1935_v12 = vsub.f32 %v1687_v37, %v1841_v8 }
 0x181   :  { %v1942_v24 = vsub.f32 %v1697_v13, %v1841_v8  ;;  %v1949_v37 = vsub.f32 %v1571_v35, %v1841_v8  ;;  %v1956_v13 = vsub.f32 %v1583_v39, %v1841_v8  ;;  %v1963_v35 = vsub.f32 %v1590_v42, %v1841_v8 }
 0x182   :  { %v801_v32 = vadd.f32 %v800_v18, %v799_v36  ;;  %v739_v36 = vmul.f32 %v1893_v51, %v1893_v51  ;;  %v808_v47 = vsel %vm532_vm2, %v738_v25, 0.0  ;;  %v1970_v39 = vsub.f32 %v1595_v44, %v1841_v8 }
 0x183   :  { %v1977_v42 = vsub.f32 %v1607_v49, %v1841_v8  ;;  %v1984_v44 = vsub.f32 %v1613_v52, %v1841_v8  ;;  %v1991_v49 = vsub.f32 %v1619_v55, %v1841_v8  ;;  %v1998_v52 = vsub.f32 %v1625_v58, %v1841_v8 }
 0x184   :  { %v803_v22 = vadd.f32 %v802_v38, %v801_v32  ;;  %v740_v32 = vmul.f32 %v1900_v54, %v1900_v54  ;;  %v810_v16 = vsel %vm532_vm2, %v739_v36, 0.0  ;;  %v2005_v55 = vsub.f32 %v1635_v63, %v1841_v8 }
 0x185   :  { %v2012_v58 = vsub.f32 %v1643_v3, %v1841_v8  ;;  %v2019_v63 = vsub.f32 %v1663_v17, %v1841_v8  ;;  %v2026_v3 = vsub.f32 %v1681_v31, %v1841_v8  ;;  %v2033_v17 = vsub.f32 %v1699_v14, %v1841_v8 }
 0x186   :  { %v805_v30 = vadd.f32 %v804_v43, %v803_v22  ;;  %v741_v22 = vmul.f32 %v1907_v57, %v1907_v57  ;;  %v812_v25 = vsel %vm532_vm2, %v740_v32, 0.0 }
 0x187   :  { %2801 = vst [vmem:[#allocation16_spill] sm:$0xff] %v2019_v63 }
 0x188   :  { %v807_v18 = vadd.f32 %v806_v46, %v805_v30  ;;  %v742_v30 = vmul.f32 %v1914_v60, %v1914_v60  ;;  %v814_v36 = vsel %vm532_vm2, %v741_v22, 0.0  ;;  %2802 = vst [vmem:[#allocation17_spill] sm:$0xff] %v2026_v3 }
 0x18a   :  { %v809_v38 = vadd.f32 %v808_v47, %v807_v18  ;;  %v743_v18 = vmul.f32 %v1921_v62, %v1921_v62  ;;  %v816_v32 = vsel %vm532_vm2, %v742_v30, 0.0 }
 0x18c   :  { %v811_v43 = vadd.f32 %v810_v16, %v809_v38  ;;  %v744_v38 = vmul.f32 %v1928_v2, %v1928_v2  ;;  %v818_v22 = vsel %vm532_vm2, %v743_v18, 0.0 }
 0x18e   :  { %v813_v46 = vadd.f32 %v812_v25, %v811_v43  ;;  %v745_v43 = vmul.f32 %v1935_v12, %v1935_v12  ;;  %v820_v30 = vsel %vm532_vm2, %v744_v38, 0.0 }
 0x190   :  { %v815_v47 = vadd.f32 %v814_v36, %v813_v46  ;;  %v746_v46 = vmul.f32 %v1942_v24, %v1942_v24  ;;  %v822_v18 = vsel %vm532_vm2, %v745_v43, 0.0 }
 0x192   :  { %v817_v16 = vadd.f32 %v816_v32, %v815_v47  ;;  %v747_v47 = vmul.f32 %v1949_v37, %v1949_v37  ;;  %v824_v38 = vsel %vm532_vm2, %v746_v46, 0.0 }
 0x194   :  { %v819_v25 = vadd.f32 %v818_v22, %v817_v16  ;;  %v748_v16 = vmul.f32 %v1956_v13, %v1956_v13  ;;  %v826_v43 = vsel %vm532_vm2, %v747_v47, 0.0 }
 0x196   :  { %v821_v36 = vadd.f32 %v820_v30, %v819_v25  ;;  %v749_v25 = vmul.f32 %v1963_v35, %v1963_v35  ;;  %v828_v46 = vsel %vm532_vm2, %v748_v16, 0.0 }
 0x198   :  { %v823_v32 = vadd.f32 %v822_v18, %v821_v36  ;;  %v750_v36 = vmul.f32 %v1970_v39, %v1970_v39  ;;  %v830_v47 = vsel %vm532_vm2, %v749_v25, 0.0 }
 0x19a   :  { %v825_v22 = vadd.f32 %v824_v38, %v823_v32  ;;  %v751_v32 = vmul.f32 %v1977_v42, %v1977_v42  ;;  %v832_v16 = vsel %vm532_vm2, %v750_v36, 0.0 }
 0x19c   :  { %v827_v30 = vadd.f32 %v826_v43, %v825_v22  ;;  %v752_v22 = vmul.f32 %v1984_v44, %v1984_v44  ;;  %v834_v25 = vsel %vm532_vm2, %v751_v32, 0.0 }
 0x19e   :  { %v829_v18 = vadd.f32 %v828_v46, %v827_v30  ;;  %v753_v30 = vmul.f32 %v1991_v49, %v1991_v49  ;;  %v836_v36 = vsel %vm532_vm2, %v752_v22, 0.0 }
 0x1a0   :  { %v831_v38 = vadd.f32 %v830_v47, %v829_v18  ;;  %v754_v18 = vmul.f32 %v1998_v52, %v1998_v52  ;;  %v838_v32 = vsel %vm532_vm2, %v753_v30, 0.0 }
 0x1a2   :  { %v833_v43 = vadd.f32 %v832_v16, %v831_v38  ;;  %v755_v38 = vmul.f32 %v2005_v55, %v2005_v55  ;;  %v840_v22 = vsel %vm532_vm2, %v754_v18, 0.0 }
 0x1a4   :  { %v835_v46 = vadd.f32 %v834_v25, %v833_v43  ;;  %v756_v43 = vmul.f32 %v2012_v58, %v2012_v58  ;;  %v842_v30 = vsel %vm532_vm2, %v755_v38, 0.0 }
 0x1a6   :  { %v837_v47 = vadd.f32 %v836_v36, %v835_v46  ;;  %v757_v46 = vmul.f32 %v2019_v63, %v2019_v63  ;;  %v844_v18 = vsel %vm532_vm2, %v756_v43, 0.0  ;;  %v759_v63 = vmul.f32 %v2033_v17, %v2033_v17 }
 0x1a8   :  { %v839_v16 = vadd.f32 %v838_v32, %v837_v47  ;;  %v2803_v47 = vld [vmem:[#allocation7_spill] sm:$0xff]  ;;  %v758_v32 = vmul.f32 %v2026_v3, %v2026_v3  ;;  %v846_v38 = vsel %vm532_vm2, %v757_v46, 0.0  ;;  %v850_v46 = vsel %vm532_vm2, %v759_v63, 0.0 }
 0x1a9   :  { %v2040_v31 = vsub.f32 %v2803_v47, %v1841_v8 }
 0x1aa   :  { %v841_v25 = vadd.f32 %v840_v22, %v839_v16  ;;  %v2804_v22 = vld [vmem:[#allocation8_spill] sm:$0xff]  ;;  %v848_v43 = vsel %vm532_vm2, %v758_v32, 0.0 }
 0x1ab   :  { %v2047_v14 = vsub.f32 %v2804_v22, %v1841_v8  ;;  %v760_v3 = vmul.f32 %v2040_v31, %v2040_v31 }
 0x1ac   :  { %v843_v36 = vadd.f32 %v842_v30, %v841_v25  ;;  %v2805_v30 = vld [vmem:[#allocation10_spill] sm:$0xff] }
 0x1ad   :  { %v2054_v47 = vsub.f32 %v2805_v30, %v1841_v8  ;;  %v761_v22 = vmul.f32 %v2047_v14, %v2047_v14  ;;  %v852_v32 = vsel %vm532_vm2, %v760_v3, 0.0 }
 0x1ae   :  { %v845_v16 = vadd.f32 %v844_v18, %v843_v36  ;;  %v2061_v18 = vsub.f32 %v1597_v45, %v1841_v8  ;;  %v2075_v45 = vsub.f32 %v1615_v53, %v1841_v8 }
 0x1af   :  { %2806 = vst [vmem:[#allocation7_spill] sm:$0xff] %v2054_v47  ;;  %v762_v30 = vmul.f32 %v2054_v47, %v2054_v47  ;;  %v854_v63 = vsel %vm532_vm2, %v761_v22, 0.0 }
 0x1b0   :  { %v847_v25 = vadd.f32 %v846_v38, %v845_v16  ;;  %2807 = vst [vmem:[#allocation8_spill] sm:$0xff] %v2061_v18  ;;  %v2068_v38 = vsub.f32 %v1609_v50, %v1841_v8 }
 0x1b1   :  { %v856_v3 = vsel %vm532_vm2, %v762_v30, 0.0 }
 0x1b2   :  { %v849_v36 = vadd.f32 %v848_v43, %v847_v25  ;;  %v763_v43 = vmul.f32 %v2061_v18, %v2061_v18  ;;  %v764_v47 = vmul.f32 %v2068_v38, %v2068_v38  ;;  %v765_v18 = vmul.f32 %v2075_v45, %v2075_v45 }
 0x1b4   :  { %v851_v16 = vadd.f32 %v850_v46, %v849_v36  ;;  %v2808_v46 = vld [vmem:[#allocation2_spill] sm:$0xff]  ;;  %v858_v22 = vsel %vm532_vm2, %v763_v43, 0.0  ;;  %v860_v30 = vsel %vm532_vm2, %v764_v47, 0.0  ;;  %v862_v43 = vsel %vm532_vm2, %v765_v18, 0.0 }
 0x1b5   :  { %v2082_v50 = vsub.f32 %v2808_v46, %v1841_v8 }
 0x1b6   :  { %v853_v25 = vadd.f32 %v852_v32, %v851_v16  ;;  %v2809_v32 = vld [vmem:[#allocation3_spill] sm:$0xff] }
 0x1b7   :  { %v2089_v53 = vsub.f32 %v2809_v32, %v1841_v8  ;;  %v766_v46 = vmul.f32 %v2082_v50, %v2082_v50 }
 0x1b8   :  { %v855_v36 = vadd.f32 %v854_v63, %v853_v25  ;;  %v2096_v63 = vsub.f32 %v1637_v0, %v1841_v8  ;;  %v2110_v0 = vsub.f32 %v1667_v19, %v1841_v8 }
 0x1b9   :  { %2810 = vst [vmem:[#allocation10_spill] sm:$0xff] %v2089_v53  ;;  %v767_v32 = vmul.f32 %v2089_v53, %v2089_v53  ;;  %v864_v47 = vsel %vm532_vm2, %v766_v46, 0.0 }
 0x1ba   :  { %v857_v16 = vadd.f32 %v856_v3, %v855_v36  ;;  %2811 = vst [vmem:[#allocation2_spill] sm:$0xff] %v2096_v63  ;;  %v2103_v3 = vsub.f32 %v1647_v5, %v1841_v8 }
 0x1bb   :  { %v866_v18 = vsel %vm532_vm2, %v767_v32, 0.0 }
 0x1bc   :  { %v859_v25 = vadd.f32 %v858_v22, %v857_v16  ;;  %v768_v22 = vmul.f32 %v2096_v63, %v2096_v63  ;;  %v769_v53 = vmul.f32 %v2103_v3, %v2103_v3  ;;  %v770_v63 = vmul.f32 %v2110_v0, %v2110_v0 }
 0x1be   :  { %v861_v36 = vadd.f32 %v860_v30, %v859_v25  ;;  %v2812_v30 = vld [vmem:[#allocation5_spill] sm:$0xff]  ;;  %v868_v46 = vsel %vm532_vm2, %v768_v22, 0.0  ;;  %v870_v32 = vsel %vm532_vm2, %v769_v53, 0.0  ;;  %v872_v22 = vsel %vm532_vm2, %v770_v63, 0.0 }
 0x1bf   :  { %v2117_v5 = vsub.f32 %v2812_v30, %v1841_v8 }
 0x1c0   :  { %v863_v16 = vadd.f32 %v862_v43, %v861_v36  ;;  %v2813_v43 = vld [vmem:[#allocation6_spill] sm:$0xff] }
 0x1c1   :  { %v2124_v19 = vsub.f32 %v2813_v43, %v1841_v8  ;;  %v771_v30 = vmul.f32 %v2117_v5, %v2117_v5 }
 0x1c2   :  { %v865_v25 = vadd.f32 %v864_v47, %v863_v16  ;;  %v2131_v47 = vsub.f32 %v1719_v4, %v1841_v8  ;;  %v2145_v4 = vsub.f32 %v1751_v26, %v1841_v8  ;;  %v2159_v26 = vsub.f32 %v1779_v56, %v1841_v8 }
 0x1c3   :  { %2814 = vst [vmem:[#allocation3_spill] sm:$0xff] %v2124_v19  ;;  %v772_v43 = vmul.f32 %v2124_v19, %v2124_v19  ;;  %v874_v53 = vsel %vm532_vm2, %v771_v30, 0.0  ;;  %v2173_v56 = vsub.f32 %v1631_v61, %v1841_v8 }
 0x1c4   :  { %v867_v36 = vadd.f32 %v866_v18, %v865_v25  ;;  %v2138_v18 = vsub.f32 %v1735_v28, %v1841_v8  ;;  %2816 = vst [vmem:[#allocation5_spill] sm:$0xff] %v2159_v26 }
 0x1c5   :  { %v876_v63 = vsel %vm532_vm2, %v772_v43, 0.0 }
 0x1c6   :  { %v869_v16 = vadd.f32 %v868_v46, %v867_v36  ;;  %v773_v46 = vmul.f32 %v2131_v47, %v2131_v47  ;;  %v774_v19 = vmul.f32 %v2138_v18, %v2138_v18 }
 0x1c8   :  { %v871_v25 = vadd.f32 %v870_v32, %v869_v16  ;;  %v2815_v32 = vld [vmem:[#allocation11_spill] sm:$0xff]  ;;  %v878_v30 = vsel %vm532_vm2, %v773_v46, 0.0  ;;  %v880_v43 = vsel %vm532_vm2, %v774_v19, 0.0 }
 0x1c9   :  { %v2152_v28 = vsub.f32 %v2815_v32, %v1841_v8 }
 0x1ca   :  { %v873_v36 = vadd.f32 %v872_v22, %v871_v25  ;;  %v775_v22 = vmul.f32 %v2145_v4, %v2145_v4 }
 0x1cb   :  { %v776_v32 = vmul.f32 %v2152_v28, %v2152_v28 }
 0x1cc   :  { %v875_v16 = vadd.f32 %v874_v53, %v873_v36  ;;  %v2166_v53 = vsub.f32 %v1793_v33, %v1841_v8  ;;  %v882_v46 = vsel %vm532_vm2, %v775_v22, 0.0  ;;  %v2180_v33 = vsub.f32 %v1639_v1, %v1841_v8 }
 0x1cd   :  { %v884_v19 = vsel %vm532_vm2, %v776_v32, 0.0  ;;  %v2194_v1 = vsub.f32 %v1669_v21, %v1841_v8  ;;  %v2208_v21 = vsub.f32 %v1705_v20, %v1841_v8 }
 0x1ce   :  { %v877_v25 = vadd.f32 %v876_v63, %v875_v16  ;;  %v777_v63 = vmul.f32 %v2159_v26, %v2159_v26  ;;  %v779_v26 = vmul.f32 %v2173_v56, %v2173_v56 }
 0x1cf   :  { %2819 = vst [vmem:[#allocation11_spill] sm:$0xff] %v2194_v1 }
 0x1d0   :  { %v879_v36 = vadd.f32 %v878_v30, %v877_v25  ;;  %v778_v30 = vmul.f32 %v2166_v53, %v2166_v53  ;;  %v886_v22 = vsel %vm532_vm2, %v777_v63, 0.0  ;;  %v890_v63 = vsel %vm532_vm2, %v779_v26, 0.0  ;;  %2821 = vst [vmem:[#allocation18_spill] sm:$0xff] %v2208_v21 }
 0x1d2   :  { %v881_v16 = vadd.f32 %v880_v43, %v879_v36  ;;  %v2817_v43 = vld [vmem:[#allocation4_spill] sm:$0xff]  ;;  %v888_v32 = vsel %vm532_vm2, %v778_v30, 0.0 }
 0x1d3   :  { %v2187_v61 = vsub.f32 %v2817_v43, %v1841_v8 }
 0x1d4   :  { %v883_v25 = vadd.f32 %v882_v46, %v881_v16  ;;  %v780_v46 = vmul.f32 %v2180_v33, %v2180_v33 }
 0x1d5   :  { %2818 = vst [vmem:[#allocation6_spill] sm:$0xff] %v2187_v61  ;;  %v781_v43 = vmul.f32 %v2187_v61, %v2187_v61 }
 0x1d6   :  { %v885_v36 = vadd.f32 %v884_v19, %v883_v25  ;;  %v2201_v19 = vsub.f32 %v1689_v41, %v1841_v8  ;;  %v892_v30 = vsel %vm532_vm2, %v780_v46, 0.0  ;;  %v2215_v41 = vsub.f32 %v1721_v7, %v1841_v8 }
 0x1d7   :  { %v894_v26 = vsel %vm532_vm2, %v781_v43, 0.0  ;;  %v2229_v7 = vsub.f32 %v1753_v27, %v1841_v8 }
 0x1d8   :  { %v887_v16 = vadd.f32 %v886_v22, %v885_v36  ;;  %2820 = vst [vmem:[#allocation4_spill] sm:$0xff] %v2201_v19  ;;  %v782_v22 = vmul.f32 %v2194_v1, %v2194_v1  ;;  %v784_v1 = vmul.f32 %v2208_v21, %v2208_v21 }
 0x1d9   :  { %2822 = vst [vmem:[#allocation19_spill] sm:$0xff] %v2215_v41 }
 0x1da   :  { %v889_v25 = vadd.f32 %v888_v32, %v887_v16  ;;  %v783_v32 = vmul.f32 %v2201_v19, %v2201_v19  ;;  %v896_v46 = vsel %vm532_vm2, %v782_v22, 0.0  ;;  %2825 = vst [vmem:[#allocation20_spill] sm:$0xff] %v2229_v7  ;;  %v900_v22 = vsel %vm532_vm2, %v784_v1, 0.0 }
 0x1dc   :  { %v891_v36 = vadd.f32 %v890_v63, %v889_v25  ;;  %v2823_v63 = vld [vmem:[#allocation9_spill] sm:$0xff]  ;;  %v898_v43 = vsel %vm532_vm2, %v783_v32, 0.0 }
 0x1dd   :  { %v2222_v20 = vsub.f32 %v2823_v63, %v1841_v8 }
 0x1de   :  { %v893_v16 = vadd.f32 %v892_v30, %v891_v36  ;;  %v785_v30 = vmul.f32 %v2215_v41, %v2215_v41  ;;  %v787_v41 = vmul.f32 %v2229_v7, %v2229_v7 }
 0x1df   :  { %2824 = vst [vmem:[#allocation9_spill] sm:$0xff] %v2222_v20  ;;  %v786_v21 = vmul.f32 %v2222_v20, %v2222_v20 }
 0x1e0   :  { %v895_v25 = vadd.f32 %v894_v26, %v893_v16  ;;  %v2826_v26 = vld [vmem:[#allocation12_spill] sm:$0xff]  ;;  %v902_v32 = vsel %vm532_vm2, %v785_v30, 0.0  ;;  %v906_v30 = vsel %vm532_vm2, %v787_v41, 0.0 }
 0x1e1   :  { %v2236_v63 = vsub.f32 %v2826_v26, %v1841_v8  ;;  %v904_v1 = vsel %vm532_vm2, %v786_v21, 0.0 }
 0x1e2   :  { %v897_v36 = vadd.f32 %v896_v46, %v895_v25  ;;  %v2828_v46 = vld [vmem:[#allocation13_spill] sm:$0xff] }
 0x1e3   :  { %2827 = vst [vmem:[#allocation12_spill] sm:$0xff] %v2236_v63  ;;  %v2243_v27 = vsub.f32 %v2828_v46, %v1841_v8  ;;  %v788_v20 = vmul.f32 %v2236_v63, %v2236_v63 }
 0x1e4   :  { %v899_v16 = vadd.f32 %v898_v43, %v897_v36  ;;  %v2830_v43 = vld [vmem:[#allocation14_spill] sm:$0xff] }
 0x1e5   :  { %2829 = vst [vmem:[#allocation13_spill] sm:$0xff] %v2243_v27  ;;  %v2250_v26 = vsub.f32 %v2830_v43, %v1841_v8  ;;  %v789_v7 = vmul.f32 %v2243_v27, %v2243_v27  ;;  %v908_v21 = vsel %vm532_vm2, %v788_v20, 0.0 }
 0x1e6   :  { %v901_v25 = vadd.f32 %v900_v22, %v899_v16  ;;  %v2832_v22 = vld [vmem:[#allocation15_spill] sm:$0xff] }
 0x1e7   :  { %2831 = vst [vmem:[#allocation14_spill] sm:$0xff] %v2250_v26  ;;  %v2257_v46 = vsub.f32 %v2832_v22, %v1841_v8  ;;  %v790_v43 = vmul.f32 %v2250_v26, %v2250_v26  ;;  %v910_v41 = vsel %vm532_vm2, %v789_v7, 0.0 }
 0x1e8   :  { %v903_v36 = vadd.f32 %v902_v32, %v901_v25  ;;  %v2264_v32 = vsub.f32 %v1819_v6, %v1841_v8  ;;  %v730_v6 = vsub.f32 %v1837_v59, %v1841_v8 }
 0x1e9   :  { %2833 = vst [vmem:[#allocation15_spill] sm:$0xff] %v2257_v46  ;;  %v791_v22 = vmul.f32 %v2257_v46, %v2257_v46  ;;  %v912_v26 = vsel %vm532_vm2, %v790_v43, 0.0 }
 0x1ea   :  { %v905_v16 = vadd.f32 %v904_v1, %v903_v36  ;;  %2834 = vst [vmem:[#allocation21_spill] sm:$0xff] %v2264_v32  ;;  %v2271_v1 = vsub.f32 %v1829_v29, %v1841_v8  ;;  %v794_v27 = vmul.f32 %v730_v6, %v730_v6 }
 0x1eb   :  { %v914_v29 = vsel %vm532_vm2, %v791_v22, 0.0 }
 0x1ec   :  { %v907_v25 = vadd.f32 %v906_v30, %v905_v16  ;;  %2835 = vst [vmem:[#allocation22_spill] sm:$0xff] %v2271_v1  ;;  %v792_v30 = vmul.f32 %v2264_v32, %v2264_v32  ;;  %v920_v59 = vsel %vm532_vm2, %v794_v27, 0.0  ;;  %v929_v27 = vld [vmem:[%s2750_s2] sm:$0x1] }
 0x1ee   :  { %v909_v36 = vadd.f32 %v908_v21, %v907_v25  ;;  %v793_v25 = vmul.f32 %v2271_v1, %v2271_v1  ;;  %v916_v46 = vsel %vm532_vm2, %v792_v30, 0.0 }
 0x1f0   :  { %v911_v16 = vadd.f32 %v910_v41, %v909_v36  ;;  %v918_v36 = vsel %vm532_vm2, %v793_v25, 0.0 }
 0x1f2   :  { %v913_v20 = vadd.f32 %v912_v26, %v911_v16 }
 0x1f4   :  { %v915_v21 = vadd.f32 %v914_v29, %v913_v20 }
 0x1f6   :  { %v917_v7 = vadd.f32 %v916_v46, %v915_v21 }
 0x1f8   :  { %v919_v41 = vadd.f32 %v918_v36, %v917_v7 }
 0x1fa   :  { %v921_v8 = vadd.f32 %v920_v59, %v919_v41 }
 0x1fc   :  { %v922_v32 = vrot.slane %v921_v8, 4 }
 0x1fe   :  { %v923_v63 = vadd.f32 %v922_v32, %v921_v8 }
 0x200   :  { %v924_v43 = vrot.slane %v923_v63, 2 }
 0x202   :  { %v925_v26 = vadd.f32 %v924_v43, %v923_v63 }
 0x204   :  { %v926_v16 = vrot.slane %v925_v26, 1 }
 0x206   :  { %v927_v19 = vadd.f32 %v926_v16, %v925_v26 }
 0x208   :  { %v928_v1 = vmul.f32 0.001953125, %v927_v19 }
 0x20a   :  { %v930_v61 = vadd.f32 1e-05, %v928_v1 }
 0x20c   :  { %1421 = vrsqrt.f32 %v930_v61  ;;  %vm937_vm4 = vweird.f32 %v930_v61 }
 0x212   :  { %v1422_v22 = vpop.eup %1421 }
 0x213   :  { %v932_v20 = vmul.f32 %v1422_v22, %v930_v61  ;;  %vm938_vm3 = vweird.f32 %v1422_v22  ;;  %v2301_v61 = vld [vmem:[%s2749_s3] ss:$0 sm:$0xff] }
 0x214   :  { %vm939_vm5 = vmor %vm937_vm4, %vm938_vm3 }
 0x215   :  { %v933_v29 = vmul.f32 %v1422_v22, %v932_v20 }
 0x217   :  { %v934_v30 = vmul.f32 0.5, %v933_v29 }
 0x219   :  { %v935_v46 = vsub.f32 1.5, %v934_v30 }
 0x21b   :  { %v936_v21 = vmul.f32 %v1422_v22, %v935_v46 }
 0x21d   :  { %v940_v32 = vsel %vm939_vm5, %v1422_v22, %v936_v21 }
 0x21e   :  { %v941_v63 = vmul.f32 %v940_v32, %v929_v27 }
 0x220   :  { %v2290_v25 = vperm.slane %v941_v63, 0 }
 0x222   :  { %v945_v19 = vmul.f32 %v2290_v25, %v1845_v9  ;;  %v946_v1 = vmul.f32 %v2290_v25, %v1849_v10  ;;  %v947_v7 = vmul.f32 %v2290_v25, %v1853_v11  ;;  %v948_v36 = vmul.f32 %v2290_v25, %v1857_v15 }
 0x223   :  { %v949_v41 = vmul.f32 %v2290_v25, %v1865_v34  ;;  %v950_v9 = vmul.f32 %v2290_v25, %v1871_v40  ;;  %v1008_v59 = vmul.f32 %v2290_v25, %v730_v6  ;;  %v951_v10 = vmul.f32 %v2290_v25, %v1879_v23 }
 0x224   :  { %v1013_v11 = vadd.f32 %v2301_v61, %v945_v19  ;;  %v1014_v8 = vadd.f32 %v2301_v61, %v946_v1  ;;  %v1015_v43 = vadd.f32 %v2301_v61, %v947_v7  ;;  %v952_v15 = vmul.f32 %v2290_v25, %v1886_v48 }
 0x225   :  { %v1016_v26 = vadd.f32 %v2301_v61, %v948_v36  ;;  %v953_v34 = vmul.f32 %v2290_v25, %v1893_v51  ;;  %v1017_v40 = vadd.f32 %v2301_v61, %v949_v41  ;;  %v954_v6 = vmul.f32 %v2290_v25, %v1900_v54 }
 0x226   :  { %v955_v23 = vmul.f32 %v2290_v25, %v1907_v57  ;;  %v1018_v16 = vadd.f32 %v2301_v61, %v950_v9  ;;  %v2327_v22 = vadd.f32 %v2301_v61, %v1008_v59  ;;  %v1019_v48 = vadd.f32 %v2301_v61, %v951_v10 }
 0x227   :  { %v1077_v20 = vmax.f32 %v1013_v11, 0.0  ;;  %v1078_v29 = vmax.f32 %v1014_v8, 0.0  ;;  %v1079_v30 = vmax.f32 %v1015_v43, 0.0  ;;  %v956_v51 = vmul.f32 %v2290_v25, %v1914_v60 }
 0x228   :  { %v1020_v46 = vadd.f32 %v2301_v61, %v952_v15  ;;  %v1080_v21 = vmax.f32 %v1016_v26, 0.0  ;;  %v957_v54 = vmul.f32 %v2290_v25, %v1921_v62  ;;  %v1021_v57 = vadd.f32 %v2301_v61, %v953_v34 }
 0x229   :  { %v1081_v27 = vmax.f32 %v1017_v40, 0.0  ;;  %1141 = vst.msk [vmem:[%s2751_s4] sm:$0xff] %vm532_vm2, %v1077_v20  ;;  %v958_v32 = vmul.f32 %v2290_v25, %v1928_v2  ;;  %v1022_v63 = vadd.f32 %v2301_v61, %v954_v6  ;;  %v1082_v60 = vmax.f32 %v1018_v16, 0.0 }
 0x22a   :  { %1142 = vst.msk [vmem:[%s2751_s4 + $0x8] sm:$0xff] %vm532_vm2, %v1078_v29  ;;  %v959_v62 = vmul.f32 %v2290_v25, %v1935_v12  ;;  %v1023_v19 = vadd.f32 %v2301_v61, %v955_v23  ;;  %v1083_v1 = vmax.f32 %v1019_v48, 0.0  ;;  %v960_v2 = vmul.f32 %v2290_v25, %v1942_v24 }
 0x22b   :  { %1143 = vst.msk [vmem:[%s2751_s4 + $0x10] sm:$0xff] %vm532_vm2, %v1079_v30  ;;  %v1024_v7 = vadd.f32 %v2301_v61, %v956_v51  ;;  %v1084_v36 = vmax.f32 %v1020_v46, 0.0  ;;  %v961_v12 = vmul.f32 %v2290_v25, %v1949_v37  ;;  %v1025_v41 = vadd.f32 %v2301_v61, %v957_v54 }
 0x22c   :  { %1144 = vst.msk [vmem:[%s2751_s4 + $0x18] sm:$0xff] %vm532_vm2, %v1080_v21  ;;  %v1085_v9 = vmax.f32 %v1021_v57, 0.0  ;;  %v962_v24 = vmul.f32 %v2290_v25, %v1956_v13  ;;  %v1026_v59 = vadd.f32 %v2301_v61, %v958_v32  ;;  %v1086_v10 = vmax.f32 %v1022_v63, 0.0 }
 0x22d   :  { %1145 = vst.msk [vmem:[%s2751_s4 + $0x20] sm:$0xff] %vm532_vm2, %v1081_v27  ;;  %v963_v37 = vmul.f32 %v2290_v25, %v1963_v35  ;;  %v1027_v11 = vadd.f32 %v2301_v61, %v959_v62  ;;  %v1087_v8 = vmax.f32 %v1023_v19, 0.0  ;;  %v964_v13 = vmul.f32 %v2290_v25, %v1970_v39 }
 0x22e   :  { %1146 = vst.msk [vmem:[%s2751_s4 + $0x28] sm:$0xff] %vm532_vm2, %v1082_v60  ;;  %v1028_v43 = vadd.f32 %v2301_v61, %v960_v2  ;;  %v1088_v15 = vmax.f32 %v1024_v7, 0.0  ;;  %v965_v35 = vmul.f32 %v2290_v25, %v1977_v42  ;;  %v1029_v26 = vadd.f32 %v2301_v61, %v961_v12 }
 0x22f   :  { %1147 = vst.msk [vmem:[%s2751_s4 + $0x30] sm:$0xff] %vm532_vm2, %v1083_v1  ;;  %v1089_v34 = vmax.f32 %v1025_v41, 0.0  ;;  %v966_v39 = vmul.f32 %v2290_v25, %v1984_v44  ;;  %v1030_v40 = vadd.f32 %v2301_v61, %v962_v24  ;;  %v1090_v6 = vmax.f32 %v1026_v59, 0.0 }
 0x230   :  { %1148 = vst.msk [vmem:[%s2751_s4 + $0x38] sm:$0xff] %vm532_vm2, %v1084_v36  ;;  %v967_v42 = vmul.f32 %v2290_v25, %v1991_v49  ;;  %v1031_v23 = vadd.f32 %v2301_v61, %v963_v37  ;;  %v1091_v16 = vmax.f32 %v1027_v11, 0.0  ;;  %v968_v44 = vmul.f32 %v2290_v25, %v1998_v52 }
 0x231   :  { %1149 = vst.msk [vmem:[%s2751_s4 + $0x40] sm:$0xff] %vm532_vm2, %v1085_v9  ;;  %v1032_v48 = vadd.f32 %v2301_v61, %v964_v13  ;;  %v1092_v20 = vmax.f32 %v1028_v43, 0.0  ;;  %v969_v49 = vmul.f32 %v2290_v25, %v2005_v55  ;;  %v1033_v29 = vadd.f32 %v2301_v61, %v965_v35  ;;  %v2836_v55 = vld [vmem:[#allocation16_spill] sm:$0xff] }
 0x232   :  { %1150 = vst.msk [vmem:[%s2751_s4 + $0x48] sm:$0xff] %vm532_vm2, %v1086_v10  ;;  %v1093_v30 = vmax.f32 %v1029_v26, 0.0  ;;  %v970_v52 = vmul.f32 %v2290_v25, %v2012_v58  ;;  %v1034_v51 = vadd.f32 %v2301_v61, %v966_v39  ;;  %v1094_v46 = vmax.f32 %v1030_v40, 0.0  ;;  %v2837_v58 = vld [vmem:[#allocation17_spill] sm:$0xff] }
 0x233   :  { %1151 = vst.msk [vmem:[%s2751_s4 + $0x50] sm:$0xff] %vm532_vm2, %v1087_v8  ;;  %v971_v21 = vmul.f32 %v2290_v25, %v2836_v55  ;;  %v1035_v54 = vadd.f32 %v2301_v61, %v967_v42  ;;  %v1095_v57 = vmax.f32 %v1031_v23, 0.0  ;;  %v972_v27 = vmul.f32 %v2290_v25, %v2837_v58 }
 0x234   :  { %1152 = vst.msk [vmem:[%s2751_s4 + $0x58] sm:$0xff] %vm532_vm2, %v1088_v15  ;;  %v1036_v32 = vadd.f32 %v2301_v61, %v968_v44  ;;  %v1096_v63 = vmax.f32 %v1032_v48, 0.0  ;;  %v973_v60 = vmul.f32 %v2290_v25, %v2033_v17  ;;  %v1037_v62 = vadd.f32 %v2301_v61, %v969_v49 }
 0x235   :  { %1153 = vst.msk [vmem:[%s2751_s4 + $0x60] sm:$0xff] %vm532_vm2, %v1089_v34  ;;  %v1097_v19 = vmax.f32 %v1033_v29, 0.0  ;;  %v974_v1 = vmul.f32 %v2290_v25, %v2040_v31  ;;  %v1038_v2 = vadd.f32 %v2301_v61, %v970_v52  ;;  %v1098_v7 = vmax.f32 %v1034_v51, 0.0  ;;  %v2838_v31 = vld [vmem:[#allocation7_spill] sm:$0xff] }
 0x236   :  { %1154 = vst.msk [vmem:[%s2751_s4 + $0x68] sm:$0xff] %vm532_vm2, %v1090_v6  ;;  %v975_v17 = vmul.f32 %v2290_v25, %v2047_v14  ;;  %v1039_v36 = vadd.f32 %v2301_v61, %v971_v21  ;;  %v1099_v12 = vmax.f32 %v1035_v54, 0.0  ;;  %v976_v41 = vmul.f32 %v2290_v25, %v2838_v31  ;;  %v2839_v14 = vld [vmem:[#allocation8_spill] sm:$0xff] }
 0x237   :  { %1155 = vst.msk [vmem:[%s2751_s4 + $0x70] sm:$0xff] %vm532_vm2, %v1091_v16  ;;  %v1040_v9 = vadd.f32 %v2301_v61, %v972_v27  ;;  %v1100_v24 = vmax.f32 %v1036_v32, 0.0  ;;  %v977_v59 = vmul.f32 %v2290_v25, %v2839_v14  ;;  %v1041_v10 = vadd.f32 %v2301_v61, %v973_v60 }
 0x238   :  { %1156 = vst.msk [vmem:[%s2751_s4 + $0x78] sm:$0xff] %vm532_vm2, %v1092_v20  ;;  %v1101_v37 = vmax.f32 %v1037_v62, 0.0  ;;  %v978_v11 = vmul.f32 %v2290_v25, %v2068_v38  ;;  %v1042_v8 = vadd.f32 %v2301_v61, %v974_v1  ;;  %v1102_v13 = vmax.f32 %v1038_v2, 0.0 }
 0x239   :  { %1157 = vst.msk [vmem:[%s2751_s4 + $0x80] sm:$0xff] %vm532_vm2, %v1093_v30  ;;  %v979_v43 = vmul.f32 %v2290_v25, %v2075_v45  ;;  %v1043_v15 = vadd.f32 %v2301_v61, %v975_v17  ;;  %v1103_v35 = vmax.f32 %v1039_v36, 0.0  ;;  %v980_v38 = vmul.f32 %v2290_v25, %v2082_v50  ;;  %v2840_v45 = vld [vmem:[#allocation10_spill] sm:$0xff] }
 0x23a   :  { %1158 = vst.msk [vmem:[%s2751_s4 + $0x88] sm:$0xff] %vm532_vm2, %v1094_v46  ;;  %v1044_v26 = vadd.f32 %v2301_v61, %v976_v41  ;;  %v1104_v34 = vmax.f32 %v1040_v9, 0.0  ;;  %v981_v39 = vmul.f32 %v2290_v25, %v2840_v45  ;;  %v1045_v40 = vadd.f32 %v2301_v61, %v977_v59  ;;  %v2841_v50 = vld [vmem:[#allocation2_spill] sm:$0xff] }
 0x23b   :  { %1159 = vst.msk [vmem:[%s2751_s4 + $0x90] sm:$0xff] %vm532_vm2, %v1095_v57  ;;  %v1105_v6 = vmax.f32 %v1041_v10, 0.0  ;;  %v982_v42 = vmul.f32 %v2290_v25, %v2841_v50  ;;  %v1046_v23 = vadd.f32 %v2301_v61, %v978_v11  ;;  %v1106_v16 = vmax.f32 %v1042_v8, 0.0 }
 0x23c   :  { %1160 = vst.msk [vmem:[%s2751_s4 + $0x98] sm:$0xff] %vm532_vm2, %v1096_v63  ;;  %v983_v44 = vmul.f32 %v2290_v25, %v2103_v3  ;;  %v1047_v48 = vadd.f32 %v2301_v61, %v979_v43  ;;  %v1107_v20 = vmax.f32 %v1043_v15, 0.0  ;;  %v984_v49 = vmul.f32 %v2290_v25, %v2110_v0  ;;  %v2842_v0 = vld [vmem:[#allocation3_spill] sm:$0xff] }
 0x23d   :  { %1161 = vst.msk [vmem:[%s2751_s4 + $0xa0] sm:$0xff] %vm532_vm2, %v1097_v19  ;;  %v1048_v29 = vadd.f32 %v2301_v61, %v980_v38  ;;  %v1108_v30 = vmax.f32 %v1044_v26, 0.0  ;;  %v985_v3 = vmul.f32 %v2290_v25, %v2117_v5  ;;  %v1049_v52 = vadd.f32 %v2301_v61, %v981_v39  ;;  %v2847_v38 = vld [vmem:[#allocation18_spill] sm:$0xff]  ;;  %v2848_v39 = vld [vmem:[#allocation19_spill] sm:$0xff] }
 0x23e   :  { %1162 = vst.msk [vmem:[%s2751_s4 + $0xa8] sm:$0xff] %vm532_vm2, %v1098_v7  ;;  %v1109_v51 = vmax.f32 %v1045_v40, 0.0  ;;  %v986_v46 = vmul.f32 %v2290_v25, %v2842_v0  ;;  %v1050_v55 = vadd.f32 %v2301_v61, %v982_v42  ;;  %v1110_v21 = vmax.f32 %v1046_v23, 0.0  ;;  %v2849_v42 = vld [vmem:[#allocation9_spill] sm:$0xff] }
 0x23f   :  { %1163 = vst.msk [vmem:[%s2751_s4 + $0xb0] sm:$0xff] %vm532_vm2, %v1099_v12  ;;  %v987_v5 = vmul.f32 %v2290_v25, %v2131_v47  ;;  %v1051_v54 = vadd.f32 %v2301_v61, %v983_v44  ;;  %v1111_v57 = vmax.f32 %v1047_v48, 0.0  ;;  %v988_v58 = vmul.f32 %v2290_v25, %v2138_v18  ;;  %v2850_v48 = vld [vmem:[#allocation20_spill] sm:$0xff]  ;;  %v2852_v0 = vld [vmem:[#allocation13_spill] sm:$0xff] }
 0x240   :  { %1164 = vst.msk [vmem:[%s2751_s4 + $0xb8] sm:$0xff] %vm532_vm2, %v1100_v24  ;;  %v1052_v27 = vadd.f32 %v2301_v61, %v984_v49  ;;  %v1112_v32 = vmax.f32 %v1048_v29, 0.0  ;;  %v989_v47 = vmul.f32 %v2290_v25, %v2145_v4  ;;  %v1053_v63 = vadd.f32 %v2301_v61, %v985_v3  ;;  %v2843_v4 = vld [vmem:[#allocation5_spill] sm:$0xff] }
 0x241   :  { %1165 = vst.msk [vmem:[%s2751_s4 + $0xc0] sm:$0xff] %vm532_vm2, %v1101_v37  ;;  %v1113_v60 = vmax.f32 %v1049_v52, 0.0  ;;  %v990_v18 = vmul.f32 %v2290_v25, %v2152_v28  ;;  %v1054_v62 = vadd.f32 %v2301_v61, %v986_v46  ;;  %v1114_v19 = vmax.f32 %v1050_v55, 0.0 }
 0x242   :  { %1166 = vst.msk [vmem:[%s2751_s4 + $0xc8] sm:$0xff] %vm532_vm2, %v1102_v13  ;;  %v991_v1 = vmul.f32 %v2290_v25, %v2843_v4  ;;  %v1055_v2 = vadd.f32 %v2301_v61, %v987_v5  ;;  %v1115_v7 = vmax.f32 %v1051_v54, 0.0  ;;  %v992_v28 = vmul.f32 %v2290_v25, %v2166_v53  ;;  %v2846_v13 = vld [vmem:[#allocation4_spill] sm:$0xff]  ;;  %v2853_v5 = vld [vmem:[#allocation14_spill] sm:$0xff] }
 0x243   :  { %1167 = vst.msk [vmem:[%s2751_s4 + $0xd0] sm:$0xff] %vm532_vm2, %v1103_v35  ;;  %v1056_v17 = vadd.f32 %v2301_v61, %v988_v58  ;;  %v1116_v36 = vmax.f32 %v1052_v27, 0.0  ;;  %v993_v12 = vmul.f32 %v2290_v25, %v2173_v56  ;;  %v1057_v31 = vadd.f32 %v2301_v61, %v989_v47  ;;  %v2844_v56 = vld [vmem:[#allocation6_spill] sm:$0xff]  ;;  %v2854_v27 = vld [vmem:[#allocation15_spill] sm:$0xff] }
 0x244   :  { %1168 = vst.msk [vmem:[%s2751_s4 + $0xd8] sm:$0xff] %vm532_vm2, %v1104_v34  ;;  %v1117_v41 = vmax.f32 %v1053_v63, 0.0  ;;  %v994_v53 = vmul.f32 %v2290_v25, %v2180_v33  ;;  %v1058_v9 = vadd.f32 %v2301_v61, %v990_v18  ;;  %v1118_v24 = vmax.f32 %v1054_v62, 0.0  ;;  %v2845_v33 = vld [vmem:[#allocation11_spill] sm:$0xff]  ;;  %v2856_v4 = vld [vmem:[#allocation22_spill] sm:$0xff] }
 0x245   :  { %1169 = vst.msk [vmem:[%s2751_s4 + $0xe0] sm:$0xff] %vm532_vm2, %v1105_v6  ;;  %v995_v14 = vmul.f32 %v2290_v25, %v2844_v56  ;;  %v1059_v59 = vadd.f32 %v2301_v61, %v991_v1  ;;  %v1119_v10 = vmax.f32 %v1055_v2, 0.0  ;;  %v996_v37 = vmul.f32 %v2290_v25, %v2845_v33 }
 0x246   :  { %1170 = vst.msk [vmem:[%s2751_s4 + $0xe8] sm:$0xff] %vm532_vm2, %v1106_v16  ;;  %v1060_v11 = vadd.f32 %v2301_v61, %v992_v28  ;;  %v1120_v8 = vmax.f32 %v1056_v17, 0.0  ;;  %v997_v43 = vmul.f32 %v2290_v25, %v2846_v13  ;;  %v1061_v15 = vadd.f32 %v2301_v61, %v993_v12 }
 0x247   :  { %1171 = vst.msk [vmem:[%s2751_s4 + $0xf0] sm:$0xff] %vm532_vm2, %v1107_v20  ;;  %v1121_v35 = vmax.f32 %v1057_v31, 0.0  ;;  %v998_v26 = vmul.f32 %v2290_v25, %v2847_v38  ;;  %v1062_v34 = vadd.f32 %v2301_v61, %v994_v53  ;;  %v1122_v45 = vmax.f32 %v1058_v9, 0.0 }
 0x248   :  { %1172 = vst.msk [vmem:[%s2751_s4 + $0xf8] sm:$0xff] %vm532_vm2, %v1108_v30  ;;  %v999_v40 = vmul.f32 %v2290_v25, %v2848_v39  ;;  %v1063_v6 = vadd.f32 %v2301_v61, %v995_v14  ;;  %v1123_v50 = vmax.f32 %v1059_v59, 0.0  ;;  %v1000_v23 = vmul.f32 %v2290_v25, %v2849_v42  ;;  %v2851_v30 = vld [vmem:[#allocation12_spill] sm:$0xff] }
 0x249   :  { %1173 = vst.msk [vmem:[%s2751_s4 + $0x100] sm:$0xff] %vm532_vm2, %v1109_v51  ;;  %v1064_v16 = vadd.f32 %v2301_v61, %v996_v37  ;;  %v1124_v44 = vmax.f32 %v1060_v11, 0.0  ;;  %v1001_v20 = vmul.f32 %v2290_v25, %v2850_v48  ;;  %v1065_v49 = vadd.f32 %v2301_v61, %v997_v43 }
 0x24a   :  { %1174 = vst.msk [vmem:[%s2751_s4 + $0x108] sm:$0xff] %vm532_vm2, %v1110_v21  ;;  %v1125_v29 = vmax.f32 %v1061_v15, 0.0  ;;  %v1002_v3 = vmul.f32 %v2290_v25, %v2851_v30  ;;  %v1066_v52 = vadd.f32 %v2301_v61, %v998_v26  ;;  %v1126_v51 = vmax.f32 %v1062_v34, 0.0 }
 0x24b   :  { %1175 = vst.msk [vmem:[%s2751_s4 + $0x110] sm:$0xff] %vm532_vm2, %v1111_v57  ;;  %v1003_v46 = vmul.f32 %v2290_v25, %v2852_v0  ;;  %v1067_v55 = vadd.f32 %v2301_v61, %v999_v40  ;;  %v1127_v21 = vmax.f32 %v1063_v6, 0.0  ;;  %v1004_v54 = vmul.f32 %v2290_v25, %v2853_v5 }
 0x24c   :  { %1176 = vst.msk [vmem:[%s2751_s4 + $0x118] sm:$0xff] %vm532_vm2, %v1112_v32  ;;  %v1068_v57 = vadd.f32 %v2301_v61, %v1000_v23  ;;  %v1128_v58 = vmax.f32 %v1064_v16, 0.0  ;;  %v1005_v32 = vmul.f32 %v2290_v25, %v2854_v27  ;;  %v1069_v47 = vadd.f32 %v2301_v61, %v1001_v20 }
 0x24d   :  { %1177 = vst.msk [vmem:[%s2751_s4 + $0x120] sm:$0xff] %vm532_vm2, %v1113_v60  ;;  %v1129_v63 = vmax.f32 %v1065_v49, 0.0  ;;  %v2855_v60 = vld [vmem:[#allocation21_spill] sm:$0xff]  ;;  %v1070_v62 = vadd.f32 %v2301_v61, %v1002_v3  ;;  %v1007_v1 = vmul.f32 %v2290_v25, %v2856_v4  ;;  %v1071_v2 = vadd.f32 %v2301_v61, %v1003_v46 }
 0x24e   :  { %1178 = vst.msk [vmem:[%s2751_s4 + $0x128] sm:$0xff] %vm532_vm2, %v1114_v19  ;;  %v1006_v18 = vmul.f32 %v2290_v25, %v2855_v60  ;;  %v1130_v19 = vmax.f32 %v1066_v52, 0.0  ;;  %v1072_v28 = vadd.f32 %v2301_v61, %v1004_v54  ;;  %v1132_v17 = vmax.f32 %v1068_v57, 0.0 }
 0x24f   :  { %1179 = vst.msk [vmem:[%s2751_s4 + $0x130] sm:$0xff] %vm532_vm2, %v1115_v7  ;;  %v1131_v7 = vmax.f32 %v1067_v55, 0.0  ;;  %v1133_v12 = vmax.f32 %v1069_v47, 0.0  ;;  %v1134_v31 = vmax.f32 %v1070_v62, 0.0  ;;  %v1135_v53 = vmax.f32 %v1071_v2, 0.0 }
 0x250   :  { %1180 = vst.msk [vmem:[%s2751_s4 + $0x138] sm:$0xff] %vm532_vm2, %v1116_v36  ;;  %v1073_v36 = vadd.f32 %v2301_v61, %v1005_v32  ;;  %v1074_v25 = vadd.f32 %v2301_v61, %v1006_v18  ;;  %v1136_v9 = vmax.f32 %v1072_v28, 0.0  ;;  %v1140_v14 = vmax.f32 %v2327_v22, 0.0 }
 0x251   :  { %1181 = vst.msk [vmem:[%s2751_s4 + $0x140] sm:$0xff] %vm532_vm2, %v1117_v41  ;;  %v1075_v41 = vadd.f32 %v2301_v61, %v1007_v1 }
 0x252   :  { %1182 = vst.msk [vmem:[%s2751_s4 + $0x148] sm:$0xff] %vm532_vm2, %v1118_v24  ;;  %v1137_v24 = vmax.f32 %v1073_v36, 0.0  ;;  %v1138_v56 = vmax.f32 %v1074_v25, 0.0 }
 0x253   :  { %1183 = vst.msk [vmem:[%s2751_s4 + $0x150] sm:$0xff] %vm532_vm2, %v1119_v10  ;;  %v1139_v61 = vmax.f32 %v1075_v41, 0.0 }
 0x254   :  { %1184 = vst.msk [vmem:[%s2751_s4 + $0x158] sm:$0xff] %vm532_vm2, %v1120_v8 }
 0x255   :  { %1185 = vst.msk [vmem:[%s2751_s4 + $0x160] sm:$0xff] %vm532_vm2, %v1121_v35 }
 0x256   :  { %1186 = vst.msk [vmem:[%s2751_s4 + $0x168] sm:$0xff] %vm532_vm2, %v1122_v45 }
 0x257   :  { %1187 = vst.msk [vmem:[%s2751_s4 + $0x170] sm:$0xff] %vm532_vm2, %v1123_v50 }
 0x258   :  { %1188 = vst.msk [vmem:[%s2751_s4 + $0x178] sm:$0xff] %vm532_vm2, %v1124_v44 }
 0x259   :  { %1189 = vst.msk [vmem:[%s2751_s4 + $0x180] sm:$0xff] %vm532_vm2, %v1125_v29 }
 0x25a   :  { %1190 = vst.msk [vmem:[%s2751_s4 + $0x188] sm:$0xff] %vm532_vm2, %v1126_v51 }
 0x25b   :  { %1191 = vst.msk [vmem:[%s2751_s4 + $0x190] sm:$0xff] %vm532_vm2, %v1127_v21 }
 0x25c   :  { %1192 = vst.msk [vmem:[%s2751_s4 + $0x198] sm:$0xff] %vm532_vm2, %v1128_v58 }
 0x25d   :  { %1193 = vst.msk [vmem:[%s2751_s4 + $0x1a0] sm:$0xff] %vm532_vm2, %v1129_v63 }
 0x25e   :  { %1194 = vst.msk [vmem:[%s2751_s4 + $0x1a8] sm:$0xff] %vm532_vm2, %v1130_v19 }
 0x25f   :  { %1195 = vst.msk [vmem:[%s2751_s4 + $0x1b0] sm:$0xff] %vm532_vm2, %v1131_v7 }
 0x260   :  { %1196 = vst.msk [vmem:[%s2751_s4 + $0x1b8] sm:$0xff] %vm532_vm2, %v1132_v17 }
 0x261   :  { %1197 = vst.msk [vmem:[%s2751_s4 + $0x1c0] sm:$0xff] %vm532_vm2, %v1133_v12 }
 0x262   :  { %1198 = vst.msk [vmem:[%s2751_s4 + $0x1c8] sm:$0xff] %vm532_vm2, %v1134_v31 }
 0x263   :  { %1199 = vst.msk [vmem:[%s2751_s4 + $0x1d0] sm:$0xff] %vm532_vm2, %v1135_v53 }
 0x264   :  { %1200 = vst.msk [vmem:[%s2751_s4 + $0x1d8] sm:$0xff] %vm532_vm2, %v1136_v9 }
 0x265   :  { %1201 = vst.msk [vmem:[%s2751_s4 + $0x1e0] sm:$0xff] %vm532_vm2, %v1137_v24 }
 0x266   :  { %1202 = vst.msk [vmem:[%s2751_s4 + $0x1e8] sm:$0xff] %vm532_vm2, %v1138_v56 }
 0x267   :  { %1203 = vst.msk [vmem:[%s2751_s4 + $0x1f0] sm:$0xff] %vm532_vm2, %v1139_v61 }
 0x268   :  { %1204 = vst.msk [vmem:[%s2751_s4 + $0x1f8] sm:$0xff] %vm532_vm2, %v1140_v14 }

// kernel: epistemic_forward.12
= control target key start
LH: loop header
LB: loop body
LE: loop exit
PB: predicated region body
PF: predicated region fallthrough
CT: control target
= control target key end

     0   :  { %vm1298_vm0 = vcmask 523264   ;;  %s6485_s1 = inlined_call_operand.vmem [shape: bf16[576,64], index: 1, kind: input, shape index: {}]   ;;  %s6486_s0 = inlined_call_operand.vmem [shape: bf16[512,576], index: 0, kind: input, shape index: {}]   ;;  %s6487_s3 = inlined_call_operand.vmem [shape: f32[1,64], index: 3, kind: input, shape index: {}]   ;;  %s6488_s2 = inlined_call_operand.vmem [shape: f32[1,64], index: 2, kind: input, shape index: {}]   ;;  %s6489_s4 = inlined_call_operand.vmem [shape: f32[512,64], index: 4, kind: output, shape index: {}]  }
   0x1   :  { %v3899_v0 = vld [vmem:[%s6485_s1 + $0x38] sm:$0xff]  ;;  %v3898_v1 = vld [vmem:[%s6485_s1 + $0x30] sm:$0xff]  ;;  %v3897_v2 = vld [vmem:[%s6485_s1 + $0x28] sm:$0xff] }
   0x2   :  { %3928 = vmatpush.bf16.msra.mxu1 %v3899_v0  ;;  %3929 = vmatpush.bf16.msra.mxu2 %v3899_v0  ;;  %v3896_v3 = vld [vmem:[%s6485_s1 + $0x20] sm:$0xff]  ;;  %v3895_v4 = vld [vmem:[%s6485_s1 + $0x18] sm:$0xff]  ;;  %v3894_v5 = vld [vmem:[%s6485_s1 + $0x10] sm:$0xff] }
   0x3   :  { %3930 = vmatpush.bf16.msra.mxu3 %v3899_v0  ;;  %1395 = vmatpush.bf16.msra.mxu0 %v3899_v0  ;;  %v3893_v6 = vld [vmem:[%s6485_s1 + $0x8] sm:$0xff]  ;;  %v3892_v7 = vld [vmem:[%s6485_s1] sm:$0xff]  ;;  %v3774_v9 = vld [vmem:[%s6486_s0 + $0x150] sm:$0xf0] }
   0x4   :  { %v3078_v8 = vld [vmem:[%s6486_s0 + $0x140] sm:$0xf]  ;;  %v3814_v11 = vld [vmem:[%s6486_s0 + $0x290] sm:$0xf0]  ;;  %v3915_v16 = vld [vmem:[%s6485_s1 + $0xb8] sm:$0xff] }
   0x5   :  { %v3238_v10 = vld [vmem:[%s6486_s0 + $0x280] sm:$0xf]  ;;  %v3854_v13 = vld [vmem:[%s6486_s0 + $0x3d0] sm:$0xf0]  ;;  %v3923_v17 = vld [vmem:[%s6485_s1 + $0xf8] sm:$0xff]  ;;  %v3079_v18 = vor.u32 %v3774_v9, %v3078_v8 }
   0x6   :  { %3931 = vmatpush.bf16.msra.mxu1 %v3898_v1  ;;  %3932 = vmatpush.bf16.msra.mxu2 %v3898_v1  ;;  %v3398_v12 = vld [vmem:[%s6486_s0 + $0x3c0] sm:$0xf]  ;;  %v3734_v15 = vld [vmem:[%s6486_s0 + $0x10] sm:$0xf0]  ;;  %v3239_v19 = vor.u32 %v3814_v11, %v3238_v10  ;;  %v3907_v22 = vld [vmem:[%s6485_s1 + $0x78] sm:$0xff] }
   0x7   :  { %3933 = vmatpush.bf16.msra.mxu3 %v3898_v1  ;;  %1396 = vmatpush.bf16.msra.mxu0 %v3898_v1  ;;  %v2918_v14 = vld [vmem:[%s6486_s0] sm:$0xf]  ;;  %v3399_v20 = vor.u32 %v3854_v13, %v3398_v12  ;;  %v3927_v23 = vld [vmem:[%s6485_s1 + $0x118] sm:$0xff]  ;;  %v3914_v24 = vld [vmem:[%s6485_s1 + $0xb0] sm:$0xff] }
   0x8   :  { %v2919_v21 = vor.u32 %v3734_v15, %v2918_v14  ;;  %v3922_v25 = vld [vmem:[%s6485_s1 + $0xf0] sm:$0xff]  ;;  %v3913_v28 = vld [vmem:[%s6485_s1 + $0xa8] sm:$0xff]  ;;  %v3779_v32 = vld [vmem:[%s6486_s0 + $0x178] sm:$0xf0] }
   0x9   :  { %v3906_v26 = vld [vmem:[%s6485_s1 + $0x70] sm:$0xff]  ;;  %v3921_v29 = vld [vmem:[%s6485_s1 + $0xe8] sm:$0xff]  ;;  %v3819_v34 = vld [vmem:[%s6486_s0 + $0x2b8] sm:$0xf0] }
   0xa   :  { %3934 = vmatpush.bf16.msra.mxu1 %v3897_v2  ;;  %3935 = vmatpush.bf16.msra.mxu2 %v3897_v2  ;;  %v3926_v27 = vld [vmem:[%s6485_s1 + $0x110] sm:$0xff]  ;;  %v3905_v30 = vld [vmem:[%s6485_s1 + $0x68] sm:$0xff]  ;;  %v3859_v36 = vld [vmem:[%s6486_s0 + $0x3f8] sm:$0xf0] }
   0xb   :  { %3936 = vmatpush.bf16.msra.mxu3 %v3897_v2  ;;  %1397 = vmatpush.bf16.msra.mxu0 %v3897_v2  ;;  %v3098_v31 = vld [vmem:[%s6486_s0 + $0x168] sm:$0xf]  ;;  %v3739_v38 = vld [vmem:[%s6486_s0 + $0x38] sm:$0xf0]  ;;  %v3912_v43 = vld [vmem:[%s6485_s1 + $0xa0] sm:$0xff] }
   0xc   :  { %v3258_v33 = vld [vmem:[%s6486_s0 + $0x2a8] sm:$0xf]  ;;  %v3099_v39 = vor.u32 %v3779_v32, %v3098_v31  ;;  %v3920_v44 = vld [vmem:[%s6485_s1 + $0xe0] sm:$0xff]  ;;  %v3118_v46 = vld [vmem:[%s6486_s0 + $0x190] sm:$0xf] }
   0xd   :  { %v3418_v35 = vld [vmem:[%s6486_s0 + $0x3e8] sm:$0xf]  ;;  %v3259_v40 = vor.u32 %v3819_v34, %v3258_v33  ;;  %v3904_v45 = vld [vmem:[%s6485_s1 + $0x60] sm:$0xff]  ;;  %v3278_v48 = vld [vmem:[%s6486_s0 + $0x2d0] sm:$0xf] }
   0xe   :  { %3937 = vmatpush.bf16.msra.mxu1 %v3896_v3  ;;  %3938 = vmatpush.bf16.msra.mxu2 %v3896_v3  ;;  %v2938_v37 = vld [vmem:[%s6486_s0 + $0x28] sm:$0xf]  ;;  %v3419_v41 = vor.u32 %v3859_v36, %v3418_v35  ;;  %v3784_v47 = vld [vmem:[%s6486_s0 + $0x1a0] sm:$0xf0]  ;;  %v3438_v50 = vld [vmem:[%s6486_s0 + $0x410] sm:$0xf] }
   0xf   :  { %3939 = vmatpush.bf16.msra.mxu3 %v3896_v3  ;;  %1398 = vmatpush.bf16.msra.mxu0 %v3896_v3  ;;  %v2939_v42 = vor.u32 %v3739_v38, %v2938_v37  ;;  %v3824_v49 = vld [vmem:[%s6486_s0 + $0x2e0] sm:$0xf0]  ;;  %v2958_v52 = vld [vmem:[%s6486_s0 + $0x50] sm:$0xf]  ;;  %v3119_v54 = vor.u32 %v3784_v47, %v3118_v46  ;;  %v3911_v58 = vld [vmem:[%s6485_s1 + $0x98] sm:$0xff] }
  0x10   :  { %v3864_v51 = vld [vmem:[%s6486_s0 + $0x420] sm:$0xf0]  ;;  %v3279_v55 = vor.u32 %v3824_v49, %v3278_v48  ;;  %v3919_v59 = vld [vmem:[%s6485_s1 + $0xd8] sm:$0xff]  ;;  %v3925_v61 = vld [vmem:[%s6485_s1 + $0x108] sm:$0xff] }
  0x11   :  { %v3744_v53 = vld [vmem:[%s6486_s0 + $0x60] sm:$0xf0]  ;;  %v3439_v56 = vor.u32 %v3864_v51, %v3438_v50  ;;  %v3903_v60 = vld [vmem:[%s6485_s1 + $0x58] sm:$0xff]  ;;  %v3789_v63 = vld [vmem:[%s6486_s0 + $0x1c8] sm:$0xf0] }
  0x12   :  { %3940 = vmatpush.bf16.msra.mxu1 %v3895_v4  ;;  %3941 = vmatpush.bf16.msra.mxu2 %v3895_v4  ;;  %v2959_v57 = vor.u32 %v3744_v53, %v2958_v52  ;;  %v3138_v62 = vld [vmem:[%s6486_s0 + $0x1b8] sm:$0xf]  ;;  %v3829_v1 = vld [vmem:[%s6486_s0 + $0x308] sm:$0xf0]  ;;  %v3910_v10 = vld [vmem:[%s6485_s1 + $0x90] sm:$0xff] }
  0x13   :  { %3942 = vmatpush.bf16.msra.mxu3 %v3895_v4  ;;  %1399 = vmatpush.bf16.msra.mxu0 %v3895_v4  ;;  %v3298_v0 = vld [vmem:[%s6486_s0 + $0x2f8] sm:$0xf]  ;;  %v3869_v3 = vld [vmem:[%s6486_s0 + $0x448] sm:$0xf0]  ;;  %v3918_v11 = vld [vmem:[%s6485_s1 + $0xd0] sm:$0xff] }
  0x14   :  { %v3458_v2 = vld [vmem:[%s6486_s0 + $0x438] sm:$0xf]  ;;  %v3902_v12 = vld [vmem:[%s6485_s1 + $0x50] sm:$0xff]  ;;  %v3158_v13 = vld [vmem:[%s6486_s0 + $0x1e0] sm:$0xf] }
  0x15   :  { %v2978_v4 = vld [vmem:[%s6486_s0 + $0x78] sm:$0xf]  ;;  %v3459_v8 = vor.u32 %v3869_v3, %v3458_v2  ;;  %v3794_v14 = vld [vmem:[%s6486_s0 + $0x1f0] sm:$0xf0]  ;;  %v3318_v15 = vld [vmem:[%s6486_s0 + $0x320] sm:$0xf] }
  0x16   :  { %3943 = vmatpush.bf16.msra.mxu1 %v3894_v5  ;;  %3944 = vmatpush.bf16.msra.mxu2 %v3894_v5  ;;  %v3338_v31 = vld [vmem:[%s6486_s0 + $0x348] sm:$0xf]  ;;  %v3839_v32 = vld [vmem:[%s6486_s0 + $0x358] sm:$0xf0]  ;;  %v3358_v46 = vld [vmem:[%s6486_s0 + $0x370] sm:$0xf] }
  0x17   :  { %3945 = vmatpush.bf16.msra.mxu3 %v3894_v5  ;;  %1400 = vmatpush.bf16.msra.mxu0 %v3894_v5  ;;  %v3749_v5 = vld [vmem:[%s6486_s0 + $0x88] sm:$0xf0]  ;;  %v3498_v33 = vld [vmem:[%s6486_s0 + $0x488] sm:$0xf]  ;;  %v3879_v34 = vld [vmem:[%s6486_s0 + $0x498] sm:$0xf0]  ;;  %v3339_v38 = vor.u32 %v3839_v32, %v3338_v31 }
  0x18   :  { %v2979_v9 = vor.u32 %v3749_v5, %v2978_v4  ;;  %v3018_v35 = vld [vmem:[%s6486_s0 + $0xc8] sm:$0xf]  ;;  %v3759_v36 = vld [vmem:[%s6486_s0 + $0xd8] sm:$0xf0]  ;;  %v3844_v47 = vld [vmem:[%s6486_s0 + $0x380] sm:$0xf0] }
  0x19   :  { %v3518_v48 = vld [vmem:[%s6486_s0 + $0x4b0] sm:$0xf]  ;;  %v3884_v49 = vld [vmem:[%s6486_s0 + $0x4c0] sm:$0xf0]  ;;  %v3359_v53 = vor.u32 %v3844_v47, %v3358_v46  ;;  %v2920_v5 = vld [vmem:[%s6486_s0 + $0x14] sm:$0xf0] }
  0x1a   :  { %3946 = vmatpush.bf16.msra.mxu1 %v3893_v6  ;;  %3947 = vmatpush.bf16.msra.mxu2 %v3893_v6  ;;  %v3038_v50 = vld [vmem:[%s6486_s0 + $0xf0] sm:$0xf]  ;;  %v3764_v51 = vld [vmem:[%s6486_s0 + $0x100] sm:$0xf0]  ;;  %v3743_v46 = vld [vmem:[%s6486_s0 + $0x5c] sm:$0xf] }
  0x1b   :  { %3948 = vmatpush.bf16.msra.mxu3 %v3893_v6  ;;  %1401 = vmatpush.bf16.msra.mxu0 %v3893_v6  ;;  %v3139_v6 = vor.u32 %v3789_v63, %v3138_v62  ;;  %v3058_v62 = vld [vmem:[%s6486_s0 + $0x118] sm:$0xf]  ;;  %v3769_v63 = vld [vmem:[%s6486_s0 + $0x128] sm:$0xf0]  ;;  %v3732_v4 = vld [vmem:[%s6486_s0 + $0x4] sm:$0xf] }
  0x1c   :  { %v3059_v3 = vor.u32 %v3769_v63, %v3058_v62  ;;  %v2968_v47 = vld [vmem:[%s6486_s0 + $0x6c] sm:$0xf0]  ;;  %v3747_v62 = vld [vmem:[%s6486_s0 + $0x7c] sm:$0xf] }
  0x1d   :  { %v2980_v63 = vld [vmem:[%s6486_s0 + $0x8c] sm:$0xf0] }
  0x1e   :  { %3949 = vmatpush.bf16.msra.mxu1 %v3892_v7  ;;  %3950 = vmatpush.bf16.msra.mxu2 %v3892_v7 }
  0x1f   :  { %3951 = vmatpush.bf16.msra.mxu3 %v3892_v7  ;;  %1402 = vmatpush.bf16.msra.mxu0 %v3892_v7  ;;  %v3299_v7 = vor.u32 %v3829_v1, %v3298_v0 }
  0x21   :  { %1443 = vmatmul.bf16.vlgmr.msra.gmra.mxu1 %v3079_v18  ;;  %1483 = vmatmul.bf16.vlgmr.msra.gmra.mxu2 %v3239_v19  ;;  %v3874_v18 = vld [vmem:[%s6486_s0 + $0x470] sm:$0xf0]  ;;  %v2998_v19 = vld [vmem:[%s6486_s0 + $0xa0] sm:$0xf] }
  0x22   :  { %1733 = vmatpush.bf16.msrb.mxu2 %v3915_v16  ;;  %1523 = vmatmul.bf16.vlgmr.msra.gmra.mxu3 %v3399_v20  ;;  %v3834_v16 = vld [vmem:[%s6486_s0 + $0x330] sm:$0xf0] }
  0x23   :  { %1902 = vmatpush.bf16.msrb.mxu3 %v3923_v17  ;;  %1403 = vmatmul.bf16.vlgmr.msra.gmra.mxu0 %v2919_v21  ;;  %v3478_v17 = vld [vmem:[%s6486_s0 + $0x460] sm:$0xf]  ;;  %v3754_v20 = vld [vmem:[%s6486_s0 + $0xb0] sm:$0xf0]  ;;  %v3159_v21 = vor.u32 %v3794_v14, %v3158_v13 }
  0x24   :  { %1564 = vmatpush.bf16.msrb.mxu1 %v3907_v22  ;;  %2075 = vmatpush.bf16.msrb.mxu0 %v3927_v23  ;;  %v3319_v22 = vor.u32 %v3834_v16, %v3318_v15  ;;  %v3479_v23 = vor.u32 %v3874_v18, %v3478_v17 }
  0x26   :  { %1734 = vmatpush.bf16.msrb.mxu2 %v3914_v24  ;;  %v2999_v24 = vor.u32 %v3754_v20, %v2998_v19 }
  0x27   :  { %1903 = vmatpush.bf16.msrb.mxu3 %v3922_v25  ;;  %v3909_v25 = vld [vmem:[%s6485_s1 + $0x88] sm:$0xff] }
  0x28   :  { %1565 = vmatpush.bf16.msrb.mxu1 %v3906_v26  ;;  %2076 = vmatpush.bf16.msrb.mxu0 %v3926_v27  ;;  %v3917_v26 = vld [vmem:[%s6485_s1 + $0xc8] sm:$0xff] }
  0x29   :  { %v3901_v27 = vld [vmem:[%s6485_s1 + $0x48] sm:$0xff] }
  0x2a   :  { %1735 = vmatpush.bf16.msrb.mxu2 %v3913_v28  ;;  %v3924_v28 = vld [vmem:[%s6485_s1 + $0x100] sm:$0xff] }
  0x2b   :  { %1904 = vmatpush.bf16.msrb.mxu3 %v3921_v29  ;;  %v3178_v29 = vld [vmem:[%s6486_s0 + $0x208] sm:$0xf] }
  0x2c   :  { %1566 = vmatpush.bf16.msrb.mxu1 %v3905_v30  ;;  %2077 = vmatpush.bf16.msrb.mxu0 %v3925_v61  ;;  %v3799_v30 = vld [vmem:[%s6486_s0 + $0x218] sm:$0xf0]  ;;  %v3889_v61 = vld [vmem:[%s6486_s0 + $0x4e8] sm:$0xf0] }
  0x2d   :  { %v3179_v37 = vor.u32 %v3799_v30, %v3178_v29  ;;  %v3741_v29 = vld [vmem:[%s6486_s0 + $0x48] sm:$0xf0] }
  0x2e   :  { %1736 = vmatpush.bf16.msrb.mxu2 %v3912_v43  ;;  %v3900_v43 = vld [vmem:[%s6485_s1 + $0x40] sm:$0xff] }
  0x2f   :  { %1905 = vmatpush.bf16.msrb.mxu3 %v3920_v44  ;;  %v3198_v44 = vld [vmem:[%s6486_s0 + $0x230] sm:$0xf] }
  0x30   :  { %1567 = vmatpush.bf16.msrb.mxu1 %v3904_v45  ;;  %2078 = vmatpush.bf16.msrb.mxu0 %v3924_v28  ;;  %v3804_v45 = vld [vmem:[%s6486_s0 + $0x240] sm:$0xf0]  ;;  %v2954_v28 = vld [vmem:[%s6486_s0 + $0x38] sm:$0xf] }
  0x31   :  { %1448 = vmatmul.bf16.gmra.mxu1 %v3099_v39  ;;  %1488 = vmatmul.bf16.gmra.mxu2 %v3259_v40  ;;  %v3499_v39 = vor.u32 %v3879_v34, %v3498_v33  ;;  %v3019_v40 = vor.u32 %v3759_v36, %v3018_v35  ;;  %v3199_v52 = vor.u32 %v3804_v45, %v3198_v44  ;;  %v2966_v44 = vld [vmem:[%s6486_s0 + $0x58] sm:$0xf]  ;;  %v3745_v45 = vld [vmem:[%s6486_s0 + $0x68] sm:$0xf0] }
  0x32   :  { %1528 = vmatmul.bf16.gmra.mxu3 %v3419_v41  ;;  %1737 = vmatpush.bf16.msrb.mxu2 %v3911_v58  ;;  %v3908_v41 = vld [vmem:[%s6485_s1 + $0x80] sm:$0xff]  ;;  %v3378_v58 = vld [vmem:[%s6486_s0 + $0x398] sm:$0xf]  ;;  %v2955_v36 = vor.u32 %v3741_v29, %v2954_v28  ;;  %v3753_v28 = vld [vmem:[%s6486_s0 + $0xac] sm:$0xf] }
  0x33   :  { %1408 = vmatmul.bf16.gmra.mxu0 %v2939_v42  ;;  %1906 = vmatpush.bf16.msrb.mxu3 %v3919_v59  ;;  %v3916_v42 = vld [vmem:[%s6485_s1 + $0xc0] sm:$0xff]  ;;  %v3849_v59 = vld [vmem:[%s6486_s0 + $0x3a8] sm:$0xf0] }
  0x34   :  { %1568 = vmatpush.bf16.msrb.mxu1 %v3903_v60  ;;  %v3538_v60 = vld [vmem:[%s6486_s0 + $0x4d8] sm:$0xf]  ;;  %v3379_v1 = vor.u32 %v3849_v59, %v3378_v58  ;;  %v3008_v29 = vld [vmem:[%s6486_s0 + $0xbc] sm:$0xf0] }
  0x35   :  { %v3539_v2 = vor.u32 %v3889_v61, %v3538_v60 }
  0x36   :  { %1738 = vmatpush.bf16.msrb.mxu2 %v3910_v10  ;;  %v2934_v10 = vld [vmem:[%s6486_s0 + $0x10] sm:$0xf] }
  0x37   :  { %1907 = vmatpush.bf16.msrb.mxu3 %v3918_v11  ;;  %v3736_v11 = vld [vmem:[%s6486_s0 + $0x20] sm:$0xf0] }
  0x38   :  { %1569 = vmatpush.bf16.msrb.mxu1 %v3902_v12  ;;  %v2923_v12 = vor.u32 %v3732_v4, %v2920_v5  ;;  %v2935_v16 = vor.u32 %v3736_v11, %v2934_v10  ;;  %v2994_v4 = vld [vmem:[%s6486_s0 + $0x88] sm:$0xf]  ;;  %v3751_v5 = vld [vmem:[%s6486_s0 + $0x98] sm:$0xf0] }
  0x3a   :  { %1739 = vmatpush.bf16.msrb.mxu2 %v3909_v25  ;;  %v3740_v25 = vld [vmem:[%s6486_s0 + $0x40] sm:$0xf0] }
  0x3b   :  { %1908 = vmatpush.bf16.msrb.mxu3 %v3917_v26  ;;  %v3738_v26 = vld [vmem:[%s6486_s0 + $0x34] sm:$0xf] }
  0x3c   :  { %1570 = vmatpush.bf16.msrb.mxu1 %v3901_v27  ;;  %v2948_v27 = vld [vmem:[%s6486_s0 + $0x44] sm:$0xf0] }
  0x3d   :  { %v2951_v35 = vor.u32 %v3738_v26, %v2948_v27  ;;  %v3006_v26 = vld [vmem:[%s6486_s0 + $0xa8] sm:$0xf]  ;;  %v3755_v27 = vld [vmem:[%s6486_s0 + $0xb8] sm:$0xf0] }
  0x3e   :  { %1740 = vmatpush.bf16.msrb.mxu2 %v3908_v41 }
  0x3f   :  { %1909 = vmatpush.bf16.msrb.mxu3 %v3916_v42  ;;  %v3742_v42 = vld [vmem:[%s6486_s0 + $0x54] sm:$0xf] }
  0x40   :  { %1571 = vmatpush.bf16.msrb.mxu1 %v3900_v43  ;;  %v2960_v43 = vld [vmem:[%s6486_s0 + $0x64] sm:$0xf0] }
  0x41   :  { %1453 = vmatmul.bf16.gmra.mxu1 %v3119_v54  ;;  %1493 = vmatmul.bf16.gmra.mxu2 %v3279_v55  ;;  %v3519_v54 = vor.u32 %v3884_v49, %v3518_v48  ;;  %v3039_v55 = vor.u32 %v3764_v51, %v3038_v50  ;;  %v2974_v48 = vld [vmem:[%s6486_s0 + $0x60] sm:$0xf]  ;;  %v3746_v49 = vld [vmem:[%s6486_s0 + $0x70] sm:$0xf0] }
  0x42   :  { %1533 = vmatmul.bf16.gmra.mxu3 %v3439_v56  ;;  %v3218_v56 = vld [vmem:[%s6486_s0 + $0x258] sm:$0xf] }
  0x43   :  { %1413 = vmatmul.bf16.gmra.mxu0 %v2959_v57  ;;  %v3809_v57 = vld [vmem:[%s6486_s0 + $0x268] sm:$0xf0] }
  0x44   :  { %v3219_v0 = vor.u32 %v3809_v57, %v3218_v56  ;;  %v2975_v56 = vor.u32 %v3746_v49, %v2974_v48 }
  0x51   :  { %1458 = vmatmul.bf16.gmra.mxu1 %v3139_v6  ;;  %1498 = vmatmul.bf16.gmra.mxu2 %v3299_v7  ;;  %v2926_v6 = vld [vmem:[%s6486_s0 + $0x8] sm:$0xf]  ;;  %v3735_v7 = vld [vmem:[%s6486_s0 + $0x18] sm:$0xf0] }
  0x52   :  { %1538 = vmatmul.bf16.gmra.mxu3 %v3459_v8  ;;  %v3733_v8 = vld [vmem:[%s6486_s0 + $0xc] sm:$0xf]  ;;  %v2927_v13 = vor.u32 %v3735_v7, %v2926_v6 }
  0x53   :  { %1418 = vmatmul.bf16.gmra.mxu0 %v2979_v9  ;;  %v2928_v9 = vld [vmem:[%s6486_s0 + $0x1c] sm:$0xf0] }
  0x54   :  { %v2931_v15 = vor.u32 %v3733_v8, %v2928_v9  ;;  %v2983_v8 = vor.u32 %v3747_v62, %v2980_v63  ;;  %v3026_v62 = vld [vmem:[%s6486_s0 + $0xd0] sm:$0xf]  ;;  %v3760_v63 = vld [vmem:[%s6486_s0 + $0xe0] sm:$0xf0] }
  0x61   :  { %1463 = vmatmul.bf16.gmra.mxu1 %v3159_v21  ;;  %1503 = vmatmul.bf16.gmra.mxu2 %v3319_v22  ;;  %v3737_v22 = vld [vmem:[%s6486_s0 + $0x2c] sm:$0xf] }
  0x62   :  { %1543 = vmatmul.bf16.gmra.mxu3 %v3479_v23  ;;  %v2940_v23 = vld [vmem:[%s6486_s0 + $0x3c] sm:$0xf0] }
  0x63   :  { %1423 = vmatmul.bf16.gmra.mxu0 %v2999_v24  ;;  %v2946_v24 = vld [vmem:[%s6486_s0 + $0x30] sm:$0xf]  ;;  %v2943_v32 = vor.u32 %v3737_v22, %v2940_v23 }
  0x64   :  { %v2947_v33 = vor.u32 %v3740_v25, %v2946_v24  ;;  %v3752_v24 = vld [vmem:[%s6486_s0 + $0xa4] sm:$0xf]  ;;  %v3000_v25 = vld [vmem:[%s6486_s0 + $0xb4] sm:$0xf0] }
  0x71   :  { %1468 = vmatmul.bf16.gmra.mxu1 %v3179_v37  ;;  %1508 = vmatmul.bf16.gmra.mxu2 %v3339_v38 }
  0x72   :  { %1548 = vmatmul.bf16.gmra.mxu3 %v3499_v39 }
  0x73   :  { %1428 = vmatmul.bf16.gmra.mxu0 %v3019_v40 }
  0x81   :  { %1473 = vmatmul.bf16.gmra.mxu1 %v3199_v52  ;;  %1513 = vmatmul.bf16.gmra.mxu2 %v3359_v53  ;;  %v2963_v52 = vor.u32 %v3742_v42, %v2960_v43  ;;  %v2967_v53 = vor.u32 %v3745_v45, %v2966_v44  ;;  %v3003_v42 = vor.u32 %v3752_v24, %v3000_v25 }
  0x82   :  { %1553 = vmatmul.bf16.gmra.mxu3 %v3519_v54  ;;  %v3007_v43 = vor.u32 %v3755_v27, %v3006_v26  ;;  %v3011_v45 = vor.u32 %v3753_v28, %v3008_v29 }
  0x83   :  { %1433 = vmatmul.bf16.gmra.mxu0 %v3039_v55  ;;  %v2971_v55 = vor.u32 %v3743_v46, %v2968_v47 }
  0x91   :  { %1478 = vmatmul.bf16.gmra.mxu1 %v3219_v0  ;;  %1518 = vmatmul.bf16.gmra.mxu2 %v3379_v1  ;;  %v2986_v0 = vld [vmem:[%s6486_s0 + $0x80] sm:$0xf]  ;;  %v3750_v1 = vld [vmem:[%s6486_s0 + $0x90] sm:$0xf0] }
  0x92   :  { %1558 = vmatmul.bf16.gmra.mxu3 %v3539_v2  ;;  %v3748_v2 = vld [vmem:[%s6486_s0 + $0x84] sm:$0xf]  ;;  %v2987_v9 = vor.u32 %v3750_v1, %v2986_v0  ;;  %v3758_v0 = vld [vmem:[%s6486_s0 + $0xd4] sm:$0xf]  ;;  %v3028_v1 = vld [vmem:[%s6486_s0 + $0xe4] sm:$0xf0] }
  0x93   :  { %1438 = vmatmul.bf16.gmra.mxu0 %v3059_v3  ;;  %v2988_v3 = vld [vmem:[%s6486_s0 + $0x94] sm:$0xf0] }
  0x94   :  { %v2991_v11 = vor.u32 %v3748_v2, %v2988_v3  ;;  %v3034_v2 = vld [vmem:[%s6486_s0 + $0xd8] sm:$0xf]  ;;  %v3761_v3 = vld [vmem:[%s6486_s0 + $0xe8] sm:$0xf0] }
  0x95   :  { %v3035_v24 = vor.u32 %v3761_v3, %v3034_v2 }
  0x9e   :  { %v4304_v14 = vpop.f32.mrf.mxu1 }
  0xa0   :  { %v4306_v17 = vpop.f32.mrf.mxu0 }
  0xa1   :  { %1572 = vmatmul.bf16.vlgmr.msrb.gmra.mxu1 %v2923_v12  ;;  %1741 = vmatmul.bf16.vlgmr.msrb.gmra.mxu2 %v2927_v13  ;;  %v2995_v12 = vor.u32 %v3751_v5, %v2994_v4 }
  0xa2   :  { %1910 = vmatmul.bf16.vlgmr.msrb.gmra.mxu3 %v2931_v15 }
  0xa3   :  { %3700 = vmatmul.msk.bf16.vlgmr.msrb.gmra.mxu0 %vm1298_vm0, %v2935_v16 }
  0xa4   :  { %v4309_v18 = vpop.f32.mrf.mxu2 }
  0xa5   :  { %v4311_v19 = vpop.f32.mrf.mxu3 }
  0xa6   :  { %6546 = vst [vmem:[#allocation2_spill] sm:$0xff] %v4311_v19  ;;  %v4313_v20 = vpop.f32.mrf.mxu1 }
  0xa8   :  { %v4315_v21 = vpop.f32.mrf.mxu0 }
  0xac   :  { %v4341_v30 = vpop.f32.mrf.mxu2 }
  0xad   :  { %v4343_v31 = vpop.f32.mrf.mxu3 }
  0xae   :  { %6547 = vst [vmem:[#allocation3_spill] sm:$0xff] %v4343_v31  ;;  %v4345_v34 = vpop.f32.mrf.mxu1 }
  0xb0   :  { %v4347_v37 = vpop.f32.mrf.mxu0 }
  0xb1   :  { %1577 = vmatmul.bf16.gmra.mxu1 %v2943_v32  ;;  %1746 = vmatmul.bf16.gmra.mxu2 %v2947_v33  ;;  %v3014_v32 = vld [vmem:[%s6486_s0 + $0xb0] sm:$0xf]  ;;  %v3756_v33 = vld [vmem:[%s6486_s0 + $0xc0] sm:$0xf0] }
  0xb2   :  { %1915 = vmatmul.bf16.gmra.mxu3 %v2951_v35  ;;  %v3015_v46 = vor.u32 %v3756_v33, %v3014_v32  ;;  %v3762_v32 = vld [vmem:[%s6486_s0 + $0xf4] sm:$0xf]  ;;  %v3040_v33 = vld [vmem:[%s6486_s0 + $0x104] sm:$0xf0] }
  0xb3   :  { %3701 = vmatmul.msk.bf16.gmra.mxu0 %vm1298_vm0, %v2955_v36 }
  0xb4   :  { %v4350_v38 = vpop.f32.mrf.mxu2 }
  0xb5   :  { %v4352_v39 = vpop.f32.mrf.mxu3 }
  0xb6   :  { %6548 = vst [vmem:[#allocation4_spill] sm:$0xff] %v4352_v39  ;;  %v4354_v40 = vpop.f32.mrf.mxu1 }
  0xb8   :  { %v4356_v41 = vpop.f32.mrf.mxu0 }
  0xbc   :  { %v4382_v50 = vpop.f32.mrf.mxu2 }
  0xbd   :  { %v4384_v51 = vpop.f32.mrf.mxu3 }
  0xbe   :  { %6549 = vst [vmem:[#allocation5_spill] sm:$0xff] %v4384_v51  ;;  %v4386_v54 = vpop.f32.mrf.mxu1 }
  0xc0   :  { %v4388_v57 = vpop.f32.mrf.mxu0 }
  0xc1   :  { %1582 = vmatmul.bf16.gmra.mxu1 %v2963_v52  ;;  %1751 = vmatmul.bf16.gmra.mxu2 %v2967_v53 }
  0xc2   :  { %1920 = vmatmul.bf16.gmra.mxu3 %v2971_v55  ;;  %v3757_v55 = vld [vmem:[%s6486_s0 + $0xcc] sm:$0xf] }
  0xc3   :  { %3702 = vmatmul.msk.bf16.gmra.mxu0 %vm1298_vm0, %v2975_v56  ;;  %v3020_v56 = vld [vmem:[%s6486_s0 + $0xdc] sm:$0xf0] }
  0xc4   :  { %v4391_v58 = vpop.f32.mrf.mxu2 }
  0xc5   :  { %v4393_v59 = vpop.f32.mrf.mxu3 }
  0xc6   :  { %6550 = vst [vmem:[#allocation6_spill] sm:$0xff] %v4393_v59  ;;  %v4395_v60 = vpop.f32.mrf.mxu1 }
  0xc8   :  { %v4397_v61 = vpop.f32.mrf.mxu0 }
  0xcc   :  { %v4423_v6 = vpop.f32.mrf.mxu2 }
  0xcd   :  { %v4425_v7 = vpop.f32.mrf.mxu3 }
  0xce   :  { %6551 = vst [vmem:[#allocation7_spill] sm:$0xff] %v4425_v7  ;;  %v4427_v10 = vpop.f32.mrf.mxu1 }
  0xd0   :  { %v4429_v13 = vpop.f32.mrf.mxu0 }
  0xd1   :  { %1587 = vmatmul.bf16.gmra.mxu1 %v2983_v8  ;;  %1756 = vmatmul.bf16.gmra.mxu2 %v2987_v9  ;;  %v3023_v8 = vor.u32 %v3757_v55, %v3020_v56  ;;  %v3027_v9 = vor.u32 %v3760_v63, %v3026_v62  ;;  %v3054_v55 = vld [vmem:[%s6486_s0 + $0x100] sm:$0xf]  ;;  %v3766_v56 = vld [vmem:[%s6486_s0 + $0x110] sm:$0xf0] }
  0xd2   :  { %1925 = vmatmul.bf16.gmra.mxu3 %v2991_v11 }
  0xd3   :  { %3703 = vmatmul.msk.bf16.gmra.mxu0 %vm1298_vm0, %v2995_v12  ;;  %v3031_v12 = vor.u32 %v3758_v0, %v3028_v1  ;;  %v3043_v0 = vor.u32 %v3762_v32, %v3040_v33  ;;  %v3767_v32 = vld [vmem:[%s6486_s0 + $0x11c] sm:$0xf]  ;;  %v3060_v33 = vld [vmem:[%s6486_s0 + $0x12c] sm:$0xf0] }
  0xd4   :  { %v4432_v15 = vpop.f32.mrf.mxu2 }
  0xd5   :  { %v4434_v16 = vpop.f32.mrf.mxu3 }
  0xd6   :  { %6552 = vst [vmem:[#allocation8_spill] sm:$0xff] %v4434_v16  ;;  %v4436_v22 = vpop.f32.mrf.mxu1 }
  0xd8   :  { %v4438_v23 = vpop.f32.mrf.mxu0 }
  0xdc   :  { %v4464_v35 = vpop.f32.mrf.mxu2 }
  0xdd   :  { %v4466_v36 = vpop.f32.mrf.mxu3 }
  0xde   :  { %6553 = vst [vmem:[#allocation9_spill] sm:$0xff] %v4466_v36  ;;  %v4468_v44 = vpop.f32.mrf.mxu1 }
  0xe0   :  { %v4470_v47 = vpop.f32.mrf.mxu0 }
  0xe1   :  { %1592 = vmatmul.bf16.gmra.mxu1 %v3003_v42  ;;  %1761 = vmatmul.bf16.gmra.mxu2 %v3007_v43  ;;  %v3046_v42 = vld [vmem:[%s6486_s0 + $0xf8] sm:$0xf]  ;;  %v3765_v43 = vld [vmem:[%s6486_s0 + $0x108] sm:$0xf0] }
  0xe2   :  { %1930 = vmatmul.bf16.gmra.mxu3 %v3011_v45  ;;  %v3763_v45 = vld [vmem:[%s6486_s0 + $0xfc] sm:$0xf]  ;;  %v3047_v1 = vor.u32 %v3765_v43, %v3046_v42  ;;  %v3066_v42 = vld [vmem:[%s6486_s0 + $0x120] sm:$0xf]  ;;  %v3770_v43 = vld [vmem:[%s6486_s0 + $0x130] sm:$0xf0] }
  0xe3   :  { %3704 = vmatmul.msk.bf16.gmra.mxu0 %vm1298_vm0, %v3015_v46  ;;  %v3048_v46 = vld [vmem:[%s6486_s0 + $0x10c] sm:$0xf0] }
  0xe4   :  { %v4473_v48 = vpop.f32.mrf.mxu2  ;;  %v3051_v3 = vor.u32 %v3763_v45, %v3048_v46  ;;  %v3768_v45 = vld [vmem:[%s6486_s0 + $0x124] sm:$0xf]  ;;  %v3068_v46 = vld [vmem:[%s6486_s0 + $0x134] sm:$0xf0] }
  0xe5   :  { %v4475_v49 = vpop.f32.mrf.mxu3 }
  0xe6   :  { %6554 = vst [vmem:[#allocation10_spill] sm:$0xff] %v4475_v49  ;;  %v4477_v52 = vpop.f32.mrf.mxu1 }
  0xe8   :  { %v4479_v53 = vpop.f32.mrf.mxu0 }
  0xec   :  { %v4505_v4 = vpop.f32.mrf.mxu2 }
  0xed   :  { %v4507_v5 = vpop.f32.mrf.mxu3 }
  0xee   :  { %6555 = vst [vmem:[#allocation11_spill] sm:$0xff] %v4507_v5  ;;  %v4509_v11 = vpop.f32.mrf.mxu1  ;;  %v3071_v5 = vor.u32 %v3768_v45, %v3068_v46  ;;  %v3094_v45 = vld [vmem:[%s6486_s0 + $0x150] sm:$0xf]  ;;  %v3776_v46 = vld [vmem:[%s6486_s0 + $0x160] sm:$0xf0] }
  0xef   :  { %v3095_v39 = vor.u32 %v3776_v46, %v3094_v45 }
  0xf0   :  { %v4511_v25 = vpop.f32.mrf.mxu0 }
  0xf1   :  { %1597 = vmatmul.bf16.gmra.mxu1 %v3023_v8  ;;  %1766 = vmatmul.bf16.gmra.mxu2 %v3027_v9  ;;  %v3055_v8 = vor.u32 %v3766_v56, %v3054_v55  ;;  %v3074_v55 = vld [vmem:[%s6486_s0 + $0x128] sm:$0xf]  ;;  %v3771_v56 = vld [vmem:[%s6486_s0 + $0x138] sm:$0xf0] }
  0xf2   :  { %1935 = vmatmul.bf16.gmra.mxu3 %v3031_v12  ;;  %v3075_v49 = vor.u32 %v3771_v56, %v3074_v55 }
  0xf3   :  { %3705 = vmatmul.msk.bf16.gmra.mxu0 %vm1298_vm0, %v3035_v24 }
  0xf4   :  { %v4514_v26 = vpop.f32.mrf.mxu2 }
  0xf5   :  { %6556 = vst [vmem:[#allocation12_spill] sm:$0xff] %v4514_v26  ;;  %v4516_v27 = vpop.f32.mrf.mxu3 }
  0xf6   :  { %6557 = vst [vmem:[#allocation13_spill] sm:$0xff] %v4516_v27  ;;  %v4518_v28 = vpop.f32.mrf.mxu1 }
  0xf8   :  { %v4520_v29 = vpop.f32.mrf.mxu0 }
  0xfc   :  { %v4546_v62 = vpop.f32.mrf.mxu2 }
  0xfd   :  { %6558 = vst [vmem:[#allocation14_spill] sm:$0xff] %v4546_v62  ;;  %v4548_v63 = vpop.f32.mrf.mxu3 }
  0xfe   :  { %6559 = vst [vmem:[#allocation15_spill] sm:$0xff] %v4548_v63  ;;  %v4550_v2 = vpop.f32.mrf.mxu1 }
 0x100   :  { %v4552_v9 = vpop.f32.mrf.mxu0 }
 0x101   :  { %1602 = vmatmul.bf16.gmra.mxu1 %v3043_v0  ;;  %1771 = vmatmul.bf16.gmra.mxu2 %v3047_v1 }
 0x102   :  { %1940 = vmatmul.bf16.gmra.mxu3 %v3051_v3  ;;  %v3063_v3 = vor.u32 %v3767_v32, %v3060_v33  ;;  %v3772_v32 = vld [vmem:[%s6486_s0 + $0x144] sm:$0xf]  ;;  %v3080_v33 = vld [vmem:[%s6486_s0 + $0x154] sm:$0xf0] }
 0x103   :  { %3706 = vmatmul.msk.bf16.gmra.mxu0 %vm1298_vm0, %v3055_v8  ;;  %v3067_v8 = vor.u32 %v3770_v43, %v3066_v42  ;;  %v3773_v42 = vld [vmem:[%s6486_s0 + $0x14c] sm:$0xf]  ;;  %v3088_v43 = vld [vmem:[%s6486_s0 + $0x15c] sm:$0xf0] }
 0x104   :  { %v4555_v12 = vpop.f32.mrf.mxu2  ;;  %v3091_v51 = vor.u32 %v3773_v42, %v3088_v43 }
 0x105   :  { %6560 = vst [vmem:[#allocation16_spill] sm:$0xff] %v4555_v12  ;;  %v4557_v24 = vpop.f32.mrf.mxu3 }
 0x106   :  { %6561 = vst [vmem:[#allocation17_spill] sm:$0xff] %v4557_v24  ;;  %v4559_v27 = vpop.f32.mrf.mxu1 }
 0x108   :  { %v4561_v63 = vpop.f32.mrf.mxu0 }
 0x10c   :  { %v4587_v0 = vpop.f32.mrf.mxu2 }
 0x10d   :  { %6562 = vst [vmem:[#allocation18_spill] sm:$0xff] %v4587_v0  ;;  %v4589_v1 = vpop.f32.mrf.mxu3 }
 0x10e   :  { %6563 = vst [vmem:[#allocation19_spill] sm:$0xff] %v4589_v1  ;;  %v4591_v24 = vpop.f32.mrf.mxu1 }
 0x110   :  { %v4593_v36 = vpop.f32.mrf.mxu0 }
 0x111   :  { %1607 = vmatmul.bf16.gmra.mxu1 %v3063_v3  ;;  %1776 = vmatmul.bf16.gmra.mxu2 %v3067_v8  ;;  %v3083_v3 = vor.u32 %v3772_v32, %v3080_v33  ;;  %v3777_v32 = vld [vmem:[%s6486_s0 + $0x16c] sm:$0xf] }
 0x112   :  { %1945 = vmatmul.bf16.gmra.mxu3 %v3071_v5  ;;  %v3775_v5 = vld [vmem:[%s6486_s0 + $0x158] sm:$0xf0] }
 0x113   :  { %3707 = vmatmul.msk.bf16.gmra.mxu0 %vm1298_vm0, %v3075_v49  ;;  %v3086_v49 = vld [vmem:[%s6486_s0 + $0x148] sm:$0xf] }
 0x114   :  { %v4596_v16 = vpop.f32.mrf.mxu2  ;;  %v3087_v8 = vor.u32 %v3775_v5, %v3086_v49 }
 0x115   :  { %6564 = vst [vmem:[#allocation20_spill] sm:$0xff] %v4596_v16  ;;  %v4598_v7 = vpop.f32.mrf.mxu3 }
 0x116   :  { %6565 = vst [vmem:[#allocation21_spill] sm:$0xff] %v4598_v7  ;;  %v4600_v59 = vpop.f32.mrf.mxu1 }
 0x118   :  { %v4602_v1 = vpop.f32.mrf.mxu0 }
 0x11c   :  { %v4628_v55 = vpop.f32.mrf.mxu2 }
 0x11d   :  { %6566 = vst [vmem:[#allocation22_spill] sm:$0xff] %v4628_v55  ;;  %v4630_v56 = vpop.f32.mrf.mxu3 }
 0x11e   :  { %6567 = vst [vmem:[#allocation23_spill] sm:$0xff] %v4630_v56  ;;  %v1573_v7 = vpop.f32.mrf.mxu1 }
 0x11f   :  { %v1574_v19 = vadd.f32 %v1573_v7, %v4306_v17  ;;  %v3106_v17 = vld [vmem:[%s6486_s0 + $0x170] sm:$0xf]  ;;  %v3108_v7 = vld [vmem:[%s6486_s0 + $0x184] sm:$0xf0] }
 0x120   :  { %v2080_v31 = vpop.f32.mrf.mxu0 }
 0x121   :  { %1612 = vmatmul.bf16.gmra.mxu1 %v3083_v3  ;;  %1781 = vmatmul.bf16.gmra.mxu2 %v3087_v8 }
 0x122   :  { %1950 = vmatmul.bf16.gmra.mxu3 %v3091_v51  ;;  %v3100_v51 = vld [vmem:[%s6486_s0 + $0x17c] sm:$0xf0] }
 0x123   :  { %3708 = vmatmul.msk.bf16.gmra.mxu0 %vm1298_vm0, %v3095_v39  ;;  %v3103_v5 = vor.u32 %v3777_v32, %v3100_v51 }
 0x124   :  { %v1742_v16 = vpop.f32.mrf.mxu2 }
 0x125   :  { %v1743_v0 = vadd.f32 %v1742_v16, %v1574_v19  ;;  %v1911_v12 = vpop.f32.mrf.mxu3  ;;  %v3780_v19 = vld [vmem:[%s6486_s0 + $0x180] sm:$0xf0]  ;;  %v3114_v16 = vld [vmem:[%s6486_s0 + $0x178] sm:$0xf] }
 0x126   :  { %v1575_v62 = vpop.f32.mrf.mxu1  ;;  %v3107_v42 = vor.u32 %v3780_v19, %v3106_v17  ;;  %v3120_v19 = vld [vmem:[%s6486_s0 + $0x1a4] sm:$0xf0] }
 0x127   :  { %v1912_v55 = vadd.f32 %v1911_v12, %v1743_v0  ;;  %v1576_v39 = vadd.f32 %v1575_v62, %v4315_v21  ;;  %v3781_v12 = vld [vmem:[%s6486_s0 + $0x188] sm:$0xf0] }
 0x128   :  { %v2082_v26 = vpop.f32.mrf.mxu0  ;;  %v3115_v21 = vor.u32 %v3781_v12, %v3114_v16  ;;  %v3128_v16 = vld [vmem:[%s6486_s0 + $0x1ac] sm:$0xf0]  ;;  %v3134_v12 = vld [vmem:[%s6486_s0 + $0x1a0] sm:$0xf] }
 0x129   :  { %v4634_v56 = vadd.f32 %v2080_v31, %v1912_v55  ;;  %v3778_v31 = vld [vmem:[%s6486_s0 + $0x174] sm:$0xf] }
 0x12a   :  { %v3111_v45 = vor.u32 %v3778_v31, %v3108_v7  ;;  %v3785_v31 = vld [vmem:[%s6486_s0 + $0x1a8] sm:$0xf0] }
 0x12b   :  { %6568 = vst [vmem:[#allocation24_spill] sm:$0xff] %v4634_v56 }
 0x12c   :  { %v1744_v0 = vpop.f32.mrf.mxu2 }
 0x12d   :  { %v1745_v33 = vadd.f32 %v1744_v0, %v1576_v39  ;;  %v1913_v49 = vpop.f32.mrf.mxu3 }
 0x12e   :  { %v1578_v43 = vpop.f32.mrf.mxu1 }
 0x12f   :  { %v1914_v62 = vadd.f32 %v1913_v49, %v1745_v33  ;;  %v1579_v3 = vadd.f32 %v1578_v43, %v4347_v37  ;;  %v3126_v37 = vld [vmem:[%s6486_s0 + $0x198] sm:$0xf]  ;;  %v3786_v33 = vld [vmem:[%s6486_s0 + $0x1b0] sm:$0xf0] }
 0x130   :  { %v2085_v46 = vpop.f32.mrf.mxu0 }
 0x131   :  { %v4661_v55 = vadd.f32 %v2082_v26, %v1914_v62  ;;  %1617 = vmatmul.bf16.gmra.mxu1 %v3103_v5  ;;  %1786 = vmatmul.bf16.gmra.mxu2 %v3107_v42  ;;  %v3782_v26 = vld [vmem:[%s6486_s0 + $0x194] sm:$0xf] }
 0x132   :  { %1955 = vmatmul.bf16.gmra.mxu3 %v3111_v45  ;;  %v3123_v43 = vor.u32 %v3782_v26, %v3120_v19  ;;  %v3127_v45 = vor.u32 %v3785_v31, %v3126_v37  ;;  %v3140_v31 = vld [vmem:[%s6486_s0 + $0x1cc] sm:$0xf0] }
 0x133   :  { %3709 = vmatmul.msk.bf16.gmra.mxu0 %vm1298_vm0, %v3115_v21 }
 0x134   :  { %v1747_v8 = vpop.f32.mrf.mxu2 }
 0x135   :  { %v1748_v56 = vadd.f32 %v1747_v8, %v1579_v3  ;;  %v1916_v39 = vpop.f32.mrf.mxu3 }
 0x136   :  { %v1580_v0 = vpop.f32.mrf.mxu1 }
 0x137   :  { %v1917_v32 = vadd.f32 %v1916_v39, %v1748_v56  ;;  %v3783_v56 = vld [vmem:[%s6486_s0 + $0x19c] sm:$0xf]  ;;  %v1581_v7 = vadd.f32 %v1580_v0, %v4356_v41  ;;  %v3135_v41 = vor.u32 %v3786_v33, %v3134_v12  ;;  %v3148_v33 = vld [vmem:[%s6486_s0 + $0x1d4] sm:$0xf0] }
 0x138   :  { %v2087_v51 = vpop.f32.mrf.mxu0  ;;  %v3131_v62 = vor.u32 %v3783_v56, %v3128_v16  ;;  %v3790_v56 = vld [vmem:[%s6486_s0 + $0x1d0] sm:$0xf0]  ;;  %v3788_v16 = vld [vmem:[%s6486_s0 + $0x1c4] sm:$0xf] }
 0x139   :  { %v4665_v17 = vadd.f32 %v2085_v46, %v1917_v32 }
 0x13c   :  { %v1749_v49 = vpop.f32.mrf.mxu2 }
 0x13d   :  { %v1750_v5 = vadd.f32 %v1749_v49, %v1581_v7  ;;  %v1918_v42 = vpop.f32.mrf.mxu3 }
 0x13e   :  { %v1583_v21 = vpop.f32.mrf.mxu1 }
 0x13f   :  { %v1919_v46 = vadd.f32 %v1918_v42, %v1750_v5  ;;  %v1584_v39 = vadd.f32 %v1583_v21, %v4388_v57  ;;  %v3146_v57 = vld [vmem:[%s6486_s0 + $0x1c0] sm:$0xf]  ;;  %v3154_v5 = vld [vmem:[%s6486_s0 + $0x1c8] sm:$0xf]  ;;  %v3791_v42 = vld [vmem:[%s6486_s0 + $0x1d8] sm:$0xf0] }
 0x140   :  { %v2090_v3 = vpop.f32.mrf.mxu0 }
 0x141   :  { %v4692_v8 = vadd.f32 %v2087_v51, %v1919_v46  ;;  %1622 = vmatmul.bf16.gmra.mxu1 %v3123_v43  ;;  %1791 = vmatmul.bf16.gmra.mxu2 %v3127_v45  ;;  %v3787_v51 = vld [vmem:[%s6486_s0 + $0x1bc] sm:$0xf] }
 0x142   :  { %1960 = vmatmul.bf16.gmra.mxu3 %v3131_v62  ;;  %v3143_v62 = vor.u32 %v3787_v51, %v3140_v31 }
 0x143   :  { %3710 = vmatmul.msk.bf16.gmra.mxu0 %vm1298_vm0, %v3135_v41  ;;  %v3147_v41 = vor.u32 %v3790_v56, %v3146_v57  ;;  %v3160_v56 = vld [vmem:[%s6486_s0 + $0x1f4] sm:$0xf0] }
 0x144   :  { %v1752_v0 = vpop.f32.mrf.mxu2 }
 0x145   :  { %v1753_v32 = vadd.f32 %v1752_v0, %v1584_v39  ;;  %v1921_v7 = vpop.f32.mrf.mxu3 }
 0x146   :  { %v1585_v49 = vpop.f32.mrf.mxu1 }
 0x147   :  { %v1922_v26 = vadd.f32 %v1921_v7, %v1753_v32  ;;  %v1586_v12 = vadd.f32 %v1585_v49, %v4397_v61  ;;  %v3155_v61 = vor.u32 %v3791_v42, %v3154_v5  ;;  %v3168_v42 = vld [vmem:[%s6486_s0 + $0x1fc] sm:$0xf0] }
 0x148   :  { %v2092_v19 = vpop.f32.mrf.mxu0 }
 0x149   :  { %v4696_v37 = vadd.f32 %v2090_v3, %v1922_v26  ;;  %v3151_v3 = vor.u32 %v3788_v16, %v3148_v33  ;;  %v3795_v16 = vld [vmem:[%s6486_s0 + $0x1f8] sm:$0xf0]  ;;  %v3793_v33 = vld [vmem:[%s6486_s0 + $0x1ec] sm:$0xf] }
 0x14c   :  { %v1754_v43 = vpop.f32.mrf.mxu2 }
 0x14d   :  { %v1755_v45 = vadd.f32 %v1754_v43, %v1586_v12  ;;  %v1923_v21 = vpop.f32.mrf.mxu3 }
 0x14e   :  { %v1588_v46 = vpop.f32.mrf.mxu1 }
 0x14f   :  { %v1924_v39 = vadd.f32 %v1923_v21, %v1755_v45  ;;  %v1589_v7 = vadd.f32 %v1588_v46, %v4429_v13  ;;  %v3166_v13 = vld [vmem:[%s6486_s0 + $0x1e8] sm:$0xf]  ;;  %v3174_v45 = vld [vmem:[%s6486_s0 + $0x1f0] sm:$0xf]  ;;  %v3796_v21 = vld [vmem:[%s6486_s0 + $0x200] sm:$0xf0] }
 0x150   :  { %v2095_v0 = vpop.f32.mrf.mxu0 }
 0x151   :  { %v4723_v32 = vadd.f32 %v2092_v19, %v1924_v39  ;;  %1627 = vmatmul.bf16.gmra.mxu1 %v3143_v62  ;;  %1796 = vmatmul.bf16.gmra.mxu2 %v3147_v41  ;;  %v3792_v19 = vld [vmem:[%s6486_s0 + $0x1e4] sm:$0xf] }
 0x152   :  { %1965 = vmatmul.bf16.gmra.mxu3 %v3151_v3  ;;  %v3163_v3 = vor.u32 %v3792_v19, %v3160_v56 }
 0x153   :  { %3711 = vmatmul.msk.bf16.gmra.mxu0 %vm1298_vm0, %v3155_v61  ;;  %v3167_v61 = vor.u32 %v3795_v16, %v3166_v13  ;;  %v3180_v16 = vld [vmem:[%s6486_s0 + $0x21c] sm:$0xf0] }
 0x154   :  { %v1757_v49 = vpop.f32.mrf.mxu2 }
 0x155   :  { %v1758_v26 = vadd.f32 %v1757_v49, %v1589_v7  ;;  %v1926_v12 = vpop.f32.mrf.mxu3 }
 0x156   :  { %v1590_v43 = vpop.f32.mrf.mxu1 }
 0x157   :  { %v1927_v51 = vadd.f32 %v1926_v12, %v1758_v26  ;;  %v1591_v5 = vadd.f32 %v1590_v43, %v4438_v23  ;;  %v3175_v23 = vor.u32 %v3796_v21, %v3174_v45  ;;  %v3188_v21 = vld [vmem:[%s6486_s0 + $0x224] sm:$0xf0] }
 0x158   :  { %v2097_v31 = vpop.f32.mrf.mxu0 }
 0x159   :  { %v4727_v57 = vadd.f32 %v2095_v0, %v1927_v51  ;;  %v3171_v0 = vor.u32 %v3793_v33, %v3168_v42  ;;  %v3800_v33 = vld [vmem:[%s6486_s0 + $0x220] sm:$0xf0]  ;;  %v3798_v42 = vld [vmem:[%s6486_s0 + $0x214] sm:$0xf] }
 0x15c   :  { %v1759_v62 = vpop.f32.mrf.mxu2 }
 0x15d   :  { %v1760_v41 = vadd.f32 %v1759_v62, %v1591_v5  ;;  %v1928_v46 = vpop.f32.mrf.mxu3 }
 0x15e   :  { %v1593_v39 = vpop.f32.mrf.mxu1 }
 0x15f   :  { %v1929_v7 = vadd.f32 %v1928_v46, %v1760_v41  ;;  %v1594_v12 = vadd.f32 %v1593_v39, %v4470_v47  ;;  %v3186_v47 = vld [vmem:[%s6486_s0 + $0x210] sm:$0xf]  ;;  %v3194_v41 = vld [vmem:[%s6486_s0 + $0x218] sm:$0xf]  ;;  %v3801_v46 = vld [vmem:[%s6486_s0 + $0x228] sm:$0xf0] }
 0x160   :  { %v2100_v49 = vpop.f32.mrf.mxu0 }
 0x161   :  { %v4754_v26 = vadd.f32 %v2097_v31, %v1929_v7  ;;  %1632 = vmatmul.bf16.gmra.mxu1 %v3163_v3  ;;  %1801 = vmatmul.bf16.gmra.mxu2 %v3167_v61  ;;  %v3797_v31 = vld [vmem:[%s6486_s0 + $0x20c] sm:$0xf] }
 0x162   :  { %1970 = vmatmul.bf16.gmra.mxu3 %v3171_v0  ;;  %v3183_v0 = vor.u32 %v3797_v31, %v3180_v16 }
 0x163   :  { %3712 = vmatmul.msk.bf16.gmra.mxu0 %vm1298_vm0, %v3175_v23  ;;  %v3187_v23 = vor.u32 %v3800_v33, %v3186_v47  ;;  %v3200_v33 = vld [vmem:[%s6486_s0 + $0x244] sm:$0xf0] }
 0x164   :  { %v1762_v43 = vpop.f32.mrf.mxu2 }
 0x165   :  { %v1763_v51 = vadd.f32 %v1762_v43, %v1594_v12  ;;  %v1931_v5 = vpop.f32.mrf.mxu3 }
 0x166   :  { %v1595_v62 = vpop.f32.mrf.mxu1 }
 0x167   :  { %v1932_v19 = vadd.f32 %v1931_v5, %v1763_v51  ;;  %v1596_v45 = vadd.f32 %v1595_v62, %v4479_v53  ;;  %v3195_v53 = vor.u32 %v3801_v46, %v3194_v41  ;;  %v3208_v46 = vld [vmem:[%s6486_s0 + $0x24c] sm:$0xf0] }
 0x168   :  { %v2102_v56 = vpop.f32.mrf.mxu0 }
 0x169   :  { %v4758_v13 = vadd.f32 %v2100_v49, %v1932_v19  ;;  %v3191_v49 = vor.u32 %v3798_v42, %v3188_v21  ;;  %v3805_v42 = vld [vmem:[%s6486_s0 + $0x248] sm:$0xf0]  ;;  %v3803_v21 = vld [vmem:[%s6486_s0 + $0x23c] sm:$0xf] }
 0x16b   :  { %6569 = vst [vmem:[#allocation25_spill] sm:$0xff] %v4758_v13 }
 0x16c   :  { %v1764_v3 = vpop.f32.mrf.mxu2 }
 0x16d   :  { %v1765_v61 = vadd.f32 %v1764_v3, %v1596_v45  ;;  %v1933_v39 = vpop.f32.mrf.mxu3 }
 0x16e   :  { %v1598_v7 = vpop.f32.mrf.mxu1 }
 0x16f   :  { %v1934_v12 = vadd.f32 %v1933_v39, %v1765_v61  ;;  %v1599_v5 = vadd.f32 %v1598_v7, %v4511_v25  ;;  %v3206_v25 = vld [vmem:[%s6486_s0 + $0x238] sm:$0xf]  ;;  %v3214_v61 = vld [vmem:[%s6486_s0 + $0x240] sm:$0xf]  ;;  %v3806_v39 = vld [vmem:[%s6486_s0 + $0x250] sm:$0xf0] }
 0x170   :  { %v2105_v43 = vpop.f32.mrf.mxu0 }
 0x171   :  { %v4785_v51 = vadd.f32 %v2102_v56, %v1934_v12  ;;  %1637 = vmatmul.bf16.gmra.mxu1 %v3183_v0  ;;  %1806 = vmatmul.bf16.gmra.mxu2 %v3187_v23  ;;  %v3802_v56 = vld [vmem:[%s6486_s0 + $0x234] sm:$0xf] }
 0x172   :  { %1975 = vmatmul.bf16.gmra.mxu3 %v3191_v49  ;;  %v3203_v49 = vor.u32 %v3802_v56, %v3200_v33 }
 0x173   :  { %3713 = vmatmul.msk.bf16.gmra.mxu0 %vm1298_vm0, %v3195_v53  ;;  %v3207_v53 = vor.u32 %v3805_v42, %v3206_v25  ;;  %v3220_v42 = vld [vmem:[%s6486_s0 + $0x26c] sm:$0xf0] }
 0x174   :  { %v1767_v62 = vpop.f32.mrf.mxu2 }
 0x175   :  { %v1768_v19 = vadd.f32 %v1767_v62, %v1599_v5  ;;  %v1936_v45 = vpop.f32.mrf.mxu3 }
 0x176   :  { %v1600_v3 = vpop.f32.mrf.mxu1 }
 0x177   :  { %v1937_v31 = vadd.f32 %v1936_v45, %v1768_v19  ;;  %v1601_v41 = vadd.f32 %v1600_v3, %v4520_v29  ;;  %v3215_v29 = vor.u32 %v3806_v39, %v3214_v61  ;;  %v3228_v39 = vld [vmem:[%s6486_s0 + $0x274] sm:$0xf0] }
 0x178   :  { %v2107_v16 = vpop.f32.mrf.mxu0 }
 0x179   :  { %v4789_v47 = vadd.f32 %v2105_v43, %v1937_v31  ;;  %v3211_v43 = vor.u32 %v3803_v21, %v3208_v46  ;;  %v3810_v21 = vld [vmem:[%s6486_s0 + $0x270] sm:$0xf0]  ;;  %v3808_v46 = vld [vmem:[%s6486_s0 + $0x264] sm:$0xf] }
 0x17c   :  { %v1769_v0 = vpop.f32.mrf.mxu2 }
 0x17d   :  { %v1770_v23 = vadd.f32 %v1769_v0, %v1601_v41  ;;  %v1938_v7 = vpop.f32.mrf.mxu3 }
 0x17e   :  { %v1603_v12 = vpop.f32.mrf.mxu1 }
 0x17f   :  { %v1939_v5 = vadd.f32 %v1938_v7, %v1770_v23  ;;  %v1604_v45 = vadd.f32 %v1603_v12, %v4552_v9  ;;  %v3226_v9 = vld [vmem:[%s6486_s0 + $0x260] sm:$0xf]  ;;  %v3234_v23 = vld [vmem:[%s6486_s0 + $0x268] sm:$0xf]  ;;  %v3811_v7 = vld [vmem:[%s6486_s0 + $0x278] sm:$0xf0] }
 0x180   :  { %v2110_v62 = vpop.f32.mrf.mxu0 }
 0x181   :  { %v4816_v19 = vadd.f32 %v2107_v16, %v1939_v5  ;;  %1642 = vmatmul.bf16.gmra.mxu1 %v3203_v49  ;;  %1811 = vmatmul.bf16.gmra.mxu2 %v3207_v53  ;;  %v3807_v16 = vld [vmem:[%s6486_s0 + $0x25c] sm:$0xf] }
 0x182   :  { %1980 = vmatmul.bf16.gmra.mxu3 %v3211_v43  ;;  %v3223_v43 = vor.u32 %v3807_v16, %v3220_v42 }
 0x183   :  { %3714 = vmatmul.msk.bf16.gmra.mxu0 %vm1298_vm0, %v3215_v29  ;;  %v3227_v29 = vor.u32 %v3810_v21, %v3226_v9  ;;  %v3240_v21 = vld [vmem:[%s6486_s0 + $0x294] sm:$0xf0] }
 0x184   :  { %v1772_v3 = vpop.f32.mrf.mxu2 }
 0x185   :  { %v1773_v31 = vadd.f32 %v1772_v3, %v1604_v45  ;;  %v1941_v41 = vpop.f32.mrf.mxu3 }
 0x186   :  { %v1605_v0 = vpop.f32.mrf.mxu1 }
 0x187   :  { %v1942_v56 = vadd.f32 %v1941_v41, %v1773_v31  ;;  %v1606_v61 = vadd.f32 %v1605_v0, %v4561_v63  ;;  %v3235_v63 = vor.u32 %v3811_v7, %v3234_v23  ;;  %v3248_v7 = vld [vmem:[%s6486_s0 + $0x29c] sm:$0xf0] }
 0x188   :  { %v2112_v33 = vpop.f32.mrf.mxu0 }
 0x189   :  { %v4820_v25 = vadd.f32 %v2110_v62, %v1942_v56  ;;  %v3231_v62 = vor.u32 %v3808_v46, %v3228_v39  ;;  %v3815_v46 = vld [vmem:[%s6486_s0 + $0x298] sm:$0xf0]  ;;  %v3813_v39 = vld [vmem:[%s6486_s0 + $0x28c] sm:$0xf] }
 0x18b   :  { %6570 = vst [vmem:[#allocation26_spill] sm:$0xff] %v4820_v25 }
 0x18c   :  { %v1774_v49 = vpop.f32.mrf.mxu2 }
 0x18d   :  { %v1775_v53 = vadd.f32 %v1774_v49, %v1606_v61  ;;  %v1943_v12 = vpop.f32.mrf.mxu3 }
 0x18e   :  { %v1608_v5 = vpop.f32.mrf.mxu1 }
 0x18f   :  { %v1944_v45 = vadd.f32 %v1943_v12, %v1775_v53  ;;  %v1609_v41 = vadd.f32 %v1608_v5, %v4593_v36  ;;  %v3246_v36 = vld [vmem:[%s6486_s0 + $0x288] sm:$0xf]  ;;  %v3254_v53 = vld [vmem:[%s6486_s0 + $0x290] sm:$0xf]  ;;  %v3816_v12 = vld [vmem:[%s6486_s0 + $0x2a0] sm:$0xf0] }
 0x190   :  { %v2115_v3 = vpop.f32.mrf.mxu0 }
 0x191   :  { %v4847_v31 = vadd.f32 %v2112_v33, %v1944_v45  ;;  %1647 = vmatmul.bf16.gmra.mxu1 %v3223_v43  ;;  %1816 = vmatmul.bf16.gmra.mxu2 %v3227_v29  ;;  %v3812_v33 = vld [vmem:[%s6486_s0 + $0x284] sm:$0xf] }
 0x192   :  { %1985 = vmatmul.bf16.gmra.mxu3 %v3231_v62  ;;  %v3243_v62 = vor.u32 %v3812_v33, %v3240_v21 }
 0x193   :  { %3715 = vmatmul.msk.bf16.gmra.mxu0 %vm1298_vm0, %v3235_v63  ;;  %v3247_v63 = vor.u32 %v3815_v46, %v3246_v36  ;;  %v3260_v46 = vld [vmem:[%s6486_s0 + $0x2bc] sm:$0xf0] }
 0x194   :  { %v1777_v0 = vpop.f32.mrf.mxu2 }
 0x195   :  { %v1778_v56 = vadd.f32 %v1777_v0, %v1609_v41  ;;  %v1946_v61 = vpop.f32.mrf.mxu3 }
 0x196   :  { %v1610_v49 = vpop.f32.mrf.mxu1 }
 0x197   :  { %v1947_v16 = vadd.f32 %v1946_v61, %v1778_v56  ;;  %v1611_v23 = vadd.f32 %v1610_v49, %v4602_v1  ;;  %v3255_v1 = vor.u32 %v3816_v12, %v3254_v53  ;;  %v3268_v12 = vld [vmem:[%s6486_s0 + $0x2c4] sm:$0xf0] }
 0x198   :  { %v2117_v42 = vpop.f32.mrf.mxu0 }
 0x199   :  { %v4851_v9 = vadd.f32 %v2115_v3, %v1947_v16  ;;  %v3251_v3 = vor.u32 %v3813_v39, %v3248_v7  ;;  %v3820_v39 = vld [vmem:[%s6486_s0 + $0x2c0] sm:$0xf0]  ;;  %v3818_v7 = vld [vmem:[%s6486_s0 + $0x2b4] sm:$0xf] }
 0x19c   :  { %v1779_v43 = vpop.f32.mrf.mxu2 }
 0x19d   :  { %v1780_v29 = vadd.f32 %v1779_v43, %v1611_v23  ;;  %v1948_v5 = vpop.f32.mrf.mxu3 }
 0x19e   :  { %v1613_v45 = vpop.f32.mrf.mxu1 }
 0x19f   :  { %v1949_v41 = vadd.f32 %v1948_v5, %v1780_v29  ;;  %v1614_v61 = vadd.f32 %v1613_v45, %v4304_v14  ;;  %v3266_v14 = vld [vmem:[%s6486_s0 + $0x2b0] sm:$0xf]  ;;  %v3274_v29 = vld [vmem:[%s6486_s0 + $0x2b8] sm:$0xf]  ;;  %v3821_v5 = vld [vmem:[%s6486_s0 + $0x2c8] sm:$0xf0] }
 0x1a0   :  { %v2120_v0 = vpop.f32.mrf.mxu0 }
 0x1a1   :  { %v4878_v56 = vadd.f32 %v2117_v42, %v1949_v41  ;;  %1652 = vmatmul.bf16.gmra.mxu1 %v3243_v62  ;;  %1821 = vmatmul.bf16.gmra.mxu2 %v3247_v63  ;;  %v3817_v42 = vld [vmem:[%s6486_s0 + $0x2ac] sm:$0xf] }
 0x1a2   :  { %1990 = vmatmul.bf16.gmra.mxu3 %v3251_v3  ;;  %v3263_v3 = vor.u32 %v3817_v42, %v3260_v46 }
 0x1a3   :  { %6571 = vst [vmem:[#allocation27_spill] sm:$0xff] %v4878_v56  ;;  %3716 = vmatmul.msk.bf16.gmra.mxu0 %vm1298_vm0, %v3255_v1  ;;  %v3267_v1 = vor.u32 %v3820_v39, %v3266_v14  ;;  %v3280_v39 = vld [vmem:[%s6486_s0 + $0x2e4] sm:$0xf0] }
 0x1a4   :  { %v1782_v49 = vpop.f32.mrf.mxu2 }
 0x1a5   :  { %v1783_v16 = vadd.f32 %v1782_v49, %v1614_v61  ;;  %v1951_v23 = vpop.f32.mrf.mxu3 }
 0x1a6   :  { %v1615_v43 = vpop.f32.mrf.mxu1 }
 0x1a7   :  { %v1952_v33 = vadd.f32 %v1951_v23, %v1783_v16  ;;  %v1616_v53 = vadd.f32 %v1615_v43, %v4313_v20  ;;  %v3275_v20 = vor.u32 %v3821_v5, %v3274_v29  ;;  %v3288_v5 = vld [vmem:[%s6486_s0 + $0x2ec] sm:$0xf0] }
 0x1a8   :  { %v2122_v21 = vpop.f32.mrf.mxu0 }
 0x1a9   :  { %v4882_v36 = vadd.f32 %v2120_v0, %v1952_v33  ;;  %v3271_v0 = vor.u32 %v3818_v7, %v3268_v12  ;;  %v3825_v7 = vld [vmem:[%s6486_s0 + $0x2e8] sm:$0xf0]  ;;  %v3823_v12 = vld [vmem:[%s6486_s0 + $0x2dc] sm:$0xf] }
 0x1ab   :  { %6572 = vst [vmem:[#allocation28_spill] sm:$0xff] %v4882_v36 }
 0x1ac   :  { %v1784_v62 = vpop.f32.mrf.mxu2 }
 0x1ad   :  { %v1785_v63 = vadd.f32 %v1784_v62, %v1616_v53  ;;  %v1953_v45 = vpop.f32.mrf.mxu3 }
 0x1ae   :  { %v1618_v41 = vpop.f32.mrf.mxu1 }
 0x1af   :  { %v1954_v61 = vadd.f32 %v1953_v45, %v1785_v63  ;;  %v1619_v23 = vadd.f32 %v1618_v41, %v4345_v34  ;;  %v3286_v34 = vld [vmem:[%s6486_s0 + $0x2d8] sm:$0xf]  ;;  %v3294_v63 = vld [vmem:[%s6486_s0 + $0x2e0] sm:$0xf]  ;;  %v3826_v45 = vld [vmem:[%s6486_s0 + $0x2f0] sm:$0xf0] }
 0x1b0   :  { %v2125_v49 = vpop.f32.mrf.mxu0 }
 0x1b1   :  { %v4909_v16 = vadd.f32 %v2122_v21, %v1954_v61  ;;  %1657 = vmatmul.bf16.gmra.mxu1 %v3263_v3  ;;  %1826 = vmatmul.bf16.gmra.mxu2 %v3267_v1  ;;  %v3822_v21 = vld [vmem:[%s6486_s0 + $0x2d4] sm:$0xf] }
 0x1b2   :  { %1995 = vmatmul.bf16.gmra.mxu3 %v3271_v0  ;;  %v3283_v0 = vor.u32 %v3822_v21, %v3280_v39 }
 0x1b3   :  { %6573 = vst [vmem:[#allocation29_spill] sm:$0xff] %v4909_v16  ;;  %3717 = vmatmul.msk.bf16.gmra.mxu0 %vm1298_vm0, %v3275_v20  ;;  %v3287_v20 = vor.u32 %v3825_v7, %v3286_v34  ;;  %v3300_v7 = vld [vmem:[%s6486_s0 + $0x30c] sm:$0xf0] }
 0x1b4   :  { %v1787_v43 = vpop.f32.mrf.mxu2 }
 0x1b5   :  { %v1788_v33 = vadd.f32 %v1787_v43, %v1619_v23  ;;  %v1956_v53 = vpop.f32.mrf.mxu3 }
 0x1b6   :  { %v1620_v62 = vpop.f32.mrf.mxu1 }
 0x1b7   :  { %v1957_v42 = vadd.f32 %v1956_v53, %v1788_v33  ;;  %v1621_v29 = vadd.f32 %v1620_v62, %v4354_v40  ;;  %v3295_v40 = vor.u32 %v3826_v45, %v3294_v63  ;;  %v3308_v45 = vld [vmem:[%s6486_s0 + $0x314] sm:$0xf0] }
 0x1b8   :  { %v2127_v46 = vpop.f32.mrf.mxu0 }
 0x1b9   :  { %v4913_v14 = vadd.f32 %v2125_v49, %v1957_v42  ;;  %v3291_v49 = vor.u32 %v3823_v12, %v3288_v5  ;;  %v3830_v12 = vld [vmem:[%s6486_s0 + $0x310] sm:$0xf0]  ;;  %v3828_v5 = vld [vmem:[%s6486_s0 + $0x304] sm:$0xf] }
 0x1bb   :  { %6574 = vst [vmem:[#allocation30_spill] sm:$0xff] %v4913_v14 }
 0x1bc   :  { %v1789_v3 = vpop.f32.mrf.mxu2 }
 0x1bd   :  { %v1790_v1 = vadd.f32 %v1789_v3, %v1621_v29  ;;  %v1958_v41 = vpop.f32.mrf.mxu3 }
 0x1be   :  { %v1623_v61 = vpop.f32.mrf.mxu1 }
 0x1bf   :  { %v1959_v23 = vadd.f32 %v1958_v41, %v1790_v1  ;;  %v1624_v53 = vadd.f32 %v1623_v61, %v4386_v54  ;;  %v3306_v54 = vld [vmem:[%s6486_s0 + $0x300] sm:$0xf]  ;;  %v3314_v1 = vld [vmem:[%s6486_s0 + $0x308] sm:$0xf]  ;;  %v3831_v41 = vld [vmem:[%s6486_s0 + $0x318] sm:$0xf0] }
 0x1c0   :  { %v2130_v43 = vpop.f32.mrf.mxu0 }
 0x1c1   :  { %v4940_v33 = vadd.f32 %v2127_v46, %v1959_v23  ;;  %1662 = vmatmul.bf16.gmra.mxu1 %v3283_v0  ;;  %1831 = vmatmul.bf16.gmra.mxu2 %v3287_v20  ;;  %v3827_v46 = vld [vmem:[%s6486_s0 + $0x2fc] sm:$0xf] }
 0x1c2   :  { %2000 = vmatmul.bf16.gmra.mxu3 %v3291_v49  ;;  %v3303_v49 = vor.u32 %v3827_v46, %v3300_v7 }
 0x1c3   :  { %6575 = vst [vmem:[#allocation31_spill] sm:$0xff] %v4940_v33  ;;  %3718 = vmatmul.msk.bf16.gmra.mxu0 %vm1298_vm0, %v3295_v40  ;;  %v3307_v40 = vor.u32 %v3830_v12, %v3306_v54  ;;  %v3320_v12 = vld [vmem:[%s6486_s0 + $0x334] sm:$0xf0] }
 0x1c4   :  { %v1792_v62 = vpop.f32.mrf.mxu2 }
 0x1c5   :  { %v1793_v42 = vadd.f32 %v1792_v62, %v1624_v53  ;;  %v1961_v29 = vpop.f32.mrf.mxu3 }
 0x1c6   :  { %v1625_v3 = vpop.f32.mrf.mxu1 }
 0x1c7   :  { %v1962_v21 = vadd.f32 %v1961_v29, %v1793_v42  ;;  %v1626_v63 = vadd.f32 %v1625_v3, %v4395_v60  ;;  %v3315_v60 = vor.u32 %v3831_v41, %v3314_v1  ;;  %v3328_v41 = vld [vmem:[%s6486_s0 + $0x33c] sm:$0xf0] }
 0x1c8   :  { %v2132_v39 = vpop.f32.mrf.mxu0 }
 0x1c9   :  { %v4944_v34 = vadd.f32 %v2130_v43, %v1962_v21  ;;  %v3311_v43 = vor.u32 %v3828_v5, %v3308_v45  ;;  %v3835_v5 = vld [vmem:[%s6486_s0 + $0x338] sm:$0xf0]  ;;  %v3833_v45 = vld [vmem:[%s6486_s0 + $0x32c] sm:$0xf] }
 0x1cb   :  { %6576 = vst [vmem:[#allocation32_spill] sm:$0xff] %v4944_v34 }
 0x1cc   :  { %v1794_v0 = vpop.f32.mrf.mxu2 }
 0x1cd   :  { %v1795_v20 = vadd.f32 %v1794_v0, %v1626_v63  ;;  %v1963_v61 = vpop.f32.mrf.mxu3 }
 0x1ce   :  { %v1628_v23 = vpop.f32.mrf.mxu1 }
 0x1cf   :  { %v1964_v53 = vadd.f32 %v1963_v61, %v1795_v20  ;;  %v1629_v29 = vadd.f32 %v1628_v23, %v4427_v10  ;;  %v3326_v10 = vld [vmem:[%s6486_s0 + $0x328] sm:$0xf]  ;;  %v3334_v20 = vld [vmem:[%s6486_s0 + $0x330] sm:$0xf]  ;;  %v3836_v61 = vld [vmem:[%s6486_s0 + $0x340] sm:$0xf0] }
 0x1d0   :  { %v2135_v62 = vpop.f32.mrf.mxu0 }
 0x1d1   :  { %v4971_v42 = vadd.f32 %v2132_v39, %v1964_v53  ;;  %1667 = vmatmul.bf16.gmra.mxu1 %v3303_v49  ;;  %1836 = vmatmul.bf16.gmra.mxu2 %v3307_v40  ;;  %v3832_v39 = vld [vmem:[%s6486_s0 + $0x324] sm:$0xf] }
 0x1d2   :  { %2005 = vmatmul.bf16.gmra.mxu3 %v3311_v43  ;;  %v3323_v43 = vor.u32 %v3832_v39, %v3320_v12 }
 0x1d3   :  { %6577 = vst [vmem:[#allocation33_spill] sm:$0xff] %v4971_v42  ;;  %3719 = vmatmul.msk.bf16.gmra.mxu0 %vm1298_vm0, %v3315_v60  ;;  %v3327_v60 = vor.u32 %v3835_v5, %v3326_v10  ;;  %v3340_v5 = vld [vmem:[%s6486_s0 + $0x35c] sm:$0xf0] }
 0x1d4   :  { %v1797_v3 = vpop.f32.mrf.mxu2 }
 0x1d5   :  { %v1798_v21 = vadd.f32 %v1797_v3, %v1629_v29  ;;  %v1966_v63 = vpop.f32.mrf.mxu3 }
 0x1d6   :  { %v1630_v0 = vpop.f32.mrf.mxu1 }
 0x1d7   :  { %v1967_v46 = vadd.f32 %v1966_v63, %v1798_v21  ;;  %v1631_v1 = vadd.f32 %v1630_v0, %v4436_v22  ;;  %v3335_v22 = vor.u32 %v3836_v61, %v3334_v20  ;;  %v3348_v61 = vld [vmem:[%s6486_s0 + $0x364] sm:$0xf0] }
 0x1d8   :  { %v2137_v7 = vpop.f32.mrf.mxu0 }
 0x1d9   :  { %v4975_v54 = vadd.f32 %v2135_v62, %v1967_v46  ;;  %v3331_v62 = vor.u32 %v3833_v45, %v3328_v41  ;;  %v3840_v45 = vld [vmem:[%s6486_s0 + $0x360] sm:$0xf0]  ;;  %v3838_v41 = vld [vmem:[%s6486_s0 + $0x354] sm:$0xf] }
 0x1db   :  { %6578 = vst [vmem:[#allocation34_spill] sm:$0xff] %v4975_v54 }
 0x1dc   :  { %v1799_v49 = vpop.f32.mrf.mxu2 }
 0x1dd   :  { %v1800_v40 = vadd.f32 %v1799_v49, %v1631_v1  ;;  %v1968_v23 = vpop.f32.mrf.mxu3 }
 0x1de   :  { %v1633_v53 = vpop.f32.mrf.mxu1 }
 0x1df   :  { %v1969_v29 = vadd.f32 %v1968_v23, %v1800_v40  ;;  %v1634_v63 = vadd.f32 %v1633_v53, %v4468_v44  ;;  %v3346_v44 = vld [vmem:[%s6486_s0 + $0x350] sm:$0xf]  ;;  %v3354_v40 = vld [vmem:[%s6486_s0 + $0x358] sm:$0xf]  ;;  %v3841_v23 = vld [vmem:[%s6486_s0 + $0x368] sm:$0xf0] }
 0x1e0   :  { %v2140_v3 = vpop.f32.mrf.mxu0 }
 0x1e1   :  { %v5002_v21 = vadd.f32 %v2137_v7, %v1969_v29  ;;  %1672 = vmatmul.bf16.gmra.mxu1 %v3323_v43  ;;  %1841 = vmatmul.bf16.gmra.mxu2 %v3327_v60  ;;  %v3837_v7 = vld [vmem:[%s6486_s0 + $0x34c] sm:$0xf] }
 0x1e2   :  { %2010 = vmatmul.bf16.gmra.mxu3 %v3331_v62  ;;  %v3343_v62 = vor.u32 %v3837_v7, %v3340_v5 }
 0x1e3   :  { %6579 = vst [vmem:[#allocation35_spill] sm:$0xff] %v5002_v21  ;;  %3720 = vmatmul.msk.bf16.gmra.mxu0 %vm1298_vm0, %v3335_v22  ;;  %v3347_v22 = vor.u32 %v3840_v45, %v3346_v44  ;;  %v3360_v45 = vld [vmem:[%s6486_s0 + $0x384] sm:$0xf0] }
 0x1e4   :  { %v1802_v0 = vpop.f32.mrf.mxu2 }
 0x1e5   :  { %v1803_v46 = vadd.f32 %v1802_v0, %v1634_v63  ;;  %v1971_v1 = vpop.f32.mrf.mxu3 }
 0x1e6   :  { %v1635_v49 = vpop.f32.mrf.mxu1 }
 0x1e7   :  { %v1972_v39 = vadd.f32 %v1971_v1, %v1803_v46  ;;  %v1636_v20 = vadd.f32 %v1635_v49, %v4477_v52  ;;  %v3355_v52 = vor.u32 %v3841_v23, %v3354_v40  ;;  %v3368_v23 = vld [vmem:[%s6486_s0 + $0x38c] sm:$0xf0] }
 0x1e8   :  { %v2142_v12 = vpop.f32.mrf.mxu0 }
 0x1e9   :  { %v5006_v10 = vadd.f32 %v2140_v3, %v1972_v39  ;;  %v3351_v3 = vor.u32 %v3838_v41, %v3348_v61  ;;  %v3845_v41 = vld [vmem:[%s6486_s0 + $0x388] sm:$0xf0]  ;;  %v3843_v61 = vld [vmem:[%s6486_s0 + $0x37c] sm:$0xf] }
 0x1eb   :  { %6580 = vst [vmem:[#allocation36_spill] sm:$0xff] %v5006_v10 }
 0x1ec   :  { %v1804_v43 = vpop.f32.mrf.mxu2 }
 0x1ed   :  { %v1805_v60 = vadd.f32 %v1804_v43, %v1636_v20  ;;  %v1973_v53 = vpop.f32.mrf.mxu3 }
 0x1ee   :  { %v1638_v29 = vpop.f32.mrf.mxu1 }
 0x1ef   :  { %v1974_v63 = vadd.f32 %v1973_v53, %v1805_v60  ;;  %v1639_v1 = vadd.f32 %v1638_v29, %v4509_v11  ;;  %v3366_v11 = vld [vmem:[%s6486_s0 + $0x378] sm:$0xf]  ;;  %v3374_v60 = vld [vmem:[%s6486_s0 + $0x380] sm:$0xf]  ;;  %v3846_v53 = vld [vmem:[%s6486_s0 + $0x390] sm:$0xf0] }
 0x1f0   :  { %v2145_v0 = vpop.f32.mrf.mxu0 }
 0x1f1   :  { %v5033_v46 = vadd.f32 %v2142_v12, %v1974_v63  ;;  %1677 = vmatmul.bf16.gmra.mxu1 %v3343_v62  ;;  %1846 = vmatmul.bf16.gmra.mxu2 %v3347_v22  ;;  %v3842_v12 = vld [vmem:[%s6486_s0 + $0x374] sm:$0xf] }
 0x1f2   :  { %2015 = vmatmul.bf16.gmra.mxu3 %v3351_v3  ;;  %v3363_v3 = vor.u32 %v3842_v12, %v3360_v45 }
 0x1f3   :  { %6581 = vst [vmem:[#allocation37_spill] sm:$0xff] %v5033_v46  ;;  %3721 = vmatmul.msk.bf16.gmra.mxu0 %vm1298_vm0, %v3355_v52  ;;  %v3367_v52 = vor.u32 %v3845_v41, %v3366_v11  ;;  %v3380_v41 = vld [vmem:[%s6486_s0 + $0x3ac] sm:$0xf0] }
 0x1f4   :  { %v1807_v49 = vpop.f32.mrf.mxu2 }
 0x1f5   :  { %v1808_v39 = vadd.f32 %v1807_v49, %v1639_v1  ;;  %v1976_v20 = vpop.f32.mrf.mxu3 }
 0x1f6   :  { %v1640_v43 = vpop.f32.mrf.mxu1 }
 0x1f7   :  { %v1977_v7 = vadd.f32 %v1976_v20, %v1808_v39  ;;  %v1641_v40 = vadd.f32 %v1640_v43, %v4518_v28  ;;  %v3375_v28 = vor.u32 %v3846_v53, %v3374_v60  ;;  %v3388_v53 = vld [vmem:[%s6486_s0 + $0x3b4] sm:$0xf0] }
 0x1f8   :  { %v2147_v5 = vpop.f32.mrf.mxu0 }
 0x1f9   :  { %v5037_v44 = vadd.f32 %v2145_v0, %v1977_v7  ;;  %v3371_v0 = vor.u32 %v3843_v61, %v3368_v23  ;;  %v3850_v61 = vld [vmem:[%s6486_s0 + $0x3b0] sm:$0xf0]  ;;  %v3848_v23 = vld [vmem:[%s6486_s0 + $0x3a4] sm:$0xf] }
 0x1fb   :  { %6582 = vst [vmem:[#allocation38_spill] sm:$0xff] %v5037_v44 }
 0x1fc   :  { %v1809_v62 = vpop.f32.mrf.mxu2 }
 0x1fd   :  { %v1810_v22 = vadd.f32 %v1809_v62, %v1641_v40  ;;  %v1978_v29 = vpop.f32.mrf.mxu3 }
 0x1fe   :  { %v1643_v63 = vpop.f32.mrf.mxu1 }
 0x1ff   :  { %v1979_v1 = vadd.f32 %v1978_v29, %v1810_v22  ;;  %v1644_v20 = vadd.f32 %v1643_v63, %v4550_v2  ;;  %v3386_v2 = vld [vmem:[%s6486_s0 + $0x3a0] sm:$0xf]  ;;  %v3394_v22 = vld [vmem:[%s6486_s0 + $0x3a8] sm:$0xf]  ;;  %v3851_v29 = vld [vmem:[%s6486_s0 + $0x3b8] sm:$0xf0] }
 0x200   :  { %v2150_v49 = vpop.f32.mrf.mxu0 }
 0x201   :  { %v5064_v39 = vadd.f32 %v2147_v5, %v1979_v1  ;;  %1682 = vmatmul.bf16.gmra.mxu1 %v3363_v3  ;;  %1851 = vmatmul.bf16.gmra.mxu2 %v3367_v52  ;;  %v3847_v5 = vld [vmem:[%s6486_s0 + $0x39c] sm:$0xf] }
 0x202   :  { %2020 = vmatmul.bf16.gmra.mxu3 %v3371_v0  ;;  %v3383_v0 = vor.u32 %v3847_v5, %v3380_v41 }
 0x203   :  { %6583 = vst [vmem:[#allocation39_spill] sm:$0xff] %v5064_v39  ;;  %3722 = vmatmul.msk.bf16.gmra.mxu0 %vm1298_vm0, %v3375_v28  ;;  %v3387_v28 = vor.u32 %v3850_v61, %v3386_v2  ;;  %v3400_v61 = vld [vmem:[%s6486_s0 + $0x3d4] sm:$0xf0] }
 0x204   :  { %v1812_v43 = vpop.f32.mrf.mxu2 }
 0x205   :  { %v1813_v7 = vadd.f32 %v1812_v43, %v1644_v20  ;;  %v1981_v40 = vpop.f32.mrf.mxu3 }
 0x206   :  { %v1645_v62 = vpop.f32.mrf.mxu1 }
 0x207   :  { %v1982_v12 = vadd.f32 %v1981_v40, %v1813_v7  ;;  %v1646_v60 = vadd.f32 %v1645_v62, %v4559_v27  ;;  %v3395_v27 = vor.u32 %v3851_v29, %v3394_v22  ;;  %v3408_v29 = vld [vmem:[%s6486_s0 + $0x3dc] sm:$0xf0] }
 0x208   :  { %v2152_v45 = vpop.f32.mrf.mxu0 }
 0x209   :  { %v5068_v11 = vadd.f32 %v2150_v49, %v1982_v12  ;;  %v3391_v49 = vor.u32 %v3848_v23, %v3388_v53  ;;  %v3855_v23 = vld [vmem:[%s6486_s0 + $0x3d8] sm:$0xf0]  ;;  %v3853_v53 = vld [vmem:[%s6486_s0 + $0x3cc] sm:$0xf] }
 0x20b   :  { %6584 = vst [vmem:[#allocation40_spill] sm:$0xff] %v5068_v11 }
 0x20c   :  { %v1814_v3 = vpop.f32.mrf.mxu2 }
 0x20d   :  { %v1815_v52 = vadd.f32 %v1814_v3, %v1646_v60  ;;  %v1983_v63 = vpop.f32.mrf.mxu3 }
 0x20e   :  { %v1648_v1 = vpop.f32.mrf.mxu1 }
 0x20f   :  { %v1984_v20 = vadd.f32 %v1983_v63, %v1815_v52  ;;  %v1649_v40 = vadd.f32 %v1648_v1, %v4591_v24  ;;  %v3406_v24 = vld [vmem:[%s6486_s0 + $0x3c8] sm:$0xf]  ;;  %v3414_v52 = vld [vmem:[%s6486_s0 + $0x3d0] sm:$0xf]  ;;  %v3856_v63 = vld [vmem:[%s6486_s0 + $0x3e0] sm:$0xf0] }
 0x210   :  { %v2155_v43 = vpop.f32.mrf.mxu0 }
 0x211   :  { %v5095_v7 = vadd.f32 %v2152_v45, %v1984_v20  ;;  %1687 = vmatmul.bf16.gmra.mxu1 %v3383_v0  ;;  %1856 = vmatmul.bf16.gmra.mxu2 %v3387_v28  ;;  %v3852_v45 = vld [vmem:[%s6486_s0 + $0x3c4] sm:$0xf] }
 0x212   :  { %2025 = vmatmul.bf16.gmra.mxu3 %v3391_v49  ;;  %v3403_v49 = vor.u32 %v3852_v45, %v3400_v61 }
 0x213   :  { %6585 = vst [vmem:[#allocation41_spill] sm:$0xff] %v5095_v7  ;;  %3723 = vmatmul.msk.bf16.gmra.mxu0 %vm1298_vm0, %v3395_v27  ;;  %v3407_v27 = vor.u32 %v3855_v23, %v3406_v24  ;;  %v3420_v23 = vld [vmem:[%s6486_s0 + $0x3fc] sm:$0xf0] }
 0x214   :  { %v1817_v62 = vpop.f32.mrf.mxu2 }
 0x215   :  { %v1818_v12 = vadd.f32 %v1817_v62, %v1649_v40  ;;  %v1986_v60 = vpop.f32.mrf.mxu3 }
 0x216   :  { %v1650_v3 = vpop.f32.mrf.mxu1 }
 0x217   :  { %v1987_v5 = vadd.f32 %v1986_v60, %v1818_v12  ;;  %v1651_v22 = vadd.f32 %v1650_v3, %v4600_v59  ;;  %v3415_v59 = vor.u32 %v3856_v63, %v3414_v52  ;;  %v3428_v63 = vld [vmem:[%s6486_s0 + $0x404] sm:$0xf0] }
 0x218   :  { %v2157_v41 = vpop.f32.mrf.mxu0 }
 0x219   :  { %v5099_v2 = vadd.f32 %v2155_v43, %v1987_v5  ;;  %v3411_v43 = vor.u32 %v3853_v53, %v3408_v29  ;;  %v3860_v53 = vld [vmem:[%s6486_s0 + $0x400] sm:$0xf0]  ;;  %v3858_v29 = vld [vmem:[%s6486_s0 + $0x3f4] sm:$0xf] }
 0x21b   :  { %6586 = vst [vmem:[#allocation42_spill] sm:$0xff] %v5099_v2 }
 0x21c   :  { %v1819_v0 = vpop.f32.mrf.mxu2 }
 0x21d   :  { %v1820_v28 = vadd.f32 %v1819_v0, %v1651_v22  ;;  %v1988_v1 = vpop.f32.mrf.mxu3 }
 0x21e   :  { %v1653_v20 = vpop.f32.mrf.mxu1 }
 0x21f   :  { %v1989_v40 = vadd.f32 %v1988_v1, %v1820_v28  ;;  %v1654_v60 = vadd.f32 %v1653_v20, %v4309_v18  ;;  %v3426_v18 = vld [vmem:[%s6486_s0 + $0x3f0] sm:$0xf]  ;;  %v3434_v28 = vld [vmem:[%s6486_s0 + $0x3f8] sm:$0xf]  ;;  %v3861_v1 = vld [vmem:[%s6486_s0 + $0x408] sm:$0xf0] }
 0x220   :  { %v2160_v62 = vpop.f32.mrf.mxu0 }
 0x221   :  { %v5126_v12 = vadd.f32 %v2157_v41, %v1989_v40  ;;  %1692 = vmatmul.bf16.gmra.mxu1 %v3403_v49  ;;  %1861 = vmatmul.bf16.gmra.mxu2 %v3407_v27  ;;  %v3857_v41 = vld [vmem:[%s6486_s0 + $0x3ec] sm:$0xf] }
 0x222   :  { %2030 = vmatmul.bf16.gmra.mxu3 %v3411_v43  ;;  %v3423_v43 = vor.u32 %v3857_v41, %v3420_v23 }
 0x223   :  { %6587 = vst [vmem:[#allocation43_spill] sm:$0xff] %v5126_v12  ;;  %3724 = vmatmul.msk.bf16.gmra.mxu0 %vm1298_vm0, %v3415_v59  ;;  %v3427_v59 = vor.u32 %v3860_v53, %v3426_v18  ;;  %v3440_v53 = vld [vmem:[%s6486_s0 + $0x424] sm:$0xf0] }
 0x224   :  { %v1822_v3 = vpop.f32.mrf.mxu2 }
 0x225   :  { %v1823_v5 = vadd.f32 %v1822_v3, %v1654_v60  ;;  %v1991_v22 = vpop.f32.mrf.mxu3 }
 0x226   :  { %v1655_v0 = vpop.f32.mrf.mxu1 }
 0x227   :  { %v1992_v45 = vadd.f32 %v1991_v22, %v1823_v5  ;;  %v1656_v52 = vadd.f32 %v1655_v0, %v4341_v30  ;;  %v3435_v30 = vor.u32 %v3861_v1, %v3434_v28  ;;  %v3448_v1 = vld [vmem:[%s6486_s0 + $0x42c] sm:$0xf0] }
 0x228   :  { %v2162_v61 = vpop.f32.mrf.mxu0 }
 0x229   :  { %v5130_v24 = vadd.f32 %v2160_v62, %v1992_v45  ;;  %v3431_v62 = vor.u32 %v3858_v29, %v3428_v63  ;;  %v3865_v29 = vld [vmem:[%s6486_s0 + $0x428] sm:$0xf0]  ;;  %v3863_v63 = vld [vmem:[%s6486_s0 + $0x41c] sm:$0xf] }
 0x22b   :  { %6588 = vst [vmem:[#allocation44_spill] sm:$0xff] %v5130_v24 }
 0x22c   :  { %v1824_v49 = vpop.f32.mrf.mxu2 }
 0x22d   :  { %v1825_v27 = vadd.f32 %v1824_v49, %v1656_v52  ;;  %v1993_v20 = vpop.f32.mrf.mxu3 }
 0x22e   :  { %v1658_v40 = vpop.f32.mrf.mxu1 }
 0x22f   :  { %v1994_v60 = vadd.f32 %v1993_v20, %v1825_v27  ;;  %v1659_v22 = vadd.f32 %v1658_v40, %v4350_v38  ;;  %v3446_v38 = vld [vmem:[%s6486_s0 + $0x418] sm:$0xf]  ;;  %v3454_v27 = vld [vmem:[%s6486_s0 + $0x420] sm:$0xf]  ;;  %v3866_v20 = vld [vmem:[%s6486_s0 + $0x430] sm:$0xf0] }
 0x230   :  { %v2165_v3 = vpop.f32.mrf.mxu0 }
 0x231   :  { %v5157_v5 = vadd.f32 %v2162_v61, %v1994_v60  ;;  %1697 = vmatmul.bf16.gmra.mxu1 %v3423_v43  ;;  %1866 = vmatmul.bf16.gmra.mxu2 %v3427_v59  ;;  %v3862_v61 = vld [vmem:[%s6486_s0 + $0x414] sm:$0xf] }
 0x232   :  { %2035 = vmatmul.bf16.gmra.mxu3 %v3431_v62  ;;  %v3443_v62 = vor.u32 %v3862_v61, %v3440_v53 }
 0x233   :  { %6589 = vst [vmem:[#allocation45_spill] sm:$0xff] %v5157_v5  ;;  %3725 = vmatmul.msk.bf16.gmra.mxu0 %vm1298_vm0, %v3435_v30  ;;  %v3447_v30 = vor.u32 %v3865_v29, %v3446_v38  ;;  %v3460_v29 = vld [vmem:[%s6486_s0 + $0x44c] sm:$0xf0] }
 0x234   :  { %v1827_v0 = vpop.f32.mrf.mxu2 }
 0x235   :  { %v1828_v45 = vadd.f32 %v1827_v0, %v1659_v22  ;;  %v1996_v52 = vpop.f32.mrf.mxu3 }
 0x236   :  { %v1660_v49 = vpop.f32.mrf.mxu1 }
 0x237   :  { %v1997_v41 = vadd.f32 %v1996_v52, %v1828_v45  ;;  %v1661_v28 = vadd.f32 %v1660_v49, %v4382_v50  ;;  %v3455_v50 = vor.u32 %v3866_v20, %v3454_v27  ;;  %v3468_v20 = vld [vmem:[%s6486_s0 + $0x454] sm:$0xf0] }
 0x238   :  { %v2167_v23 = vpop.f32.mrf.mxu0 }
 0x239   :  { %v5161_v18 = vadd.f32 %v2165_v3, %v1997_v41  ;;  %v3451_v3 = vor.u32 %v3863_v63, %v3448_v1  ;;  %v3870_v63 = vld [vmem:[%s6486_s0 + $0x450] sm:$0xf0]  ;;  %v3868_v1 = vld [vmem:[%s6486_s0 + $0x444] sm:$0xf] }
 0x23b   :  { %6590 = vst [vmem:[#allocation46_spill] sm:$0xff] %v5161_v18 }
 0x23c   :  { %v1829_v43 = vpop.f32.mrf.mxu2 }
 0x23d   :  { %v1830_v59 = vadd.f32 %v1829_v43, %v1661_v28  ;;  %v1998_v40 = vpop.f32.mrf.mxu3 }
 0x23e   :  { %v1663_v60 = vpop.f32.mrf.mxu1 }
 0x23f   :  { %v1999_v22 = vadd.f32 %v1998_v40, %v1830_v59  ;;  %v1664_v52 = vadd.f32 %v1663_v60, %v4391_v58  ;;  %v3466_v58 = vld [vmem:[%s6486_s0 + $0x440] sm:$0xf]  ;;  %v3474_v59 = vld [vmem:[%s6486_s0 + $0x448] sm:$0xf]  ;;  %v3871_v40 = vld [vmem:[%s6486_s0 + $0x458] sm:$0xf0] }
 0x240   :  { %v2170_v0 = vpop.f32.mrf.mxu0 }
 0x241   :  { %v5188_v45 = vadd.f32 %v2167_v23, %v1999_v22  ;;  %1702 = vmatmul.bf16.gmra.mxu1 %v3443_v62  ;;  %1871 = vmatmul.bf16.gmra.mxu2 %v3447_v30  ;;  %v3867_v23 = vld [vmem:[%s6486_s0 + $0x43c] sm:$0xf] }
 0x242   :  { %2040 = vmatmul.bf16.gmra.mxu3 %v3451_v3  ;;  %v3463_v3 = vor.u32 %v3867_v23, %v3460_v29 }
 0x243   :  { %6591 = vst [vmem:[#allocation47_spill] sm:$0xff] %v5188_v45  ;;  %3726 = vmatmul.msk.bf16.gmra.mxu0 %vm1298_vm0, %v3455_v50  ;;  %v3467_v50 = vor.u32 %v3870_v63, %v3466_v58  ;;  %v3480_v63 = vld [vmem:[%s6486_s0 + $0x474] sm:$0xf0] }
 0x244   :  { %v1832_v49 = vpop.f32.mrf.mxu2 }
 0x245   :  { %v1833_v41 = vadd.f32 %v1832_v49, %v1664_v52  ;;  %v2001_v28 = vpop.f32.mrf.mxu3 }
 0x246   :  { %v1665_v43 = vpop.f32.mrf.mxu1 }
 0x247   :  { %v2002_v61 = vadd.f32 %v2001_v28, %v1833_v41  ;;  %v1666_v27 = vadd.f32 %v1665_v43, %v4423_v6  ;;  %v3475_v6 = vor.u32 %v3871_v40, %v3474_v59  ;;  %v3488_v40 = vld [vmem:[%s6486_s0 + $0x47c] sm:$0xf0] }
 0x248   :  { %v2172_v53 = vpop.f32.mrf.mxu0 }
 0x249   :  { %v5192_v38 = vadd.f32 %v2170_v0, %v2002_v61  ;;  %v3471_v0 = vor.u32 %v3868_v1, %v3468_v20  ;;  %v3875_v1 = vld [vmem:[%s6486_s0 + $0x478] sm:$0xf0]  ;;  %v3873_v20 = vld [vmem:[%s6486_s0 + $0x46c] sm:$0xf] }
 0x24b   :  { %6592 = vst [vmem:[#allocation48_spill] sm:$0xff] %v5192_v38 }
 0x24c   :  { %v1834_v62 = vpop.f32.mrf.mxu2 }
 0x24d   :  { %v1835_v30 = vadd.f32 %v1834_v62, %v1666_v27  ;;  %v2003_v60 = vpop.f32.mrf.mxu3 }
 0x24e   :  { %v1668_v22 = vpop.f32.mrf.mxu1 }
 0x24f   :  { %v2004_v52 = vadd.f32 %v2003_v60, %v1835_v30  ;;  %v1669_v28 = vadd.f32 %v1668_v22, %v4432_v15  ;;  %v3486_v15 = vld [vmem:[%s6486_s0 + $0x468] sm:$0xf]  ;;  %v3494_v30 = vld [vmem:[%s6486_s0 + $0x470] sm:$0xf]  ;;  %v3876_v60 = vld [vmem:[%s6486_s0 + $0x480] sm:$0xf0] }
 0x250   :  { %v2175_v49 = vpop.f32.mrf.mxu0 }
 0x251   :  { %v5219_v41 = vadd.f32 %v2172_v53, %v2004_v52  ;;  %1707 = vmatmul.bf16.gmra.mxu1 %v3463_v3  ;;  %1876 = vmatmul.bf16.gmra.mxu2 %v3467_v50  ;;  %v3872_v53 = vld [vmem:[%s6486_s0 + $0x464] sm:$0xf] }
 0x252   :  { %2045 = vmatmul.bf16.gmra.mxu3 %v3471_v0  ;;  %v3483_v0 = vor.u32 %v3872_v53, %v3480_v63 }
 0x253   :  { %6593 = vst [vmem:[#allocation49_spill] sm:$0xff] %v5219_v41  ;;  %3727 = vmatmul.msk.bf16.gmra.mxu0 %vm1298_vm0, %v3475_v6  ;;  %v3487_v6 = vor.u32 %v3875_v1, %v3486_v15  ;;  %v3500_v1 = vld [vmem:[%s6486_s0 + $0x49c] sm:$0xf0] }
 0x254   :  { %v1837_v43 = vpop.f32.mrf.mxu2 }
 0x255   :  { %v1838_v61 = vadd.f32 %v1837_v43, %v1669_v28  ;;  %v2006_v27 = vpop.f32.mrf.mxu3 }
 0x256   :  { %v1670_v62 = vpop.f32.mrf.mxu1 }
 0x257   :  { %v2007_v23 = vadd.f32 %v2006_v27, %v1838_v61  ;;  %v1671_v59 = vadd.f32 %v1670_v62, %v4464_v35  ;;  %v3495_v35 = vor.u32 %v3876_v60, %v3494_v30  ;;  %v3508_v60 = vld [vmem:[%s6486_s0 + $0x4a4] sm:$0xf0] }
 0x258   :  { %v2177_v29 = vpop.f32.mrf.mxu0 }
 0x259   :  { %v5223_v58 = vadd.f32 %v2175_v49, %v2007_v23  ;;  %v3491_v49 = vor.u32 %v3873_v20, %v3488_v40  ;;  %v3880_v20 = vld [vmem:[%s6486_s0 + $0x4a0] sm:$0xf0]  ;;  %v3878_v40 = vld [vmem:[%s6486_s0 + $0x494] sm:$0xf] }
 0x25b   :  { %6594 = vst [vmem:[#allocation50_spill] sm:$0xff] %v5223_v58 }
 0x25c   :  { %v1839_v3 = vpop.f32.mrf.mxu2 }
 0x25d   :  { %v1840_v50 = vadd.f32 %v1839_v3, %v1671_v59  ;;  %v2008_v22 = vpop.f32.mrf.mxu3 }
 0x25e   :  { %v1673_v52 = vpop.f32.mrf.mxu1 }
 0x25f   :  { %v2009_v28 = vadd.f32 %v2008_v22, %v1840_v50  ;;  %v1674_v27 = vadd.f32 %v1673_v52, %v4473_v48  ;;  %v3506_v48 = vld [vmem:[%s6486_s0 + $0x490] sm:$0xf]  ;;  %v3514_v50 = vld [vmem:[%s6486_s0 + $0x498] sm:$0xf]  ;;  %v3881_v22 = vld [vmem:[%s6486_s0 + $0x4a8] sm:$0xf0] }
 0x260   :  { %v2180_v43 = vpop.f32.mrf.mxu0 }
 0x261   :  { %v5250_v61 = vadd.f32 %v2177_v29, %v2009_v28  ;;  %1712 = vmatmul.bf16.gmra.mxu1 %v3483_v0  ;;  %1881 = vmatmul.bf16.gmra.mxu2 %v3487_v6  ;;  %v3877_v29 = vld [vmem:[%s6486_s0 + $0x48c] sm:$0xf] }
 0x262   :  { %2050 = vmatmul.bf16.gmra.mxu3 %v3491_v49  ;;  %v3503_v49 = vor.u32 %v3877_v29, %v3500_v1 }
 0x263   :  { %6595 = vst [vmem:[#allocation51_spill] sm:$0xff] %v5250_v61  ;;  %3728 = vmatmul.msk.bf16.gmra.mxu0 %vm1298_vm0, %v3495_v35  ;;  %v3507_v35 = vor.u32 %v3880_v20, %v3506_v48  ;;  %v3520_v20 = vld [vmem:[%s6486_s0 + $0x4c4] sm:$0xf0] }
 0x264   :  { %v1842_v62 = vpop.f32.mrf.mxu2 }
 0x265   :  { %v1843_v23 = vadd.f32 %v1842_v62, %v1674_v27  ;;  %v2011_v59 = vpop.f32.mrf.mxu3 }
 0x266   :  { %v1675_v3 = vpop.f32.mrf.mxu1 }
 0x267   :  { %v2012_v53 = vadd.f32 %v2011_v59, %v1843_v23  ;;  %v1676_v30 = vadd.f32 %v1675_v3, %v4505_v4  ;;  %v3515_v4 = vor.u32 %v3881_v22, %v3514_v50  ;;  %v6598_v59 = vld [vmem:[#allocation12_spill] sm:$0xff]  ;;  %v6600_v50 = vld [vmem:[#allocation14_spill] sm:$0xff] }
 0x268   :  { %v2182_v63 = vpop.f32.mrf.mxu0 }
 0x269   :  { %v5254_v15 = vadd.f32 %v2180_v43, %v2012_v53  ;;  %v3511_v43 = vor.u32 %v3878_v40, %v3508_v60  ;;  %v3526_v40 = vld [vmem:[%s6486_s0 + $0x4b8] sm:$0xf]  ;;  %v3885_v60 = vld [vmem:[%s6486_s0 + $0x4c8] sm:$0xf0] }
 0x26b   :  { %6596 = vst [vmem:[#allocation52_spill] sm:$0xff] %v5254_v15 }
 0x26c   :  { %v1844_v0 = vpop.f32.mrf.mxu2 }
 0x26d   :  { %v1845_v6 = vadd.f32 %v1844_v0, %v1676_v30  ;;  %v2013_v52 = vpop.f32.mrf.mxu3 }
 0x26e   :  { %v1678_v28 = vpop.f32.mrf.mxu1 }
 0x26f   :  { %v2014_v27 = vadd.f32 %v2013_v52, %v1845_v6  ;;  %v1679_v3 = vadd.f32 %v1678_v28, %v6598_v59  ;;  %v3528_v6 = vld [vmem:[%s6486_s0 + $0x4cc] sm:$0xf0]  ;;  %v3534_v52 = vld [vmem:[%s6486_s0 + $0x4c0] sm:$0xf] }
 0x270   :  { %v2185_v62 = vpop.f32.mrf.mxu0 }
 0x271   :  { %v5281_v23 = vadd.f32 %v2182_v63, %v2014_v27  ;;  %1717 = vmatmul.bf16.gmra.mxu1 %v3503_v49  ;;  %1886 = vmatmul.bf16.gmra.mxu2 %v3507_v35  ;;  %v3882_v63 = vld [vmem:[%s6486_s0 + $0x4b4] sm:$0xf]  ;;  %v3527_v27 = vor.u32 %v3885_v60, %v3526_v40  ;;  %v3540_v60 = vld [vmem:[%s6486_s0 + $0x4ec] sm:$0xf0] }
 0x272   :  { %2055 = vmatmul.bf16.gmra.mxu3 %v3511_v43  ;;  %v3886_v49 = vld [vmem:[%s6486_s0 + $0x4d0] sm:$0xf0] }
 0x273   :  { %6597 = vst [vmem:[#allocation53_spill] sm:$0xff] %v5281_v23  ;;  %3729 = vmatmul.msk.bf16.gmra.mxu0 %vm1298_vm0, %v3515_v4  ;;  %v3523_v4 = vor.u32 %v3882_v63, %v3520_v20 }
 0x274   :  { %v1847_v53 = vpop.f32.mrf.mxu2 }
 0x275   :  { %v1848_v15 = vadd.f32 %v1847_v53, %v1679_v3  ;;  %v2016_v30 = vpop.f32.mrf.mxu3  ;;  %v3535_v3 = vor.u32 %v3886_v49, %v3534_v52  ;;  %v3548_v49 = vld [vmem:[%s6486_s0 + $0x4f4] sm:$0xf0] }
 0x276   :  { %v1680_v0 = vpop.f32.mrf.mxu1 }
 0x277   :  { %v2017_v29 = vadd.f32 %v2016_v30, %v1848_v15  ;;  %v3883_v15 = vld [vmem:[%s6486_s0 + $0x4bc] sm:$0xf]  ;;  %v1681_v22 = vadd.f32 %v1680_v0, %v6600_v50 }
 0x278   :  { %v2187_v1 = vpop.f32.mrf.mxu0  ;;  %v3531_v59 = vor.u32 %v3883_v15, %v3528_v6  ;;  %v3546_v15 = vld [vmem:[%s6486_s0 + $0x4e0] sm:$0xf] }
 0x279   :  { %v5285_v48 = vadd.f32 %v2185_v62, %v2017_v29  ;;  %v6602_v29 = vld [vmem:[#allocation16_spill] sm:$0xff]  ;;  %v6604_v6 = vld [vmem:[#allocation18_spill] sm:$0xff] }
 0x27b   :  { %6599 = vst [vmem:[#allocation12_spill] sm:$0xff] %v5285_v48 }
 0x27c   :  { %v1849_v35 = vpop.f32.mrf.mxu2 }
 0x27d   :  { %v1850_v28 = vadd.f32 %v1849_v35, %v1681_v22  ;;  %v2018_v43 = vpop.f32.mrf.mxu3 }
 0x27e   :  { %v1683_v62 = vpop.f32.mrf.mxu1 }
 0x27f   :  { %v2019_v53 = vadd.f32 %v2018_v43, %v1850_v28  ;;  %v1684_v50 = vadd.f32 %v1683_v62, %v6602_v29  ;;  %v3554_v28 = vld [vmem:[%s6486_s0 + $0x4e8] sm:$0xf]  ;;  %v3891_v43 = vld [vmem:[%s6486_s0 + $0x4f8] sm:$0xf0] }
 0x280   :  { %v2190_v30 = vpop.f32.mrf.mxu0  ;;  %v3555_v29 = vor.u32 %v3891_v43, %v3554_v28 }
 0x281   :  { %v5312_v0 = vadd.f32 %v2187_v1, %v2019_v53  ;;  %1722 = vmatmul.bf16.gmra.mxu1 %v3523_v4  ;;  %1891 = vmatmul.bf16.gmra.mxu2 %v3527_v27  ;;  %v3887_v1 = vld [vmem:[%s6486_s0 + $0x4dc] sm:$0xf] }
 0x282   :  { %2060 = vmatmul.bf16.gmra.mxu3 %v3531_v59  ;;  %v3543_v59 = vor.u32 %v3887_v1, %v3540_v60 }
 0x283   :  { %6601 = vst [vmem:[#allocation14_spill] sm:$0xff] %v5312_v0  ;;  %3730 = vmatmul.msk.bf16.gmra.mxu0 %vm1298_vm0, %v3535_v3 }
 0x284   :  { %v1852_v48 = vpop.f32.mrf.mxu2 }
 0x285   :  { %v1853_v23 = vadd.f32 %v1852_v48, %v1684_v50  ;;  %v2021_v22 = vpop.f32.mrf.mxu3  ;;  %v3890_v48 = vld [vmem:[%s6486_s0 + $0x4f0] sm:$0xf0] }
 0x286   :  { %v1685_v35 = vpop.f32.mrf.mxu1  ;;  %v3547_v3 = vor.u32 %v3890_v48, %v3546_v15  ;;  %v6607_v48 = vld [vmem:[#allocation22_spill] sm:$0xff] }
 0x287   :  { %v2022_v63 = vadd.f32 %v2021_v22, %v1853_v23  ;;  %v3888_v23 = vld [vmem:[%s6486_s0 + $0x4e4] sm:$0xf]  ;;  %v1686_v52 = vadd.f32 %v1685_v35, %v6604_v6 }
 0x288   :  { %v2192_v20 = vpop.f32.mrf.mxu0 }
 0x289   :  { %v5316_v40 = vadd.f32 %v2190_v30, %v2022_v63  ;;  %v3551_v30 = vor.u32 %v3888_v23, %v3548_v49  ;;  %v6606_v63 = vld [vmem:[#allocation20_spill] sm:$0xff] }
 0x28b   :  { %6603 = vst [vmem:[#allocation16_spill] sm:$0xff] %v5316_v40 }
 0x28c   :  { %v1854_v4 = vpop.f32.mrf.mxu2 }
 0x28d   :  { %v1855_v27 = vadd.f32 %v1854_v4, %v1686_v52  ;;  %v2023_v62 = vpop.f32.mrf.mxu3 }
 0x28e   :  { %v1688_v53 = vpop.f32.mrf.mxu1 }
 0x28f   :  { %v2024_v50 = vadd.f32 %v2023_v62, %v1855_v27  ;;  %v1689_v6 = vadd.f32 %v1688_v53, %v6606_v63 }
 0x290   :  { %v2195_v22 = vpop.f32.mrf.mxu0 }
 0x291   :  { %v5343_v35 = vadd.f32 %v2192_v20, %v2024_v50  ;;  %1727 = vmatmul.bf16.gmra.mxu1 %v3543_v59  ;;  %1896 = vmatmul.bf16.gmra.mxu2 %v3547_v3  ;;  %v6608_v3 = vld [vmem:[#allocation2_spill] sm:$0xff] }
 0x292   :  { %2065 = vmatmul.bf16.gmra.mxu3 %v3551_v30 }
 0x293   :  { %6605 = vst [vmem:[#allocation18_spill] sm:$0xff] %v5343_v35  ;;  %3731 = vmatmul.msk.bf16.gmra.mxu0 %vm1298_vm0, %v3555_v29 }
 0x294   :  { %v1857_v40 = vpop.f32.mrf.mxu2 }
 0x295   :  { %v1858_v0 = vadd.f32 %v1857_v40, %v1689_v6  ;;  %v2026_v52 = vpop.f32.mrf.mxu3  ;;  %v2241_v40 = vsel %vm1298_vm0, %v4661_v55, 0.0  ;;  %v2243_v6 = vsel %vm1298_vm0, %v4665_v17, 0.0 }
 0x296   :  { %v1690_v4 = vpop.f32.mrf.mxu1 }
 0x297   :  { %v2027_v1 = vadd.f32 %v2026_v52, %v1858_v0  ;;  %v1691_v23 = vadd.f32 %v1690_v4, %v6607_v48 }
 0x298   :  { %v2197_v60 = vpop.f32.mrf.mxu0 }
 0x299   :  { %v5347_v15 = vadd.f32 %v2195_v22, %v2027_v1  ;;  %v6609_v22 = vld [vmem:[#allocation24_spill] sm:$0xff] }
 0x29a   :  { %v2240_v63 = vsel %vm1298_vm0, %v6609_v22, 0.0 }
 0x29b   :  { %v2242_v1 = vadd.f32 %v2241_v40, %v2240_v63 }
 0x29c   :  { %v1859_v49 = vpop.f32.mrf.mxu2 }
 0x29d   :  { %v1860_v20 = vadd.f32 %v1859_v49, %v1691_v23  ;;  %v2028_v28 = vpop.f32.mrf.mxu3  ;;  %v2244_v23 = vadd.f32 %v2243_v6, %v2242_v1  ;;  %v2247_v49 = vsel %vm1298_vm0, %v4696_v37, 0.0 }
 0x29e   :  { %v1693_v43 = vpop.f32.mrf.mxu1 }
 0x29f   :  { %v2029_v27 = vadd.f32 %v2028_v28, %v1860_v20  ;;  %v1694_v53 = vadd.f32 %v1693_v43, %v6608_v3  ;;  %v6611_v20 = vld [vmem:[#allocation3_spill] sm:$0xff]  ;;  %v2249_v3 = vsel %vm1298_vm0, %v4723_v32, 0.0 }
 0x2a0   :  { %v2200_v62 = vpop.f32.mrf.mxu0 }
 0x2a1   :  { %v5350_v59 = vadd.f32 %v2197_v60, %v2029_v27  ;;  %v2245_v60 = vsel %vm1298_vm0, %v4692_v8, 0.0 }
 0x2a2   :  { %v2246_v43 = vadd.f32 %v2245_v60, %v2244_v23  ;;  %v2255_v60 = vsel %vm1298_vm0, %v4758_v13, 0.0  ;;  %v6612_v23 = vld [vmem:[#allocation4_spill] sm:$0xff] }
 0x2a4   :  { %v1862_v30 = vpop.f32.mrf.mxu2 }
 0x2a5   :  { %v1863_v0 = vadd.f32 %v1862_v30, %v1694_v53  ;;  %v2031_v29 = vpop.f32.mrf.mxu3 }
 0x2a6   :  { %v1695_v50 = vpop.f32.mrf.mxu1 }
 0x2a7   :  { %v2032_v52 = vadd.f32 %v2031_v29, %v1863_v0  ;;  %v1696_v28 = vadd.f32 %v1695_v50, %v6611_v20  ;;  %v2248_v0 = vadd.f32 %v2247_v49, %v2246_v43  ;;  %v2251_v29 = vsel %vm1298_vm0, %v4727_v57, 0.0 }
 0x2a8   :  { %v2202_v4 = vpop.f32.mrf.mxu0  ;;  %v2257_v43 = vsel %vm1298_vm0, %v4785_v51, 0.0 }
 0x2a9   :  { %v5361_v48 = vadd.f32 %v2200_v62, %v2032_v52  ;;  %v2250_v6 = vadd.f32 %v2249_v3, %v2248_v0  ;;  %v2253_v52 = vsel %vm1298_vm0, %v4754_v26, 0.0  ;;  %v2259_v0 = vsel %vm1298_vm0, %v4789_v47, 0.0 }
 0x2ab   :  { %6610 = vst [vmem:[#allocation20_spill] sm:$0xff] %v5361_v48  ;;  %v2252_v50 = vadd.f32 %v2251_v29, %v2250_v6  ;;  %v2261_v6 = vsel %vm1298_vm0, %v4816_v19, 0.0 }
 0x2ac   :  { %v1864_v27 = vpop.f32.mrf.mxu2 }
 0x2ad   :  { %v1865_v53 = vadd.f32 %v1864_v27, %v1696_v28  ;;  %v2033_v30 = vpop.f32.mrf.mxu3  ;;  %v2254_v28 = vadd.f32 %v2253_v52, %v2252_v50  ;;  %v2263_v52 = vsel %vm1298_vm0, %v4820_v25, 0.0  ;;  %v6613_v50 = vld [vmem:[#allocation5_spill] sm:$0xff] }
 0x2ae   :  { %v1698_v40 = vpop.f32.mrf.mxu1 }
 0x2af   :  { %v2034_v62 = vadd.f32 %v2033_v30, %v1865_v53  ;;  %v1699_v20 = vadd.f32 %v1698_v40, %v6612_v23  ;;  %v2256_v30 = vadd.f32 %v2255_v60, %v2254_v28  ;;  %v2265_v28 = vsel %vm1298_vm0, %v4847_v31, 0.0 }
 0x2b0   :  { %v2205_v63 = vpop.f32.mrf.mxu0 }
 0x2b1   :  { %v5372_v1 = vadd.f32 %v2202_v4, %v2034_v62  ;;  %v2258_v29 = vadd.f32 %v2257_v43, %v2256_v30  ;;  %v2267_v30 = vsel %vm1298_vm0, %v4851_v9, 0.0 }
 0x2b3   :  { %v2260_v40 = vadd.f32 %v2259_v0, %v2258_v29  ;;  %v2269_v29 = vsel %vm1298_vm0, %v4878_v56, 0.0 }
 0x2b4   :  { %v1867_v49 = vpop.f32.mrf.mxu2 }
 0x2b5   :  { %v1868_v27 = vadd.f32 %v1867_v49, %v1699_v20  ;;  %v2036_v53 = vpop.f32.mrf.mxu3  ;;  %v2262_v20 = vadd.f32 %v2261_v6, %v2260_v40  ;;  %v2271_v6 = vsel %vm1298_vm0, %v4882_v36, 0.0  ;;  %v6614_v40 = vld [vmem:[#allocation6_spill] sm:$0xff]  ;;  %v6620_v36 = vld [vmem:[#allocation7_spill] sm:$0xff] }
 0x2b6   :  { %v1700_v3 = vpop.f32.mrf.mxu1 }
 0x2b7   :  { %v2037_v4 = vadd.f32 %v2036_v53, %v1868_v27  ;;  %v1701_v23 = vadd.f32 %v1700_v3, %v6613_v50  ;;  %v2264_v53 = vadd.f32 %v2263_v52, %v2262_v20  ;;  %v2273_v20 = vsel %vm1298_vm0, %v4909_v16, 0.0 }
 0x2b8   :  { %v2207_v62 = vpop.f32.mrf.mxu0 }
 0x2b9   :  { %v5383_v13 = vadd.f32 %v2205_v63, %v2037_v4  ;;  %v2266_v0 = vadd.f32 %v2265_v28, %v2264_v53 }
 0x2bb   :  { %v2268_v3 = vadd.f32 %v2267_v30, %v2266_v0 }
 0x2bc   :  { %v1869_v60 = vpop.f32.mrf.mxu2 }
 0x2bd   :  { %v1870_v49 = vadd.f32 %v1869_v60, %v1701_v23  ;;  %v2038_v27 = vpop.f32.mrf.mxu3  ;;  %v2270_v23 = vadd.f32 %v2269_v29, %v2268_v3  ;;  %v2279_v3 = vsel %vm1298_vm0, %v4944_v34, 0.0 }
 0x2be   :  { %v1703_v43 = vpop.f32.mrf.mxu1 }
 0x2bf   :  { %v2039_v63 = vadd.f32 %v2038_v27, %v1870_v49  ;;  %v1704_v50 = vadd.f32 %v1703_v43, %v6614_v40  ;;  %v2272_v27 = vadd.f32 %v2271_v6, %v2270_v23  ;;  %v2277_v43 = vsel %vm1298_vm0, %v4940_v33, 0.0 }
 0x2c0   :  { %v2210_v4 = vpop.f32.mrf.mxu0 }
 0x2c1   :  { %v5394_v25 = vadd.f32 %v2207_v62, %v2039_v63  ;;  %v2275_v62 = vsel %vm1298_vm0, %v4913_v14, 0.0  ;;  %v2274_v63 = vadd.f32 %v2273_v20, %v2272_v27  ;;  %v2283_v20 = vsel %vm1298_vm0, %v4975_v54, 0.0 }
 0x2c2   :  { %v2285_v27 = vsel %vm1298_vm0, %v5002_v21, 0.0 }
 0x2c3   :  { %v2276_v29 = vadd.f32 %v2275_v62, %v2274_v63 }
 0x2c4   :  { %v1872_v52 = vpop.f32.mrf.mxu2 }
 0x2c5   :  { %v1873_v60 = vadd.f32 %v1872_v52, %v1704_v50  ;;  %v2041_v49 = vpop.f32.mrf.mxu3  ;;  %v2278_v40 = vadd.f32 %v2277_v43, %v2276_v29  ;;  %v2281_v50 = vsel %vm1298_vm0, %v4971_v42, 0.0  ;;  %v2289_v29 = vsel %vm1298_vm0, %v5033_v46, 0.0 }
 0x2c6   :  { %v5401_v28 = vpop.f32.mrf.mxu1 }
 0x2c7   :  { %v2042_v53 = vadd.f32 %v2041_v49, %v1873_v60  ;;  %v2280_v52 = vadd.f32 %v2279_v3, %v2278_v40 }
 0x2c8   :  { %v5405_v30 = vpop.f32.mrf.mxu0 }
 0x2c9   :  { %v5409_v0 = vadd.f32 %v2210_v4, %v2042_v53  ;;  %v2282_v49 = vadd.f32 %v2281_v50, %v2280_v52  ;;  %v2287_v53 = vsel %vm1298_vm0, %v5006_v10, 0.0  ;;  %v2291_v50 = vsel %vm1298_vm0, %v5037_v44, 0.0 }
 0x2cb   :  { %v2284_v62 = vadd.f32 %v2283_v20, %v2282_v49  ;;  %v2293_v49 = vsel %vm1298_vm0, %v5064_v39, 0.0 }
 0x2cc   :  { %v5413_v6 = vpop.f32.mrf.mxu2 }
 0x2cd   :  { %v5417_v23 = vpop.f32.mrf.mxu3  ;;  %v2286_v63 = vadd.f32 %v2285_v27, %v2284_v62  ;;  %v2295_v62 = vsel %vm1298_vm0, %v5068_v11, 0.0 }
 0x2ce   :  { %v5419_v60 = vpop.f32.mrf.mxu1 }
 0x2cf   :  { %v2288_v40 = vadd.f32 %v2287_v53, %v2286_v63  ;;  %v2297_v53 = vsel %vm1298_vm0, %v5095_v7, 0.0 }
 0x2d0   :  { %v5423_v4 = vpop.f32.mrf.mxu0 }
 0x2d1   :  { %v2290_v20 = vadd.f32 %v2289_v29, %v2288_v40  ;;  %v2299_v29 = vsel %vm1298_vm0, %v5099_v2, 0.0 }
 0x2d3   :  { %v2292_v27 = vadd.f32 %v2291_v50, %v2290_v20  ;;  %v2301_v20 = vsel %vm1298_vm0, %v5126_v12, 0.0 }
 0x2d4   :  { %v5429_v43 = vpop.f32.mrf.mxu2 }
 0x2d5   :  { %v5433_v3 = vpop.f32.mrf.mxu3  ;;  %v2294_v10 = vadd.f32 %v2293_v49, %v2292_v27  ;;  %v2303_v27 = vsel %vm1298_vm0, %v5130_v24, 0.0 }
 0x2d6   :  { %v5435_v54 = vpop.f32.mrf.mxu1 }
 0x2d7   :  { %v2296_v21 = vadd.f32 %v2295_v62, %v2294_v10  ;;  %v2305_v10 = vsel %vm1298_vm0, %v5157_v5, 0.0  ;;  %v2313_v5 = vsel %vm1298_vm0, %v5219_v41, 0.0  ;;  %v6616_v41 = vld [vmem:[#allocation53_spill] sm:$0xff] }
 0x2d8   :  { %v5439_v52 = vpop.f32.mrf.mxu0  ;;  %v2321_v34 = vsel %vm1298_vm0, %v6616_v41, 0.0  ;;  %v2329_v41 = vsel %vm1298_vm0, %v5343_v35, 0.0 }
 0x2d9   :  { %v2298_v50 = vadd.f32 %v2297_v53, %v2296_v21  ;;  %v2307_v21 = vsel %vm1298_vm0, %v5161_v18, 0.0  ;;  %v2315_v18 = vsel %vm1298_vm0, %v5223_v58, 0.0  ;;  %v6617_v58 = vld [vmem:[#allocation12_spill] sm:$0xff] }
 0x2da   :  { %v2323_v14 = vsel %vm1298_vm0, %v6617_v58, 0.0  ;;  %v1706_v58 = vadd.f32 %v5401_v28, %v6620_v36  ;;  %v2335_v36 = vsel %vm1298_vm0, %v5361_v48, 0.0  ;;  %v6622_v28 = vld [vmem:[#allocation9_spill] sm:$0xff] }
 0x2db   :  { %v2300_v49 = vadd.f32 %v2299_v29, %v2298_v50  ;;  %v2309_v29 = vsel %vm1298_vm0, %v5188_v45, 0.0 }
 0x2dc   :  { %v5445_v46 = vpop.f32.mrf.mxu2 }
 0x2dd   :  { %v5449_v63 = vpop.f32.mrf.mxu3  ;;  %v2302_v11 = vadd.f32 %v2301_v20, %v2300_v49  ;;  %v2311_v20 = vsel %vm1298_vm0, %v5192_v38, 0.0  ;;  %v6615_v38 = vld [vmem:[#allocation52_spill] sm:$0xff] }
 0x2de   :  { %v5451_v44 = vpop.f32.mrf.mxu1 }
 0x2df   :  { %v2304_v39 = vadd.f32 %v2303_v27, %v2302_v11 }
 0x2e0   :  { %v5455_v40 = vpop.f32.mrf.mxu0 }
 0x2e1   :  { %v2306_v12 = vadd.f32 %v2305_v10, %v2304_v39 }
 0x2e3   :  { %v2308_v50 = vadd.f32 %v2307_v21, %v2306_v12  ;;  %v2317_v12 = vsel %vm1298_vm0, %v5250_v61, 0.0  ;;  %v6618_v61 = vld [vmem:[#allocation14_spill] sm:$0xff] }
 0x2e4   :  { %v5461_v7 = vpop.f32.mrf.mxu2 }
 0x2e5   :  { %v5465_v62 = vpop.f32.mrf.mxu3  ;;  %v2310_v49 = vadd.f32 %v2309_v29, %v2308_v50  ;;  %v2319_v29 = vsel %vm1298_vm0, %v6615_v38, 0.0  ;;  %v6619_v38 = vld [vmem:[#allocation16_spill] sm:$0xff] }
 0x2e6   :  { %v1715_v2 = vpop.f32.mrf.mxu1 }
 0x2e7   :  { %v2312_v27 = vadd.f32 %v2311_v20, %v2310_v49 }
 0x2e8   :  { %v5469_v53 = vpop.f32.mrf.mxu0 }
 0x2e9   :  { %v2314_v10 = vadd.f32 %v2313_v5, %v2312_v27 }
 0x2eb   :  { %v2316_v21 = vadd.f32 %v2315_v18, %v2314_v10  ;;  %v2325_v18 = vsel %vm1298_vm0, %v6618_v61, 0.0 }
 0x2ec   :  { %v1884_v24 = vpop.f32.mrf.mxu2 }
 0x2ed   :  { %v5477_v11 = vpop.f32.mrf.mxu3  ;;  %v2318_v50 = vadd.f32 %v2317_v12, %v2316_v21  ;;  %v2327_v12 = vsel %vm1298_vm0, %v6619_v38, 0.0 }
 0x2ee   :  { %v1718_v42 = vpop.f32.mrf.mxu1 }
 0x2ef   :  { %v2320_v49 = vadd.f32 %v2319_v29, %v2318_v50 }
 0x2f0   :  { %v5481_v39 = vpop.f32.mrf.mxu0 }
 0x2f1   :  { %v2322_v5 = vadd.f32 %v2321_v34, %v2320_v49  ;;  %v2331_v49 = vsel %vm1298_vm0, %v5347_v15, 0.0 }
 0x2f3   :  { %v2324_v10 = vadd.f32 %v2323_v14, %v2322_v5  ;;  %v1875_v14 = vadd.f32 %v5413_v6, %v1706_v58  ;;  %v6621_v5 = vld [vmem:[#allocation8_spill] sm:$0xff] }
 0x2f4   :  { %v1887_v45 = vpop.f32.mrf.mxu2  ;;  %v1709_v38 = vadd.f32 %v5419_v60, %v6621_v5  ;;  %v2337_v60 = vsel %vm1298_vm0, %v5372_v1, 0.0 }
 0x2f5   :  { %v5489_v20 = vpop.f32.mrf.mxu3  ;;  %v2326_v21 = vadd.f32 %v2325_v18, %v2324_v10  ;;  %v2333_v18 = vsel %vm1298_vm0, %v5350_v59, 0.0  ;;  %v2044_v58 = vadd.f32 %v5417_v23, %v1875_v14  ;;  %v6624_v23 = vld [vmem:[#allocation11_spill] sm:$0xff] }
 0x2f6   :  { %v1720_v33 = vpop.f32.mrf.mxu1  ;;  %v1878_v35 = vadd.f32 %v5429_v43, %v1709_v38  ;;  %v1716_v14 = vadd.f32 %v1715_v2, %v6624_v23 }
 0x2f7   :  { %v2328_v50 = vadd.f32 %v2327_v12, %v2326_v21  ;;  %v1711_v21 = vadd.f32 %v5435_v54, %v6622_v28  ;;  %v2339_v54 = vsel %vm1298_vm0, %v5383_v13, 0.0  ;;  %v5529_v28 = vadd.f32 %v5405_v30, %v2044_v58  ;;  %v6626_v30 = vld [vmem:[#allocation15_spill] sm:$0xff] }
 0x2f8   :  { %v5493_v27 = vpop.f32.mrf.mxu0  ;;  %v2047_v5 = vadd.f32 %v5433_v3, %v1878_v35  ;;  %v1721_v58 = vadd.f32 %v1720_v33, %v6626_v30 }
 0x2f9   :  { %v2330_v56 = vadd.f32 %v2329_v41, %v2328_v50  ;;  %v1880_v50 = vadd.f32 %v5445_v46, %v1711_v21  ;;  %v2341_v46 = vsel %vm1298_vm0, %v5394_v25, 0.0  ;;  %v6625_v21 = vld [vmem:[#allocation13_spill] sm:$0xff] }
 0x2fa   :  { %v1719_v35 = vadd.f32 %v1718_v42, %v6625_v21 }
 0x2fb   :  { %v2332_v10 = vadd.f32 %v2331_v49, %v2330_v56  ;;  %v6623_v56 = vld [vmem:[#allocation10_spill] sm:$0xff] }
 0x2fc   :  { %v1889_v16 = vpop.f32.mrf.mxu2  ;;  %v1714_v38 = vadd.f32 %v5451_v44, %v6623_v56  ;;  %v2049_v44 = vadd.f32 %v5449_v63, %v1880_v50 }
 0x2fd   :  { %v2058_v29 = vpop.f32.mrf.mxu3  ;;  %v2334_v41 = vadd.f32 %v2333_v18, %v2332_v10  ;;  %v1890_v50 = vadd.f32 %v1889_v16, %v1721_v58 }
 0x2fe   :  { %v1723_v34 = vpop.f32.mrf.mxu1  ;;  %v1883_v18 = vadd.f32 %v5461_v7, %v1714_v38  ;;  %v2343_v7 = vsel %vm1298_vm0, %v5409_v0, 0.0  ;;  %v2345_v38 = vsel %vm1298_vm0, %v5529_v28, 0.0  ;;  %v5545_v42 = vadd.f32 %v5439_v52, %v2049_v44 }
 0x2ff   :  { %v2336_v49 = vadd.f32 %v2335_v36, %v2334_v41  ;;  %v1885_v36 = vadd.f32 %v1884_v24, %v1716_v14  ;;  %v5536_v41 = vadd.f32 %v5423_v4, %v2047_v5 }
 0x300   :  { %v5511_v12 = vpop.f32.mrf.mxu0  ;;  %v2052_v2 = vadd.f32 %v5465_v62, %v1883_v18  ;;  %v2349_v16 = vsel %vm1298_vm0, %v5545_v42, 0.0 }
 0x301   :  { %v2338_v10 = vadd.f32 %v2337_v60, %v2336_v49  ;;  %v1888_v60 = vadd.f32 %v1887_v45, %v1719_v35  ;;  %v2054_v4 = vadd.f32 %v5477_v11, %v1885_v36  ;;  %v6627_v49 = vld [vmem:[#allocation17_spill] sm:$0xff]  ;;  %v2347_v45 = vsel %vm1298_vm0, %v5536_v41, 0.0 }
 0x302   :  { %v1724_v5 = vadd.f32 %v1723_v34, %v6627_v49  ;;  %v5552_v62 = vadd.f32 %v5455_v40, %v2052_v2  ;;  %v2059_v34 = vadd.f32 %v2058_v29, %v1890_v50 }
 0x303   :  { %v2340_v3 = vadd.f32 %v2339_v54, %v2338_v10  ;;  %v2057_v18 = vadd.f32 %v5489_v20, %v1888_v60  ;;  %v6628_v10 = vld [vmem:[#allocation19_spill] sm:$0xff]  ;;  %v5559_v11 = vadd.f32 %v5469_v53, %v2054_v4 }
 0x304   :  { %v1892_v6 = vpop.f32.mrf.mxu2  ;;  %v2351_v21 = vsel %vm1298_vm0, %v5552_v62, 0.0  ;;  %v2228_v53 = vadd.f32 %v5493_v27, %v2059_v34 }
 0x305   :  { %v2061_v43 = vpop.f32.mrf.mxu3  ;;  %v2342_v56 = vadd.f32 %v2341_v46, %v2340_v3  ;;  %v1893_v14 = vadd.f32 %v1892_v6, %v1724_v5  ;;  %v5564_v40 = vadd.f32 %v5481_v39, %v2057_v18  ;;  %v6629_v6 = vld [vmem:[#allocation21_spill] sm:$0xff] }
 0x306   :  { %v1725_v48 = vpop.f32.mrf.mxu1  ;;  %v2357_v4 = vsel %vm1298_vm0, %v2228_v53, 0.0 }
 0x307   :  { %v2344_v23 = vadd.f32 %v2343_v7, %v2342_v56  ;;  %v1726_v52 = vadd.f32 %v1725_v48, %v6628_v10  ;;  %v2062_v20 = vadd.f32 %v2061_v43, %v1893_v14  ;;  %v2353_v7 = vsel %vm1298_vm0, %v5559_v11, 0.0 }
 0x308   :  { %v2232_v63 = vpop.f32.mrf.mxu0  ;;  %v2355_v56 = vsel %vm1298_vm0, %v5564_v40, 0.0 }
 0x309   :  { %v2346_v46 = vadd.f32 %v2345_v38, %v2344_v23  ;;  %v2231_v39 = vadd.f32 %v5511_v12, %v2062_v20 }
 0x30b   :  { %v2348_v36 = vadd.f32 %v2347_v45, %v2346_v46  ;;  %v2359_v5 = vsel %vm1298_vm0, %v2231_v39, 0.0 }
 0x30c   :  { %v1894_v24 = vpop.f32.mrf.mxu2 }
 0x30d   :  { %v2063_v54 = vpop.f32.mrf.mxu3  ;;  %v1895_v44 = vadd.f32 %v1894_v24, %v1726_v52  ;;  %v2350_v48 = vadd.f32 %v2349_v16, %v2348_v36 }
 0x30e   :  { %v1728_v33 = vpop.f32.mrf.mxu1 }
 0x30f   :  { %v1729_v35 = vadd.f32 %v1728_v33, %v6629_v6  ;;  %v2064_v2 = vadd.f32 %v2063_v54, %v1895_v44  ;;  %v2352_v30 = vadd.f32 %v2351_v21, %v2350_v48  ;;  %v6630_v54 = vld [vmem:[#allocation23_spill] sm:$0xff] }
 0x310   :  { %v2235_v58 = vpop.f32.mrf.mxu0 }
 0x311   :  { %v2354_v38 = vadd.f32 %v2353_v7, %v2352_v30  ;;  %v2233_v50 = vadd.f32 %v2232_v63, %v2064_v2 }
 0x313   :  { %v2356_v49 = vadd.f32 %v2355_v56, %v2354_v38  ;;  %v2361_v18 = vsel %vm1298_vm0, %v2233_v50, 0.0 }
 0x314   :  { %v1897_v3 = vpop.f32.mrf.mxu2 }
 0x315   :  { %v1898_v29 = vadd.f32 %v1897_v3, %v1729_v35  ;;  %v2066_v60 = vpop.f32.mrf.mxu3  ;;  %v2358_v45 = vadd.f32 %v2357_v4, %v2356_v49 }
 0x316   :  { %v1730_v24 = vpop.f32.mrf.mxu1 }
 0x317   :  { %v2067_v43 = vadd.f32 %v2066_v60, %v1898_v29  ;;  %v1731_v23 = vadd.f32 %v1730_v24, %v6630_v54  ;;  %v2360_v10 = vadd.f32 %v2359_v5, %v2358_v45 }
 0x318   :  { %v2237_v34 = vpop.f32.mrf.mxu0 }
 0x319   :  { %v2236_v27 = vadd.f32 %v2235_v58, %v2067_v43  ;;  %v2362_v16 = vadd.f32 %v2361_v18, %v2360_v10 }
 0x31b   :  { %v2363_v12 = vsel %vm1298_vm0, %v2236_v27, 0.0 }
 0x31c   :  { %v1899_v33 = vpop.f32.mrf.mxu2  ;;  %v2364_v63 = vadd.f32 %v2363_v12, %v2362_v16 }
 0x31d   :  { %v1900_v14 = vadd.f32 %v1899_v33, %v1731_v23  ;;  %v2068_v52 = vpop.f32.mrf.mxu3 }
 0x31f   :  { %v2069_v46 = vadd.f32 %v2068_v52, %v1900_v14  ;;  %v6635_v14 = vld [vmem:[#allocation25_spill] sm:$0xff] }
 0x321   :  { %v2238_v44 = vadd.f32 %v2237_v34, %v2069_v46 }
 0x323   :  { %v2365_v36 = vsel %vm1298_vm0, %v2238_v44, 0.0 }
 0x324   :  { %v2366_v21 = vadd.f32 %v2365_v36, %v2364_v63 }
 0x326   :  { %v2367_v20 = vrot.slane %v2366_v21, 4 }
 0x328   :  { %v2368_v6 = vadd.f32 %v2367_v20, %v2366_v21 }
 0x32a   :  { %v2369_v35 = vrot.slane %v2368_v6, 2 }
 0x32c   :  { %v2370_v48 = vadd.f32 %v2369_v35, %v2368_v6 }
 0x32e   :  { %v2371_v3 = vrot.slane %v2370_v48, 1 }
 0x330   :  { %v2372_v7 = vadd.f32 %v2371_v3, %v2370_v48  ;;  %v6636_v48 = vld [vmem:[#allocation26_spill] sm:$0xff] }
 0x332   :  { %v5579_v2 = vmul.f32 0.001953125, %v2372_v7 }
 0x334   :  { %v5582_v29 = vsub.f32 %v2228_v53, %v5579_v2  ;;  %v5585_v60 = vsub.f32 %v2231_v39, %v5579_v2  ;;  %v5588_v30 = vsub.f32 %v2233_v50, %v5579_v2  ;;  %v5591_v58 = vsub.f32 %v2236_v27, %v5579_v2 }
 0x335   :  { %v5594_v56 = vsub.f32 %v2238_v44, %v5579_v2  ;;  %v5598_v43 = vsub.f32 %v6609_v22, %v5579_v2  ;;  %v5602_v53 = vsub.f32 %v4661_v55, %v5579_v2  ;;  %v5606_v39 = vsub.f32 %v4665_v17, %v5579_v2 }
 0x336   :  { %6631 = vst [vmem:[#allocation22_spill] sm:$0xff] %v5582_v29  ;;  %v5610_v38 = vsub.f32 %v4692_v8, %v5579_v2  ;;  %v5618_v22 = vsub.f32 %v4696_v37, %v5579_v2  ;;  %v5624_v17 = vsub.f32 %v4723_v32, %v5579_v2  ;;  %v5632_v27 = vsub.f32 %v4727_v57, %v5579_v2 }
 0x337   :  { %6632 = vst [vmem:[#allocation2_spill] sm:$0xff] %v5585_v60  ;;  %v2438_v24 = vmul.f32 %v5598_v43, %v5598_v43  ;;  %v2439_v4 = vmul.f32 %v5602_v53, %v5602_v53  ;;  %v2440_v55 = vmul.f32 %v5606_v39, %v5606_v39  ;;  %v5639_v32 = vsub.f32 %v4754_v26, %v5579_v2 }
 0x338   :  { %6633 = vst [vmem:[#allocation24_spill] sm:$0xff] %v5588_v30  ;;  %v2441_v8 = vmul.f32 %v5610_v38, %v5610_v38  ;;  %v2442_v37 = vmul.f32 %v5618_v22, %v5618_v22  ;;  %v2443_v45 = vmul.f32 %v5624_v17, %v5624_v17  ;;  %v5646_v57 = vsub.f32 %v6635_v14, %v5579_v2 }
 0x339   :  { %6634 = vst [vmem:[#allocation3_spill] sm:$0xff] %v5591_v58  ;;  %v2502_v50 = vsel %vm1298_vm0, %v2438_v24, 0.0  ;;  %v2503_v49 = vsel %vm1298_vm0, %v2439_v4, 0.0  ;;  %v2505_v54 = vsel %vm1298_vm0, %v2440_v55, 0.0  ;;  %v2444_v10 = vmul.f32 %v5632_v27, %v5632_v27 }
 0x33a   :  { %v2504_v5 = vadd.f32 %v2503_v49, %v2502_v50  ;;  %v2507_v33 = vsel %vm1298_vm0, %v2441_v8, 0.0  ;;  %v2509_v52 = vsel %vm1298_vm0, %v2442_v37, 0.0  ;;  %v5653_v26 = vsub.f32 %v4785_v51, %v5579_v2 }
 0x33b   :  { %v2445_v46 = vmul.f32 %v5639_v32, %v5639_v32  ;;  %v2511_v16 = vsel %vm1298_vm0, %v2443_v45, 0.0  ;;  %v5660_v44 = vsub.f32 %v4789_v47, %v5579_v2  ;;  %v2446_v63 = vmul.f32 %v5646_v57, %v5646_v57 }
 0x33c   :  { %v2506_v23 = vadd.f32 %v2505_v54, %v2504_v5  ;;  %v2513_v36 = vsel %vm1298_vm0, %v2444_v10, 0.0  ;;  %v5667_v51 = vsub.f32 %v4816_v19, %v5579_v2  ;;  %v2447_v20 = vmul.f32 %v5653_v26, %v5653_v26  ;;  %v6637_v54 = vld [vmem:[#allocation27_spill] sm:$0xff] }
 0x33d   :  { %v2515_v6 = vsel %vm1298_vm0, %v2445_v46, 0.0  ;;  %v5674_v47 = vsub.f32 %v6636_v48, %v5579_v2  ;;  %v2448_v3 = vmul.f32 %v5660_v44, %v5660_v44  ;;  %v2517_v7 = vsel %vm1298_vm0, %v2446_v63, 0.0  ;;  %v6641_v48 = vld [vmem:[#allocation31_spill] sm:$0xff] }
 0x33e   :  { %v2508_v18 = vadd.f32 %v2507_v33, %v2506_v23  ;;  %v5681_v19 = vsub.f32 %v4847_v31, %v5579_v2  ;;  %v2449_v4 = vmul.f32 %v5667_v51, %v5667_v51  ;;  %v2519_v55 = vsel %vm1298_vm0, %v2447_v20, 0.0 }
 0x33f   :  { %v5688_v50 = vsub.f32 %v4851_v9, %v5579_v2  ;;  %v2450_v49 = vmul.f32 %v5674_v47, %v5674_v47  ;;  %v2521_v5 = vsel %vm1298_vm0, %v2448_v3, 0.0  ;;  %v5695_v31 = vsub.f32 %v6637_v54, %v5579_v2  ;;  %v6643_v54 = vld [vmem:[#allocation33_spill] sm:$0xff] }
 0x340   :  { %v2510_v12 = vadd.f32 %v2509_v52, %v2508_v18  ;;  %v2451_v23 = vmul.f32 %v5681_v19, %v5681_v19  ;;  %v2523_v45 = vsel %vm1298_vm0, %v2449_v4, 0.0  ;;  %v6638_v18 = vld [vmem:[#allocation28_spill] sm:$0xff]  ;;  %v5723_v3 = vsub.f32 %v6641_v48, %v5579_v2 }
 0x341   :  { %v5702_v9 = vsub.f32 %v6638_v18, %v5579_v2  ;;  %v2452_v14 = vmul.f32 %v5688_v50, %v5688_v50  ;;  %v2525_v10 = vsel %vm1298_vm0, %v2450_v49, 0.0 }
 0x342   :  { %v2512_v34 = vadd.f32 %v2511_v16, %v2510_v12  ;;  %v6639_v12 = vld [vmem:[#allocation29_spill] sm:$0xff]  ;;  %v2453_v16 = vmul.f32 %v5695_v31, %v5695_v31 }
 0x343   :  { %v5709_v46 = vsub.f32 %v6639_v12, %v5579_v2  ;;  %v2454_v20 = vmul.f32 %v5702_v9, %v5702_v9 }
 0x344   :  { %v2514_v21 = vadd.f32 %v2513_v36, %v2512_v34  ;;  %v2527_v34 = vsel %vm1298_vm0, %v2451_v23, 0.0  ;;  %v6640_v36 = vld [vmem:[#allocation30_spill] sm:$0xff]  ;;  %v5737_v23 = vsub.f32 %v6643_v54, %v5579_v2 }
 0x346   :  { %v2516_v35 = vadd.f32 %v2515_v6, %v2514_v21  ;;  %v5716_v21 = vsub.f32 %v6640_v36, %v5579_v2  ;;  %v2529_v6 = vsel %vm1298_vm0, %v2452_v14, 0.0  ;;  %v6644_v14 = vld [vmem:[#allocation34_spill] sm:$0xff]  ;;  %v2459_v36 = vmul.f32 %v5737_v23, %v5737_v23 }
 0x348   :  { %v2518_v24 = vadd.f32 %v2517_v7, %v2516_v35  ;;  %v2455_v7 = vmul.f32 %v5709_v46, %v5709_v46  ;;  %v2456_v49 = vmul.f32 %v5716_v21, %v5716_v21 }
 0x34a   :  { %v2520_v8 = vadd.f32 %v2519_v55, %v2518_v24  ;;  %v2531_v24 = vsel %vm1298_vm0, %v2453_v16, 0.0  ;;  %v6642_v55 = vld [vmem:[#allocation32_spill] sm:$0xff]  ;;  %v2537_v12 = vsel %vm1298_vm0, %v2456_v49, 0.0 }
 0x34c   :  { %v2522_v37 = vadd.f32 %v2521_v5, %v2520_v8  ;;  %v5730_v8 = vsub.f32 %v6642_v55, %v5579_v2  ;;  %v2533_v5 = vsel %vm1298_vm0, %v2454_v20, 0.0  ;;  %v6647_v55 = vld [vmem:[#allocation37_spill] sm:$0xff] }
 0x34d   :  { %v5765_v49 = vsub.f32 %v6647_v55, %v5579_v2  ;;  %v6651_v55 = vld [vmem:[#allocation41_spill] sm:$0xff] }
 0x34e   :  { %v2524_v33 = vadd.f32 %v2523_v45, %v2522_v37  ;;  %v2457_v45 = vmul.f32 %v5723_v3, %v5723_v3 }
 0x350   :  { %v2526_v52 = vadd.f32 %v2525_v10, %v2524_v33  ;;  %v2535_v33 = vsel %vm1298_vm0, %v2455_v7, 0.0  ;;  %v5744_v10 = vsub.f32 %v6644_v14, %v5579_v2  ;;  %v2539_v20 = vsel %vm1298_vm0, %v2457_v45, 0.0  ;;  %v6648_v45 = vld [vmem:[#allocation38_spill] sm:$0xff] }
 0x352   :  { %v2528_v63 = vadd.f32 %v2527_v34, %v2526_v52  ;;  %v2458_v52 = vmul.f32 %v5730_v8, %v5730_v8  ;;  %v6645_v34 = vld [vmem:[#allocation35_spill] sm:$0xff]  ;;  %v2460_v7 = vmul.f32 %v5744_v10, %v5744_v10 }
 0x354   :  { %v2530_v35 = vadd.f32 %v2529_v6, %v2528_v63  ;;  %v5751_v63 = vsub.f32 %v6645_v34, %v5579_v2  ;;  %v2545_v14 = vsel %vm1298_vm0, %v2460_v7, 0.0  ;;  %v2463_v34 = vmul.f32 %v5765_v49, %v5765_v49 }
 0x356   :  { %v2532_v4 = vadd.f32 %v2531_v24, %v2530_v35  ;;  %v6646_v35 = vld [vmem:[#allocation36_spill] sm:$0xff]  ;;  %v2541_v24 = vsel %vm1298_vm0, %v2458_v52, 0.0 }
 0x357   :  { %v5758_v48 = vsub.f32 %v6646_v35, %v5579_v2 }
 0x358   :  { %v2534_v37 = vadd.f32 %v2533_v5, %v2532_v4  ;;  %v2461_v5 = vmul.f32 %v5751_v63, %v5751_v63 }
 0x35a   :  { %v2536_v18 = vadd.f32 %v2535_v33, %v2534_v37  ;;  %v2543_v37 = vsel %vm1298_vm0, %v2459_v36, 0.0  ;;  %v5772_v33 = vsub.f32 %v6648_v45, %v5579_v2  ;;  %v2547_v36 = vsel %vm1298_vm0, %v2461_v5, 0.0 }
 0x35b   :  { %v2551_v5 = vsel %vm1298_vm0, %v2463_v34, 0.0 }
 0x35c   :  { %v2538_v16 = vadd.f32 %v2537_v12, %v2536_v18  ;;  %v2462_v18 = vmul.f32 %v5758_v48, %v5758_v48  ;;  %v6649_v12 = vld [vmem:[#allocation39_spill] sm:$0xff] }
 0x35e   :  { %v2540_v6 = vadd.f32 %v2539_v20, %v2538_v16  ;;  %v5779_v16 = vsub.f32 %v6649_v12, %v5579_v2  ;;  %v2549_v7 = vsel %vm1298_vm0, %v2462_v18, 0.0 }
 0x360   :  { %v2542_v4 = vadd.f32 %v2541_v24, %v2540_v6  ;;  %v6650_v6 = vld [vmem:[#allocation40_spill] sm:$0xff]  ;;  %v2464_v24 = vmul.f32 %v5772_v33, %v5772_v33 }
 0x361   :  { %v5786_v35 = vsub.f32 %v6650_v6, %v5579_v2 }
 0x362   :  { %v2544_v54 = vadd.f32 %v2543_v37, %v2542_v4  ;;  %v5793_v37 = vsub.f32 %v6651_v55, %v5579_v2  ;;  %v2553_v18 = vsel %vm1298_vm0, %v2464_v24, 0.0  ;;  %v6657_v55 = vld [vmem:[#allocation44_spill] sm:$0xff] }
 0x363   :  { %v2466_v12 = vmul.f32 %v5786_v35, %v5786_v35 }
 0x364   :  { %v2546_v52 = vadd.f32 %v2545_v14, %v2544_v54  ;;  %6652 = vst [vmem:[#allocation4_spill] sm:$0xff] %v5793_v37  ;;  %v2465_v54 = vmul.f32 %v5779_v16, %v5779_v16  ;;  %v6653_v14 = vld [vmem:[#allocation42_spill] sm:$0xff] }
 0x365   :  { %v2557_v24 = vsel %vm1298_vm0, %v2466_v12, 0.0 }
 0x366   :  { %v2548_v20 = vadd.f32 %v2547_v36, %v2546_v52  ;;  %v5800_v52 = vsub.f32 %v6653_v14, %v5579_v2  ;;  %v2555_v34 = vsel %vm1298_vm0, %v2465_v54, 0.0 }
 0x368   :  { %v2550_v4 = vadd.f32 %v2549_v7, %v2548_v20  ;;  %6654 = vst [vmem:[#allocation5_spill] sm:$0xff] %v5800_v52  ;;  %v6655_v20 = vld [vmem:[#allocation43_spill] sm:$0xff]  ;;  %v2467_v7 = vmul.f32 %v5793_v37, %v5793_v37  ;;  %v2468_v14 = vmul.f32 %v5800_v52, %v5800_v52 }
 0x369   :  { %v5807_v6 = vsub.f32 %v6655_v20, %v5579_v2 }
 0x36a   :  { %v2552_v45 = vadd.f32 %v2551_v5, %v2550_v4  ;;  %v5814_v5 = vsub.f32 %v6657_v55, %v5579_v2  ;;  %v2559_v54 = vsel %vm1298_vm0, %v2467_v7, 0.0  ;;  %v2561_v12 = vsel %vm1298_vm0, %v2468_v14, 0.0 }
 0x36b   :  { %6656 = vst [vmem:[#allocation6_spill] sm:$0xff] %v5807_v6  ;;  %v2469_v37 = vmul.f32 %v5807_v6, %v5807_v6 }
 0x36c   :  { %v2554_v36 = vadd.f32 %v2553_v18, %v2552_v45  ;;  %6658 = vst [vmem:[#allocation14_spill] sm:$0xff] %v5814_v5  ;;  %v6659_v18 = vld [vmem:[#allocation45_spill] sm:$0xff]  ;;  %v2470_v52 = vmul.f32 %v5814_v5, %v5814_v5 }
 0x36d   :  { %v5821_v20 = vsub.f32 %v6659_v18, %v5579_v2  ;;  %v2563_v7 = vsel %vm1298_vm0, %v2469_v37, 0.0 }
 0x36e   :  { %v2556_v4 = vadd.f32 %v2555_v34, %v2554_v36  ;;  %v6661_v34 = vld [vmem:[#allocation46_spill] sm:$0xff]  ;;  %v2565_v14 = vsel %vm1298_vm0, %v2470_v52, 0.0 }
 0x36f   :  { %6660 = vst [vmem:[#allocation7_spill] sm:$0xff] %v5821_v20  ;;  %v5828_v55 = vsub.f32 %v6661_v34, %v5579_v2  ;;  %v2471_v6 = vmul.f32 %v5821_v20, %v5821_v20 }
 0x370   :  { %v2558_v45 = vadd.f32 %v2557_v24, %v2556_v4  ;;  %v6663_v24 = vld [vmem:[#allocation47_spill] sm:$0xff] }
 0x371   :  { %6662 = vst [vmem:[#allocation8_spill] sm:$0xff] %v5828_v55  ;;  %v5835_v18 = vsub.f32 %v6663_v24, %v5579_v2  ;;  %v2472_v5 = vmul.f32 %v5828_v55, %v5828_v55  ;;  %v2567_v37 = vsel %vm1298_vm0, %v2471_v6, 0.0 }
 0x372   :  { %v2560_v36 = vadd.f32 %v2559_v54, %v2558_v45  ;;  %v6665_v54 = vld [vmem:[#allocation48_spill] sm:$0xff] }
 0x373   :  { %6664 = vst [vmem:[#allocation9_spill] sm:$0xff] %v5835_v18  ;;  %v5842_v34 = vsub.f32 %v6665_v54, %v5579_v2  ;;  %v2473_v20 = vmul.f32 %v5835_v18, %v5835_v18  ;;  %v2569_v52 = vsel %vm1298_vm0, %v2472_v5, 0.0 }
 0x374   :  { %v2562_v4 = vadd.f32 %v2561_v12, %v2560_v36  ;;  %v6667_v12 = vld [vmem:[#allocation49_spill] sm:$0xff] }
 0x375   :  { %6666 = vst [vmem:[#allocation10_spill] sm:$0xff] %v5842_v34  ;;  %v5849_v24 = vsub.f32 %v6667_v12, %v5579_v2  ;;  %v2474_v55 = vmul.f32 %v5842_v34, %v5842_v34  ;;  %v2571_v6 = vsel %vm1298_vm0, %v2473_v20, 0.0 }
 0x376   :  { %v2564_v45 = vadd.f32 %v2563_v7, %v2562_v4  ;;  %v6669_v7 = vld [vmem:[#allocation50_spill] sm:$0xff] }
 0x377   :  { %6668 = vst [vmem:[#allocation11_spill] sm:$0xff] %v5849_v24  ;;  %v5856_v54 = vsub.f32 %v6669_v7, %v5579_v2  ;;  %v2475_v18 = vmul.f32 %v5849_v24, %v5849_v24  ;;  %v2573_v5 = vsel %vm1298_vm0, %v2474_v55, 0.0 }
 0x378   :  { %v2566_v36 = vadd.f32 %v2565_v14, %v2564_v45  ;;  %v6671_v14 = vld [vmem:[#allocation51_spill] sm:$0xff] }
 0x379   :  { %6670 = vst [vmem:[#allocation13_spill] sm:$0xff] %v5856_v54  ;;  %v5863_v12 = vsub.f32 %v6671_v14, %v5579_v2  ;;  %v2476_v34 = vmul.f32 %v5856_v54, %v5856_v54  ;;  %v2575_v20 = vsel %vm1298_vm0, %v2475_v18, 0.0 }
 0x37a   :  { %v2568_v4 = vadd.f32 %v2567_v37, %v2566_v36  ;;  %v6672_v37 = vld [vmem:[#allocation52_spill] sm:$0xff] }
 0x37b   :  { %v5870_v7 = vsub.f32 %v6672_v37, %v5579_v2  ;;  %v2477_v24 = vmul.f32 %v5863_v12, %v5863_v12  ;;  %v2577_v55 = vsel %vm1298_vm0, %v2476_v34, 0.0 }
 0x37c   :  { %v2570_v45 = vadd.f32 %v2569_v52, %v2568_v4  ;;  %v6674_v52 = vld [vmem:[#allocation53_spill] sm:$0xff] }
 0x37d   :  { %6673 = vst [vmem:[#allocation15_spill] sm:$0xff] %v5870_v7  ;;  %v5877_v14 = vsub.f32 %v6674_v52, %v5579_v2  ;;  %v2478_v54 = vmul.f32 %v5870_v7, %v5870_v7  ;;  %v2579_v18 = vsel %vm1298_vm0, %v2477_v24, 0.0 }
 0x37e   :  { %v2572_v36 = vadd.f32 %v2571_v6, %v2570_v45  ;;  %v6676_v6 = vld [vmem:[#allocation12_spill] sm:$0xff] }
 0x37f   :  { %6675 = vst [vmem:[#allocation17_spill] sm:$0xff] %v5877_v14  ;;  %v5884_v37 = vsub.f32 %v6676_v6, %v5579_v2  ;;  %v2479_v52 = vmul.f32 %v5877_v14, %v5877_v14  ;;  %v2581_v34 = vsel %vm1298_vm0, %v2478_v54, 0.0 }
 0x380   :  { %v2574_v4 = vadd.f32 %v2573_v5, %v2572_v36  ;;  %v5891_v5 = vsub.f32 %v6618_v61, %v5579_v2 }
 0x381   :  { %v2480_v7 = vmul.f32 %v5884_v37, %v5884_v37  ;;  %v2583_v24 = vsel %vm1298_vm0, %v2479_v52, 0.0 }
 0x382   :  { %v2576_v45 = vadd.f32 %v2575_v20, %v2574_v4  ;;  %v6677_v20 = vld [vmem:[#allocation16_spill] sm:$0xff]  ;;  %v2481_v14 = vmul.f32 %v5891_v5, %v5891_v5 }
 0x383   :  { %v5898_v6 = vsub.f32 %v6677_v20, %v5579_v2  ;;  %v2585_v54 = vsel %vm1298_vm0, %v2480_v7, 0.0 }
 0x384   :  { %v2578_v36 = vadd.f32 %v2577_v55, %v2576_v45  ;;  %v6679_v55 = vld [vmem:[#allocation18_spill] sm:$0xff]  ;;  %v2587_v52 = vsel %vm1298_vm0, %v2481_v14, 0.0 }
 0x385   :  { %6678 = vst [vmem:[#allocation19_spill] sm:$0xff] %v5898_v6  ;;  %v5905_v61 = vsub.f32 %v6679_v55, %v5579_v2  ;;  %v2482_v20 = vmul.f32 %v5898_v6, %v5898_v6 }
 0x386   :  { %v2580_v4 = vadd.f32 %v2579_v18, %v2578_v36  ;;  %v5912_v18 = vsub.f32 %v5347_v15, %v5579_v2 }
 0x387   :  { %v2483_v55 = vmul.f32 %v5905_v61, %v5905_v61  ;;  %v2589_v7 = vsel %vm1298_vm0, %v2482_v20, 0.0 }
 0x388   :  { %v2582_v45 = vadd.f32 %v2581_v34, %v2580_v4  ;;  %v5919_v34 = vsub.f32 %v5350_v59, %v5579_v2  ;;  %v2484_v6 = vmul.f32 %v5912_v18, %v5912_v18  ;;  %v5933_v59 = vsub.f32 %v5372_v1, %v5579_v2 }
 0x389   :  { %v2591_v14 = vsel %vm1298_vm0, %v2483_v55, 0.0  ;;  %v5947_v1 = vsub.f32 %v5394_v25, %v5579_v2  ;;  %v5961_v25 = vsub.f32 %v5529_v28, %v5579_v2  ;;  %v5975_v28 = vsub.f32 %v5545_v42, %v5579_v2 }
 0x38a   :  { %v2584_v36 = vadd.f32 %v2583_v24, %v2582_v45  ;;  %v6680_v24 = vld [vmem:[#allocation20_spill] sm:$0xff]  ;;  %v2593_v20 = vsel %vm1298_vm0, %v2484_v6, 0.0  ;;  %v5989_v42 = vsub.f32 %v5559_v11, %v5579_v2 }
 0x38b   :  { %v5926_v15 = vsub.f32 %v6680_v24, %v5579_v2 }
 0x38c   :  { %v2586_v4 = vadd.f32 %v2585_v54, %v2584_v36  ;;  %v2485_v54 = vmul.f32 %v5919_v34, %v5919_v34  ;;  %6683 = vst [vmem:[#allocation25_spill] sm:$0xff] %v5989_v42  ;;  %v2495_v11 = vmul.f32 %v5989_v42, %v5989_v42 }
 0x38d   :  { %v2486_v24 = vmul.f32 %v5926_v15, %v5926_v15 }
 0x38e   :  { %v2588_v45 = vadd.f32 %v2587_v52, %v2586_v4  ;;  %v5940_v52 = vsub.f32 %v5383_v13, %v5579_v2  ;;  %v2595_v55 = vsel %vm1298_vm0, %v2485_v54, 0.0  ;;  %v5954_v13 = vsub.f32 %v5409_v0, %v5579_v2 }
 0x38f   :  { %v2597_v6 = vsel %vm1298_vm0, %v2486_v24, 0.0  ;;  %v5968_v0 = vsub.f32 %v5536_v41, %v5579_v2  ;;  %v5982_v41 = vsub.f32 %v5552_v62, %v5579_v2  ;;  %v5996_v62 = vsub.f32 %v5564_v40, %v5579_v2 }
 0x390   :  { %v2590_v36 = vadd.f32 %v2589_v7, %v2588_v45  ;;  %v2487_v7 = vmul.f32 %v5933_v59, %v5933_v59  ;;  %v2497_v40 = vmul.f32 %v5582_v29, %v5582_v29  ;;  %v2615_v2 = vsel %vm1298_vm0, %v2495_v11, 0.0 }
 0x391   :  { %6681 = vst [vmem:[#allocation21_spill] sm:$0xff] %v5968_v0  ;;  %v2501_v11 = vmul.f32 %v5594_v56, %v5594_v56 }
 0x392   :  { %v2592_v4 = vadd.f32 %v2591_v14, %v2590_v36  ;;  %v2488_v14 = vmul.f32 %v5940_v52, %v5940_v52  ;;  %v2599_v54 = vsel %vm1298_vm0, %v2487_v7, 0.0  ;;  %6682 = vst [vmem:[#allocation23_spill] sm:$0xff] %v5982_v41 }
 0x393   :  { %6684 = vst [vmem:[#allocation26_spill] sm:$0xff] %v5996_v62 }
 0x394   :  { %v2594_v45 = vadd.f32 %v2593_v20, %v2592_v4  ;;  %v2489_v20 = vmul.f32 %v5947_v1, %v5947_v1  ;;  %v2601_v24 = vsel %vm1298_vm0, %v2488_v14, 0.0 }
 0x396   :  { %v2596_v36 = vadd.f32 %v2595_v55, %v2594_v45  ;;  %v2490_v55 = vmul.f32 %v5954_v13, %v5954_v13  ;;  %v2603_v7 = vsel %vm1298_vm0, %v2489_v20, 0.0 }
 0x398   :  { %v2598_v4 = vadd.f32 %v2597_v6, %v2596_v36  ;;  %v2491_v6 = vmul.f32 %v5961_v25, %v5961_v25  ;;  %v2605_v14 = vsel %vm1298_vm0, %v2490_v55, 0.0 }
 0x39a   :  { %v2600_v45 = vadd.f32 %v2599_v54, %v2598_v4  ;;  %v2492_v54 = vmul.f32 %v5968_v0, %v5968_v0  ;;  %v2607_v20 = vsel %vm1298_vm0, %v2491_v6, 0.0  ;;  %v2496_v6 = vmul.f32 %v5996_v62, %v5996_v62 }
 0x39c   :  { %v2602_v36 = vadd.f32 %v2601_v24, %v2600_v45  ;;  %v2493_v24 = vmul.f32 %v5975_v28, %v5975_v28  ;;  %v2609_v55 = vsel %vm1298_vm0, %v2492_v54, 0.0  ;;  %v2498_v54 = vmul.f32 %v5585_v60, %v5585_v60 }
 0x39e   :  { %v2604_v4 = vadd.f32 %v2603_v7, %v2602_v36  ;;  %v2494_v7 = vmul.f32 %v5982_v41, %v5982_v41 }
 0x3a0   :  { %v2606_v45 = vadd.f32 %v2605_v14, %v2604_v4  ;;  %v2611_v14 = vsel %vm1298_vm0, %v2493_v24, 0.0  ;;  %v2499_v24 = vmul.f32 %v5588_v30, %v5588_v30 }
 0x3a2   :  { %v2608_v36 = vadd.f32 %v2607_v20, %v2606_v45  ;;  %v2613_v45 = vsel %vm1298_vm0, %v2494_v7, 0.0  ;;  %v2621_v7 = vsel %vm1298_vm0, %v2498_v54, 0.0 }
 0x3a4   :  { %v2610_v4 = vadd.f32 %v2609_v55, %v2608_v36  ;;  %v2617_v36 = vsel %vm1298_vm0, %v2496_v6, 0.0 }
 0x3a6   :  { %v2612_v0 = vadd.f32 %v2611_v14, %v2610_v4  ;;  %v2619_v4 = vsel %vm1298_vm0, %v2497_v40, 0.0 }
 0x3a8   :  { %v2614_v20 = vadd.f32 %v2613_v45, %v2612_v0  ;;  %v2500_v0 = vmul.f32 %v5591_v58, %v5591_v58 }
 0x3aa   :  { %v2616_v41 = vadd.f32 %v2615_v2, %v2614_v20  ;;  %v2623_v20 = vsel %vm1298_vm0, %v2499_v24, 0.0 }
 0x3ac   :  { %v2618_v55 = vadd.f32 %v2617_v36, %v2616_v41  ;;  %v2625_v41 = vsel %vm1298_vm0, %v2500_v0, 0.0  ;;  %v2627_v36 = vsel %vm1298_vm0, %v2501_v11, 0.0 }
 0x3ae   :  { %v2620_v14 = vadd.f32 %v2619_v4, %v2618_v55 }
 0x3b0   :  { %v2622_v45 = vadd.f32 %v2621_v7, %v2620_v14 }
 0x3b2   :  { %v2624_v2 = vadd.f32 %v2623_v20, %v2622_v45 }
 0x3b4   :  { %v2626_v6 = vadd.f32 %v2625_v41, %v2624_v2 }
 0x3b6   :  { %v2628_v30 = vadd.f32 %v2627_v36, %v2626_v6 }
 0x3b8   :  { %v2629_v40 = vrot.slane %v2628_v30, 4 }
 0x3ba   :  { %v2630_v55 = vadd.f32 %v2629_v40, %v2628_v30  ;;  %v2636_v30 = vld [vmem:[%s6488_s2] sm:$0x1] }
 0x3bc   :  { %v2631_v4 = vrot.slane %v2630_v55, 2 }
 0x3be   :  { %v2632_v60 = vadd.f32 %v2631_v4, %v2630_v55 }
 0x3c0   :  { %v2633_v58 = vrot.slane %v2632_v60, 1 }
 0x3c2   :  { %v2634_v29 = vadd.f32 %v2633_v58, %v2632_v60 }
 0x3c4   :  { %v2635_v54 = vmul.f32 0.001953125, %v2634_v29 }
 0x3c6   :  { %v2637_v14 = vadd.f32 1e-05, %v2635_v54 }
 0x3c8   :  { %3953 = vrsqrt.f32 %v2637_v14  ;;  %vm2644_vm2 = vweird.f32 %v2637_v14 }
 0x3ce   :  { %v3954_v7 = vpop.eup %3953 }
 0x3cf   :  { %v2639_v62 = vmul.f32 %v3954_v7, %v2637_v14  ;;  %vm2645_vm1 = vweird.f32 %v3954_v7 }
 0x3d0   :  { %vm2646_vm3 = vmor %vm2644_vm2, %vm2645_vm1 }
 0x3d1   :  { %v2640_v42 = vmul.f32 %v3954_v7, %v2639_v62 }
 0x3d3   :  { %v2641_v24 = vmul.f32 0.5, %v2640_v42  ;;  %v6038_v42 = vld [vmem:[%s6487_s3] ss:$0 sm:$0xff] }
 0x3d5   :  { %v2642_v45 = vsub.f32 1.5, %v2641_v24 }
 0x3d7   :  { %v2643_v20 = vmul.f32 %v3954_v7, %v2642_v45 }
 0x3d9   :  { %v2647_v0 = vsel %vm2646_vm3, %v3954_v7, %v2643_v20 }
 0x3da   :  { %v2648_v11 = vmul.f32 %v2647_v0, %v2636_v30 }
 0x3dc   :  { %v6027_v2 = vperm.slane %v2648_v11, 0 }
 0x3de   :  { %v2652_v29 = vmul.f32 %v6027_v2, %v5598_v43  ;;  %v2653_v60 = vmul.f32 %v6027_v2, %v5602_v53  ;;  %v2654_v58 = vmul.f32 %v6027_v2, %v5606_v39  ;;  %v2655_v62 = vmul.f32 %v6027_v2, %v5610_v38 }
 0x3df   :  { %v2656_v41 = vmul.f32 %v6027_v2, %v5618_v22  ;;  %v2657_v43 = vmul.f32 %v6027_v2, %v5624_v17  ;;  %v2715_v53 = vmul.f32 %v6027_v2, %v5594_v56  ;;  %v2658_v39 = vmul.f32 %v6027_v2, %v5632_v27 }
 0x3e0   :  { %v2720_v6 = vadd.f32 %v6038_v42, %v2652_v29  ;;  %v2721_v36 = vadd.f32 %v6038_v42, %v2653_v60  ;;  %v2722_v40 = vadd.f32 %v6038_v42, %v2654_v58  ;;  %v2659_v38 = vmul.f32 %v6027_v2, %v5639_v32 }
 0x3e1   :  { %v2723_v22 = vadd.f32 %v6038_v42, %v2655_v62  ;;  %v2660_v17 = vmul.f32 %v6027_v2, %v5646_v57  ;;  %v2724_v55 = vadd.f32 %v6038_v42, %v2656_v41  ;;  %v2661_v56 = vmul.f32 %v6027_v2, %v5653_v26 }
 0x3e2   :  { %v2662_v27 = vmul.f32 %v6027_v2, %v5660_v44  ;;  %v2725_v4 = vadd.f32 %v6038_v42, %v2657_v43  ;;  %v6065_v54 = vadd.f32 %v6038_v42, %v2715_v53  ;;  %v2726_v32 = vadd.f32 %v6038_v42, %v2658_v39 }
 0x3e3   :  { %v2784_v14 = vmax.f32 %v2720_v6, 0.0  ;;  %v2785_v7 = vmax.f32 %v2721_v36, 0.0  ;;  %v2786_v24 = vmax.f32 %v2722_v40, 0.0  ;;  %v2663_v57 = vmul.f32 %v6027_v2, %v5667_v51 }
 0x3e4   :  { %v2727_v45 = vadd.f32 %v6038_v42, %v2659_v38  ;;  %v2787_v20 = vmax.f32 %v2723_v22, 0.0  ;;  %v2664_v26 = vmul.f32 %v6027_v2, %v5674_v47  ;;  %v2728_v44 = vadd.f32 %v6038_v42, %v2660_v17 }
 0x3e5   :  { %v2788_v30 = vmax.f32 %v2724_v55, 0.0  ;;  %2848 = vst.msk [vmem:[%s6489_s4] sm:$0xff] %vm1298_vm0, %v2784_v14  ;;  %v2665_v0 = vmul.f32 %v6027_v2, %v5681_v19  ;;  %v2729_v11 = vadd.f32 %v6038_v42, %v2661_v56  ;;  %v2789_v51 = vmax.f32 %v2725_v4, 0.0 }
 0x3e6   :  { %2849 = vst.msk [vmem:[%s6489_s4 + $0x8] sm:$0xff] %vm1298_vm0, %v2785_v7  ;;  %v2666_v47 = vmul.f32 %v6027_v2, %v5688_v50  ;;  %v2730_v29 = vadd.f32 %v6038_v42, %v2662_v27  ;;  %v2790_v60 = vmax.f32 %v2726_v32, 0.0  ;;  %v2667_v19 = vmul.f32 %v6027_v2, %v5695_v31 }
 0x3e7   :  { %2850 = vst.msk [vmem:[%s6489_s4 + $0x10] sm:$0xff] %vm1298_vm0, %v2786_v24  ;;  %v2731_v58 = vadd.f32 %v6038_v42, %v2663_v57  ;;  %v2791_v62 = vmax.f32 %v2727_v45, 0.0  ;;  %v2668_v50 = vmul.f32 %v6027_v2, %v5702_v9  ;;  %v2732_v41 = vadd.f32 %v6038_v42, %v2664_v26 }
 0x3e8   :  { %2851 = vst.msk [vmem:[%s6489_s4 + $0x18] sm:$0xff] %vm1298_vm0, %v2787_v20  ;;  %v2792_v43 = vmax.f32 %v2728_v44, 0.0  ;;  %v2669_v31 = vmul.f32 %v6027_v2, %v5709_v46  ;;  %v2733_v53 = vadd.f32 %v6038_v42, %v2665_v0  ;;  %v2793_v39 = vmax.f32 %v2729_v11, 0.0 }
 0x3e9   :  { %2852 = vst.msk [vmem:[%s6489_s4 + $0x20] sm:$0xff] %vm1298_vm0, %v2788_v30  ;;  %v2670_v9 = vmul.f32 %v6027_v2, %v5716_v21  ;;  %v2734_v6 = vadd.f32 %v6038_v42, %v2666_v47  ;;  %v2794_v36 = vmax.f32 %v2730_v29, 0.0  ;;  %v2671_v46 = vmul.f32 %v6027_v2, %v5723_v3 }
 0x3ea   :  { %2853 = vst.msk [vmem:[%s6489_s4 + $0x28] sm:$0xff] %vm1298_vm0, %v2789_v51  ;;  %v2735_v40 = vadd.f32 %v6038_v42, %v2667_v19  ;;  %v2795_v38 = vmax.f32 %v2731_v58, 0.0  ;;  %v2672_v21 = vmul.f32 %v6027_v2, %v5730_v8  ;;  %v2736_v22 = vadd.f32 %v6038_v42, %v2668_v50 }
 0x3eb   :  { %2854 = vst.msk [vmem:[%s6489_s4 + $0x30] sm:$0xff] %vm1298_vm0, %v2790_v60  ;;  %v2796_v17 = vmax.f32 %v2732_v41, 0.0  ;;  %v2673_v3 = vmul.f32 %v6027_v2, %v5737_v23  ;;  %v2737_v55 = vadd.f32 %v6038_v42, %v2669_v31  ;;  %v2797_v56 = vmax.f32 %v2733_v53, 0.0  ;;  %v6688_v31 = vld [vmem:[#allocation14_spill] sm:$0xff] }
 0x3ec   :  { %2855 = vst.msk [vmem:[%s6489_s4 + $0x38] sm:$0xff] %vm1298_vm0, %v2791_v62  ;;  %v2674_v8 = vmul.f32 %v6027_v2, %v5744_v10  ;;  %v2738_v27 = vadd.f32 %v6038_v42, %v2670_v9  ;;  %v2798_v4 = vmax.f32 %v2734_v6, 0.0  ;;  %v2675_v23 = vmul.f32 %v6027_v2, %v5751_v63  ;;  %v6687_v62 = vld [vmem:[#allocation6_spill] sm:$0xff]  ;;  %v6689_v6 = vld [vmem:[#allocation7_spill] sm:$0xff] }
 0x3ed   :  { %2856 = vst.msk [vmem:[%s6489_s4 + $0x40] sm:$0xff] %vm1298_vm0, %v2792_v43  ;;  %v2739_v32 = vadd.f32 %v6038_v42, %v2671_v46  ;;  %v2799_v14 = vmax.f32 %v2735_v40, 0.0  ;;  %v2676_v10 = vmul.f32 %v6027_v2, %v5758_v48  ;;  %v2740_v7 = vadd.f32 %v6038_v42, %v2672_v21 }
 0x3ee   :  { %2857 = vst.msk [vmem:[%s6489_s4 + $0x48] sm:$0xff] %vm1298_vm0, %v2793_v39  ;;  %v2800_v24 = vmax.f32 %v2736_v22, 0.0  ;;  %v2677_v63 = vmul.f32 %v6027_v2, %v5765_v49  ;;  %v2741_v57 = vadd.f32 %v6038_v42, %v2673_v3  ;;  %v2801_v45 = vmax.f32 %v2737_v55, 0.0  ;;  %v6691_v3 = vld [vmem:[#allocation9_spill] sm:$0xff] }
 0x3ef   :  { %2858 = vst.msk [vmem:[%s6489_s4 + $0x50] sm:$0xff] %vm1298_vm0, %v2794_v36  ;;  %v2678_v48 = vmul.f32 %v6027_v2, %v5772_v33  ;;  %v2742_v20 = vadd.f32 %v6038_v42, %v2674_v8  ;;  %v2802_v26 = vmax.f32 %v2738_v27, 0.0  ;;  %v2679_v49 = vmul.f32 %v6027_v2, %v5779_v16  ;;  %v6685_v16 = vld [vmem:[#allocation4_spill] sm:$0xff]  ;;  %v6692_v27 = vld [vmem:[#allocation10_spill] sm:$0xff] }
 0x3f0   :  { %2859 = vst.msk [vmem:[%s6489_s4 + $0x58] sm:$0xff] %vm1298_vm0, %v2795_v38  ;;  %v2743_v44 = vadd.f32 %v6038_v42, %v2675_v23  ;;  %v2803_v30 = vmax.f32 %v2739_v32, 0.0  ;;  %v2680_v33 = vmul.f32 %v6027_v2, %v5786_v35  ;;  %v2744_v0 = vadd.f32 %v6038_v42, %v2676_v10  ;;  %v6686_v35 = vld [vmem:[#allocation5_spill] sm:$0xff]  ;;  %v6690_v38 = vld [vmem:[#allocation8_spill] sm:$0xff] }
 0x3f1   :  { %2860 = vst.msk [vmem:[%s6489_s4 + $0x60] sm:$0xff] %vm1298_vm0, %v2796_v17  ;;  %v2804_v11 = vmax.f32 %v2740_v7, 0.0  ;;  %v2681_v51 = vmul.f32 %v6027_v2, %v6685_v16  ;;  %v2745_v47 = vadd.f32 %v6038_v42, %v2677_v63  ;;  %v2805_v29 = vmax.f32 %v2741_v57, 0.0  ;;  %v6694_v63 = vld [vmem:[#allocation13_spill] sm:$0xff] }
 0x3f2   :  { %2861 = vst.msk [vmem:[%s6489_s4 + $0x68] sm:$0xff] %vm1298_vm0, %v2797_v56  ;;  %v2682_v60 = vmul.f32 %v6027_v2, %v6686_v35  ;;  %v2746_v19 = vadd.f32 %v6038_v42, %v2678_v48  ;;  %v2806_v58 = vmax.f32 %v2742_v20, 0.0  ;;  %v2683_v50 = vmul.f32 %v6027_v2, %v6687_v62 }
 0x3f3   :  { %2862 = vst.msk [vmem:[%s6489_s4 + $0x70] sm:$0xff] %vm1298_vm0, %v2798_v4  ;;  %v2747_v41 = vadd.f32 %v6038_v42, %v2679_v49  ;;  %v2807_v43 = vmax.f32 %v2743_v44, 0.0  ;;  %v2684_v53 = vmul.f32 %v6027_v2, %v6688_v31  ;;  %v2748_v39 = vadd.f32 %v6038_v42, %v2680_v33  ;;  %v6695_v44 = vld [vmem:[#allocation15_spill] sm:$0xff] }
 0x3f4   :  { %2863 = vst.msk [vmem:[%s6489_s4 + $0x78] sm:$0xff] %vm1298_vm0, %v2799_v14  ;;  %v2808_v9 = vmax.f32 %v2744_v0, 0.0  ;;  %v2685_v36 = vmul.f32 %v6027_v2, %v6689_v6  ;;  %v2749_v46 = vadd.f32 %v6038_v42, %v2681_v51  ;;  %v2809_v40 = vmax.f32 %v2745_v47, 0.0  ;;  %v6693_v14 = vld [vmem:[#allocation11_spill] sm:$0xff] }
 0x3f5   :  { %2864 = vst.msk [vmem:[%s6489_s4 + $0x80] sm:$0xff] %vm1298_vm0, %v2800_v24  ;;  %v2686_v21 = vmul.f32 %v6027_v2, %v6690_v38  ;;  %v2750_v22 = vadd.f32 %v6038_v42, %v2682_v60  ;;  %v2810_v17 = vmax.f32 %v2746_v19, 0.0  ;;  %v2687_v55 = vmul.f32 %v6027_v2, %v6691_v3 }
 0x3f6   :  { %2865 = vst.msk [vmem:[%s6489_s4 + $0x88] sm:$0xff] %vm1298_vm0, %v2801_v45  ;;  %v2751_v56 = vadd.f32 %v6038_v42, %v2683_v50  ;;  %v2811_v8 = vmax.f32 %v2747_v41, 0.0  ;;  %v2688_v4 = vmul.f32 %v6027_v2, %v6692_v27  ;;  %v2752_v23 = vadd.f32 %v6038_v42, %v2684_v53 }
 0x3f7   :  { %2866 = vst.msk [vmem:[%s6489_s4 + $0x90] sm:$0xff] %vm1298_vm0, %v2802_v26  ;;  %v2812_v32 = vmax.f32 %v2748_v39, 0.0  ;;  %v2689_v10 = vmul.f32 %v6027_v2, %v6693_v14  ;;  %v2753_v7 = vadd.f32 %v6038_v42, %v2685_v36  ;;  %v2813_v24 = vmax.f32 %v2749_v46, 0.0 }
 0x3f8   :  { %2867 = vst.msk [vmem:[%s6489_s4 + $0x98] sm:$0xff] %vm1298_vm0, %v2803_v30  ;;  %v2690_v57 = vmul.f32 %v6027_v2, %v6694_v63  ;;  %v2754_v45 = vadd.f32 %v6038_v42, %v2686_v21  ;;  %v2814_v48 = vmax.f32 %v2750_v22, 0.0  ;;  %v2691_v20 = vmul.f32 %v6027_v2, %v5863_v12  ;;  %v6696_v12 = vld [vmem:[#allocation17_spill] sm:$0xff] }
 0x3f9   :  { %2868 = vst.msk [vmem:[%s6489_s4 + $0xa0] sm:$0xff] %vm1298_vm0, %v2804_v11  ;;  %v2755_v26 = vadd.f32 %v6038_v42, %v2687_v55  ;;  %v2815_v49 = vmax.f32 %v2751_v56, 0.0  ;;  %v2692_v30 = vmul.f32 %v6027_v2, %v6695_v44  ;;  %v2756_v33 = vadd.f32 %v6038_v42, %v2688_v4 }
 0x3fa   :  { %2869 = vst.msk [vmem:[%s6489_s4 + $0xa8] sm:$0xff] %vm1298_vm0, %v2805_v29  ;;  %v2816_v0 = vmax.f32 %v2752_v23, 0.0  ;;  %v2693_v11 = vmul.f32 %v6027_v2, %v6696_v12  ;;  %v2757_v16 = vadd.f32 %v6038_v42, %v2689_v10  ;;  %v2817_v51 = vmax.f32 %v2753_v7, 0.0 }
 0x3fb   :  { %2870 = vst.msk [vmem:[%s6489_s4 + $0xb0] sm:$0xff] %vm1298_vm0, %v2806_v58  ;;  %v2694_v47 = vmul.f32 %v6027_v2, %v5884_v37  ;;  %v2758_v29 = vadd.f32 %v6038_v42, %v2690_v57  ;;  %v2818_v35 = vmax.f32 %v2754_v45, 0.0  ;;  %v2695_v60 = vmul.f32 %v6027_v2, %v5891_v5  ;;  %v6697_v37 = vld [vmem:[#allocation19_spill] sm:$0xff] }
 0x3fc   :  { %2871 = vst.msk [vmem:[%s6489_s4 + $0xb8] sm:$0xff] %vm1298_vm0, %v2807_v43  ;;  %v2759_v19 = vadd.f32 %v6038_v42, %v2691_v20  ;;  %v2819_v58 = vmax.f32 %v2755_v26, 0.0  ;;  %v2696_v62 = vmul.f32 %v6027_v2, %v6697_v37  ;;  %v2760_v50 = vadd.f32 %v6038_v42, %v2692_v30 }
 0x3fd   :  { %2872 = vst.msk [vmem:[%s6489_s4 + $0xc0] sm:$0xff] %vm1298_vm0, %v2808_v9  ;;  %v2820_v41 = vmax.f32 %v2756_v33, 0.0  ;;  %v2697_v5 = vmul.f32 %v6027_v2, %v5905_v61  ;;  %v2761_v43 = vadd.f32 %v6038_v42, %v2693_v11  ;;  %v2821_v31 = vmax.f32 %v2757_v16, 0.0 }
 0x3fe   :  { %2873 = vst.msk [vmem:[%s6489_s4 + $0xc8] sm:$0xff] %vm1298_vm0, %v2809_v40  ;;  %v2698_v53 = vmul.f32 %v6027_v2, %v5912_v18  ;;  %v2762_v39 = vadd.f32 %v6038_v42, %v2694_v47  ;;  %v2822_v9 = vmax.f32 %v2758_v29, 0.0  ;;  %v2699_v61 = vmul.f32 %v6027_v2, %v5919_v34 }
 0x3ff   :  { %2874 = vst.msk [vmem:[%s6489_s4 + $0xd0] sm:$0xff] %vm1298_vm0, %v2810_v17  ;;  %v2763_v6 = vadd.f32 %v6038_v42, %v2695_v60  ;;  %v2823_v36 = vmax.f32 %v2759_v19, 0.0  ;;  %v2700_v18 = vmul.f32 %v6027_v2, %v5926_v15  ;;  %v2764_v46 = vadd.f32 %v6038_v42, %v2696_v62  ;;  %v6704_v60 = vld [vmem:[#allocation24_spill] sm:$0xff]  ;;  %v6705_v62 = vld [vmem:[#allocation3_spill] sm:$0xff] }
 0x400   :  { %2875 = vst.msk [vmem:[%s6489_s4 + $0xd8] sm:$0xff] %vm1298_vm0, %v2811_v8  ;;  %v2824_v40 = vmax.f32 %v2760_v50, 0.0  ;;  %v2701_v34 = vmul.f32 %v6027_v2, %v5933_v59  ;;  %v2765_v38 = vadd.f32 %v6038_v42, %v2697_v5  ;;  %v2825_v21 = vmax.f32 %v2761_v43, 0.0 }
 0x401   :  { %2876 = vst.msk [vmem:[%s6489_s4 + $0xe0] sm:$0xff] %vm1298_vm0, %v2812_v32  ;;  %v2702_v15 = vmul.f32 %v6027_v2, %v5940_v52  ;;  %v2766_v22 = vadd.f32 %v6038_v42, %v2698_v53  ;;  %v2826_v17 = vmax.f32 %v2762_v39, 0.0  ;;  %v2703_v59 = vmul.f32 %v6027_v2, %v5947_v1 }
 0x402   :  { %2877 = vst.msk [vmem:[%s6489_s4 + $0xe8] sm:$0xff] %vm1298_vm0, %v2813_v24  ;;  %v2767_v3 = vadd.f32 %v6038_v42, %v2699_v61  ;;  %v2827_v55 = vmax.f32 %v2763_v6, 0.0  ;;  %v2704_v52 = vmul.f32 %v6027_v2, %v5954_v13  ;;  %v2768_v56 = vadd.f32 %v6038_v42, %v2700_v18  ;;  %v6698_v13 = vld [vmem:[#allocation21_spill] sm:$0xff]  ;;  %v6699_v24 = vld [vmem:[#allocation23_spill] sm:$0xff] }
 0x403   :  { %2878 = vst.msk [vmem:[%s6489_s4 + $0xf0] sm:$0xff] %vm1298_vm0, %v2814_v48  ;;  %v2828_v8 = vmax.f32 %v2764_v46, 0.0  ;;  %v2705_v1 = vmul.f32 %v6027_v2, %v5961_v25  ;;  %v2769_v27 = vadd.f32 %v6038_v42, %v2701_v34  ;;  %v2829_v4 = vmax.f32 %v2765_v38, 0.0 }
 0x404   :  { %2879 = vst.msk [vmem:[%s6489_s4 + $0xf8] sm:$0xff] %vm1298_vm0, %v2815_v49  ;;  %v2706_v23 = vmul.f32 %v6027_v2, %v6698_v13  ;;  %v2770_v32 = vadd.f32 %v6038_v42, %v2702_v15  ;;  %v2830_v14 = vmax.f32 %v2766_v22, 0.0  ;;  %v2707_v25 = vmul.f32 %v6027_v2, %v5975_v28  ;;  %v6700_v28 = vld [vmem:[#allocation25_spill] sm:$0xff]  ;;  %v6701_v49 = vld [vmem:[#allocation26_spill] sm:$0xff] }
 0x405   :  { %2880 = vst.msk [vmem:[%s6489_s4 + $0x100] sm:$0xff] %vm1298_vm0, %v2816_v0  ;;  %v2771_v10 = vadd.f32 %v6038_v42, %v2703_v59  ;;  %v2831_v7 = vmax.f32 %v2767_v3, 0.0  ;;  %v2708_v63 = vmul.f32 %v6027_v2, %v6699_v24  ;;  %v2772_v57 = vadd.f32 %v6038_v42, %v2704_v52  ;;  %v6702_v0 = vld [vmem:[#allocation22_spill] sm:$0xff] }
 0x406   :  { %2881 = vst.msk [vmem:[%s6489_s4 + $0x108] sm:$0xff] %vm1298_vm0, %v2817_v51  ;;  %v2832_v45 = vmax.f32 %v2768_v56, 0.0  ;;  %v2709_v48 = vmul.f32 %v6027_v2, %v6700_v28  ;;  %v2773_v20 = vadd.f32 %v6038_v42, %v2705_v1  ;;  %v2833_v26 = vmax.f32 %v2769_v27, 0.0  ;;  %v6703_v51 = vld [vmem:[#allocation2_spill] sm:$0xff] }
 0x407   :  { %2882 = vst.msk [vmem:[%s6489_s4 + $0x110] sm:$0xff] %vm1298_vm0, %v2818_v35  ;;  %v2710_v44 = vmul.f32 %v6027_v2, %v6701_v49  ;;  %v2774_v30 = vadd.f32 %v6038_v42, %v2706_v23  ;;  %v2834_v33 = vmax.f32 %v2770_v32, 0.0  ;;  %v2711_v12 = vmul.f32 %v6027_v2, %v6702_v0 }
 0x408   :  { %2883 = vst.msk [vmem:[%s6489_s4 + $0x118] sm:$0xff] %vm1298_vm0, %v2819_v58  ;;  %v2775_v11 = vadd.f32 %v6038_v42, %v2707_v25  ;;  %v2835_v16 = vmax.f32 %v2771_v10, 0.0  ;;  %v2712_v47 = vmul.f32 %v6027_v2, %v6703_v51  ;;  %v2776_v29 = vadd.f32 %v6038_v42, %v2708_v63 }
 0x409   :  { %2884 = vst.msk [vmem:[%s6489_s4 + $0x120] sm:$0xff] %vm1298_vm0, %v2820_v41  ;;  %v2836_v35 = vmax.f32 %v2772_v57, 0.0  ;;  %v2713_v19 = vmul.f32 %v6027_v2, %v6704_v60  ;;  %v2777_v58 = vadd.f32 %v6038_v42, %v2709_v48  ;;  %v2837_v37 = vmax.f32 %v2773_v20, 0.0 }
 0x40a   :  { %2885 = vst.msk [vmem:[%s6489_s4 + $0x128] sm:$0xff] %vm1298_vm0, %v2821_v31  ;;  %v2714_v50 = vmul.f32 %v6027_v2, %v6705_v62  ;;  %v2778_v41 = vadd.f32 %v6038_v42, %v2710_v44  ;;  %v2838_v5 = vmax.f32 %v2774_v30, 0.0  ;;  %v2779_v43 = vadd.f32 %v6038_v42, %v2711_v12 }
 0x40b   :  { %2886 = vst.msk [vmem:[%s6489_s4 + $0x130] sm:$0xff] %vm1298_vm0, %v2822_v9  ;;  %v2839_v31 = vmax.f32 %v2775_v11, 0.0  ;;  %v2780_v53 = vadd.f32 %v6038_v42, %v2712_v47  ;;  %v2840_v39 = vmax.f32 %v2776_v29, 0.0  ;;  %v2781_v2 = vadd.f32 %v6038_v42, %v2713_v19 }
 0x40c   :  { %2887 = vst.msk [vmem:[%s6489_s4 + $0x138] sm:$0xff] %vm1298_vm0, %v2823_v36  ;;  %v2841_v9 = vmax.f32 %v2777_v58, 0.0  ;;  %v2782_v61 = vadd.f32 %v6038_v42, %v2714_v50  ;;  %v2842_v6 = vmax.f32 %v2778_v41, 0.0  ;;  %v2843_v36 = vmax.f32 %v2779_v43, 0.0 }
 0x40d   :  { %2888 = vst.msk [vmem:[%s6489_s4 + $0x140] sm:$0xff] %vm1298_vm0, %v2824_v40  ;;  %v2844_v18 = vmax.f32 %v2780_v53, 0.0  ;;  %v2845_v46 = vmax.f32 %v2781_v2, 0.0  ;;  %v2847_v40 = vmax.f32 %v6065_v54, 0.0 }
 0x40e   :  { %2889 = vst.msk [vmem:[%s6489_s4 + $0x148] sm:$0xff] %vm1298_vm0, %v2825_v21  ;;  %v2846_v42 = vmax.f32 %v2782_v61, 0.0 }
 0x40f   :  { %2890 = vst.msk [vmem:[%s6489_s4 + $0x150] sm:$0xff] %vm1298_vm0, %v2826_v17 }
 0x410   :  { %2891 = vst.msk [vmem:[%s6489_s4 + $0x158] sm:$0xff] %vm1298_vm0, %v2827_v55 }
 0x411   :  { %2892 = vst.msk [vmem:[%s6489_s4 + $0x160] sm:$0xff] %vm1298_vm0, %v2828_v8 }
 0x412   :  { %2893 = vst.msk [vmem:[%s6489_s4 + $0x168] sm:$0xff] %vm1298_vm0, %v2829_v4 }
 0x413   :  { %2894 = vst.msk [vmem:[%s6489_s4 + $0x170] sm:$0xff] %vm1298_vm0, %v2830_v14 }
 0x414   :  { %2895 = vst.msk [vmem:[%s6489_s4 + $0x178] sm:$0xff] %vm1298_vm0, %v2831_v7 }
 0x415   :  { %2896 = vst.msk [vmem:[%s6489_s4 + $0x180] sm:$0xff] %vm1298_vm0, %v2832_v45 }
 0x416   :  { %2897 = vst.msk [vmem:[%s6489_s4 + $0x188] sm:$0xff] %vm1298_vm0, %v2833_v26 }
 0x417   :  { %2898 = vst.msk [vmem:[%s6489_s4 + $0x190] sm:$0xff] %vm1298_vm0, %v2834_v33 }
 0x418   :  { %2899 = vst.msk [vmem:[%s6489_s4 + $0x198] sm:$0xff] %vm1298_vm0, %v2835_v16 }
 0x419   :  { %2900 = vst.msk [vmem:[%s6489_s4 + $0x1a0] sm:$0xff] %vm1298_vm0, %v2836_v35 }
 0x41a   :  { %2901 = vst.msk [vmem:[%s6489_s4 + $0x1a8] sm:$0xff] %vm1298_vm0, %v2837_v37 }
 0x41b   :  { %2902 = vst.msk [vmem:[%s6489_s4 + $0x1b0] sm:$0xff] %vm1298_vm0, %v2838_v5 }
 0x41c   :  { %2903 = vst.msk [vmem:[%s6489_s4 + $0x1b8] sm:$0xff] %vm1298_vm0, %v2839_v31 }
 0x41d   :  { %2904 = vst.msk [vmem:[%s6489_s4 + $0x1c0] sm:$0xff] %vm1298_vm0, %v2840_v39 }
 0x41e   :  { %2905 = vst.msk [vmem:[%s6489_s4 + $0x1c8] sm:$0xff] %vm1298_vm0, %v2841_v9 }
 0x41f   :  { %2906 = vst.msk [vmem:[%s6489_s4 + $0x1d0] sm:$0xff] %vm1298_vm0, %v2842_v6 }
 0x420   :  { %2907 = vst.msk [vmem:[%s6489_s4 + $0x1d8] sm:$0xff] %vm1298_vm0, %v2843_v36 }
 0x421   :  { %2908 = vst.msk [vmem:[%s6489_s4 + $0x1e0] sm:$0xff] %vm1298_vm0, %v2844_v18 }
 0x422   :  { %2909 = vst.msk [vmem:[%s6489_s4 + $0x1e8] sm:$0xff] %vm1298_vm0, %v2845_v46 }
 0x423   :  { %2910 = vst.msk [vmem:[%s6489_s4 + $0x1f0] sm:$0xff] %vm1298_vm0, %v2846_v42 }
 0x424   :  { %2911 = vst.msk [vmem:[%s6489_s4 + $0x1f8] sm:$0xff] %vm1298_vm0, %v2847_v40 }

// kernel: epistemic_forward.13
= control target key start
LH: loop header
LB: loop body
LE: loop exit
PB: predicated region body
PF: predicated region fallthrough
CT: control target
= control target key end

     0   :  { %vm554_vm0 = vcmask 523264   ;;  %s1976_s1 = inlined_call_operand.vmem [shape: bf16[576,128], index: 1, kind: input, shape index: {}]   ;;  %s1977_s0 = inlined_call_operand.vmem [shape: bf16[128,576], index: 0, kind: input, shape index: {}]   ;;  %s1978_s3 = inlined_call_operand.vmem [shape: f32[1,128], index: 3, kind: input, shape index: {}]   ;;  %s1979_s2 = inlined_call_operand.vmem [shape: f32[1,128], index: 2, kind: input, shape index: {}]   ;;  %s1980_s4 = inlined_call_operand.vmem [shape: f32[128,128], index: 4, kind: output, shape index: {}]  }
   0x1   :  { %v1347_v0 = vld [vmem:[%s1976_s1 + $0x38] sm:$0xff]  ;;  %v1346_v1 = vld [vmem:[%s1976_s1 + $0x30] sm:$0xff]  ;;  %v1345_v2 = vld [vmem:[%s1976_s1 + $0x28] sm:$0xff] }
   0x2   :  { %1376 = vmatpush.bf16.msra.mxu1 %v1347_v0  ;;  %1377 = vmatpush.bf16.msra.mxu2 %v1347_v0  ;;  %v1344_v3 = vld [vmem:[%s1976_s1 + $0x20] sm:$0xff]  ;;  %v1343_v4 = vld [vmem:[%s1976_s1 + $0x18] sm:$0xff]  ;;  %v1342_v5 = vld [vmem:[%s1976_s1 + $0x10] sm:$0xff] }
   0x3   :  { %1378 = vmatpush.bf16.msra.mxu3 %v1347_v0  ;;  %579 = vmatpush.bf16.msra.mxu0 %v1347_v0  ;;  %v1341_v6 = vld [vmem:[%s1976_s1 + $0x8] sm:$0xff]  ;;  %v1340_v7 = vld [vmem:[%s1976_s1] sm:$0xff]  ;;  %v1030_v8 = vld [vmem:[%s1977_s0 + $0x50] sm:$0xf] }
   0x4   :  { %v1312_v9 = vld [vmem:[%s1977_s0 + $0x60] sm:$0xf0]  ;;  %v1070_v10 = vld [vmem:[%s1977_s0 + $0xa0] sm:$0xf]  ;;  %v1322_v11 = vld [vmem:[%s1977_s0 + $0xb0] sm:$0xf0] }
   0x5   :  { %v1110_v12 = vld [vmem:[%s1977_s0 + $0xf0] sm:$0xf]  ;;  %v1332_v13 = vld [vmem:[%s1977_s0 + $0x100] sm:$0xf0]  ;;  %v990_v14 = vld [vmem:[%s1977_s0] sm:$0xf]  ;;  %v1031_v18 = vor.u32 %v1312_v9, %v1030_v8  ;;  %v1071_v19 = vor.u32 %v1322_v11, %v1070_v10 }
   0x6   :  { %1379 = vmatpush.bf16.msra.mxu1 %v1346_v1  ;;  %1380 = vmatpush.bf16.msra.mxu2 %v1346_v1  ;;  %v1302_v15 = vld [vmem:[%s1977_s0 + $0x10] sm:$0xf0]  ;;  %v1363_v16 = vld [vmem:[%s1976_s1 + $0xb8] sm:$0xff]  ;;  %v1111_v20 = vor.u32 %v1332_v13, %v1110_v12  ;;  %v1361_v28 = vld [vmem:[%s1976_s1 + $0xa8] sm:$0xff] }
   0x7   :  { %1381 = vmatpush.bf16.msra.mxu3 %v1346_v1  ;;  %580 = vmatpush.bf16.msra.mxu0 %v1346_v1  ;;  %v1355_v17 = vld [vmem:[%s1976_s1 + $0x78] sm:$0xff]  ;;  %v991_v21 = vor.u32 %v1302_v15, %v990_v14  ;;  %v1362_v24 = vld [vmem:[%s1976_s1 + $0xb0] sm:$0xff]  ;;  %v1353_v29 = vld [vmem:[%s1976_s1 + $0x68] sm:$0xff] }
   0x8   :  { %v1371_v22 = vld [vmem:[%s1976_s1 + $0xf8] sm:$0xff]  ;;  %v1354_v25 = vld [vmem:[%s1976_s1 + $0x70] sm:$0xff]  ;;  %v1369_v30 = vld [vmem:[%s1976_s1 + $0xe8] sm:$0xff] }
   0x9   :  { %v1375_v23 = vld [vmem:[%s1976_s1 + $0x118] sm:$0xff]  ;;  %v1370_v26 = vld [vmem:[%s1976_s1 + $0xf0] sm:$0xff]  ;;  %v1373_v31 = vld [vmem:[%s1976_s1 + $0x108] sm:$0xff] }
   0xa   :  { %1382 = vmatpush.bf16.msra.mxu1 %v1345_v2  ;;  %1383 = vmatpush.bf16.msra.mxu2 %v1345_v2  ;;  %v1374_v27 = vld [vmem:[%s1976_s1 + $0x110] sm:$0xff]  ;;  %v1360_v32 = vld [vmem:[%s1976_s1 + $0xa0] sm:$0xff]  ;;  %v1050_v35 = vld [vmem:[%s1977_s0 + $0x78] sm:$0xf] }
   0xb   :  { %1384 = vmatpush.bf16.msra.mxu3 %v1345_v2  ;;  %581 = vmatpush.bf16.msra.mxu0 %v1345_v2  ;;  %v1352_v33 = vld [vmem:[%s1976_s1 + $0x60] sm:$0xff]  ;;  %v1317_v36 = vld [vmem:[%s1977_s0 + $0x88] sm:$0xf0]  ;;  %v1090_v37 = vld [vmem:[%s1977_s0 + $0xc8] sm:$0xf] }
   0xc   :  { %v1368_v34 = vld [vmem:[%s1976_s1 + $0xe0] sm:$0xff]  ;;  %v1327_v38 = vld [vmem:[%s1977_s0 + $0xd8] sm:$0xf0]  ;;  %v1130_v39 = vld [vmem:[%s1977_s0 + $0x118] sm:$0xf]  ;;  %v1051_v46 = vor.u32 %v1317_v36, %v1050_v35 }
   0xd   :  { %v1337_v40 = vld [vmem:[%s1977_s0 + $0x128] sm:$0xf0]  ;;  %v1010_v41 = vld [vmem:[%s1977_s0 + $0x28] sm:$0xf]  ;;  %v1307_v42 = vld [vmem:[%s1977_s0 + $0x38] sm:$0xf0]  ;;  %v1091_v47 = vor.u32 %v1327_v38, %v1090_v37 }
   0xe   :  { %1385 = vmatpush.bf16.msra.mxu1 %v1344_v3  ;;  %1386 = vmatpush.bf16.msra.mxu2 %v1344_v3  ;;  %v1372_v43 = vld [vmem:[%s1976_s1 + $0x100] sm:$0xff]  ;;  %v1359_v44 = vld [vmem:[%s1976_s1 + $0x98] sm:$0xff]  ;;  %v1131_v48 = vor.u32 %v1337_v40, %v1130_v39  ;;  %v1011_v49 = vor.u32 %v1307_v42, %v1010_v41  ;;  %v1358_v51 = vld [vmem:[%s1976_s1 + $0x90] sm:$0xff] }
   0xf   :  { %1387 = vmatpush.bf16.msra.mxu3 %v1344_v3  ;;  %582 = vmatpush.bf16.msra.mxu0 %v1344_v3  ;;  %v1351_v45 = vld [vmem:[%s1976_s1 + $0x58] sm:$0xff]  ;;  %v1350_v52 = vld [vmem:[%s1976_s1 + $0x50] sm:$0xff]  ;;  %v1357_v54 = vld [vmem:[%s1976_s1 + $0x88] sm:$0xff] }
  0x10   :  { %v1367_v50 = vld [vmem:[%s1976_s1 + $0xd8] sm:$0xff]  ;;  %v1366_v53 = vld [vmem:[%s1976_s1 + $0xd0] sm:$0xff]  ;;  %v1349_v55 = vld [vmem:[%s1976_s1 + $0x48] sm:$0xff] }
  0x11   :  { %v1365_v56 = vld [vmem:[%s1976_s1 + $0xc8] sm:$0xff]  ;;  %v1356_v57 = vld [vmem:[%s1976_s1 + $0x80] sm:$0xff]  ;;  %v992_v61 = vld [vmem:[%s1977_s0 + $0x14] sm:$0xf0] }
  0x12   :  { %1388 = vmatpush.bf16.msra.mxu1 %v1343_v4  ;;  %1389 = vmatpush.bf16.msra.mxu2 %v1343_v4  ;;  %v1348_v58 = vld [vmem:[%s1976_s1 + $0x40] sm:$0xff]  ;;  %v998_v62 = vld [vmem:[%s1977_s0 + $0x8] sm:$0xf]  ;;  %v1303_v63 = vld [vmem:[%s1977_s0 + $0x18] sm:$0xf0] }
  0x13   :  { %1390 = vmatpush.bf16.msra.mxu3 %v1343_v4  ;;  %583 = vmatpush.bf16.msra.mxu0 %v1343_v4  ;;  %v1364_v59 = vld [vmem:[%s1976_s1 + $0xc0] sm:$0xff]  ;;  %v1301_v0 = vld [vmem:[%s1977_s0 + $0xc] sm:$0xf]  ;;  %v1006_v2 = vld [vmem:[%s1977_s0 + $0x10] sm:$0xf] }
  0x14   :  { %v1300_v60 = vld [vmem:[%s1977_s0 + $0x4] sm:$0xf]  ;;  %v1000_v1 = vld [vmem:[%s1977_s0 + $0x1c] sm:$0xf0]  ;;  %v1305_v8 = vld [vmem:[%s1977_s0 + $0x2c] sm:$0xf] }
  0x15   :  { %v1304_v3 = vld [vmem:[%s1977_s0 + $0x20] sm:$0xf0]  ;;  %v995_v4 = vor.u32 %v1300_v60, %v992_v61  ;;  %v1012_v9 = vld [vmem:[%s1977_s0 + $0x3c] sm:$0xf0]  ;;  %v1018_v10 = vld [vmem:[%s1977_s0 + $0x30] sm:$0xf] }
  0x16   :  { %1391 = vmatpush.bf16.msra.mxu1 %v1342_v5  ;;  %1392 = vmatpush.bf16.msra.mxu2 %v1342_v5  ;;  %v1308_v11 = vld [vmem:[%s1977_s0 + $0x40] sm:$0xf0]  ;;  %v1306_v12 = vld [vmem:[%s1977_s0 + $0x34] sm:$0xf]  ;;  %v1020_v13 = vld [vmem:[%s1977_s0 + $0x44] sm:$0xf0] }
  0x17   :  { %1393 = vmatpush.bf16.msra.mxu3 %v1342_v5  ;;  %584 = vmatpush.bf16.msra.mxu0 %v1342_v5  ;;  %v999_v5 = vor.u32 %v1303_v63, %v998_v62  ;;  %v1026_v14 = vld [vmem:[%s1977_s0 + $0x38] sm:$0xf]  ;;  %v1309_v15 = vld [vmem:[%s1977_s0 + $0x48] sm:$0xf0]  ;;  %v1318_v35 = vld [vmem:[%s1977_s0 + $0x90] sm:$0xf0] }
  0x18   :  { %v1316_v36 = vld [vmem:[%s1977_s0 + $0x84] sm:$0xf]  ;;  %v1060_v37 = vld [vmem:[%s1977_s0 + $0x94] sm:$0xf0]  ;;  %v1066_v38 = vld [vmem:[%s1977_s0 + $0x88] sm:$0xf] }
  0x19   :  { %v1319_v39 = vld [vmem:[%s1977_s0 + $0x98] sm:$0xf0]  ;;  %v1063_v42 = vor.u32 %v1316_v36, %v1060_v37  ;;  %v1326_v60 = vld [vmem:[%s1977_s0 + $0xd4] sm:$0xf]  ;;  %v1100_v61 = vld [vmem:[%s1977_s0 + $0xe4] sm:$0xf0] }
  0x1a   :  { %1394 = vmatpush.bf16.msra.mxu1 %v1341_v6  ;;  %1395 = vmatpush.bf16.msra.mxu2 %v1341_v6  ;;  %v1106_v62 = vld [vmem:[%s1977_s0 + $0xd8] sm:$0xf]  ;;  %v1329_v63 = vld [vmem:[%s1977_s0 + $0xe8] sm:$0xf0] }
  0x1b   :  { %1396 = vmatpush.bf16.msra.mxu3 %v1341_v6  ;;  %585 = vmatpush.bf16.msra.mxu0 %v1341_v6  ;;  %v1003_v6 = vor.u32 %v1301_v0, %v1000_v1 }
  0x1e   :  { %1397 = vmatpush.bf16.msra.mxu1 %v1340_v7  ;;  %1398 = vmatpush.bf16.msra.mxu2 %v1340_v7 }
  0x1f   :  { %1399 = vmatpush.bf16.msra.mxu3 %v1340_v7  ;;  %586 = vmatpush.bf16.msra.mxu0 %v1340_v7  ;;  %v1007_v7 = vor.u32 %v1304_v3, %v1006_v2  ;;  %v1103_v2 = vor.u32 %v1326_v60, %v1100_v61  ;;  %v1107_v3 = vor.u32 %v1329_v63, %v1106_v62 }
  0x21   :  { %597 = vmatmul.bf16.vlgmr.msra.gmra.mxu1 %v1031_v18  ;;  %607 = vmatmul.bf16.vlgmr.msra.gmra.mxu2 %v1071_v19  ;;  %v1023_v18 = vor.u32 %v1306_v12, %v1020_v13  ;;  %v1027_v19 = vor.u32 %v1309_v15, %v1026_v14 }
  0x22   :  { %677 = vmatpush.bf16.msrb.mxu2 %v1363_v16  ;;  %628 = vmatpush.bf16.msrb.mxu1 %v1355_v17  ;;  %v1015_v16 = vor.u32 %v1305_v8, %v1012_v9  ;;  %v1019_v17 = vor.u32 %v1308_v11, %v1018_v10  ;;  %v1331_v8 = vld [vmem:[%s1977_s0 + $0xfc] sm:$0xf]  ;;  %v1120_v9 = vld [vmem:[%s1977_s0 + $0x10c] sm:$0xf0]  ;;  %v1126_v10 = vld [vmem:[%s1977_s0 + $0x100] sm:$0xf] }
  0x23   :  { %617 = vmatmul.bf16.vlgmr.msra.gmra.mxu3 %v1111_v20  ;;  %587 = vmatmul.bf16.vlgmr.msra.gmra.mxu0 %v991_v21  ;;  %v1310_v20 = vld [vmem:[%s1977_s0 + $0x54] sm:$0xf]  ;;  %v1032_v21 = vld [vmem:[%s1977_s0 + $0x64] sm:$0xf0]  ;;  %v1123_v15 = vor.u32 %v1331_v8, %v1120_v9 }
  0x24   :  { %726 = vmatpush.bf16.msrb.mxu3 %v1371_v22  ;;  %779 = vmatpush.bf16.msrb.mxu0 %v1375_v23  ;;  %v1038_v22 = vld [vmem:[%s1977_s0 + $0x58] sm:$0xf]  ;;  %v1313_v23 = vld [vmem:[%s1977_s0 + $0x68] sm:$0xf0]  ;;  %v1334_v11 = vld [vmem:[%s1977_s0 + $0x110] sm:$0xf0] }
  0x26   :  { %678 = vmatpush.bf16.msrb.mxu2 %v1362_v24  ;;  %629 = vmatpush.bf16.msrb.mxu1 %v1354_v25  ;;  %v1311_v24 = vld [vmem:[%s1977_s0 + $0x5c] sm:$0xf]  ;;  %v1040_v25 = vld [vmem:[%s1977_s0 + $0x6c] sm:$0xf0] }
  0x28   :  { %727 = vmatpush.bf16.msrb.mxu3 %v1370_v26  ;;  %780 = vmatpush.bf16.msrb.mxu0 %v1374_v27  ;;  %v1046_v26 = vld [vmem:[%s1977_s0 + $0x60] sm:$0xf]  ;;  %v1314_v27 = vld [vmem:[%s1977_s0 + $0x70] sm:$0xf0] }
  0x2a   :  { %679 = vmatpush.bf16.msrb.mxu2 %v1361_v28  ;;  %630 = vmatpush.bf16.msrb.mxu1 %v1353_v29  ;;  %v1035_v28 = vor.u32 %v1310_v20, %v1032_v21  ;;  %v1039_v29 = vor.u32 %v1313_v23, %v1038_v22  ;;  %v1335_v22 = vld [vmem:[%s1977_s0 + $0x11c] sm:$0xf]  ;;  %v1132_v23 = vld [vmem:[%s1977_s0 + $0x12c] sm:$0xf0] }
  0x2c   :  { %728 = vmatpush.bf16.msrb.mxu3 %v1369_v30  ;;  %781 = vmatpush.bf16.msrb.mxu0 %v1373_v31  ;;  %v1043_v30 = vor.u32 %v1311_v24, %v1040_v25  ;;  %v1047_v31 = vor.u32 %v1314_v27, %v1046_v26  ;;  %v1138_v24 = vld [vmem:[%s1977_s0 + $0x120] sm:$0xf]  ;;  %v1338_v25 = vld [vmem:[%s1977_s0 + $0x130] sm:$0xf0]  ;;  %v1336_v26 = vld [vmem:[%s1977_s0 + $0x124] sm:$0xf] }
  0x2d   :  { %v1140_v27 = vld [vmem:[%s1977_s0 + $0x134] sm:$0xf0] }
  0x2e   :  { %680 = vmatpush.bf16.msrb.mxu2 %v1360_v32  ;;  %631 = vmatpush.bf16.msrb.mxu1 %v1352_v33  ;;  %v1315_v32 = vld [vmem:[%s1977_s0 + $0x7c] sm:$0xf]  ;;  %v1052_v33 = vld [vmem:[%s1977_s0 + $0x8c] sm:$0xf0] }
  0x2f   :  { %v1055_v40 = vor.u32 %v1315_v32, %v1052_v33  ;;  %v1135_v32 = vor.u32 %v1335_v22, %v1132_v23  ;;  %v1139_v33 = vor.u32 %v1338_v25, %v1138_v24 }
  0x30   :  { %729 = vmatpush.bf16.msrb.mxu3 %v1368_v34  ;;  %782 = vmatpush.bf16.msrb.mxu0 %v1372_v43  ;;  %v1058_v34 = vld [vmem:[%s1977_s0 + $0x80] sm:$0xf]  ;;  %v1067_v43 = vor.u32 %v1319_v39, %v1066_v38 }
  0x31   :  { %602 = vmatmul.bf16.gmra.mxu1 %v1051_v46  ;;  %612 = vmatmul.bf16.gmra.mxu2 %v1091_v47  ;;  %v1059_v41 = vor.u32 %v1318_v35, %v1058_v34  ;;  %v1078_v46 = vld [vmem:[%s1977_s0 + $0xa8] sm:$0xf]  ;;  %v1323_v47 = vld [vmem:[%s1977_s0 + $0xb8] sm:$0xf0]  ;;  %v1143_v35 = vor.u32 %v1336_v26, %v1140_v27 }
  0x32   :  { %681 = vmatpush.bf16.msrb.mxu2 %v1359_v44  ;;  %632 = vmatpush.bf16.msrb.mxu1 %v1351_v45  ;;  %v1320_v44 = vld [vmem:[%s1977_s0 + $0xa4] sm:$0xf]  ;;  %v1072_v45 = vld [vmem:[%s1977_s0 + $0xb4] sm:$0xf0] }
  0x33   :  { %622 = vmatmul.bf16.gmra.mxu3 %v1131_v48  ;;  %592 = vmatmul.bf16.gmra.mxu0 %v1011_v49  ;;  %v1321_v48 = vld [vmem:[%s1977_s0 + $0xac] sm:$0xf]  ;;  %v1080_v49 = vld [vmem:[%s1977_s0 + $0xbc] sm:$0xf0] }
  0x34   :  { %730 = vmatpush.bf16.msrb.mxu3 %v1367_v50  ;;  %v1086_v50 = vld [vmem:[%s1977_s0 + $0xb0] sm:$0xf] }
  0x36   :  { %682 = vmatpush.bf16.msrb.mxu2 %v1358_v51  ;;  %633 = vmatpush.bf16.msrb.mxu1 %v1350_v52  ;;  %v1324_v51 = vld [vmem:[%s1977_s0 + $0xc0] sm:$0xf0]  ;;  %v1075_v52 = vor.u32 %v1320_v44, %v1072_v45 }
  0x38   :  { %731 = vmatpush.bf16.msrb.mxu3 %v1366_v53  ;;  %v1079_v53 = vor.u32 %v1323_v47, %v1078_v46 }
  0x3a   :  { %683 = vmatpush.bf16.msrb.mxu2 %v1357_v54  ;;  %634 = vmatpush.bf16.msrb.mxu1 %v1349_v55  ;;  %v1083_v54 = vor.u32 %v1321_v48, %v1080_v49  ;;  %v1087_v55 = vor.u32 %v1324_v51, %v1086_v50 }
  0x3c   :  { %732 = vmatpush.bf16.msrb.mxu3 %v1365_v56  ;;  %v1325_v56 = vld [vmem:[%s1977_s0 + $0xcc] sm:$0xf] }
  0x3e   :  { %684 = vmatpush.bf16.msrb.mxu2 %v1356_v57  ;;  %635 = vmatpush.bf16.msrb.mxu1 %v1348_v58  ;;  %v1092_v57 = vld [vmem:[%s1977_s0 + $0xdc] sm:$0xf0]  ;;  %v1098_v58 = vld [vmem:[%s1977_s0 + $0xd0] sm:$0xf] }
  0x3f   :  { %v1095_v0 = vor.u32 %v1325_v56, %v1092_v57 }
  0x40   :  { %733 = vmatpush.bf16.msrb.mxu3 %v1364_v59  ;;  %v1328_v59 = vld [vmem:[%s1977_s0 + $0xe0] sm:$0xf0] }
  0x41   :  { %636 = vmatmul.bf16.vlgmr.msrb.gmra.mxu1 %v995_v4  ;;  %685 = vmatmul.bf16.vlgmr.msrb.gmra.mxu2 %v999_v5  ;;  %v1099_v1 = vor.u32 %v1328_v59, %v1098_v58  ;;  %v1330_v4 = vld [vmem:[%s1977_s0 + $0xf4] sm:$0xf]  ;;  %v1112_v5 = vld [vmem:[%s1977_s0 + $0x104] sm:$0xf0] }
  0x42   :  { %v1115_v12 = vor.u32 %v1330_v4, %v1112_v5 }
  0x43   :  { %734 = vmatmul.bf16.vlgmr.msrb.gmra.mxu3 %v1003_v6  ;;  %1292 = vmatmul.msk.bf16.vlgmr.msrb.gmra.mxu0 %vm554_vm0, %v1007_v7  ;;  %v1118_v6 = vld [vmem:[%s1977_s0 + $0xf8] sm:$0xf]  ;;  %v1333_v7 = vld [vmem:[%s1977_s0 + $0x108] sm:$0xf0] }
  0x44   :  { %v1119_v13 = vor.u32 %v1333_v7, %v1118_v6 }
  0x51   :  { %641 = vmatmul.bf16.gmra.mxu1 %v1015_v16  ;;  %690 = vmatmul.bf16.gmra.mxu2 %v1019_v17  ;;  %v1127_v16 = vor.u32 %v1334_v11, %v1126_v10 }
  0x53   :  { %739 = vmatmul.bf16.gmra.mxu3 %v1023_v18  ;;  %1293 = vmatmul.msk.bf16.gmra.mxu0 %vm554_vm0, %v1027_v19 }
  0x61   :  { %646 = vmatmul.bf16.gmra.mxu1 %v1035_v28  ;;  %695 = vmatmul.bf16.gmra.mxu2 %v1039_v29  ;;  %v1146_v28 = vld [vmem:[%s1977_s0 + $0x128] sm:$0xf]  ;;  %v1339_v29 = vld [vmem:[%s1977_s0 + $0x138] sm:$0xf0] }
  0x62   :  { %v1147_v36 = vor.u32 %v1339_v29, %v1146_v28 }
  0x63   :  { %744 = vmatmul.bf16.gmra.mxu3 %v1043_v30  ;;  %1294 = vmatmul.msk.bf16.gmra.mxu0 %vm554_vm0, %v1047_v31 }
  0x71   :  { %651 = vmatmul.bf16.gmra.mxu1 %v1055_v40  ;;  %700 = vmatmul.bf16.gmra.mxu2 %v1059_v41 }
  0x73   :  { %749 = vmatmul.bf16.gmra.mxu3 %v1063_v42  ;;  %1295 = vmatmul.msk.bf16.gmra.mxu0 %vm554_vm0, %v1067_v43 }
  0x81   :  { %656 = vmatmul.bf16.gmra.mxu1 %v1075_v52  ;;  %705 = vmatmul.bf16.gmra.mxu2 %v1079_v53 }
  0x83   :  { %754 = vmatmul.bf16.gmra.mxu3 %v1083_v54  ;;  %1296 = vmatmul.msk.bf16.gmra.mxu0 %vm554_vm0, %v1087_v55 }
  0x91   :  { %661 = vmatmul.bf16.gmra.mxu1 %v1095_v0  ;;  %710 = vmatmul.bf16.gmra.mxu2 %v1099_v1 }
  0x93   :  { %759 = vmatmul.bf16.gmra.mxu3 %v1103_v2  ;;  %1297 = vmatmul.msk.bf16.gmra.mxu0 %vm554_vm0, %v1107_v3 }
  0x9e   :  { %v1758_v14 = vpop.f32.mrf.mxu1 }
  0xa0   :  { %v588_v17 = vpop.f32.mrf.mxu0 }
  0xa1   :  { %666 = vmatmul.bf16.gmra.mxu1 %v1115_v12  ;;  %715 = vmatmul.bf16.gmra.mxu2 %v1119_v13 }
  0xa3   :  { %764 = vmatmul.bf16.gmra.mxu3 %v1123_v15  ;;  %1298 = vmatmul.msk.bf16.gmra.mxu0 %vm554_vm0, %v1127_v16 }
  0xa4   :  { %v1761_v18 = vpop.f32.mrf.mxu2 }
  0xa6   :  { %v1763_v19 = vpop.f32.mrf.mxu3  ;;  %v1765_v20 = vpop.f32.mrf.mxu1 }
  0xa8   :  { %v590_v21 = vpop.f32.mrf.mxu0 }
  0xac   :  { %v1791_v30 = vpop.f32.mrf.mxu2 }
  0xae   :  { %v1793_v31 = vpop.f32.mrf.mxu3  ;;  %v1795_v34 = vpop.f32.mrf.mxu1 }
  0xb0   :  { %v593_v37 = vpop.f32.mrf.mxu0 }
  0xb1   :  { %671 = vmatmul.bf16.gmra.mxu1 %v1135_v32  ;;  %720 = vmatmul.bf16.gmra.mxu2 %v1139_v33 }
  0xb3   :  { %769 = vmatmul.bf16.gmra.mxu3 %v1143_v35  ;;  %1299 = vmatmul.msk.bf16.gmra.mxu0 %vm554_vm0, %v1147_v36 }
  0xb4   :  { %v1798_v38 = vpop.f32.mrf.mxu2 }
  0xb6   :  { %v1800_v39 = vpop.f32.mrf.mxu3  ;;  %v1802_v40 = vpop.f32.mrf.mxu1 }
  0xb8   :  { %v595_v41 = vpop.f32.mrf.mxu0 }
  0xbc   :  { %v1804_v42 = vpop.f32.mrf.mxu2 }
  0xbe   :  { %v1806_v43 = vpop.f32.mrf.mxu3  ;;  %v637_v44 = vpop.f32.mrf.mxu1 }
  0xbf   :  { %v638_v45 = vadd.f32 %v637_v44, %v588_v17 }
  0xc0   :  { %v784_v46 = vpop.f32.mrf.mxu0 }
  0xc4   :  { %v686_v47 = vpop.f32.mrf.mxu2 }
  0xc5   :  { %v687_v48 = vadd.f32 %v686_v47, %v638_v45 }
  0xc6   :  { %v735_v49 = vpop.f32.mrf.mxu3  ;;  %v639_v50 = vpop.f32.mrf.mxu1 }
  0xc7   :  { %v736_v51 = vadd.f32 %v735_v49, %v687_v48  ;;  %v640_v52 = vadd.f32 %v639_v50, %v590_v21 }
  0xc8   :  { %v786_v53 = vpop.f32.mrf.mxu0 }
  0xc9   :  { %v1808_v54 = vadd.f32 %v784_v46, %v736_v51 }
  0xcc   :  { %v688_v55 = vpop.f32.mrf.mxu2 }
  0xcd   :  { %v689_v56 = vadd.f32 %v688_v55, %v640_v52 }
  0xce   :  { %v737_v57 = vpop.f32.mrf.mxu3  ;;  %v642_v58 = vpop.f32.mrf.mxu1 }
  0xcf   :  { %v738_v59 = vadd.f32 %v737_v57, %v689_v56  ;;  %v643_v60 = vadd.f32 %v642_v58, %v593_v37 }
  0xd0   :  { %v789_v61 = vpop.f32.mrf.mxu0 }
  0xd1   :  { %v1810_v62 = vadd.f32 %v786_v53, %v738_v59 }
  0xd3   :  { %v824_v63 = vadd.f32 %v1810_v62, %v1808_v54 }
  0xd4   :  { %v691_v0 = vpop.f32.mrf.mxu2 }
  0xd5   :  { %v692_v1 = vadd.f32 %v691_v0, %v643_v60 }
  0xd6   :  { %v740_v2 = vpop.f32.mrf.mxu3  ;;  %v644_v3 = vpop.f32.mrf.mxu1 }
  0xd7   :  { %v741_v4 = vadd.f32 %v740_v2, %v692_v1  ;;  %v645_v5 = vadd.f32 %v644_v3, %v595_v41 }
  0xd8   :  { %v791_v6 = vpop.f32.mrf.mxu0 }
  0xd9   :  { %v1814_v7 = vadd.f32 %v789_v61, %v741_v4 }
  0xdb   :  { %v825_v8 = vadd.f32 %v824_v63, %v1814_v7 }
  0xdc   :  { %v693_v9 = vpop.f32.mrf.mxu2 }
  0xdd   :  { %v694_v10 = vadd.f32 %v693_v9, %v645_v5 }
  0xde   :  { %v742_v11 = vpop.f32.mrf.mxu3  ;;  %v647_v12 = vpop.f32.mrf.mxu1 }
  0xdf   :  { %v743_v13 = vadd.f32 %v742_v11, %v694_v10  ;;  %v648_v15 = vadd.f32 %v647_v12, %v1758_v14 }
  0xe0   :  { %v794_v16 = vpop.f32.mrf.mxu0 }
  0xe1   :  { %v1818_v17 = vadd.f32 %v791_v6, %v743_v13 }
  0xe3   :  { %v826_v21 = vadd.f32 %v825_v8, %v1818_v17 }
  0xe4   :  { %v696_v22 = vpop.f32.mrf.mxu2 }
  0xe5   :  { %v697_v23 = vadd.f32 %v696_v22, %v648_v15 }
  0xe6   :  { %v745_v24 = vpop.f32.mrf.mxu3  ;;  %v649_v25 = vpop.f32.mrf.mxu1 }
  0xe7   :  { %v746_v26 = vadd.f32 %v745_v24, %v697_v23  ;;  %v650_v32 = vadd.f32 %v649_v25, %v1765_v20 }
  0xe8   :  { %v796_v27 = vpop.f32.mrf.mxu0 }
  0xe9   :  { %v1821_v28 = vadd.f32 %v794_v16, %v746_v26 }
  0xeb   :  { %v827_v29 = vadd.f32 %v826_v21, %v1821_v28 }
  0xec   :  { %v698_v33 = vpop.f32.mrf.mxu2 }
  0xed   :  { %v699_v35 = vadd.f32 %v698_v33, %v650_v32 }
  0xee   :  { %v747_v14 = vpop.f32.mrf.mxu3  ;;  %v652_v36 = vpop.f32.mrf.mxu1 }
  0xef   :  { %v748_v37 = vadd.f32 %v747_v14, %v699_v35  ;;  %v653_v46 = vadd.f32 %v652_v36, %v1795_v34 }
  0xf0   :  { %v799_v41 = vpop.f32.mrf.mxu0 }
  0xf1   :  { %v1825_v44 = vadd.f32 %v796_v27, %v748_v37 }
  0xf3   :  { %v828_v45 = vadd.f32 %v827_v29, %v1825_v44 }
  0xf4   :  { %v701_v47 = vpop.f32.mrf.mxu2 }
  0xf5   :  { %v702_v48 = vadd.f32 %v701_v47, %v653_v46 }
  0xf6   :  { %v750_v49 = vpop.f32.mrf.mxu3  ;;  %v654_v50 = vpop.f32.mrf.mxu1 }
  0xf7   :  { %v751_v51 = vadd.f32 %v750_v49, %v702_v48  ;;  %v655_v55 = vadd.f32 %v654_v50, %v1802_v40 }
  0xf8   :  { %v801_v52 = vpop.f32.mrf.mxu0 }
  0xf9   :  { %v1829_v53 = vadd.f32 %v799_v41, %v751_v51 }
  0xfb   :  { %v829_v20 = vadd.f32 %v828_v45, %v1829_v53 }
  0xfc   :  { %v703_v56 = vpop.f32.mrf.mxu2 }
  0xfd   :  { %v704_v57 = vadd.f32 %v703_v56, %v655_v55 }
  0xfe   :  { %v752_v58 = vpop.f32.mrf.mxu3  ;;  %v657_v59 = vpop.f32.mrf.mxu1 }
  0xff   :  { %v753_v60 = vadd.f32 %v752_v58, %v704_v57  ;;  %v658_v24 = vadd.f32 %v657_v59, %v1761_v18 }
 0x100   :  { %v804_v61 = vpop.f32.mrf.mxu0 }
 0x101   :  { %v1833_v63 = vadd.f32 %v801_v52, %v753_v60 }
 0x103   :  { %v830_v34 = vadd.f32 %v829_v20, %v1833_v63 }
 0x104   :  { %v706_v0 = vpop.f32.mrf.mxu2 }
 0x105   :  { %v707_v25 = vadd.f32 %v706_v0, %v658_v24 }
 0x106   :  { %v755_v1 = vpop.f32.mrf.mxu3  ;;  %v659_v2 = vpop.f32.mrf.mxu1 }
 0x107   :  { %v660_v26 = vadd.f32 %v659_v2, %v1791_v30  ;;  %v756_v35 = vadd.f32 %v755_v1, %v707_v25 }
 0x108   :  { %v806_v3 = vpop.f32.mrf.mxu0 }
 0x109   :  { %v805_v48 = vadd.f32 %v804_v61, %v756_v35 }
 0x10b   :  { %v831_v55 = vadd.f32 %v830_v34, %v805_v48 }
 0x10c   :  { %v708_v4 = vpop.f32.mrf.mxu2 }
 0x10d   :  { %v709_v27 = vadd.f32 %v708_v4, %v660_v26 }
 0x10e   :  { %v757_v5 = vpop.f32.mrf.mxu3  ;;  %v662_v6 = vpop.f32.mrf.mxu1 }
 0x10f   :  { %v663_v29 = vadd.f32 %v662_v6, %v1798_v38  ;;  %v758_v45 = vadd.f32 %v757_v5, %v709_v27 }
 0x110   :  { %v809_v8 = vpop.f32.mrf.mxu0 }
 0x111   :  { %v807_v50 = vadd.f32 %v806_v3, %v758_v45 }
 0x113   :  { %v832_v60 = vadd.f32 %v831_v55, %v807_v50 }
 0x114   :  { %v711_v9 = vpop.f32.mrf.mxu2 }
 0x115   :  { %v712_v14 = vadd.f32 %v711_v9, %v663_v29 }
 0x116   :  { %v760_v40 = vpop.f32.mrf.mxu3  ;;  %v664_v10 = vpop.f32.mrf.mxu1 }
 0x117   :  { %v665_v36 = vadd.f32 %v664_v10, %v1804_v42  ;;  %v761_v18 = vadd.f32 %v760_v40, %v712_v14 }
 0x118   :  { %v811_v11 = vpop.f32.mrf.mxu0 }
 0x119   :  { %v810_v56 = vadd.f32 %v809_v8, %v761_v18 }
 0x11b   :  { %v833_v1 = vadd.f32 %v832_v60, %v810_v56 }
 0x11c   :  { %v713_v12 = vpop.f32.mrf.mxu2 }
 0x11d   :  { %v714_v46 = vadd.f32 %v713_v12, %v665_v36 }
 0x11e   :  { %v762_v13 = vpop.f32.mrf.mxu3  ;;  %v667_v15 = vpop.f32.mrf.mxu1 }
 0x11f   :  { %v668_v47 = vadd.f32 %v667_v15, %v1763_v19  ;;  %v763_v51 = vadd.f32 %v762_v13, %v714_v46 }
 0x120   :  { %v814_v16 = vpop.f32.mrf.mxu0 }
 0x121   :  { %v812_v0 = vadd.f32 %v811_v11, %v763_v51 }
 0x124   :  { %v716_v21 = vpop.f32.mrf.mxu2 }
 0x125   :  { %v717_v49 = vadd.f32 %v716_v21, %v668_v47 }
 0x126   :  { %v765_v22 = vpop.f32.mrf.mxu3  ;;  %v669_v23 = vpop.f32.mrf.mxu1 }
 0x127   :  { %v670_v30 = vadd.f32 %v669_v23, %v1793_v31  ;;  %v766_v42 = vadd.f32 %v765_v22, %v717_v49  ;;  %v834_v31 = vadd.f32 %v833_v1, %v812_v0 }
 0x128   :  { %v816_v32 = vpop.f32.mrf.mxu0 }
 0x129   :  { %v815_v2 = vadd.f32 %v814_v16, %v766_v42 }
 0x12c   :  { %v718_v33 = vpop.f32.mrf.mxu2 }
 0x12d   :  { %v719_v38 = vadd.f32 %v718_v33, %v670_v30 }
 0x12e   :  { %v767_v37 = vpop.f32.mrf.mxu3  ;;  %v672_v41 = vpop.f32.mrf.mxu1 }
 0x12f   :  { %v673_v52 = vadd.f32 %v672_v41, %v1800_v39  ;;  %v768_v19 = vadd.f32 %v767_v37, %v719_v38  ;;  %v835_v39 = vadd.f32 %v834_v31, %v815_v2 }
 0x130   :  { %v819_v59 = vpop.f32.mrf.mxu0 }
 0x131   :  { %v817_v3 = vadd.f32 %v816_v32, %v768_v19 }
 0x133   :  { %v836_v40 = vadd.f32 %v835_v39, %v817_v3 }
 0x134   :  { %v721_v20 = vpop.f32.mrf.mxu2 }
 0x135   :  { %v722_v57 = vadd.f32 %v721_v20, %v673_v52 }
 0x136   :  { %v770_v58 = vpop.f32.mrf.mxu3  ;;  %v674_v61 = vpop.f32.mrf.mxu1 }
 0x137   :  { %v771_v4 = vadd.f32 %v770_v58, %v722_v57  ;;  %v675_v5 = vadd.f32 %v674_v61, %v1806_v43 }
 0x138   :  { %v821_v12 = vpop.f32.mrf.mxu0 }
 0x139   :  { %v820_v9 = vadd.f32 %v819_v59, %v771_v4 }
 0x13b   :  { %v837_v13 = vadd.f32 %v836_v40, %v820_v9 }
 0x13c   :  { %v723_v6 = vpop.f32.mrf.mxu2 }
 0x13d   :  { %v724_v34 = vadd.f32 %v723_v6, %v675_v5 }
 0x13e   :  { %v772_v8 = vpop.f32.mrf.mxu3 }
 0x13f   :  { %v773_v10 = vadd.f32 %v772_v8, %v724_v34 }
 0x141   :  { %v822_v15 = vadd.f32 %v821_v12, %v773_v10 }
 0x143   :  { %v838_v11 = vadd.f32 %v837_v13, %v822_v15 }
 0x145   :  { %v839_v21 = vrot.slane %v838_v11, 4 }
 0x147   :  { %v840_v22 = vadd.f32 %v839_v21, %v838_v11 }
 0x149   :  { %v841_v23 = vrot.slane %v840_v22, 2 }
 0x14b   :  { %v842_v16 = vadd.f32 %v841_v23, %v840_v22 }
 0x14d   :  { %v843_v24 = vrot.slane %v842_v16, 1 }
 0x14f   :  { %v844_v25 = vadd.f32 %v843_v24, %v842_v16  ;;  %v900_v16 = vld [vmem:[%s1979_s2] sm:$0x1] }
 0x151   :  { %v845_v26 = vmul.f32 0.0078125, %v844_v25 }
 0x153   :  { %v1845_v43 = vsub.f32 %v1808_v54, %v845_v26  ;;  %v1848_v27 = vsub.f32 %v1810_v62, %v845_v26  ;;  %v1851_v29 = vsub.f32 %v1814_v7, %v845_v26  ;;  %v1854_v32 = vsub.f32 %v1818_v17, %v845_v26 }
 0x154   :  { %v1857_v33 = vsub.f32 %v1821_v28, %v845_v26  ;;  %v1860_v35 = vsub.f32 %v1825_v44, %v845_v26  ;;  %v1863_v14 = vsub.f32 %v1829_v53, %v845_v26  ;;  %v1866_v54 = vsub.f32 %v1833_v63, %v845_v26 }
 0x155   :  { %v862_v62 = vmul.f32 %v1845_v43, %v1845_v43  ;;  %v863_v7 = vmul.f32 %v1848_v27, %v1848_v27  ;;  %v864_v17 = vmul.f32 %v1851_v29, %v1851_v29  ;;  %v865_v44 = vmul.f32 %v1854_v32, %v1854_v32 }
 0x156   :  { %v866_v53 = vmul.f32 %v1857_v33, %v1857_v33  ;;  %v867_v63 = vmul.f32 %v1860_v35, %v1860_v35  ;;  %v854_v45 = vsub.f32 %v805_v48, %v845_v26  ;;  %v868_v46 = vmul.f32 %v1863_v14, %v1863_v14 }
 0x157   :  { %v878_v28 = vadd.f32 %v863_v7, %v862_v62  ;;  %v855_v18 = vsub.f32 %v807_v50, %v845_v26  ;;  %v869_v49 = vmul.f32 %v1866_v54, %v1866_v54  ;;  %v1884_v51 = vsub.f32 %v810_v56, %v845_v26 }
 0x158   :  { %v870_v38 = vmul.f32 %v854_v45, %v854_v45  ;;  %v1886_v20 = vsub.f32 %v812_v0, %v845_v26  ;;  %v1888_v57 = vsub.f32 %v815_v2, %v845_v26  ;;  %v1892_v59 = vsub.f32 %v817_v3, %v845_v26 }
 0x159   :  { %v879_v36 = vadd.f32 %v878_v28, %v864_v17  ;;  %v871_v55 = vmul.f32 %v855_v18, %v855_v18  ;;  %v872_v48 = vmul.f32 %v1884_v51, %v1884_v51  ;;  %v1896_v56 = vsub.f32 %v820_v9, %v845_v26 }
 0x15a   :  { %v873_v50 = vmul.f32 %v1886_v20, %v1886_v20  ;;  %v874_v0 = vmul.f32 %v1888_v57, %v1888_v57  ;;  %v1900_v61 = vsub.f32 %v822_v15, %v845_v26  ;;  %v875_v1 = vmul.f32 %v1892_v59, %v1892_v59 }
 0x15b   :  { %v880_v37 = vadd.f32 %v879_v36, %v865_v44  ;;  %v876_v4 = vmul.f32 %v1896_v56, %v1896_v56  ;;  %v1400_v44 = vld [vmem:[%s1978_s3] ss:$0 sm:$0xff] }
 0x15c   :  { %v877_v3 = vmul.f32 %v1900_v61, %v1900_v61 }
 0x15d   :  { %v881_v41 = vadd.f32 %v880_v37, %v866_v53 }
 0x15f   :  { %v882_v47 = vadd.f32 %v881_v41, %v867_v63 }
 0x161   :  { %v883_v30 = vadd.f32 %v882_v47, %v868_v46 }
 0x163   :  { %v884_v52 = vadd.f32 %v883_v30, %v869_v49 }
 0x165   :  { %v885_v42 = vadd.f32 %v884_v52, %v870_v38 }
 0x167   :  { %v886_v58 = vadd.f32 %v885_v42, %v871_v55 }
 0x169   :  { %v887_v60 = vadd.f32 %v886_v58, %v872_v48 }
 0x16b   :  { %v888_v19 = vadd.f32 %v887_v60, %v873_v50 }
 0x16d   :  { %v889_v2 = vadd.f32 %v888_v19, %v874_v0 }
 0x16f   :  { %v890_v31 = vadd.f32 %v889_v2, %v875_v1 }
 0x171   :  { %v891_v5 = vadd.f32 %v890_v31, %v876_v4 }
 0x173   :  { %v892_v6 = vadd.f32 %v891_v5, %v877_v3 }
 0x175   :  { %v893_v39 = vrot.slane %v892_v6, 4 }
 0x177   :  { %v894_v9 = vadd.f32 %v893_v39, %v892_v6 }
 0x179   :  { %v895_v34 = vrot.slane %v894_v9, 2 }
 0x17b   :  { %v896_v8 = vadd.f32 %v895_v34, %v894_v9 }
 0x17d   :  { %v897_v40 = vrot.slane %v896_v8, 1 }
 0x17f   :  { %v898_v10 = vadd.f32 %v897_v40, %v896_v8 }
 0x181   :  { %v899_v12 = vmul.f32 0.0078125, %v898_v10 }
 0x183   :  { %v901_v13 = vadd.f32 1e-05, %v899_v12 }
 0x185   :  { %1401 = vrsqrt.f32 %v901_v13  ;;  %vm908_vm2 = vweird.f32 %v901_v13 }
 0x18b   :  { %v1402_v15 = vpop.eup %1401 }
 0x18c   :  { %v903_v11 = vmul.f32 %v1402_v15, %v901_v13  ;;  %vm909_vm1 = vweird.f32 %v1402_v15 }
 0x18d   :  { %vm910_vm3 = vmor %vm908_vm2, %vm909_vm1 }
 0x18e   :  { %v904_v21 = vmul.f32 %v1402_v15, %v903_v11 }
 0x190   :  { %v905_v22 = vmul.f32 0.5, %v904_v21 }
 0x192   :  { %v906_v23 = vsub.f32 1.5, %v905_v22 }
 0x194   :  { %v907_v24 = vmul.f32 %v1402_v15, %v906_v23 }
 0x196   :  { %v911_v25 = vsel %vm910_vm3, %v1402_v15, %v907_v24 }
 0x197   :  { %v912_v26 = vmul.f32 %v911_v25, %v900_v16 }
 0x199   :  { %v914_v62 = vperm.slane %v912_v26, 0 }
 0x19b   :  { %v916_v7 = vmul.f32 %v914_v62, %v1845_v43  ;;  %v917_v17 = vmul.f32 %v914_v62, %v1848_v27  ;;  %v918_v28 = vmul.f32 %v914_v62, %v1851_v29  ;;  %v919_v36 = vmul.f32 %v914_v62, %v1854_v32 }
 0x19c   :  { %v920_v53 = vmul.f32 %v914_v62, %v1857_v33  ;;  %v924_v37 = vmul.f32 %v914_v62, %v854_v45  ;;  %v925_v63 = vmul.f32 %v914_v62, %v855_v18  ;;  %v921_v41 = vmul.f32 %v914_v62, %v1860_v35 }
 0x19d   :  { %v922_v46 = vmul.f32 %v914_v62, %v1863_v14  ;;  %v936_v47 = vadd.f32 %v1400_v44, %v916_v7  ;;  %v937_v43 = vadd.f32 %v1400_v44, %v917_v17  ;;  %v938_v49 = vadd.f32 %v1400_v44, %v918_v28 }
 0x19e   :  { %v923_v27 = vmul.f32 %v914_v62, %v1866_v54  ;;  %v939_v29 = vadd.f32 %v1400_v44, %v919_v36  ;;  %v940_v30 = vadd.f32 %v1400_v44, %v920_v53  ;;  %v926_v38 = vmul.f32 %v914_v62, %v1884_v51 }
 0x19f   :  { %v941_v52 = vadd.f32 %v1400_v44, %v921_v41  ;;  %v942_v55 = vadd.f32 %v1400_v44, %v922_v46  ;;  %v952_v32 = vmax.f32 %v936_v47, 0.0  ;;  %v953_v42 = vmax.f32 %v937_v43, 0.0 }
 0x1a0   :  { %v954_v33 = vmax.f32 %v938_v49, 0.0  ;;  %v927_v45 = vmul.f32 %v914_v62, %v1886_v20  ;;  %v943_v18 = vadd.f32 %v1400_v44, %v923_v27  ;;  %v955_v35 = vmax.f32 %v939_v29, 0.0 }
 0x1a1   :  { %v928_v14 = vmul.f32 %v914_v62, %v1888_v57  ;;  %v944_v48 = vadd.f32 %v1400_v44, %v924_v37  ;;  %v956_v58 = vmax.f32 %v940_v30, 0.0  ;;  %968 = vst [vmem:[%s1980_s4] sm:$0xff] %v952_v32  ;;  %v929_v54 = vmul.f32 %v914_v62, %v1892_v59 }
 0x1a2   :  { %v945_v51 = vadd.f32 %v1400_v44, %v925_v63  ;;  %v957_v50 = vmax.f32 %v941_v52, 0.0  ;;  %969 = vst [vmem:[%s1980_s4 + $0x8] sm:$0xff] %v953_v42  ;;  %v930_v20 = vmul.f32 %v914_v62, %v1896_v56  ;;  %v946_v60 = vadd.f32 %v1400_v44, %v926_v38 }
 0x1a3   :  { %v958_v0 = vmax.f32 %v942_v55, 0.0  ;;  %970 = vst [vmem:[%s1980_s4 + $0x10] sm:$0xff] %v954_v33  ;;  %v931_v57 = vmul.f32 %v914_v62, %v1900_v61  ;;  %v947_v19 = vadd.f32 %v1400_v44, %v927_v45  ;;  %v959_v1 = vmax.f32 %v943_v18, 0.0 }
 0x1a4   :  { %971 = vst [vmem:[%s1980_s4 + $0x18] sm:$0xff] %v955_v35  ;;  %v948_v59 = vadd.f32 %v1400_v44, %v928_v14  ;;  %v960_v2 = vmax.f32 %v944_v48, 0.0  ;;  %v949_v56 = vadd.f32 %v1400_v44, %v929_v54  ;;  %v961_v4 = vmax.f32 %v945_v51, 0.0 }
 0x1a5   :  { %972 = vst [vmem:[%s1980_s4 + $0x20] sm:$0xff] %v956_v58  ;;  %v950_v31 = vadd.f32 %v1400_v44, %v930_v20  ;;  %v962_v61 = vmax.f32 %v946_v60, 0.0  ;;  %v951_v3 = vadd.f32 %v1400_v44, %v931_v57  ;;  %v963_v5 = vmax.f32 %v947_v19, 0.0 }
 0x1a6   :  { %973 = vst [vmem:[%s1980_s4 + $0x28] sm:$0xff] %v957_v50  ;;  %v964_v6 = vmax.f32 %v948_v59, 0.0  ;;  %v965_v39 = vmax.f32 %v949_v56, 0.0 }
 0x1a7   :  { %974 = vst [vmem:[%s1980_s4 + $0x30] sm:$0xff] %v958_v0  ;;  %v966_v9 = vmax.f32 %v950_v31, 0.0  ;;  %v967_v34 = vmax.f32 %v951_v3, 0.0 }
 0x1a8   :  { %975 = vst [vmem:[%s1980_s4 + $0x38] sm:$0xff] %v959_v1 }
 0x1a9   :  { %976 = vst [vmem:[%s1980_s4 + $0x40] sm:$0xff] %v960_v2 }
 0x1aa   :  { %977 = vst [vmem:[%s1980_s4 + $0x48] sm:$0xff] %v961_v4 }
 0x1ab   :  { %978 = vst [vmem:[%s1980_s4 + $0x50] sm:$0xff] %v962_v61 }
 0x1ac   :  { %979 = vst [vmem:[%s1980_s4 + $0x58] sm:$0xff] %v963_v5 }
 0x1ad   :  { %980 = vst [vmem:[%s1980_s4 + $0x60] sm:$0xff] %v964_v6 }
 0x1ae   :  { %981 = vst [vmem:[%s1980_s4 + $0x68] sm:$0xff] %v965_v39 }
 0x1af   :  { %982 = vst [vmem:[%s1980_s4 + $0x70] sm:$0xff] %v966_v9 }
 0x1b0   :  { %983 = vst [vmem:[%s1980_s4 + $0x78] sm:$0xff] %v967_v34 }

// kernel: epistemic_forward.14
= control target key start
LH: loop header
LB: loop body
LE: loop exit
PB: predicated region body
PF: predicated region fallthrough
CT: control target
= control target key end

     0   :  { %s3324_s1 = inlined_call_operand.vmem [shape: bf16[1152,128], index: 1, kind: input, shape index: {}]   ;;  %s3325_s0 = inlined_call_operand.vmem [shape: bf16[128,1152], index: 0, kind: input, shape index: {}]   ;;  %s3326_s3 = inlined_call_operand.vmem [shape: f32[1,128], index: 3, kind: input, shape index: {}]   ;;  %s3327_s2 = inlined_call_operand.vmem [shape: f32[1,128], index: 2, kind: input, shape index: {}]   ;;  %s3328_s4 = inlined_call_operand.vmem [shape: f32[128,128], index: 4, kind: output, shape index: {}]  }
   0x1   :  { %v2301_v0 = vld [vmem:[%s3324_s1 + $0x38] sm:$0xff]  ;;  %v2300_v1 = vld [vmem:[%s3324_s1 + $0x30] sm:$0xff]  ;;  %v2299_v2 = vld [vmem:[%s3324_s1 + $0x28] sm:$0xff] }
   0x2   :  { %2366 = vmatpush.bf16.msra.mxu1 %v2301_v0  ;;  %2367 = vmatpush.bf16.msra.mxu2 %v2301_v0  ;;  %v2298_v3 = vld [vmem:[%s3324_s1 + $0x20] sm:$0xff]  ;;  %v2297_v4 = vld [vmem:[%s3324_s1 + $0x18] sm:$0xff]  ;;  %v2296_v5 = vld [vmem:[%s3324_s1 + $0x10] sm:$0xff] }
   0x3   :  { %2368 = vmatpush.bf16.msra.mxu3 %v2301_v0  ;;  %1041 = vmatpush.bf16.msra.mxu0 %v2301_v0  ;;  %v2295_v6 = vld [vmem:[%s3324_s1 + $0x8] sm:$0xff]  ;;  %v2294_v7 = vld [vmem:[%s3324_s1] sm:$0xff]  ;;  %v1720_v8 = vld [vmem:[%s3325_s0 + $0x90] sm:$0xf] }
   0x4   :  { %v2244_v9 = vld [vmem:[%s3325_s0 + $0xb0] sm:$0xf0]  ;;  %v1792_v10 = vld [vmem:[%s3325_s0 + $0x120] sm:$0xf]  ;;  %v2262_v11 = vld [vmem:[%s3325_s0 + $0x140] sm:$0xf0] }
   0x5   :  { %v1864_v12 = vld [vmem:[%s3325_s0 + $0x1b0] sm:$0xf]  ;;  %v2280_v13 = vld [vmem:[%s3325_s0 + $0x1d0] sm:$0xf0]  ;;  %v1648_v14 = vld [vmem:[%s3325_s0] sm:$0xf]  ;;  %v1721_v18 = vor.u32 %v2244_v9, %v1720_v8  ;;  %v1793_v19 = vor.u32 %v2262_v11, %v1792_v10 }
   0x6   :  { %2369 = vmatpush.bf16.msra.mxu1 %v2300_v1  ;;  %2370 = vmatpush.bf16.msra.mxu2 %v2300_v1  ;;  %v2226_v15 = vld [vmem:[%s3325_s0 + $0x20] sm:$0xf0]  ;;  %v2317_v16 = vld [vmem:[%s3324_s1 + $0xb8] sm:$0xff]  ;;  %v1865_v20 = vor.u32 %v2280_v13, %v1864_v12  ;;  %v2316_v24 = vld [vmem:[%s3324_s1 + $0xb0] sm:$0xff] }
   0x7   :  { %2371 = vmatpush.bf16.msra.mxu3 %v2300_v1  ;;  %1042 = vmatpush.bf16.msra.mxu0 %v2300_v1  ;;  %v2309_v17 = vld [vmem:[%s3324_s1 + $0x78] sm:$0xff]  ;;  %v1649_v21 = vor.u32 %v2226_v15, %v1648_v14  ;;  %v2308_v25 = vld [vmem:[%s3324_s1 + $0x70] sm:$0xff]  ;;  %v2315_v28 = vld [vmem:[%s3324_s1 + $0xa8] sm:$0xff] }
   0x8   :  { %v2325_v22 = vld [vmem:[%s3324_s1 + $0xf8] sm:$0xff]  ;;  %v2324_v26 = vld [vmem:[%s3324_s1 + $0xf0] sm:$0xff]  ;;  %v2307_v29 = vld [vmem:[%s3324_s1 + $0x68] sm:$0xff] }
   0x9   :  { %v2333_v23 = vld [vmem:[%s3324_s1 + $0x138] sm:$0xff]  ;;  %v2332_v27 = vld [vmem:[%s3324_s1 + $0x130] sm:$0xff]  ;;  %v2323_v30 = vld [vmem:[%s3324_s1 + $0xe8] sm:$0xff] }
   0xa   :  { %2372 = vmatpush.bf16.msra.mxu1 %v2299_v2  ;;  %2373 = vmatpush.bf16.msra.mxu2 %v2299_v2  ;;  %v2331_v31 = vld [vmem:[%s3324_s1 + $0x128] sm:$0xff]  ;;  %v2314_v32 = vld [vmem:[%s3324_s1 + $0xa0] sm:$0xff]  ;;  %v1756_v36 = vld [vmem:[%s3325_s0 + $0xd8] sm:$0xf] }
   0xb   :  { %2374 = vmatpush.bf16.msra.mxu3 %v2299_v2  ;;  %1043 = vmatpush.bf16.msra.mxu0 %v2299_v2  ;;  %v2306_v33 = vld [vmem:[%s3324_s1 + $0x60] sm:$0xff]  ;;  %v2253_v37 = vld [vmem:[%s3325_s0 + $0xf8] sm:$0xf0]  ;;  %v1828_v38 = vld [vmem:[%s3325_s0 + $0x168] sm:$0xf] }
   0xc   :  { %v2322_v34 = vld [vmem:[%s3324_s1 + $0xe0] sm:$0xff]  ;;  %v2271_v39 = vld [vmem:[%s3325_s0 + $0x188] sm:$0xf0]  ;;  %v1900_v40 = vld [vmem:[%s3325_s0 + $0x1f8] sm:$0xf]  ;;  %v1757_v46 = vor.u32 %v2253_v37, %v1756_v36 }
   0xd   :  { %v2330_v35 = vld [vmem:[%s3324_s1 + $0x120] sm:$0xff]  ;;  %v2289_v41 = vld [vmem:[%s3325_s0 + $0x218] sm:$0xf0]  ;;  %v1684_v42 = vld [vmem:[%s3325_s0 + $0x48] sm:$0xf]  ;;  %v1829_v47 = vor.u32 %v2271_v39, %v1828_v38 }
   0xe   :  { %2375 = vmatpush.bf16.msra.mxu1 %v2298_v3  ;;  %2376 = vmatpush.bf16.msra.mxu2 %v2298_v3  ;;  %v2235_v43 = vld [vmem:[%s3325_s0 + $0x68] sm:$0xf0]  ;;  %v2313_v44 = vld [vmem:[%s3324_s1 + $0x98] sm:$0xff]  ;;  %v1901_v48 = vor.u32 %v2289_v41, %v1900_v40  ;;  %v2312_v52 = vld [vmem:[%s3324_s1 + $0x90] sm:$0xff] }
   0xf   :  { %2377 = vmatpush.bf16.msra.mxu3 %v2298_v3  ;;  %1044 = vmatpush.bf16.msra.mxu0 %v2298_v3  ;;  %v2305_v45 = vld [vmem:[%s3324_s1 + $0x58] sm:$0xff]  ;;  %v1685_v49 = vor.u32 %v2235_v43, %v1684_v42  ;;  %v2304_v53 = vld [vmem:[%s3324_s1 + $0x50] sm:$0xff]  ;;  %v2311_v56 = vld [vmem:[%s3324_s1 + $0x88] sm:$0xff] }
  0x10   :  { %v2321_v50 = vld [vmem:[%s3324_s1 + $0xd8] sm:$0xff]  ;;  %v2320_v54 = vld [vmem:[%s3324_s1 + $0xd0] sm:$0xff]  ;;  %v2303_v57 = vld [vmem:[%s3324_s1 + $0x48] sm:$0xff] }
  0x11   :  { %v2329_v51 = vld [vmem:[%s3324_s1 + $0x118] sm:$0xff]  ;;  %v2328_v55 = vld [vmem:[%s3324_s1 + $0x110] sm:$0xff]  ;;  %v2319_v58 = vld [vmem:[%s3324_s1 + $0xc8] sm:$0xff] }
  0x12   :  { %2378 = vmatpush.bf16.msra.mxu1 %v2297_v4  ;;  %2379 = vmatpush.bf16.msra.mxu2 %v2297_v4  ;;  %v2327_v59 = vld [vmem:[%s3324_s1 + $0x108] sm:$0xff]  ;;  %v2310_v60 = vld [vmem:[%s3324_s1 + $0x80] sm:$0xff]  ;;  %v2349_v2 = vld [vmem:[%s3324_s1 + $0x1b8] sm:$0xff] }
  0x13   :  { %2380 = vmatpush.bf16.msra.mxu3 %v2297_v4  ;;  %1045 = vmatpush.bf16.msra.mxu0 %v2297_v4  ;;  %v2302_v61 = vld [vmem:[%s3324_s1 + $0x40] sm:$0xff]  ;;  %v1650_v1 = vld [vmem:[%s3325_s0 + $0x24] sm:$0xf0]  ;;  %v2341_v3 = vld [vmem:[%s3324_s1 + $0x178] sm:$0xff] }
  0x14   :  { %v2222_v62 = vld [vmem:[%s3325_s0 + $0x4] sm:$0xf]  ;;  %v1656_v4 = vld [vmem:[%s3325_s0 + $0x8] sm:$0xf]  ;;  %v1664_v8 = vld [vmem:[%s3325_s0 + $0x10] sm:$0xf] }
  0x15   :  { %v2318_v63 = vld [vmem:[%s3324_s1 + $0xc0] sm:$0xff]  ;;  %v2228_v9 = vld [vmem:[%s3325_s0 + $0x30] sm:$0xf0]  ;;  %v2357_v10 = vld [vmem:[%s3324_s1 + $0x1f8] sm:$0xff]  ;;  %v1653_v12 = vor.u32 %v2222_v62, %v1650_v1 }
  0x16   :  { %2381 = vmatpush.bf16.msra.mxu1 %v2296_v5  ;;  %2382 = vmatpush.bf16.msra.mxu2 %v2296_v5  ;;  %v2326_v0 = vld [vmem:[%s3324_s1 + $0x100] sm:$0xff]  ;;  %v2365_v11 = vld [vmem:[%s3324_s1 + $0x238] sm:$0xff]  ;;  %v1665_v15 = vor.u32 %v2228_v9, %v1664_v8  ;;  %v2240_v40 = vld [vmem:[%s3325_s0 + $0x94] sm:$0xf] }
  0x17   :  { %2383 = vmatpush.bf16.msra.mxu3 %v2296_v5  ;;  %1046 = vmatpush.bf16.msra.mxu0 %v2296_v5  ;;  %v2227_v5 = vld [vmem:[%s3325_s0 + $0x28] sm:$0xf0]  ;;  %v2346_v36 = vld [vmem:[%s3324_s1 + $0x1a0] sm:$0xff]  ;;  %v1722_v41 = vld [vmem:[%s3325_s0 + $0xb4] sm:$0xf0] }
  0x18   :  { %v1657_v13 = vor.u32 %v2227_v5, %v1656_v4  ;;  %v2354_v37 = vld [vmem:[%s3324_s1 + $0x1e0] sm:$0xff]  ;;  %v1728_v42 = vld [vmem:[%s3325_s0 + $0x98] sm:$0xf]  ;;  %v2245_v43 = vld [vmem:[%s3325_s0 + $0xb8] sm:$0xf0] }
  0x19   :  { %v2338_v38 = vld [vmem:[%s3324_s1 + $0x160] sm:$0xff]  ;;  %v1772_v62 = vld [vmem:[%s3325_s0 + $0xe8] sm:$0xf]  ;;  %v2344_v4 = vld [vmem:[%s3324_s1 + $0x190] sm:$0xff] }
  0x1a   :  { %2384 = vmatpush.bf16.msra.mxu1 %v2295_v6  ;;  %2385 = vmatpush.bf16.msra.mxu2 %v2295_v6  ;;  %v2362_v39 = vld [vmem:[%s3324_s1 + $0x220] sm:$0xff]  ;;  %v2352_v5 = vld [vmem:[%s3324_s1 + $0x1d0] sm:$0xff]  ;;  %v1794_v9 = vld [vmem:[%s3325_s0 + $0x144] sm:$0xf0] }
  0x1b   :  { %2386 = vmatpush.bf16.msra.mxu3 %v2295_v6  ;;  %1047 = vmatpush.bf16.msra.mxu0 %v2295_v6  ;;  %v2223_v6 = vld [vmem:[%s3325_s0 + $0xc] sm:$0xf]  ;;  %v2258_v8 = vld [vmem:[%s3325_s0 + $0x124] sm:$0xf] }
  0x1e   :  { %2387 = vmatpush.bf16.msra.mxu1 %v2294_v7  ;;  %2388 = vmatpush.bf16.msra.mxu2 %v2294_v7 }
  0x1f   :  { %2389 = vmatpush.bf16.msra.mxu3 %v2294_v7  ;;  %1048 = vmatpush.bf16.msra.mxu0 %v2294_v7  ;;  %v1658_v7 = vld [vmem:[%s3325_s0 + $0x2c] sm:$0xf0] }
  0x20   :  { %v1661_v14 = vor.u32 %v2223_v6, %v1658_v7  ;;  %v2336_v6 = vld [vmem:[%s3324_s1 + $0x150] sm:$0xff] }
  0x21   :  { %1059 = vmatmul.bf16.vlgmr.msra.gmra.mxu1 %v1721_v18  ;;  %1069 = vmatmul.bf16.vlgmr.msra.gmra.mxu2 %v1793_v19  ;;  %v2356_v18 = vld [vmem:[%s3324_s1 + $0x1f0] sm:$0xff] }
  0x22   :  { %1139 = vmatpush.bf16.msrb.mxu2 %v2317_v16  ;;  %1090 = vmatpush.bf16.msrb.mxu1 %v2309_v17  ;;  %v2348_v16 = vld [vmem:[%s3324_s1 + $0x1b0] sm:$0xff] }
  0x23   :  { %1079 = vmatmul.bf16.vlgmr.msra.gmra.mxu3 %v1865_v20  ;;  %1049 = vmatmul.bf16.vlgmr.msra.gmra.mxu0 %v1649_v21  ;;  %v2340_v17 = vld [vmem:[%s3324_s1 + $0x170] sm:$0xff]  ;;  %v2347_v20 = vld [vmem:[%s3324_s1 + $0x1a8] sm:$0xff] }
  0x24   :  { %1188 = vmatpush.bf16.msrb.mxu3 %v2325_v22  ;;  %1237 = vmatpush.bf16.msrb.mxu0 %v2333_v23  ;;  %v2364_v19 = vld [vmem:[%s3324_s1 + $0x230] sm:$0xff]  ;;  %v2339_v21 = vld [vmem:[%s3324_s1 + $0x168] sm:$0xff] }
  0x25   :  { %v2355_v22 = vld [vmem:[%s3324_s1 + $0x1e8] sm:$0xff]  ;;  %v2360_v7 = vld [vmem:[%s3324_s1 + $0x210] sm:$0xff] }
  0x26   :  { %1140 = vmatpush.bf16.msrb.mxu2 %v2316_v24  ;;  %1091 = vmatpush.bf16.msrb.mxu1 %v2308_v25  ;;  %v2363_v23 = vld [vmem:[%s3324_s1 + $0x228] sm:$0xff]  ;;  %v1686_v25 = vld [vmem:[%s3325_s0 + $0x6c] sm:$0xf0] }
  0x27   :  { %v2231_v24 = vld [vmem:[%s3325_s0 + $0x4c] sm:$0xf] }
  0x28   :  { %1189 = vmatpush.bf16.msrb.mxu3 %v2324_v26  ;;  %1238 = vmatpush.bf16.msrb.mxu0 %v2332_v27  ;;  %v1692_v26 = vld [vmem:[%s3325_s0 + $0x50] sm:$0xf]  ;;  %v2236_v27 = vld [vmem:[%s3325_s0 + $0x70] sm:$0xf0] }
  0x2a   :  { %1141 = vmatpush.bf16.msrb.mxu2 %v2315_v28  ;;  %1092 = vmatpush.bf16.msrb.mxu1 %v2307_v29  ;;  %v2232_v28 = vld [vmem:[%s3325_s0 + $0x54] sm:$0xf]  ;;  %v1694_v29 = vld [vmem:[%s3325_s0 + $0x74] sm:$0xf0] }
  0x2c   :  { %1190 = vmatpush.bf16.msrb.mxu3 %v2323_v30  ;;  %1239 = vmatpush.bf16.msrb.mxu0 %v2331_v31  ;;  %v1700_v30 = vld [vmem:[%s3325_s0 + $0x58] sm:$0xf]  ;;  %v2237_v31 = vld [vmem:[%s3325_s0 + $0x78] sm:$0xf0] }
  0x2e   :  { %1142 = vmatpush.bf16.msrb.mxu2 %v2314_v32  ;;  %1093 = vmatpush.bf16.msrb.mxu1 %v2306_v33  ;;  %v1689_v32 = vor.u32 %v2231_v24, %v1686_v25  ;;  %v1693_v33 = vor.u32 %v2236_v27, %v1692_v26  ;;  %v2267_v24 = vld [vmem:[%s3325_s0 + $0x16c] sm:$0xf]  ;;  %v1830_v25 = vld [vmem:[%s3325_s0 + $0x18c] sm:$0xf0]  ;;  %v2272_v27 = vld [vmem:[%s3325_s0 + $0x190] sm:$0xf0] }
  0x2f   :  { %v1836_v26 = vld [vmem:[%s3325_s0 + $0x170] sm:$0xf] }
  0x30   :  { %1191 = vmatpush.bf16.msrb.mxu3 %v2322_v34  ;;  %1240 = vmatpush.bf16.msrb.mxu0 %v2330_v35  ;;  %v1697_v34 = vor.u32 %v2232_v28, %v1694_v29  ;;  %v1701_v35 = vor.u32 %v2237_v31, %v1700_v30  ;;  %v2268_v28 = vld [vmem:[%s3325_s0 + $0x174] sm:$0xf]  ;;  %v1838_v29 = vld [vmem:[%s3325_s0 + $0x194] sm:$0xf0]  ;;  %v2273_v31 = vld [vmem:[%s3325_s0 + $0x198] sm:$0xf0] }
  0x31   :  { %1064 = vmatmul.bf16.gmra.mxu1 %v1757_v46  ;;  %1074 = vmatmul.bf16.gmra.mxu2 %v1829_v47  ;;  %v1736_v46 = vld [vmem:[%s3325_s0 + $0xa0] sm:$0xf]  ;;  %v2246_v47 = vld [vmem:[%s3325_s0 + $0xc0] sm:$0xf0]  ;;  %v1844_v30 = vld [vmem:[%s3325_s0 + $0x178] sm:$0xf] }
  0x32   :  { %1143 = vmatpush.bf16.msrb.mxu2 %v2313_v44  ;;  %1094 = vmatpush.bf16.msrb.mxu1 %v2305_v45  ;;  %v2241_v44 = vld [vmem:[%s3325_s0 + $0x9c] sm:$0xf]  ;;  %v1730_v45 = vld [vmem:[%s3325_s0 + $0xbc] sm:$0xf0] }
  0x33   :  { %1084 = vmatmul.bf16.gmra.mxu3 %v1901_v48  ;;  %1054 = vmatmul.bf16.gmra.mxu0 %v1685_v49  ;;  %v1725_v48 = vor.u32 %v2240_v40, %v1722_v41  ;;  %v1729_v49 = vor.u32 %v2245_v43, %v1728_v42  ;;  %v2276_v40 = vld [vmem:[%s3325_s0 + $0x1b4] sm:$0xf]  ;;  %v1866_v41 = vld [vmem:[%s3325_s0 + $0x1d4] sm:$0xf0]  ;;  %v2281_v43 = vld [vmem:[%s3325_s0 + $0x1d8] sm:$0xf0] }
  0x34   :  { %1192 = vmatpush.bf16.msrb.mxu3 %v2321_v50  ;;  %1241 = vmatpush.bf16.msrb.mxu0 %v2329_v51  ;;  %v1733_v50 = vor.u32 %v2241_v44, %v1730_v45  ;;  %v1737_v51 = vor.u32 %v2246_v47, %v1736_v46  ;;  %v1872_v42 = vld [vmem:[%s3325_s0 + $0x1b8] sm:$0xf]  ;;  %v2277_v44 = vld [vmem:[%s3325_s0 + $0x1bc] sm:$0xf]  ;;  %v1874_v45 = vld [vmem:[%s3325_s0 + $0x1dc] sm:$0xf0] }
  0x35   :  { %v1880_v46 = vld [vmem:[%s3325_s0 + $0x1c0] sm:$0xf]  ;;  %v2282_v47 = vld [vmem:[%s3325_s0 + $0x1e0] sm:$0xf0] }
  0x36   :  { %1144 = vmatpush.bf16.msrb.mxu2 %v2312_v52  ;;  %1095 = vmatpush.bf16.msrb.mxu1 %v2304_v53  ;;  %v2345_v52 = vld [vmem:[%s3324_s1 + $0x198] sm:$0xff] }
  0x37   :  { %v2353_v53 = vld [vmem:[%s3324_s1 + $0x1d8] sm:$0xff] }
  0x38   :  { %1193 = vmatpush.bf16.msrb.mxu3 %v2320_v54  ;;  %1242 = vmatpush.bf16.msrb.mxu0 %v2328_v55  ;;  %v2337_v54 = vld [vmem:[%s3324_s1 + $0x158] sm:$0xff] }
  0x39   :  { %v2361_v55 = vld [vmem:[%s3324_s1 + $0x218] sm:$0xff] }
  0x3a   :  { %1145 = vmatpush.bf16.msrb.mxu2 %v2311_v56  ;;  %1096 = vmatpush.bf16.msrb.mxu1 %v2303_v57  ;;  %v2249_v56 = vld [vmem:[%s3325_s0 + $0xdc] sm:$0xf]  ;;  %v1758_v57 = vld [vmem:[%s3325_s0 + $0xfc] sm:$0xf0] }
  0x3c   :  { %1194 = vmatpush.bf16.msrb.mxu3 %v2319_v58  ;;  %1243 = vmatpush.bf16.msrb.mxu0 %v2327_v59  ;;  %v1764_v58 = vld [vmem:[%s3325_s0 + $0xe0] sm:$0xf]  ;;  %v2254_v59 = vld [vmem:[%s3325_s0 + $0x100] sm:$0xf0] }
  0x3d   :  { %v1765_v1 = vor.u32 %v2254_v59, %v1764_v58  ;;  %v2285_v58 = vld [vmem:[%s3325_s0 + $0x1fc] sm:$0xf]  ;;  %v1902_v59 = vld [vmem:[%s3325_s0 + $0x21c] sm:$0xf0] }
  0x3e   :  { %1146 = vmatpush.bf16.msrb.mxu2 %v2310_v60  ;;  %1097 = vmatpush.bf16.msrb.mxu1 %v2302_v61  ;;  %v2250_v60 = vld [vmem:[%s3325_s0 + $0xe4] sm:$0xf]  ;;  %v1766_v61 = vld [vmem:[%s3325_s0 + $0x104] sm:$0xf0] }
  0x40   :  { %1195 = vmatpush.bf16.msrb.mxu3 %v2318_v63  ;;  %1244 = vmatpush.bf16.msrb.mxu0 %v2326_v0  ;;  %v2255_v63 = vld [vmem:[%s3325_s0 + $0x108] sm:$0xf0]  ;;  %v1761_v0 = vor.u32 %v2249_v56, %v1758_v57 }
  0x41   :  { %1098 = vmatmul.bf16.vlgmr.msrb.gmra.mxu1 %v1653_v12  ;;  %1147 = vmatmul.bf16.vlgmr.msrb.gmra.mxu2 %v1657_v13  ;;  %v2259_v12 = vld [vmem:[%s3325_s0 + $0x12c] sm:$0xf]  ;;  %v1802_v13 = vld [vmem:[%s3325_s0 + $0x14c] sm:$0xf0] }
  0x42   :  { %1335 = vmatpush.bf16.msra.mxu2 %v2349_v2  ;;  %1286 = vmatpush.bf16.msra.mxu1 %v2341_v3  ;;  %v1769_v2 = vor.u32 %v2250_v60, %v1766_v61  ;;  %v1773_v3 = vor.u32 %v2255_v63, %v1772_v62  ;;  %v1908_v60 = vld [vmem:[%s3325_s0 + $0x200] sm:$0xf]  ;;  %v2290_v61 = vld [vmem:[%s3325_s0 + $0x220] sm:$0xf0]  ;;  %v1910_v63 = vld [vmem:[%s3325_s0 + $0x224] sm:$0xf0] }
  0x43   :  { %1196 = vmatmul.bf16.vlgmr.msrb.gmra.mxu3 %v1661_v14  ;;  %1245 = vmatmul.bf16.vlgmr.msrb.gmra.mxu0 %v1665_v15  ;;  %v1808_v14 = vld [vmem:[%s3325_s0 + $0x130] sm:$0xf]  ;;  %v2264_v15 = vld [vmem:[%s3325_s0 + $0x150] sm:$0xf0]  ;;  %v2286_v62 = vld [vmem:[%s3325_s0 + $0x204] sm:$0xf] }
  0x44   :  { %1384 = vmatpush.bf16.msra.mxu3 %v2357_v10  ;;  %1433 = vmatpush.bf16.msra.mxu0 %v2365_v11  ;;  %v1800_v10 = vld [vmem:[%s3325_s0 + $0x128] sm:$0xf]  ;;  %v2263_v11 = vld [vmem:[%s3325_s0 + $0x148] sm:$0xf0] }
  0x46   :  { %1336 = vmatpush.bf16.msra.mxu2 %v2348_v16  ;;  %1287 = vmatpush.bf16.msra.mxu1 %v2340_v17  ;;  %v1797_v16 = vor.u32 %v2258_v8, %v1794_v9  ;;  %v1801_v17 = vor.u32 %v2263_v11, %v1800_v10 }
  0x48   :  { %1385 = vmatpush.bf16.msra.mxu3 %v2356_v18  ;;  %1434 = vmatpush.bf16.msra.mxu0 %v2364_v19  ;;  %v1805_v18 = vor.u32 %v2259_v12, %v1802_v13  ;;  %v1809_v19 = vor.u32 %v2264_v15, %v1808_v14  ;;  %v2224_v14 = vld [vmem:[%s3325_s0 + $0x14] sm:$0xf]  ;;  %v1666_v15 = vld [vmem:[%s3325_s0 + $0x34] sm:$0xf0] }
  0x4a   :  { %1337 = vmatpush.bf16.msra.mxu2 %v2347_v20  ;;  %1288 = vmatpush.bf16.msra.mxu1 %v2339_v21  ;;  %v2343_v20 = vld [vmem:[%s3324_s1 + $0x188] sm:$0xff] }
  0x4b   :  { %v2351_v21 = vld [vmem:[%s3324_s1 + $0x1c8] sm:$0xff] }
  0x4c   :  { %1386 = vmatpush.bf16.msra.mxu3 %v2355_v22  ;;  %1435 = vmatpush.bf16.msra.mxu0 %v2363_v23  ;;  %v2335_v22 = vld [vmem:[%s3324_s1 + $0x148] sm:$0xff] }
  0x4d   :  { %v2359_v23 = vld [vmem:[%s3324_s1 + $0x208] sm:$0xff] }
  0x4e   :  { %1338 = vmatpush.bf16.msra.mxu2 %v2346_v36  ;;  %1289 = vmatpush.bf16.msra.mxu1 %v2338_v38  ;;  %v2342_v36 = vld [vmem:[%s3324_s1 + $0x180] sm:$0xff] }
  0x4f   :  { %v2334_v38 = vld [vmem:[%s3324_s1 + $0x140] sm:$0xff] }
  0x50   :  { %1387 = vmatpush.bf16.msra.mxu3 %v2354_v37  ;;  %1436 = vmatpush.bf16.msra.mxu0 %v2362_v39  ;;  %v2350_v37 = vld [vmem:[%s3324_s1 + $0x1c0] sm:$0xff] }
  0x51   :  { %1103 = vmatmul.bf16.gmra.mxu1 %v1689_v32  ;;  %1152 = vmatmul.bf16.gmra.mxu2 %v1693_v33  ;;  %v1833_v32 = vor.u32 %v2267_v24, %v1830_v25  ;;  %v1837_v33 = vor.u32 %v2272_v27, %v1836_v26  ;;  %v2358_v39 = vld [vmem:[%s3324_s1 + $0x200] sm:$0xff]  ;;  %v1669_v24 = vor.u32 %v2224_v14, %v1666_v15 }
  0x52   :  { %1339 = vmatpush.bf16.msra.mxu2 %v2345_v52  ;;  %1290 = vmatpush.bf16.msra.mxu1 %v2337_v54  ;;  %v1881_v52 = vor.u32 %v2282_v47, %v1880_v46  ;;  %v2239_v46 = vld [vmem:[%s3325_s0 + $0x88] sm:$0xf0]  ;;  %v2242_v14 = vld [vmem:[%s3325_s0 + $0xa4] sm:$0xf] }
  0x53   :  { %1201 = vmatmul.bf16.gmra.mxu3 %v1697_v34  ;;  %1250 = vmatmul.bf16.gmra.mxu0 %v1701_v35  ;;  %v1841_v34 = vor.u32 %v2268_v28, %v1838_v29  ;;  %v1845_v35 = vor.u32 %v2273_v31, %v1844_v30 }
  0x54   :  { %1388 = vmatpush.bf16.msra.mxu3 %v2353_v53  ;;  %1437 = vmatpush.bf16.msra.mxu0 %v2361_v55 }
  0x56   :  { %1340 = vmatpush.bf16.msra.mxu2 %v2344_v4  ;;  %1291 = vmatpush.bf16.msra.mxu1 %v2336_v6  ;;  %v1905_v4 = vor.u32 %v2285_v58, %v1902_v59 }
  0x58   :  { %1389 = vmatpush.bf16.msra.mxu3 %v2352_v5  ;;  %1438 = vmatpush.bf16.msra.mxu0 %v2360_v7  ;;  %v1909_v5 = vor.u32 %v2290_v61, %v1908_v60  ;;  %v1913_v7 = vor.u32 %v2286_v62, %v1910_v63 }
  0x5a   :  { %1341 = vmatpush.bf16.msra.mxu2 %v2343_v20  ;;  %1292 = vmatpush.bf16.msra.mxu1 %v2335_v22  ;;  %v1680_v20 = vld [vmem:[%s3325_s0 + $0x20] sm:$0xf] }
  0x5c   :  { %1390 = vmatpush.bf16.msra.mxu3 %v2351_v21  ;;  %1439 = vmatpush.bf16.msra.mxu0 %v2359_v23  ;;  %v2230_v21 = vld [vmem:[%s3325_s0 + $0x40] sm:$0xf0] }
  0x5d   :  { %v1681_v28 = vor.u32 %v2230_v21, %v1680_v20  ;;  %v2248_v20 = vld [vmem:[%s3325_s0 + $0xd0] sm:$0xf0] }
  0x5e   :  { %1342 = vmatpush.bf16.msra.mxu2 %v2342_v36  ;;  %1293 = vmatpush.bf16.msra.mxu1 %v2334_v38  ;;  %v2233_v38 = vld [vmem:[%s3325_s0 + $0x5c] sm:$0xf] }
  0x60   :  { %1391 = vmatpush.bf16.msra.mxu3 %v2350_v37  ;;  %1440 = vmatpush.bf16.msra.mxu0 %v2358_v39  ;;  %v1702_v39 = vld [vmem:[%s3325_s0 + $0x7c] sm:$0xf0] }
  0x61   :  { %1108 = vmatmul.bf16.gmra.mxu1 %v1725_v48  ;;  %1157 = vmatmul.bf16.gmra.mxu2 %v1729_v49  ;;  %v1869_v48 = vor.u32 %v2276_v40, %v1866_v41  ;;  %v1873_v49 = vor.u32 %v2281_v43, %v1872_v42  ;;  %v1708_v41 = vld [vmem:[%s3325_s0 + $0x60] sm:$0xf]  ;;  %v2238_v42 = vld [vmem:[%s3325_s0 + $0x80] sm:$0xf0] }
  0x62   :  { %v2234_v43 = vld [vmem:[%s3325_s0 + $0x64] sm:$0xf] }
  0x63   :  { %1206 = vmatmul.bf16.gmra.mxu3 %v1733_v50  ;;  %1255 = vmatmul.bf16.gmra.mxu0 %v1737_v51  ;;  %v1877_v51 = vor.u32 %v2277_v44, %v1874_v45  ;;  %v1710_v44 = vld [vmem:[%s3325_s0 + $0x84] sm:$0xf0] }
  0x64   :  { %v1716_v45 = vld [vmem:[%s3325_s0 + $0x68] sm:$0xf] }
  0x65   :  { %v1717_v58 = vor.u32 %v2239_v46, %v1716_v45  ;;  %v1780_v45 = vld [vmem:[%s3325_s0 + $0xf0] sm:$0xf]  ;;  %v2256_v46 = vld [vmem:[%s3325_s0 + $0x110] sm:$0xf0] }
  0x71   :  { %1113 = vmatmul.bf16.gmra.mxu1 %v1761_v0  ;;  %1162 = vmatmul.bf16.gmra.mxu2 %v1765_v1  ;;  %v1916_v0 = vld [vmem:[%s3325_s0 + $0x208] sm:$0xf]  ;;  %v2291_v1 = vld [vmem:[%s3325_s0 + $0x228] sm:$0xf0] }
  0x72   :  { %v1917_v8 = vor.u32 %v2291_v1, %v1916_v0 }
  0x73   :  { %1211 = vmatmul.bf16.gmra.mxu3 %v1769_v2  ;;  %1260 = vmatmul.bf16.gmra.mxu0 %v1773_v3 }
  0x81   :  { %1118 = vmatmul.bf16.gmra.mxu1 %v1797_v16  ;;  %1167 = vmatmul.bf16.gmra.mxu2 %v1801_v17  ;;  %v1672_v16 = vld [vmem:[%s3325_s0 + $0x18] sm:$0xf]  ;;  %v2229_v17 = vld [vmem:[%s3325_s0 + $0x38] sm:$0xf0] }
  0x82   :  { %v1673_v25 = vor.u32 %v2229_v17, %v1672_v16  ;;  %v1744_v16 = vld [vmem:[%s3325_s0 + $0xa8] sm:$0xf]  ;;  %v2247_v17 = vld [vmem:[%s3325_s0 + $0xc8] sm:$0xf0] }
  0x83   :  { %1216 = vmatmul.bf16.gmra.mxu3 %v1805_v18  ;;  %1265 = vmatmul.bf16.gmra.mxu0 %v1809_v19  ;;  %v2225_v18 = vld [vmem:[%s3325_s0 + $0x1c] sm:$0xf]  ;;  %v1674_v19 = vld [vmem:[%s3325_s0 + $0x3c] sm:$0xf0] }
  0x84   :  { %v1677_v27 = vor.u32 %v2225_v18, %v1674_v19  ;;  %v1746_v18 = vld [vmem:[%s3325_s0 + $0xcc] sm:$0xf0] }
  0x85   :  { %v1752_v19 = vld [vmem:[%s3325_s0 + $0xb0] sm:$0xf] }
  0x91   :  { %1123 = vmatmul.bf16.gmra.mxu1 %v1833_v32  ;;  %1172 = vmatmul.bf16.gmra.mxu2 %v1837_v33 }
  0x93   :  { %1221 = vmatmul.bf16.gmra.mxu3 %v1841_v34  ;;  %1270 = vmatmul.bf16.gmra.mxu0 %v1845_v35 }
  0x9e   :  { %v2850_v50 = vpop.f32.mrf.mxu1 }
  0xa0   :  { %v1050_v53 = vpop.f32.mrf.mxu0 }
  0xa1   :  { %1128 = vmatmul.bf16.gmra.mxu1 %v1869_v48  ;;  %1177 = vmatmul.bf16.gmra.mxu2 %v1873_v49 }
  0xa3   :  { %1226 = vmatmul.bf16.gmra.mxu3 %v1877_v51  ;;  %1275 = vmatmul.bf16.gmra.mxu0 %v1881_v52  ;;  %v1705_v51 = vor.u32 %v2233_v38, %v1702_v39  ;;  %v1709_v52 = vor.u32 %v2238_v42, %v1708_v41 }
  0xa4   :  { %v2852_v54 = vpop.f32.mrf.mxu2 }
  0xa6   :  { %v2854_v55 = vpop.f32.mrf.mxu3  ;;  %v2856_v56 = vpop.f32.mrf.mxu1 }
  0xa8   :  { %v1052_v57 = vpop.f32.mrf.mxu0 }
  0xac   :  { %v2882_v2 = vpop.f32.mrf.mxu2 }
  0xae   :  { %v2884_v3 = vpop.f32.mrf.mxu3  ;;  %v2886_v6 = vpop.f32.mrf.mxu1 }
  0xb0   :  { %v1055_v9 = vpop.f32.mrf.mxu0 }
  0xb1   :  { %1133 = vmatmul.bf16.gmra.mxu1 %v1905_v4  ;;  %1182 = vmatmul.bf16.gmra.mxu2 %v1909_v5 }
  0xb3   :  { %1231 = vmatmul.bf16.gmra.mxu3 %v1913_v7  ;;  %1280 = vmatmul.bf16.gmra.mxu0 %v1917_v8 }
  0xb4   :  { %v2888_v10 = vpop.f32.mrf.mxu2 }
  0xb6   :  { %v2890_v11 = vpop.f32.mrf.mxu3  ;;  %v2892_v12 = vpop.f32.mrf.mxu1 }
  0xb8   :  { %v1057_v13 = vpop.f32.mrf.mxu0 }
  0xbc   :  { %v2918_v22 = vpop.f32.mrf.mxu2 }
  0xbe   :  { %v2920_v23 = vpop.f32.mrf.mxu3  ;;  %v1099_v26 = vpop.f32.mrf.mxu1 }
  0xbf   :  { %v1100_v29 = vadd.f32 %v1099_v26, %v1050_v53 }
  0xc0   :  { %v1246_v30 = vpop.f32.mrf.mxu0 }
  0xc1   :  { %1294 = vmatmul.bf16.vlgmr.msra.gmra.mxu1 %v1669_v24  ;;  %1343 = vmatmul.bf16.vlgmr.msra.gmra.mxu2 %v1673_v25 }
  0xc3   :  { %1392 = vmatmul.bf16.vlgmr.msra.gmra.mxu3 %v1677_v27  ;;  %1441 = vmatmul.bf16.vlgmr.msra.gmra.mxu0 %v1681_v28  ;;  %v1745_v27 = vor.u32 %v2247_v17, %v1744_v16 }
  0xc4   :  { %v1148_v31 = vpop.f32.mrf.mxu2 }
  0xc5   :  { %v1149_v32 = vadd.f32 %v1148_v31, %v1100_v29 }
  0xc6   :  { %v1197_v33 = vpop.f32.mrf.mxu3  ;;  %v1101_v34 = vpop.f32.mrf.mxu1 }
  0xc7   :  { %v1198_v35 = vadd.f32 %v1197_v33, %v1149_v32  ;;  %v1102_v36 = vadd.f32 %v1101_v34, %v1052_v57  ;;  %v1713_v57 = vor.u32 %v2234_v43, %v1710_v44  ;;  %v2251_v43 = vld [vmem:[%s3325_s0 + $0xec] sm:$0xf] }
  0xc8   :  { %v1248_v37 = vpop.f32.mrf.mxu0 }
  0xc9   :  { %v2928_v40 = vadd.f32 %v1246_v30, %v1198_v35  ;;  %v1753_v30 = vor.u32 %v2248_v20, %v1752_v19  ;;  %v1816_v19 = vld [vmem:[%s3325_s0 + $0x138] sm:$0xf]  ;;  %v2265_v20 = vld [vmem:[%s3325_s0 + $0x158] sm:$0xf0] }
  0xcc   :  { %v1150_v47 = vpop.f32.mrf.mxu2 }
  0xcd   :  { %v1151_v48 = vadd.f32 %v1150_v47, %v1102_v36  ;;  %v1782_v47 = vld [vmem:[%s3325_s0 + $0x114] sm:$0xf0] }
  0xce   :  { %v1199_v49 = vpop.f32.mrf.mxu3  ;;  %v1104_v53 = vpop.f32.mrf.mxu1 }
  0xcf   :  { %v1200_v59 = vadd.f32 %v1199_v49, %v1151_v48  ;;  %v1105_v60 = vadd.f32 %v1104_v53, %v1055_v9  ;;  %v1738_v9 = vld [vmem:[%s3325_s0 + $0xc4] sm:$0xf0]  ;;  %v1788_v48 = vld [vmem:[%s3325_s0 + $0xf8] sm:$0xf]  ;;  %v2257_v49 = vld [vmem:[%s3325_s0 + $0x118] sm:$0xf0] }
  0xd0   :  { %v1251_v61 = vpop.f32.mrf.mxu0  ;;  %v1741_v26 = vor.u32 %v2242_v14, %v1738_v9 }
  0xd1   :  { %1299 = vmatmul.bf16.gmra.mxu1 %v1705_v51  ;;  %1348 = vmatmul.bf16.gmra.mxu2 %v1709_v52  ;;  %v2948_v62 = vadd.f32 %v1248_v37, %v1200_v59 }
  0xd3   :  { %1397 = vmatmul.bf16.gmra.mxu3 %v1713_v57  ;;  %1446 = vmatmul.bf16.gmra.mxu0 %v1717_v58  ;;  %v1781_v58 = vor.u32 %v2256_v46, %v1780_v45  ;;  %v2269_v46 = vld [vmem:[%s3325_s0 + $0x17c] sm:$0xf] }
  0xd4   :  { %v1153_v63 = vpop.f32.mrf.mxu2 }
  0xd5   :  { %v1154_v0 = vadd.f32 %v1153_v63, %v1105_v60 }
  0xd6   :  { %v1202_v1 = vpop.f32.mrf.mxu3  ;;  %v1106_v4 = vpop.f32.mrf.mxu1 }
  0xd7   :  { %v1203_v5 = vadd.f32 %v1202_v1, %v1154_v0  ;;  %v1107_v7 = vadd.f32 %v1106_v4, %v1057_v13  ;;  %v2243_v13 = vld [vmem:[%s3325_s0 + $0xac] sm:$0xf] }
  0xd8   :  { %v1253_v8 = vpop.f32.mrf.mxu0  ;;  %v1749_v29 = vor.u32 %v2243_v13, %v1746_v18  ;;  %v2260_v13 = vld [vmem:[%s3325_s0 + $0x134] sm:$0xf] }
  0xd9   :  { %v2956_v15 = vadd.f32 %v1251_v61, %v1203_v5  ;;  %v1789_v61 = vor.u32 %v2257_v49, %v1788_v48  ;;  %v2274_v48 = vld [vmem:[%s3325_s0 + $0x1a0] sm:$0xf0] }
  0xda   :  { %v2270_v49 = vld [vmem:[%s3325_s0 + $0x184] sm:$0xf] }
  0xdc   :  { %v1155_v21 = vpop.f32.mrf.mxu2 }
  0xdd   :  { %v1156_v24 = vadd.f32 %v1155_v21, %v1107_v7  ;;  %v1818_v21 = vld [vmem:[%s3325_s0 + $0x15c] sm:$0xf0] }
  0xde   :  { %v1204_v25 = vpop.f32.mrf.mxu3  ;;  %v1109_v28 = vpop.f32.mrf.mxu1 }
  0xdf   :  { %v1205_v31 = vadd.f32 %v1204_v25, %v1156_v24  ;;  %v1110_v32 = vadd.f32 %v1109_v28, %v2850_v50  ;;  %v1774_v50 = vld [vmem:[%s3325_s0 + $0x10c] sm:$0xf0]  ;;  %v1824_v24 = vld [vmem:[%s3325_s0 + $0x140] sm:$0xf]  ;;  %v2266_v25 = vld [vmem:[%s3325_s0 + $0x160] sm:$0xf0] }
  0xe0   :  { %v1256_v33 = vpop.f32.mrf.mxu0  ;;  %v1777_v57 = vor.u32 %v2251_v43, %v1774_v50 }
  0xe1   :  { %1304 = vmatmul.bf16.gmra.mxu1 %v1741_v26  ;;  %1353 = vmatmul.bf16.gmra.mxu2 %v1745_v27  ;;  %v2977_v34 = vadd.f32 %v1253_v8, %v1205_v31 }
  0xe3   :  { %1402 = vmatmul.bf16.gmra.mxu3 %v1749_v29  ;;  %1451 = vmatmul.bf16.gmra.mxu0 %v1753_v30  ;;  %v1817_v30 = vor.u32 %v2265_v20, %v1816_v19  ;;  %v2278_v20 = vld [vmem:[%s3325_s0 + $0x1c4] sm:$0xf] }
  0xe4   :  { %v1158_v35 = vpop.f32.mrf.mxu2 }
  0xe5   :  { %v1159_v36 = vadd.f32 %v1158_v35, %v1110_v32 }
  0xe6   :  { %v1207_v37 = vpop.f32.mrf.mxu3  ;;  %v1111_v38 = vpop.f32.mrf.mxu1 }
  0xe7   :  { %v1208_v39 = vadd.f32 %v1207_v37, %v1159_v36  ;;  %v1112_v41 = vadd.f32 %v1111_v38, %v2856_v56  ;;  %v2252_v56 = vld [vmem:[%s3325_s0 + $0xf4] sm:$0xf] }
  0xe8   :  { %v1258_v42 = vpop.f32.mrf.mxu0  ;;  %v1785_v60 = vor.u32 %v2252_v56, %v1782_v47  ;;  %v1846_v56 = vld [vmem:[%s3325_s0 + $0x19c] sm:$0xf0] }
  0xe9   :  { %v2986_v44 = vadd.f32 %v1256_v33, %v1208_v39  ;;  %v1825_v33 = vor.u32 %v2266_v25, %v1824_v24  ;;  %v2283_v24 = vld [vmem:[%s3325_s0 + $0x1e8] sm:$0xf0] }
  0xea   :  { %v2279_v25 = vld [vmem:[%s3325_s0 + $0x1cc] sm:$0xf] }
  0xec   :  { %v1160_v51 = vpop.f32.mrf.mxu2 }
  0xed   :  { %v1161_v52 = vadd.f32 %v1160_v51, %v1112_v41 }
  0xee   :  { %v1209_v53 = vpop.f32.mrf.mxu3  ;;  %v1114_v59 = vpop.f32.mrf.mxu1 }
  0xef   :  { %v1210_v63 = vadd.f32 %v1209_v53, %v1161_v52  ;;  %v1115_v0 = vadd.f32 %v1114_v59, %v2886_v6  ;;  %v1810_v6 = vld [vmem:[%s3325_s0 + $0x154] sm:$0xf0]  ;;  %v1854_v52 = vld [vmem:[%s3325_s0 + $0x1a4] sm:$0xf0] }
  0xf0   :  { %v1261_v1 = vpop.f32.mrf.mxu0  ;;  %v1813_v29 = vor.u32 %v2260_v13, %v1810_v6  ;;  %v1860_v53 = vld [vmem:[%s3325_s0 + $0x188] sm:$0xf] }
  0xf1   :  { %1309 = vmatmul.bf16.gmra.mxu1 %v1777_v57  ;;  %1358 = vmatmul.bf16.gmra.mxu2 %v1781_v58  ;;  %v3007_v4 = vadd.f32 %v1258_v42, %v1210_v63  ;;  %v2275_v57 = vld [vmem:[%s3325_s0 + $0x1a8] sm:$0xf0] }
  0xf3   :  { %1407 = vmatmul.bf16.gmra.mxu3 %v1785_v60  ;;  %1456 = vmatmul.bf16.gmra.mxu0 %v1789_v61  ;;  %v1849_v61 = vor.u32 %v2269_v46, %v1846_v56 }
  0xf4   :  { %v1163_v5 = vpop.f32.mrf.mxu2 }
  0xf5   :  { %v1164_v7 = vadd.f32 %v1163_v5, %v1115_v0 }
  0xf6   :  { %v1212_v8 = vpop.f32.mrf.mxu3  ;;  %v1116_v14 = vpop.f32.mrf.mxu1 }
  0xf7   :  { %v1213_v9 = vadd.f32 %v1212_v8, %v1164_v7  ;;  %v1117_v16 = vadd.f32 %v1116_v14, %v2892_v12  ;;  %v2261_v12 = vld [vmem:[%s3325_s0 + $0x13c] sm:$0xf] }
  0xf8   :  { %v1263_v17 = vpop.f32.mrf.mxu0  ;;  %v1821_v32 = vor.u32 %v2261_v12, %v1818_v21  ;;  %v1882_v12 = vld [vmem:[%s3325_s0 + $0x1e4] sm:$0xf0] }
  0xf9   :  { %v3016_v18 = vadd.f32 %v1261_v1, %v1213_v9  ;;  %v1857_v1 = vor.u32 %v2270_v49, %v1854_v52  ;;  %v2287_v49 = vld [vmem:[%s3325_s0 + $0x20c] sm:$0xf] }
  0xfc   :  { %v1165_v26 = vpop.f32.mrf.mxu2 }
  0xfd   :  { %v1166_v27 = vadd.f32 %v1165_v26, %v1117_v16 }
  0xfe   :  { %v1214_v28 = vpop.f32.mrf.mxu3  ;;  %v1119_v31 = vpop.f32.mrf.mxu1 }
  0xff   :  { %v1215_v35 = vadd.f32 %v1214_v28, %v1166_v27  ;;  %v1120_v38 = vadd.f32 %v1119_v31, %v2852_v54  ;;  %v1852_v54 = vld [vmem:[%s3325_s0 + $0x180] sm:$0xf]  ;;  %v1890_v27 = vld [vmem:[%s3325_s0 + $0x1ec] sm:$0xf0] }
 0x100   :  { %v1266_v36 = vpop.f32.mrf.mxu0  ;;  %v1853_v63 = vor.u32 %v2274_v48, %v1852_v54  ;;  %v1896_v28 = vld [vmem:[%s3325_s0 + $0x1d0] sm:$0xf] }
 0x101   :  { %1314 = vmatmul.bf16.gmra.mxu1 %v1813_v29  ;;  %1363 = vmatmul.bf16.gmra.mxu2 %v1817_v30  ;;  %v3036_v37 = vadd.f32 %v1263_v17, %v1215_v35  ;;  %v2284_v29 = vld [vmem:[%s3325_s0 + $0x1f0] sm:$0xf0] }
 0x103   :  { %1412 = vmatmul.bf16.gmra.mxu3 %v1821_v32  ;;  %1461 = vmatmul.bf16.gmra.mxu0 %v1825_v33  ;;  %v1885_v33 = vor.u32 %v2278_v20, %v1882_v12 }
 0x104   :  { %v1168_v39 = vpop.f32.mrf.mxu2 }
 0x105   :  { %v1169_v41 = vadd.f32 %v1168_v39, %v1120_v38  ;;  %v1893_v38 = vor.u32 %v2279_v25, %v1890_v27 }
 0x106   :  { %v1217_v42 = vpop.f32.mrf.mxu3  ;;  %v1121_v43 = vpop.f32.mrf.mxu1 }
 0x107   :  { %v1218_v50 = vadd.f32 %v1217_v42, %v1169_v41  ;;  %v1122_v51 = vadd.f32 %v1121_v43, %v2882_v2  ;;  %v1861_v2 = vor.u32 %v2275_v57, %v1860_v53  ;;  %v2292_v53 = vld [vmem:[%s3325_s0 + $0x230] sm:$0xf0] }
 0x108   :  { %v1268_v45 = vpop.f32.mrf.mxu0  ;;  %v2288_v57 = vld [vmem:[%s3325_s0 + $0x214] sm:$0xf] }
 0x109   :  { %v3045_v47 = vadd.f32 %v1266_v36, %v1218_v50 }
 0x10c   :  { %v1170_v58 = vpop.f32.mrf.mxu2 }
 0x10d   :  { %v1171_v59 = vadd.f32 %v1170_v58, %v1122_v51  ;;  %v1918_v51 = vld [vmem:[%s3325_s0 + $0x22c] sm:$0xf0] }
 0x10e   :  { %v1219_v60 = vpop.f32.mrf.mxu3  ;;  %v1124_v0 = vpop.f32.mrf.mxu1 }
 0x10f   :  { %v1220_v5 = vadd.f32 %v1219_v60, %v1171_v59  ;;  %v1125_v14 = vadd.f32 %v1124_v0, %v2888_v10  ;;  %v1888_v10 = vld [vmem:[%s3325_s0 + $0x1c8] sm:$0xf]  ;;  %v1926_v59 = vld [vmem:[%s3325_s0 + $0x234] sm:$0xf0] }
 0x110   :  { %v1271_v7 = vpop.f32.mrf.mxu0  ;;  %v1889_v35 = vor.u32 %v2283_v24, %v1888_v10  ;;  %v1932_v60 = vld [vmem:[%s3325_s0 + $0x218] sm:$0xf] }
 0x111   :  { %1319 = vmatmul.bf16.gmra.mxu1 %v1849_v61  ;;  %1368 = vmatmul.bf16.gmra.mxu2 %v1853_v63  ;;  %v3066_v8 = vadd.f32 %v1268_v45, %v1220_v5  ;;  %v2293_v61 = vld [vmem:[%s3325_s0 + $0x238] sm:$0xf0] }
 0x113   :  { %1417 = vmatmul.bf16.gmra.mxu3 %v1857_v1  ;;  %1466 = vmatmul.bf16.gmra.mxu0 %v1861_v2  ;;  %v1921_v2 = vor.u32 %v2287_v49, %v1918_v51 }
 0x114   :  { %v1173_v9 = vpop.f32.mrf.mxu2 }
 0x115   :  { %v1174_v16 = vadd.f32 %v1173_v9, %v1125_v14  ;;  %v1929_v14 = vor.u32 %v2288_v57, %v1926_v59 }
 0x116   :  { %v1222_v17 = vpop.f32.mrf.mxu3  ;;  %v1126_v13 = vpop.f32.mrf.mxu1 }
 0x117   :  { %v1223_v6 = vadd.f32 %v1222_v17, %v1174_v16  ;;  %v1127_v26 = vadd.f32 %v1126_v13, %v2918_v22  ;;  %v1897_v22 = vor.u32 %v2284_v29, %v1896_v28 }
 0x118   :  { %v1273_v19 = vpop.f32.mrf.mxu0 }
 0x119   :  { %v3075_v21 = vadd.f32 %v1271_v7, %v1223_v6 }
 0x11c   :  { %v1175_v30 = vpop.f32.mrf.mxu2 }
 0x11d   :  { %v1176_v31 = vadd.f32 %v1175_v30, %v1127_v26 }
 0x11e   :  { %v1224_v32 = vpop.f32.mrf.mxu3  ;;  %v1129_v36 = vpop.f32.mrf.mxu1 }
 0x11f   :  { %v1225_v39 = vadd.f32 %v1224_v32, %v1176_v31  ;;  %v1130_v43 = vadd.f32 %v1129_v36, %v2854_v55  ;;  %v1924_v55 = vld [vmem:[%s3325_s0 + $0x210] sm:$0xf] }
 0x120   :  { %v1276_v41 = vpop.f32.mrf.mxu0  ;;  %v1925_v5 = vor.u32 %v2292_v53, %v1924_v55 }
 0x121   :  { %1324 = vmatmul.bf16.gmra.mxu1 %v1885_v33  ;;  %1373 = vmatmul.bf16.gmra.mxu2 %v1889_v35  ;;  %v3096_v42 = vadd.f32 %v1273_v19, %v1225_v39 }
 0x123   :  { %1422 = vmatmul.bf16.gmra.mxu3 %v1893_v38  ;;  %1471 = vmatmul.bf16.gmra.mxu0 %v1897_v22 }
 0x124   :  { %v1178_v50 = vpop.f32.mrf.mxu2 }
 0x125   :  { %v1179_v45 = vadd.f32 %v1178_v50, %v1130_v43 }
 0x126   :  { %v1227_v46 = vpop.f32.mrf.mxu3  ;;  %v1131_v56 = vpop.f32.mrf.mxu1 }
 0x127   :  { %v1228_v54 = vadd.f32 %v1227_v46, %v1179_v45  ;;  %v1132_v58 = vadd.f32 %v1131_v56, %v2884_v3  ;;  %v1933_v3 = vor.u32 %v2293_v61, %v1932_v60 }
 0x128   :  { %v1278_v48 = vpop.f32.mrf.mxu0 }
 0x129   :  { %v3105_v52 = vadd.f32 %v1276_v41, %v1228_v54 }
 0x12c   :  { %v1180_v63 = vpop.f32.mrf.mxu2 }
 0x12d   :  { %v1181_v0 = vadd.f32 %v1180_v63, %v1132_v58 }
 0x12e   :  { %v1229_v1 = vpop.f32.mrf.mxu3  ;;  %v1134_v7 = vpop.f32.mrf.mxu1 }
 0x12f   :  { %v1230_v9 = vadd.f32 %v1229_v1, %v1181_v0  ;;  %v1135_v13 = vadd.f32 %v1134_v7, %v2890_v11 }
 0x130   :  { %v1281_v16 = vpop.f32.mrf.mxu0 }
 0x131   :  { %1329 = vmatmul.bf16.gmra.mxu1 %v1921_v2  ;;  %1378 = vmatmul.bf16.gmra.mxu2 %v1925_v5  ;;  %v3126_v17 = vadd.f32 %v1278_v48, %v1230_v9 }
 0x133   :  { %1427 = vmatmul.bf16.gmra.mxu3 %v1929_v14  ;;  %1476 = vmatmul.bf16.gmra.mxu0 %v1933_v3 }
 0x134   :  { %v1183_v6 = vpop.f32.mrf.mxu2 }
 0x135   :  { %v1184_v19 = vadd.f32 %v1183_v6, %v1135_v13 }
 0x136   :  { %v1232_v20 = vpop.f32.mrf.mxu3  ;;  %v1136_v12 = vpop.f32.mrf.mxu1 }
 0x137   :  { %v1233_v10 = vadd.f32 %v1232_v20, %v1184_v19  ;;  %v1137_v26 = vadd.f32 %v1136_v12, %v2920_v23 }
 0x138   :  { %v1283_v24 = vpop.f32.mrf.mxu0 }
 0x139   :  { %v3129_v25 = vadd.f32 %v1281_v16, %v1233_v10 }
 0x13c   :  { %v1185_v27 = vpop.f32.mrf.mxu2 }
 0x13d   :  { %v1186_v28 = vadd.f32 %v1185_v27, %v1137_v26 }
 0x13e   :  { %v1234_v29 = vpop.f32.mrf.mxu3  ;;  %v1295_v30 = vpop.f32.mrf.mxu1 }
 0x13f   :  { %v1235_v31 = vadd.f32 %v1234_v29, %v1186_v28  ;;  %v1296_v32 = vadd.f32 %v1295_v30, %v2928_v40 }
 0x140   :  { %v1442_v33 = vpop.f32.mrf.mxu0 }
 0x141   :  { %v3133_v35 = vadd.f32 %v1283_v24, %v1235_v31 }
 0x144   :  { %v1344_v11 = vpop.f32.mrf.mxu2 }
 0x145   :  { %v1345_v36 = vadd.f32 %v1344_v11, %v1296_v32 }
 0x146   :  { %v1393_v38 = vpop.f32.mrf.mxu3  ;;  %v1297_v22 = vpop.f32.mrf.mxu1 }
 0x147   :  { %v1394_v39 = vadd.f32 %v1393_v38, %v1345_v36  ;;  %v1298_v41 = vadd.f32 %v1297_v22, %v2948_v62 }
 0x148   :  { %v1444_v43 = vpop.f32.mrf.mxu0 }
 0x149   :  { %v3136_v50 = vadd.f32 %v1442_v33, %v1394_v39 }
 0x14c   :  { %v1346_v23 = vpop.f32.mrf.mxu2 }
 0x14d   :  { %v1347_v45 = vadd.f32 %v1346_v23, %v1298_v41 }
 0x14e   :  { %v1395_v46 = vpop.f32.mrf.mxu3  ;;  %v1300_v56 = vpop.f32.mrf.mxu1 }
 0x14f   :  { %v1396_v54 = vadd.f32 %v1395_v46, %v1347_v45  ;;  %v1301_v40 = vadd.f32 %v1300_v56, %v2956_v15 }
 0x150   :  { %v1447_v48 = vpop.f32.mrf.mxu0 }
 0x151   :  { %v3139_v49 = vadd.f32 %v1444_v43, %v1396_v54 }
 0x153   :  { %v1482_v51 = vadd.f32 %v3139_v49, %v3136_v50 }
 0x154   :  { %v1349_v55 = vpop.f32.mrf.mxu2 }
 0x155   :  { %v1350_v53 = vadd.f32 %v1349_v55, %v1301_v40 }
 0x156   :  { %v1398_v57 = vpop.f32.mrf.mxu3  ;;  %v1302_v62 = vpop.f32.mrf.mxu1 }
 0x157   :  { %v1399_v58 = vadd.f32 %v1398_v57, %v1350_v53  ;;  %v1303_v59 = vadd.f32 %v1302_v62, %v2977_v34 }
 0x158   :  { %v1449_v60 = vpop.f32.mrf.mxu0 }
 0x159   :  { %v3144_v61 = vadd.f32 %v1447_v48, %v1399_v58 }
 0x15b   :  { %v1483_v63 = vadd.f32 %v1482_v51, %v3144_v61 }
 0x15c   :  { %v1351_v0 = vpop.f32.mrf.mxu2 }
 0x15d   :  { %v1352_v15 = vadd.f32 %v1351_v0, %v1303_v59 }
 0x15e   :  { %v1400_v1 = vpop.f32.mrf.mxu3  ;;  %v1305_v2 = vpop.f32.mrf.mxu1 }
 0x15f   :  { %v1401_v5 = vadd.f32 %v1400_v1, %v1352_v15  ;;  %v1306_v7 = vadd.f32 %v1305_v2, %v2986_v44 }
 0x160   :  { %v1452_v14 = vpop.f32.mrf.mxu0 }
 0x161   :  { %v3148_v3 = vadd.f32 %v1449_v60, %v1401_v5 }
 0x163   :  { %v1484_v9 = vadd.f32 %v1483_v63, %v3148_v3 }
 0x164   :  { %v1354_v16 = vpop.f32.mrf.mxu2 }
 0x165   :  { %v1355_v13 = vadd.f32 %v1354_v16, %v1306_v7 }
 0x166   :  { %v1403_v34 = vpop.f32.mrf.mxu3  ;;  %v1307_v6 = vpop.f32.mrf.mxu1 }
 0x167   :  { %v1404_v19 = vadd.f32 %v1403_v34, %v1355_v13  ;;  %v1308_v24 = vadd.f32 %v1307_v6, %v3007_v4 }
 0x168   :  { %v1454_v20 = vpop.f32.mrf.mxu0 }
 0x169   :  { %v3151_v12 = vadd.f32 %v1452_v14, %v1404_v19 }
 0x16b   :  { %v1485_v10 = vadd.f32 %v1484_v9, %v3151_v12 }
 0x16c   :  { %v1356_v26 = vpop.f32.mrf.mxu2 }
 0x16d   :  { %v1357_v27 = vadd.f32 %v1356_v26, %v1308_v24 }
 0x16e   :  { %v1405_v44 = vpop.f32.mrf.mxu3  ;;  %v1310_v28 = vpop.f32.mrf.mxu1 }
 0x16f   :  { %v1406_v29 = vadd.f32 %v1405_v44, %v1357_v27  ;;  %v1311_v33 = vadd.f32 %v1310_v28, %v3016_v18 }
 0x170   :  { %v1457_v30 = vpop.f32.mrf.mxu0 }
 0x171   :  { %v3155_v31 = vadd.f32 %v1454_v20, %v1406_v29 }
 0x173   :  { %v1486_v32 = vadd.f32 %v1485_v10, %v3155_v31 }
 0x174   :  { %v1359_v11 = vpop.f32.mrf.mxu2 }
 0x175   :  { %v1360_v36 = vadd.f32 %v1359_v11, %v1311_v33 }
 0x176   :  { %v1408_v38 = vpop.f32.mrf.mxu3  ;;  %v1312_v22 = vpop.f32.mrf.mxu1 }
 0x177   :  { %v1409_v39 = vadd.f32 %v1408_v38, %v1360_v36  ;;  %v1313_v23 = vadd.f32 %v1312_v22, %v3036_v37 }
 0x178   :  { %v1459_v41 = vpop.f32.mrf.mxu0 }
 0x179   :  { %v3159_v43 = vadd.f32 %v1457_v30, %v1409_v39 }
 0x17b   :  { %v1487_v4 = vadd.f32 %v1486_v32, %v3159_v43 }
 0x17c   :  { %v1361_v45 = vpop.f32.mrf.mxu2 }
 0x17d   :  { %v1362_v46 = vadd.f32 %v1361_v45, %v1313_v23 }
 0x17e   :  { %v1410_v56 = vpop.f32.mrf.mxu3  ;;  %v1315_v54 = vpop.f32.mrf.mxu1 }
 0x17f   :  { %v1411_v40 = vadd.f32 %v1410_v56, %v1362_v46  ;;  %v1316_v55 = vadd.f32 %v1315_v54, %v3045_v47 }
 0x180   :  { %v1462_v48 = vpop.f32.mrf.mxu0 }
 0x181   :  { %v3163_v51 = vadd.f32 %v1459_v41, %v1411_v40 }
 0x183   :  { %v1488_v18 = vadd.f32 %v1487_v4, %v3163_v51 }
 0x184   :  { %v1364_v53 = vpop.f32.mrf.mxu2 }
 0x185   :  { %v1365_v57 = vadd.f32 %v1364_v53, %v1316_v55 }
 0x186   :  { %v1413_v62 = vpop.f32.mrf.mxu3  ;;  %v1317_v58 = vpop.f32.mrf.mxu1 }
 0x187   :  { %v1414_v59 = vadd.f32 %v1413_v62, %v1365_v57  ;;  %v1318_v0 = vadd.f32 %v1317_v58, %v3066_v8 }
 0x188   :  { %v1464_v60 = vpop.f32.mrf.mxu0 }
 0x189   :  { %v3167_v63 = vadd.f32 %v1462_v48, %v1414_v59 }
 0x18b   :  { %v1489_v37 = vadd.f32 %v1488_v18, %v3167_v63 }
 0x18c   :  { %v1366_v15 = vpop.f32.mrf.mxu2 }
 0x18d   :  { %v1367_v1 = vadd.f32 %v1366_v15, %v1318_v0 }
 0x18e   :  { %v1415_v2 = vpop.f32.mrf.mxu3  ;;  %v1320_v5 = vpop.f32.mrf.mxu1 }
 0x18f   :  { %v1416_v7 = vadd.f32 %v1415_v2, %v1367_v1  ;;  %v1321_v16 = vadd.f32 %v1320_v5, %v3075_v21 }
 0x190   :  { %v1467_v14 = vpop.f32.mrf.mxu0 }
 0x191   :  { %v3171_v9 = vadd.f32 %v1464_v60, %v1416_v7 }
 0x193   :  { %v1490_v47 = vadd.f32 %v1489_v37, %v3171_v9 }
 0x194   :  { %v1369_v13 = vpop.f32.mrf.mxu2 }
 0x195   :  { %v1370_v34 = vadd.f32 %v1369_v13, %v1321_v16 }
 0x196   :  { %v1418_v6 = vpop.f32.mrf.mxu3  ;;  %v1322_v19 = vpop.f32.mrf.mxu1 }
 0x197   :  { %v1419_v20 = vadd.f32 %v1418_v6, %v1370_v34  ;;  %v1323_v26 = vadd.f32 %v1322_v19, %v3096_v42 }
 0x198   :  { %v1469_v10 = vpop.f32.mrf.mxu0 }
 0x199   :  { %v1468_v24 = vadd.f32 %v1467_v14, %v1419_v20 }
 0x19b   :  { %v1491_v8 = vadd.f32 %v1490_v47, %v1468_v24 }
 0x19c   :  { %v1371_v27 = vpop.f32.mrf.mxu2 }
 0x19d   :  { %v1372_v44 = vadd.f32 %v1371_v27, %v1323_v26 }
 0x19e   :  { %v1420_v28 = vpop.f32.mrf.mxu3  ;;  %v1325_v29 = vpop.f32.mrf.mxu1 }
 0x19f   :  { %v1421_v30 = vadd.f32 %v1420_v28, %v1372_v44  ;;  %v1326_v21 = vadd.f32 %v1325_v29, %v3105_v52 }
 0x1a0   :  { %v1472_v33 = vpop.f32.mrf.mxu0 }
 0x1a1   :  { %v1470_v32 = vadd.f32 %v1469_v10, %v1421_v30 }
 0x1a3   :  { %v1492_v11 = vadd.f32 %v1491_v8, %v1470_v32 }
 0x1a4   :  { %v1374_v36 = vpop.f32.mrf.mxu2 }
 0x1a5   :  { %v1375_v38 = vadd.f32 %v1374_v36, %v1326_v21 }
 0x1a6   :  { %v1423_v22 = vpop.f32.mrf.mxu3  ;;  %v1327_v39 = vpop.f32.mrf.mxu1 }
 0x1a7   :  { %v1424_v41 = vadd.f32 %v1423_v22, %v1375_v38  ;;  %v1328_v45 = vadd.f32 %v1327_v39, %v3126_v17 }
 0x1a8   :  { %v1474_v42 = vpop.f32.mrf.mxu0 }
 0x1a9   :  { %v1473_v4 = vadd.f32 %v1472_v33, %v1424_v41 }
 0x1ab   :  { %v1493_v23 = vadd.f32 %v1492_v11, %v1473_v4 }
 0x1ac   :  { %v1376_v46 = vpop.f32.mrf.mxu2 }
 0x1ad   :  { %v1377_v56 = vadd.f32 %v1376_v46, %v1328_v45 }
 0x1ae   :  { %v1425_v54 = vpop.f32.mrf.mxu3  ;;  %v1330_v40 = vpop.f32.mrf.mxu1 }
 0x1af   :  { %v1426_v48 = vadd.f32 %v1425_v54, %v1377_v56  ;;  %v1331_v53 = vadd.f32 %v1330_v40, %v3129_v25 }
 0x1b0   :  { %v1477_v58 = vpop.f32.mrf.mxu0 }
 0x1b1   :  { %v1475_v18 = vadd.f32 %v1474_v42, %v1426_v48 }
 0x1b3   :  { %v1494_v55 = vadd.f32 %v1493_v23, %v1475_v18 }
 0x1b4   :  { %v1379_v52 = vpop.f32.mrf.mxu2 }
 0x1b5   :  { %v1380_v57 = vadd.f32 %v1379_v52, %v1331_v53 }
 0x1b6   :  { %v1428_v62 = vpop.f32.mrf.mxu3  ;;  %v1332_v60 = vpop.f32.mrf.mxu1 }
 0x1b7   :  { %v1429_v59 = vadd.f32 %v1428_v62, %v1380_v57  ;;  %v1333_v17 = vadd.f32 %v1332_v60, %v3133_v35 }
 0x1b8   :  { %v1479_v7 = vpop.f32.mrf.mxu0 }
 0x1b9   :  { %v1478_v37 = vadd.f32 %v1477_v58, %v1429_v59 }
 0x1bb   :  { %v1495_v0 = vadd.f32 %v1494_v55, %v1478_v37 }
 0x1bc   :  { %v1381_v15 = vpop.f32.mrf.mxu2 }
 0x1bd   :  { %v1382_v1 = vadd.f32 %v1381_v15, %v1333_v17 }
 0x1be   :  { %v1430_v2 = vpop.f32.mrf.mxu3 }
 0x1bf   :  { %v1431_v5 = vadd.f32 %v1430_v2, %v1382_v1 }
 0x1c1   :  { %v1480_v14 = vadd.f32 %v1479_v7, %v1431_v5 }
 0x1c3   :  { %v1496_v47 = vadd.f32 %v1495_v0, %v1480_v14 }
 0x1c5   :  { %v1497_v16 = vrot.slane %v1496_v47, 4 }
 0x1c7   :  { %v1498_v13 = vadd.f32 %v1497_v16, %v1496_v47 }
 0x1c9   :  { %v1499_v25 = vrot.slane %v1498_v13, 2 }
 0x1cb   :  { %v1500_v34 = vadd.f32 %v1499_v25, %v1498_v13 }
 0x1cd   :  { %v1501_v6 = vrot.slane %v1500_v34, 1 }
 0x1cf   :  { %v1502_v19 = vadd.f32 %v1501_v6, %v1500_v34  ;;  %v1558_v34 = vld [vmem:[%s3327_s2] sm:$0x1] }
 0x1d1   :  { %v1503_v20 = vmul.f32 0.0078125, %v1502_v19 }
 0x1d3   :  { %v3181_v10 = vsub.f32 %v3136_v50, %v1503_v20  ;;  %v3184_v8 = vsub.f32 %v3139_v49, %v1503_v20  ;;  %v3187_v35 = vsub.f32 %v3144_v61, %v1503_v20  ;;  %v3190_v26 = vsub.f32 %v3148_v3, %v1503_v20 }
 0x1d4   :  { %v3193_v27 = vsub.f32 %v3151_v12, %v1503_v20  ;;  %v3196_v44 = vsub.f32 %v3155_v31, %v1503_v20  ;;  %v3199_v28 = vsub.f32 %v3159_v43, %v1503_v20  ;;  %v3202_v50 = vsub.f32 %v3163_v51, %v1503_v20 }
 0x1d5   :  { %v3205_v49 = vsub.f32 %v3167_v63, %v1503_v20  ;;  %v3208_v61 = vsub.f32 %v3171_v9, %v1503_v20  ;;  %v3210_v3 = vsub.f32 %v1468_v24, %v1503_v20  ;;  %v3212_v29 = vsub.f32 %v1470_v32, %v1503_v20 }
 0x1d6   :  { %v3214_v12 = vsub.f32 %v1473_v4, %v1503_v20  ;;  %v3216_v31 = vsub.f32 %v1475_v18, %v1503_v20  ;;  %v3218_v30 = vsub.f32 %v1478_v37, %v1503_v20  ;;  %v3220_v43 = vsub.f32 %v1480_v14, %v1503_v20 }
 0x1d7   :  { %v1520_v51 = vmul.f32 %v3181_v10, %v3181_v10  ;;  %v1521_v63 = vmul.f32 %v3184_v8, %v3184_v8  ;;  %v1522_v9 = vmul.f32 %v3187_v35, %v3187_v35  ;;  %v1523_v32 = vmul.f32 %v3190_v26, %v3190_v26 }
 0x1d8   :  { %v1524_v11 = vmul.f32 %v3193_v27, %v3193_v27  ;;  %v1525_v36 = vmul.f32 %v3196_v44, %v3196_v44  ;;  %v1526_v22 = vmul.f32 %v3199_v28, %v3199_v28  ;;  %v1527_v41 = vmul.f32 %v3202_v50, %v3202_v50 }
 0x1d9   :  { %v1536_v24 = vadd.f32 %v1521_v63, %v1520_v51  ;;  %v1528_v23 = vmul.f32 %v3205_v49, %v3205_v49  ;;  %v1529_v42 = vmul.f32 %v3208_v61, %v3208_v61  ;;  %v1530_v56 = vmul.f32 %v3210_v3, %v3210_v3 }
 0x1da   :  { %v1531_v40 = vmul.f32 %v3212_v29, %v3212_v29  ;;  %v1532_v18 = vmul.f32 %v3214_v12, %v3214_v12  ;;  %v1533_v53 = vmul.f32 %v3216_v31, %v3216_v31  ;;  %v1534_v57 = vmul.f32 %v3218_v30, %v3218_v30 }
 0x1db   :  { %v1537_v33 = vadd.f32 %v1536_v24, %v1522_v9  ;;  %v1535_v58 = vmul.f32 %v3220_v43, %v3220_v43 }
 0x1dd   :  { %v1538_v21 = vadd.f32 %v1537_v33, %v1523_v32  ;;  %v2390_v32 = vld [vmem:[%s3326_s3] ss:$0 sm:$0xff] }
 0x1df   :  { %v1539_v38 = vadd.f32 %v1538_v21, %v1524_v11 }
 0x1e1   :  { %v1540_v39 = vadd.f32 %v1539_v38, %v1525_v36 }
 0x1e3   :  { %v1541_v4 = vadd.f32 %v1540_v39, %v1526_v22 }
 0x1e5   :  { %v1542_v45 = vadd.f32 %v1541_v4, %v1527_v41 }
 0x1e7   :  { %v1543_v46 = vadd.f32 %v1542_v45, %v1528_v23 }
 0x1e9   :  { %v1544_v54 = vadd.f32 %v1543_v46, %v1529_v42 }
 0x1eb   :  { %v1545_v48 = vadd.f32 %v1544_v54, %v1530_v56 }
 0x1ed   :  { %v1546_v55 = vadd.f32 %v1545_v48, %v1531_v40 }
 0x1ef   :  { %v1547_v52 = vadd.f32 %v1546_v55, %v1532_v18 }
 0x1f1   :  { %v1548_v62 = vadd.f32 %v1547_v52, %v1533_v53 }
 0x1f3   :  { %v1549_v59 = vadd.f32 %v1548_v62, %v1534_v57 }
 0x1f5   :  { %v1550_v60 = vadd.f32 %v1549_v59, %v1535_v58 }
 0x1f7   :  { %v1551_v37 = vrot.slane %v1550_v60, 4 }
 0x1f9   :  { %v1552_v0 = vadd.f32 %v1551_v37, %v1550_v60 }
 0x1fb   :  { %v1553_v17 = vrot.slane %v1552_v0, 2 }
 0x1fd   :  { %v1554_v15 = vadd.f32 %v1553_v17, %v1552_v0 }
 0x1ff   :  { %v1555_v1 = vrot.slane %v1554_v15, 1 }
 0x201   :  { %v1556_v2 = vadd.f32 %v1555_v1, %v1554_v15 }
 0x203   :  { %v1557_v5 = vmul.f32 0.0078125, %v1556_v2 }
 0x205   :  { %v1559_v7 = vadd.f32 1e-05, %v1557_v5 }
 0x207   :  { %2391 = vrsqrt.f32 %v1559_v7  ;;  %vm1566_vm1 = vweird.f32 %v1559_v7 }
 0x20d   :  { %v2392_v14 = vpop.eup %2391 }
 0x20e   :  { %v1561_v47 = vmul.f32 %v2392_v14, %v1559_v7  ;;  %vm1567_vm0 = vweird.f32 %v2392_v14 }
 0x20f   :  { %vm1568_vm2 = vmor %vm1566_vm1, %vm1567_vm0 }
 0x210   :  { %v1562_v16 = vmul.f32 %v2392_v14, %v1561_v47 }
 0x212   :  { %v1563_v13 = vmul.f32 0.5, %v1562_v16 }
 0x214   :  { %v1564_v25 = vsub.f32 1.5, %v1563_v13 }
 0x216   :  { %v1565_v6 = vmul.f32 %v2392_v14, %v1564_v25 }
 0x218   :  { %v1569_v19 = vsel %vm1568_vm2, %v2392_v14, %v1565_v6 }
 0x219   :  { %v1570_v20 = vmul.f32 %v1569_v19, %v1558_v34 }
 0x21b   :  { %v1572_v51 = vperm.slane %v1570_v20, 0 }
 0x21d   :  { %v1574_v63 = vmul.f32 %v1572_v51, %v3181_v10  ;;  %v1575_v9 = vmul.f32 %v1572_v51, %v3184_v8  ;;  %v1576_v24 = vmul.f32 %v1572_v51, %v3187_v35  ;;  %v1577_v33 = vmul.f32 %v1572_v51, %v3190_v26 }
 0x21e   :  { %v1578_v11 = vmul.f32 %v1572_v51, %v3193_v27  ;;  %v1579_v21 = vmul.f32 %v1572_v51, %v3196_v44  ;;  %v1582_v36 = vmul.f32 %v1572_v51, %v3205_v49  ;;  %v1583_v38 = vmul.f32 %v1572_v51, %v3208_v61 }
 0x21f   :  { %v1584_v10 = vmul.f32 %v1572_v51, %v3210_v3  ;;  %v1585_v8 = vmul.f32 %v1572_v51, %v3212_v29  ;;  %v1586_v35 = vmul.f32 %v1572_v51, %v3214_v12  ;;  %v1587_v22 = vmul.f32 %v1572_v51, %v3216_v31 }
 0x220   :  { %v1588_v39 = vmul.f32 %v1572_v51, %v3218_v30  ;;  %v1589_v26 = vmul.f32 %v1572_v51, %v3220_v43  ;;  %v1580_v27 = vmul.f32 %v1572_v51, %v3199_v28  ;;  %v1594_v41 = vadd.f32 %v2390_v32, %v1574_v63 }
 0x221   :  { %v1595_v44 = vadd.f32 %v2390_v32, %v1575_v9  ;;  %v1596_v4 = vadd.f32 %v2390_v32, %v1576_v24  ;;  %v1581_v49 = vmul.f32 %v1572_v51, %v3202_v50  ;;  %v1597_v61 = vadd.f32 %v2390_v32, %v1577_v33 }
 0x222   :  { %v1598_v23 = vadd.f32 %v2390_v32, %v1578_v11  ;;  %v1599_v3 = vadd.f32 %v2390_v32, %v1579_v21  ;;  %v1600_v45 = vadd.f32 %v2390_v32, %v1580_v27  ;;  %v1610_v29 = vmax.f32 %v1594_v41, 0.0 }
 0x223   :  { %v1611_v42 = vmax.f32 %v1595_v44, 0.0  ;;  %v1612_v12 = vmax.f32 %v1596_v4, 0.0  ;;  %v1601_v46 = vadd.f32 %v2390_v32, %v1581_v49  ;;  %v1613_v31 = vmax.f32 %v1597_v61, 0.0 }
 0x224   :  { %v1602_v56 = vadd.f32 %v2390_v32, %v1582_v36  ;;  %v1614_v30 = vmax.f32 %v1598_v23, 0.0  ;;  %1626 = vst [vmem:[%s3328_s4] sm:$0xff] %v1610_v29  ;;  %v1603_v28 = vadd.f32 %v2390_v32, %v1583_v38  ;;  %v1615_v43 = vmax.f32 %v1599_v3, 0.0 }
 0x225   :  { %1627 = vst [vmem:[%s3328_s4 + $0x8] sm:$0xff] %v1611_v42  ;;  %v1604_v50 = vadd.f32 %v2390_v32, %v1584_v10  ;;  %v1616_v54 = vmax.f32 %v1600_v45, 0.0  ;;  %v1605_v40 = vadd.f32 %v2390_v32, %v1585_v8  ;;  %v1617_v48 = vmax.f32 %v1601_v46, 0.0 }
 0x226   :  { %1628 = vst [vmem:[%s3328_s4 + $0x10] sm:$0xff] %v1612_v12  ;;  %v1606_v18 = vadd.f32 %v2390_v32, %v1586_v35  ;;  %v1618_v55 = vmax.f32 %v1602_v56, 0.0  ;;  %v1607_v53 = vadd.f32 %v2390_v32, %v1587_v22  ;;  %v1619_v52 = vmax.f32 %v1603_v28, 0.0 }
 0x227   :  { %1629 = vst [vmem:[%s3328_s4 + $0x18] sm:$0xff] %v1613_v31  ;;  %v1608_v57 = vadd.f32 %v2390_v32, %v1588_v39  ;;  %v1620_v62 = vmax.f32 %v1604_v50, 0.0  ;;  %v1609_v58 = vadd.f32 %v2390_v32, %v1589_v26  ;;  %v1621_v59 = vmax.f32 %v1605_v40, 0.0 }
 0x228   :  { %1630 = vst [vmem:[%s3328_s4 + $0x20] sm:$0xff] %v1614_v30  ;;  %v1622_v60 = vmax.f32 %v1606_v18, 0.0  ;;  %v1623_v37 = vmax.f32 %v1607_v53, 0.0 }
 0x229   :  { %1631 = vst [vmem:[%s3328_s4 + $0x28] sm:$0xff] %v1615_v43  ;;  %v1624_v0 = vmax.f32 %v1608_v57, 0.0  ;;  %v1625_v17 = vmax.f32 %v1609_v58, 0.0 }
 0x22a   :  { %1632 = vst [vmem:[%s3328_s4 + $0x30] sm:$0xff] %v1616_v54 }
 0x22b   :  { %1633 = vst [vmem:[%s3328_s4 + $0x38] sm:$0xff] %v1617_v48 }
 0x22c   :  { %1634 = vst [vmem:[%s3328_s4 + $0x40] sm:$0xff] %v1618_v55 }
 0x22d   :  { %1635 = vst [vmem:[%s3328_s4 + $0x48] sm:$0xff] %v1619_v52 }
 0x22e   :  { %1636 = vst [vmem:[%s3328_s4 + $0x50] sm:$0xff] %v1620_v62 }
 0x22f   :  { %1637 = vst [vmem:[%s3328_s4 + $0x58] sm:$0xff] %v1621_v59 }
 0x230   :  { %1638 = vst [vmem:[%s3328_s4 + $0x60] sm:$0xff] %v1622_v60 }
 0x231   :  { %1639 = vst [vmem:[%s3328_s4 + $0x68] sm:$0xff] %v1623_v37 }
 0x232   :  { %1640 = vst [vmem:[%s3328_s4 + $0x70] sm:$0xff] %v1624_v0 }
 0x233   :  { %1641 = vst [vmem:[%s3328_s4 + $0x78] sm:$0xff] %v1625_v17 }

// kernel: epistemic_forward.16
= control target key start
LH: loop header
LB: loop body
LE: loop exit
PB: predicated region body
PF: predicated region fallthrough
CT: control target
= control target key end

     0   :  { %vm1482_vm0 = vcmask 523264   ;;  %s3409_s1 = inlined_call_operand.vmem [shape: bf16[1152,64], index: 1, kind: input, shape index: {}]   ;;  %s3410_s0 = inlined_call_operand.vmem [shape: bf16[128,1152], index: 0, kind: input, shape index: {}]   ;;  %s3411_s3 = inlined_call_operand.vmem [shape: f32[1,64], index: 3, kind: input, shape index: {}]   ;;  %s3412_s2 = inlined_call_operand.vmem [shape: f32[1,64], index: 2, kind: input, shape index: {}]   ;;  %s3413_s4 = inlined_call_operand.vmem [shape: f32[128,64], index: 4, kind: output, shape index: {}]  }
   0x1   :  { %v2334_v0 = vld [vmem:[%s3409_s1 + $0x38] sm:$0xff]  ;;  %v2333_v1 = vld [vmem:[%s3409_s1 + $0x30] sm:$0xff]  ;;  %v2332_v2 = vld [vmem:[%s3409_s1 + $0x28] sm:$0xff] }
   0x2   :  { %2399 = vmatpush.bf16.msra.mxu1 %v2334_v0  ;;  %2400 = vmatpush.bf16.msra.mxu2 %v2334_v0  ;;  %v2331_v3 = vld [vmem:[%s3409_s1 + $0x20] sm:$0xff]  ;;  %v2330_v4 = vld [vmem:[%s3409_s1 + $0x18] sm:$0xff]  ;;  %v2329_v5 = vld [vmem:[%s3409_s1 + $0x10] sm:$0xff] }
   0x3   :  { %2401 = vmatpush.bf16.msra.mxu3 %v2334_v0  ;;  %1041 = vmatpush.bf16.msra.mxu0 %v2334_v0  ;;  %v2328_v6 = vld [vmem:[%s3409_s1 + $0x8] sm:$0xff]  ;;  %v2327_v7 = vld [vmem:[%s3409_s1] sm:$0xff]  ;;  %v1753_v8 = vld [vmem:[%s3410_s0 + $0x90] sm:$0xf] }
   0x4   :  { %v2277_v9 = vld [vmem:[%s3410_s0 + $0xb0] sm:$0xf0]  ;;  %v1825_v10 = vld [vmem:[%s3410_s0 + $0x120] sm:$0xf]  ;;  %v2295_v11 = vld [vmem:[%s3410_s0 + $0x140] sm:$0xf0] }
   0x5   :  { %v1897_v12 = vld [vmem:[%s3410_s0 + $0x1b0] sm:$0xf]  ;;  %v2313_v13 = vld [vmem:[%s3410_s0 + $0x1d0] sm:$0xf0]  ;;  %v1681_v14 = vld [vmem:[%s3410_s0] sm:$0xf]  ;;  %v1754_v18 = vor.u32 %v2277_v9, %v1753_v8  ;;  %v1826_v19 = vor.u32 %v2295_v11, %v1825_v10 }
   0x6   :  { %2402 = vmatpush.bf16.msra.mxu1 %v2333_v1  ;;  %2403 = vmatpush.bf16.msra.mxu2 %v2333_v1  ;;  %v2259_v15 = vld [vmem:[%s3410_s0 + $0x20] sm:$0xf0]  ;;  %v2350_v16 = vld [vmem:[%s3409_s1 + $0xb8] sm:$0xff]  ;;  %v1898_v20 = vor.u32 %v2313_v13, %v1897_v12  ;;  %v2349_v24 = vld [vmem:[%s3409_s1 + $0xb0] sm:$0xff] }
   0x7   :  { %2404 = vmatpush.bf16.msra.mxu3 %v2333_v1  ;;  %1042 = vmatpush.bf16.msra.mxu0 %v2333_v1  ;;  %v2342_v17 = vld [vmem:[%s3409_s1 + $0x78] sm:$0xff]  ;;  %v1682_v21 = vor.u32 %v2259_v15, %v1681_v14  ;;  %v2341_v25 = vld [vmem:[%s3409_s1 + $0x70] sm:$0xff]  ;;  %v2348_v28 = vld [vmem:[%s3409_s1 + $0xa8] sm:$0xff] }
   0x8   :  { %v2358_v22 = vld [vmem:[%s3409_s1 + $0xf8] sm:$0xff]  ;;  %v2357_v26 = vld [vmem:[%s3409_s1 + $0xf0] sm:$0xff]  ;;  %v2340_v29 = vld [vmem:[%s3409_s1 + $0x68] sm:$0xff] }
   0x9   :  { %v2366_v23 = vld [vmem:[%s3409_s1 + $0x138] sm:$0xff]  ;;  %v2365_v27 = vld [vmem:[%s3409_s1 + $0x130] sm:$0xff]  ;;  %v2356_v30 = vld [vmem:[%s3409_s1 + $0xe8] sm:$0xff] }
   0xa   :  { %2405 = vmatpush.bf16.msra.mxu1 %v2332_v2  ;;  %2406 = vmatpush.bf16.msra.mxu2 %v2332_v2  ;;  %v2364_v31 = vld [vmem:[%s3409_s1 + $0x128] sm:$0xff]  ;;  %v2347_v32 = vld [vmem:[%s3409_s1 + $0xa0] sm:$0xff]  ;;  %v1789_v36 = vld [vmem:[%s3410_s0 + $0xd8] sm:$0xf] }
   0xb   :  { %2407 = vmatpush.bf16.msra.mxu3 %v2332_v2  ;;  %1043 = vmatpush.bf16.msra.mxu0 %v2332_v2  ;;  %v2339_v33 = vld [vmem:[%s3409_s1 + $0x60] sm:$0xff]  ;;  %v2286_v37 = vld [vmem:[%s3410_s0 + $0xf8] sm:$0xf0]  ;;  %v1861_v38 = vld [vmem:[%s3410_s0 + $0x168] sm:$0xf] }
   0xc   :  { %v2355_v34 = vld [vmem:[%s3409_s1 + $0xe0] sm:$0xff]  ;;  %v2304_v39 = vld [vmem:[%s3410_s0 + $0x188] sm:$0xf0]  ;;  %v1933_v40 = vld [vmem:[%s3410_s0 + $0x1f8] sm:$0xf]  ;;  %v1790_v46 = vor.u32 %v2286_v37, %v1789_v36 }
   0xd   :  { %v2363_v35 = vld [vmem:[%s3409_s1 + $0x120] sm:$0xff]  ;;  %v2322_v41 = vld [vmem:[%s3410_s0 + $0x218] sm:$0xf0]  ;;  %v1717_v42 = vld [vmem:[%s3410_s0 + $0x48] sm:$0xf]  ;;  %v1862_v47 = vor.u32 %v2304_v39, %v1861_v38 }
   0xe   :  { %2408 = vmatpush.bf16.msra.mxu1 %v2331_v3  ;;  %2409 = vmatpush.bf16.msra.mxu2 %v2331_v3  ;;  %v2268_v43 = vld [vmem:[%s3410_s0 + $0x68] sm:$0xf0]  ;;  %v2346_v44 = vld [vmem:[%s3409_s1 + $0x98] sm:$0xff]  ;;  %v1934_v48 = vor.u32 %v2322_v41, %v1933_v40  ;;  %v2345_v52 = vld [vmem:[%s3409_s1 + $0x90] sm:$0xff] }
   0xf   :  { %2410 = vmatpush.bf16.msra.mxu3 %v2331_v3  ;;  %1044 = vmatpush.bf16.msra.mxu0 %v2331_v3  ;;  %v2338_v45 = vld [vmem:[%s3409_s1 + $0x58] sm:$0xff]  ;;  %v1718_v49 = vor.u32 %v2268_v43, %v1717_v42  ;;  %v2337_v53 = vld [vmem:[%s3409_s1 + $0x50] sm:$0xff]  ;;  %v2344_v56 = vld [vmem:[%s3409_s1 + $0x88] sm:$0xff] }
  0x10   :  { %v2354_v50 = vld [vmem:[%s3409_s1 + $0xd8] sm:$0xff]  ;;  %v2353_v54 = vld [vmem:[%s3409_s1 + $0xd0] sm:$0xff]  ;;  %v2336_v57 = vld [vmem:[%s3409_s1 + $0x48] sm:$0xff] }
  0x11   :  { %v2362_v51 = vld [vmem:[%s3409_s1 + $0x118] sm:$0xff]  ;;  %v2361_v55 = vld [vmem:[%s3409_s1 + $0x110] sm:$0xff]  ;;  %v2352_v58 = vld [vmem:[%s3409_s1 + $0xc8] sm:$0xff] }
  0x12   :  { %2411 = vmatpush.bf16.msra.mxu1 %v2330_v4  ;;  %2412 = vmatpush.bf16.msra.mxu2 %v2330_v4  ;;  %v2360_v59 = vld [vmem:[%s3409_s1 + $0x108] sm:$0xff]  ;;  %v2343_v60 = vld [vmem:[%s3409_s1 + $0x80] sm:$0xff]  ;;  %v2382_v2 = vld [vmem:[%s3409_s1 + $0x1b8] sm:$0xff] }
  0x13   :  { %2413 = vmatpush.bf16.msra.mxu3 %v2330_v4  ;;  %1045 = vmatpush.bf16.msra.mxu0 %v2330_v4  ;;  %v2335_v61 = vld [vmem:[%s3409_s1 + $0x40] sm:$0xff]  ;;  %v1683_v1 = vld [vmem:[%s3410_s0 + $0x24] sm:$0xf0]  ;;  %v2374_v3 = vld [vmem:[%s3409_s1 + $0x178] sm:$0xff] }
  0x14   :  { %v2255_v62 = vld [vmem:[%s3410_s0 + $0x4] sm:$0xf]  ;;  %v1689_v4 = vld [vmem:[%s3410_s0 + $0x8] sm:$0xf]  ;;  %v1697_v8 = vld [vmem:[%s3410_s0 + $0x10] sm:$0xf] }
  0x15   :  { %v2351_v63 = vld [vmem:[%s3409_s1 + $0xc0] sm:$0xff]  ;;  %v2261_v9 = vld [vmem:[%s3410_s0 + $0x30] sm:$0xf0]  ;;  %v2390_v10 = vld [vmem:[%s3409_s1 + $0x1f8] sm:$0xff]  ;;  %v1686_v12 = vor.u32 %v2255_v62, %v1683_v1 }
  0x16   :  { %2414 = vmatpush.bf16.msra.mxu1 %v2329_v5  ;;  %2415 = vmatpush.bf16.msra.mxu2 %v2329_v5  ;;  %v2359_v0 = vld [vmem:[%s3409_s1 + $0x100] sm:$0xff]  ;;  %v2398_v11 = vld [vmem:[%s3409_s1 + $0x238] sm:$0xff]  ;;  %v1698_v15 = vor.u32 %v2261_v9, %v1697_v8  ;;  %v2273_v40 = vld [vmem:[%s3410_s0 + $0x94] sm:$0xf] }
  0x17   :  { %2416 = vmatpush.bf16.msra.mxu3 %v2329_v5  ;;  %1046 = vmatpush.bf16.msra.mxu0 %v2329_v5  ;;  %v2260_v5 = vld [vmem:[%s3410_s0 + $0x28] sm:$0xf0]  ;;  %v2379_v36 = vld [vmem:[%s3409_s1 + $0x1a0] sm:$0xff]  ;;  %v1755_v41 = vld [vmem:[%s3410_s0 + $0xb4] sm:$0xf0] }
  0x18   :  { %v1690_v13 = vor.u32 %v2260_v5, %v1689_v4  ;;  %v2387_v37 = vld [vmem:[%s3409_s1 + $0x1e0] sm:$0xff]  ;;  %v1761_v42 = vld [vmem:[%s3410_s0 + $0x98] sm:$0xf]  ;;  %v2278_v43 = vld [vmem:[%s3410_s0 + $0xb8] sm:$0xf0] }
  0x19   :  { %v2371_v38 = vld [vmem:[%s3409_s1 + $0x160] sm:$0xff]  ;;  %v1805_v62 = vld [vmem:[%s3410_s0 + $0xe8] sm:$0xf]  ;;  %v2377_v4 = vld [vmem:[%s3409_s1 + $0x190] sm:$0xff] }
  0x1a   :  { %2417 = vmatpush.bf16.msra.mxu1 %v2328_v6  ;;  %2418 = vmatpush.bf16.msra.mxu2 %v2328_v6  ;;  %v2395_v39 = vld [vmem:[%s3409_s1 + $0x220] sm:$0xff]  ;;  %v2385_v5 = vld [vmem:[%s3409_s1 + $0x1d0] sm:$0xff]  ;;  %v1827_v9 = vld [vmem:[%s3410_s0 + $0x144] sm:$0xf0] }
  0x1b   :  { %2419 = vmatpush.bf16.msra.mxu3 %v2328_v6  ;;  %1047 = vmatpush.bf16.msra.mxu0 %v2328_v6  ;;  %v2256_v6 = vld [vmem:[%s3410_s0 + $0xc] sm:$0xf]  ;;  %v2291_v8 = vld [vmem:[%s3410_s0 + $0x124] sm:$0xf] }
  0x1e   :  { %2420 = vmatpush.bf16.msra.mxu1 %v2327_v7  ;;  %2421 = vmatpush.bf16.msra.mxu2 %v2327_v7 }
  0x1f   :  { %2422 = vmatpush.bf16.msra.mxu3 %v2327_v7  ;;  %1048 = vmatpush.bf16.msra.mxu0 %v2327_v7  ;;  %v1691_v7 = vld [vmem:[%s3410_s0 + $0x2c] sm:$0xf0] }
  0x20   :  { %v1694_v14 = vor.u32 %v2256_v6, %v1691_v7  ;;  %v2369_v6 = vld [vmem:[%s3409_s1 + $0x150] sm:$0xff] }
  0x21   :  { %1059 = vmatmul.bf16.vlgmr.msra.gmra.mxu1 %v1754_v18  ;;  %1069 = vmatmul.bf16.vlgmr.msra.gmra.mxu2 %v1826_v19  ;;  %v2389_v18 = vld [vmem:[%s3409_s1 + $0x1f0] sm:$0xff] }
  0x22   :  { %1139 = vmatpush.bf16.msrb.mxu2 %v2350_v16  ;;  %1090 = vmatpush.bf16.msrb.mxu1 %v2342_v17  ;;  %v2381_v16 = vld [vmem:[%s3409_s1 + $0x1b0] sm:$0xff] }
  0x23   :  { %1079 = vmatmul.bf16.vlgmr.msra.gmra.mxu3 %v1898_v20  ;;  %1049 = vmatmul.bf16.vlgmr.msra.gmra.mxu0 %v1682_v21  ;;  %v2373_v17 = vld [vmem:[%s3409_s1 + $0x170] sm:$0xff]  ;;  %v2380_v20 = vld [vmem:[%s3409_s1 + $0x1a8] sm:$0xff] }
  0x24   :  { %1188 = vmatpush.bf16.msrb.mxu3 %v2358_v22  ;;  %1237 = vmatpush.bf16.msrb.mxu0 %v2366_v23  ;;  %v2397_v19 = vld [vmem:[%s3409_s1 + $0x230] sm:$0xff]  ;;  %v2372_v21 = vld [vmem:[%s3409_s1 + $0x168] sm:$0xff] }
  0x25   :  { %v2388_v22 = vld [vmem:[%s3409_s1 + $0x1e8] sm:$0xff]  ;;  %v2393_v7 = vld [vmem:[%s3409_s1 + $0x210] sm:$0xff] }
  0x26   :  { %1140 = vmatpush.bf16.msrb.mxu2 %v2349_v24  ;;  %1091 = vmatpush.bf16.msrb.mxu1 %v2341_v25  ;;  %v2396_v23 = vld [vmem:[%s3409_s1 + $0x228] sm:$0xff]  ;;  %v1719_v25 = vld [vmem:[%s3410_s0 + $0x6c] sm:$0xf0] }
  0x27   :  { %v2264_v24 = vld [vmem:[%s3410_s0 + $0x4c] sm:$0xf] }
  0x28   :  { %1189 = vmatpush.bf16.msrb.mxu3 %v2357_v26  ;;  %1238 = vmatpush.bf16.msrb.mxu0 %v2365_v27  ;;  %v1725_v26 = vld [vmem:[%s3410_s0 + $0x50] sm:$0xf]  ;;  %v2269_v27 = vld [vmem:[%s3410_s0 + $0x70] sm:$0xf0] }
  0x2a   :  { %1141 = vmatpush.bf16.msrb.mxu2 %v2348_v28  ;;  %1092 = vmatpush.bf16.msrb.mxu1 %v2340_v29  ;;  %v2265_v28 = vld [vmem:[%s3410_s0 + $0x54] sm:$0xf]  ;;  %v1727_v29 = vld [vmem:[%s3410_s0 + $0x74] sm:$0xf0] }
  0x2c   :  { %1190 = vmatpush.bf16.msrb.mxu3 %v2356_v30  ;;  %1239 = vmatpush.bf16.msrb.mxu0 %v2364_v31  ;;  %v1733_v30 = vld [vmem:[%s3410_s0 + $0x58] sm:$0xf]  ;;  %v2270_v31 = vld [vmem:[%s3410_s0 + $0x78] sm:$0xf0] }
  0x2e   :  { %1142 = vmatpush.bf16.msrb.mxu2 %v2347_v32  ;;  %1093 = vmatpush.bf16.msrb.mxu1 %v2339_v33  ;;  %v1722_v32 = vor.u32 %v2264_v24, %v1719_v25  ;;  %v1726_v33 = vor.u32 %v2269_v27, %v1725_v26  ;;  %v2300_v24 = vld [vmem:[%s3410_s0 + $0x16c] sm:$0xf]  ;;  %v1863_v25 = vld [vmem:[%s3410_s0 + $0x18c] sm:$0xf0]  ;;  %v2305_v27 = vld [vmem:[%s3410_s0 + $0x190] sm:$0xf0] }
  0x2f   :  { %v1869_v26 = vld [vmem:[%s3410_s0 + $0x170] sm:$0xf] }
  0x30   :  { %1191 = vmatpush.bf16.msrb.mxu3 %v2355_v34  ;;  %1240 = vmatpush.bf16.msrb.mxu0 %v2363_v35  ;;  %v1730_v34 = vor.u32 %v2265_v28, %v1727_v29  ;;  %v1734_v35 = vor.u32 %v2270_v31, %v1733_v30  ;;  %v2301_v28 = vld [vmem:[%s3410_s0 + $0x174] sm:$0xf]  ;;  %v1871_v29 = vld [vmem:[%s3410_s0 + $0x194] sm:$0xf0]  ;;  %v2306_v31 = vld [vmem:[%s3410_s0 + $0x198] sm:$0xf0] }
  0x31   :  { %1064 = vmatmul.bf16.gmra.mxu1 %v1790_v46  ;;  %1074 = vmatmul.bf16.gmra.mxu2 %v1862_v47  ;;  %v1769_v46 = vld [vmem:[%s3410_s0 + $0xa0] sm:$0xf]  ;;  %v2279_v47 = vld [vmem:[%s3410_s0 + $0xc0] sm:$0xf0]  ;;  %v1877_v30 = vld [vmem:[%s3410_s0 + $0x178] sm:$0xf] }
  0x32   :  { %1143 = vmatpush.bf16.msrb.mxu2 %v2346_v44  ;;  %1094 = vmatpush.bf16.msrb.mxu1 %v2338_v45  ;;  %v2274_v44 = vld [vmem:[%s3410_s0 + $0x9c] sm:$0xf]  ;;  %v1763_v45 = vld [vmem:[%s3410_s0 + $0xbc] sm:$0xf0] }
  0x33   :  { %1084 = vmatmul.bf16.gmra.mxu3 %v1934_v48  ;;  %1054 = vmatmul.bf16.gmra.mxu0 %v1718_v49  ;;  %v1758_v48 = vor.u32 %v2273_v40, %v1755_v41  ;;  %v1762_v49 = vor.u32 %v2278_v43, %v1761_v42  ;;  %v2309_v40 = vld [vmem:[%s3410_s0 + $0x1b4] sm:$0xf]  ;;  %v1899_v41 = vld [vmem:[%s3410_s0 + $0x1d4] sm:$0xf0]  ;;  %v2314_v43 = vld [vmem:[%s3410_s0 + $0x1d8] sm:$0xf0] }
  0x34   :  { %1192 = vmatpush.bf16.msrb.mxu3 %v2354_v50  ;;  %1241 = vmatpush.bf16.msrb.mxu0 %v2362_v51  ;;  %v1766_v50 = vor.u32 %v2274_v44, %v1763_v45  ;;  %v1770_v51 = vor.u32 %v2279_v47, %v1769_v46  ;;  %v1905_v42 = vld [vmem:[%s3410_s0 + $0x1b8] sm:$0xf]  ;;  %v2310_v44 = vld [vmem:[%s3410_s0 + $0x1bc] sm:$0xf]  ;;  %v1907_v45 = vld [vmem:[%s3410_s0 + $0x1dc] sm:$0xf0] }
  0x35   :  { %v1913_v46 = vld [vmem:[%s3410_s0 + $0x1c0] sm:$0xf]  ;;  %v2315_v47 = vld [vmem:[%s3410_s0 + $0x1e0] sm:$0xf0] }
  0x36   :  { %1144 = vmatpush.bf16.msrb.mxu2 %v2345_v52  ;;  %1095 = vmatpush.bf16.msrb.mxu1 %v2337_v53  ;;  %v2378_v52 = vld [vmem:[%s3409_s1 + $0x198] sm:$0xff] }
  0x37   :  { %v2386_v53 = vld [vmem:[%s3409_s1 + $0x1d8] sm:$0xff] }
  0x38   :  { %1193 = vmatpush.bf16.msrb.mxu3 %v2353_v54  ;;  %1242 = vmatpush.bf16.msrb.mxu0 %v2361_v55  ;;  %v2370_v54 = vld [vmem:[%s3409_s1 + $0x158] sm:$0xff] }
  0x39   :  { %v2394_v55 = vld [vmem:[%s3409_s1 + $0x218] sm:$0xff] }
  0x3a   :  { %1145 = vmatpush.bf16.msrb.mxu2 %v2344_v56  ;;  %1096 = vmatpush.bf16.msrb.mxu1 %v2336_v57  ;;  %v2282_v56 = vld [vmem:[%s3410_s0 + $0xdc] sm:$0xf]  ;;  %v1791_v57 = vld [vmem:[%s3410_s0 + $0xfc] sm:$0xf0] }
  0x3c   :  { %1194 = vmatpush.bf16.msrb.mxu3 %v2352_v58  ;;  %1243 = vmatpush.bf16.msrb.mxu0 %v2360_v59  ;;  %v1797_v58 = vld [vmem:[%s3410_s0 + $0xe0] sm:$0xf]  ;;  %v2287_v59 = vld [vmem:[%s3410_s0 + $0x100] sm:$0xf0] }
  0x3d   :  { %v1798_v1 = vor.u32 %v2287_v59, %v1797_v58  ;;  %v2318_v58 = vld [vmem:[%s3410_s0 + $0x1fc] sm:$0xf]  ;;  %v1935_v59 = vld [vmem:[%s3410_s0 + $0x21c] sm:$0xf0] }
  0x3e   :  { %1146 = vmatpush.bf16.msrb.mxu2 %v2343_v60  ;;  %1097 = vmatpush.bf16.msrb.mxu1 %v2335_v61  ;;  %v2283_v60 = vld [vmem:[%s3410_s0 + $0xe4] sm:$0xf]  ;;  %v1799_v61 = vld [vmem:[%s3410_s0 + $0x104] sm:$0xf0] }
  0x40   :  { %1195 = vmatpush.bf16.msrb.mxu3 %v2351_v63  ;;  %1244 = vmatpush.bf16.msrb.mxu0 %v2359_v0  ;;  %v2288_v63 = vld [vmem:[%s3410_s0 + $0x108] sm:$0xf0]  ;;  %v1794_v0 = vor.u32 %v2282_v56, %v1791_v57 }
  0x41   :  { %1098 = vmatmul.bf16.vlgmr.msrb.gmra.mxu1 %v1686_v12  ;;  %1147 = vmatmul.bf16.vlgmr.msrb.gmra.mxu2 %v1690_v13  ;;  %v2292_v12 = vld [vmem:[%s3410_s0 + $0x12c] sm:$0xf]  ;;  %v1835_v13 = vld [vmem:[%s3410_s0 + $0x14c] sm:$0xf0] }
  0x42   :  { %1335 = vmatpush.bf16.msra.mxu2 %v2382_v2  ;;  %1286 = vmatpush.bf16.msra.mxu1 %v2374_v3  ;;  %v1802_v2 = vor.u32 %v2283_v60, %v1799_v61  ;;  %v1806_v3 = vor.u32 %v2288_v63, %v1805_v62  ;;  %v1941_v60 = vld [vmem:[%s3410_s0 + $0x200] sm:$0xf]  ;;  %v2323_v61 = vld [vmem:[%s3410_s0 + $0x220] sm:$0xf0]  ;;  %v1943_v63 = vld [vmem:[%s3410_s0 + $0x224] sm:$0xf0] }
  0x43   :  { %1196 = vmatmul.bf16.vlgmr.msrb.gmra.mxu3 %v1694_v14  ;;  %1245 = vmatmul.bf16.vlgmr.msrb.gmra.mxu0 %v1698_v15  ;;  %v1841_v14 = vld [vmem:[%s3410_s0 + $0x130] sm:$0xf]  ;;  %v2297_v15 = vld [vmem:[%s3410_s0 + $0x150] sm:$0xf0]  ;;  %v2319_v62 = vld [vmem:[%s3410_s0 + $0x204] sm:$0xf] }
  0x44   :  { %1384 = vmatpush.bf16.msra.mxu3 %v2390_v10  ;;  %1433 = vmatpush.bf16.msra.mxu0 %v2398_v11  ;;  %v1833_v10 = vld [vmem:[%s3410_s0 + $0x128] sm:$0xf]  ;;  %v2296_v11 = vld [vmem:[%s3410_s0 + $0x148] sm:$0xf0] }
  0x46   :  { %1336 = vmatpush.bf16.msra.mxu2 %v2381_v16  ;;  %1287 = vmatpush.bf16.msra.mxu1 %v2373_v17  ;;  %v1830_v16 = vor.u32 %v2291_v8, %v1827_v9  ;;  %v1834_v17 = vor.u32 %v2296_v11, %v1833_v10 }
  0x48   :  { %1385 = vmatpush.bf16.msra.mxu3 %v2389_v18  ;;  %1434 = vmatpush.bf16.msra.mxu0 %v2397_v19  ;;  %v1838_v18 = vor.u32 %v2292_v12, %v1835_v13  ;;  %v1842_v19 = vor.u32 %v2297_v15, %v1841_v14  ;;  %v2257_v14 = vld [vmem:[%s3410_s0 + $0x14] sm:$0xf]  ;;  %v1699_v15 = vld [vmem:[%s3410_s0 + $0x34] sm:$0xf0] }
  0x4a   :  { %1337 = vmatpush.bf16.msra.mxu2 %v2380_v20  ;;  %1288 = vmatpush.bf16.msra.mxu1 %v2372_v21  ;;  %v2376_v20 = vld [vmem:[%s3409_s1 + $0x188] sm:$0xff] }
  0x4b   :  { %v2384_v21 = vld [vmem:[%s3409_s1 + $0x1c8] sm:$0xff] }
  0x4c   :  { %1386 = vmatpush.bf16.msra.mxu3 %v2388_v22  ;;  %1435 = vmatpush.bf16.msra.mxu0 %v2396_v23  ;;  %v2368_v22 = vld [vmem:[%s3409_s1 + $0x148] sm:$0xff] }
  0x4d   :  { %v2392_v23 = vld [vmem:[%s3409_s1 + $0x208] sm:$0xff] }
  0x4e   :  { %1338 = vmatpush.bf16.msra.mxu2 %v2379_v36  ;;  %1289 = vmatpush.bf16.msra.mxu1 %v2371_v38  ;;  %v2375_v36 = vld [vmem:[%s3409_s1 + $0x180] sm:$0xff] }
  0x4f   :  { %v2367_v38 = vld [vmem:[%s3409_s1 + $0x140] sm:$0xff] }
  0x50   :  { %1387 = vmatpush.bf16.msra.mxu3 %v2387_v37  ;;  %1436 = vmatpush.bf16.msra.mxu0 %v2395_v39  ;;  %v2383_v37 = vld [vmem:[%s3409_s1 + $0x1c0] sm:$0xff] }
  0x51   :  { %1103 = vmatmul.bf16.gmra.mxu1 %v1722_v32  ;;  %1152 = vmatmul.bf16.gmra.mxu2 %v1726_v33  ;;  %v1866_v32 = vor.u32 %v2300_v24, %v1863_v25  ;;  %v1870_v33 = vor.u32 %v2305_v27, %v1869_v26  ;;  %v2391_v39 = vld [vmem:[%s3409_s1 + $0x200] sm:$0xff]  ;;  %v1702_v24 = vor.u32 %v2257_v14, %v1699_v15 }
  0x52   :  { %1339 = vmatpush.bf16.msra.mxu2 %v2378_v52  ;;  %1290 = vmatpush.bf16.msra.mxu1 %v2370_v54  ;;  %v1914_v52 = vor.u32 %v2315_v47, %v1913_v46  ;;  %v2272_v46 = vld [vmem:[%s3410_s0 + $0x88] sm:$0xf0]  ;;  %v2275_v14 = vld [vmem:[%s3410_s0 + $0xa4] sm:$0xf] }
  0x53   :  { %1201 = vmatmul.bf16.gmra.mxu3 %v1730_v34  ;;  %1250 = vmatmul.bf16.gmra.mxu0 %v1734_v35  ;;  %v1874_v34 = vor.u32 %v2301_v28, %v1871_v29  ;;  %v1878_v35 = vor.u32 %v2306_v31, %v1877_v30 }
  0x54   :  { %1388 = vmatpush.bf16.msra.mxu3 %v2386_v53  ;;  %1437 = vmatpush.bf16.msra.mxu0 %v2394_v55 }
  0x56   :  { %1340 = vmatpush.bf16.msra.mxu2 %v2377_v4  ;;  %1291 = vmatpush.bf16.msra.mxu1 %v2369_v6  ;;  %v1938_v4 = vor.u32 %v2318_v58, %v1935_v59 }
  0x58   :  { %1389 = vmatpush.bf16.msra.mxu3 %v2385_v5  ;;  %1438 = vmatpush.bf16.msra.mxu0 %v2393_v7  ;;  %v1942_v5 = vor.u32 %v2323_v61, %v1941_v60  ;;  %v1946_v7 = vor.u32 %v2319_v62, %v1943_v63 }
  0x5a   :  { %1341 = vmatpush.bf16.msra.mxu2 %v2376_v20  ;;  %1292 = vmatpush.bf16.msra.mxu1 %v2368_v22  ;;  %v1713_v20 = vld [vmem:[%s3410_s0 + $0x20] sm:$0xf] }
  0x5c   :  { %1390 = vmatpush.bf16.msra.mxu3 %v2384_v21  ;;  %1439 = vmatpush.bf16.msra.mxu0 %v2392_v23  ;;  %v2263_v21 = vld [vmem:[%s3410_s0 + $0x40] sm:$0xf0] }
  0x5d   :  { %v1714_v28 = vor.u32 %v2263_v21, %v1713_v20  ;;  %v2281_v20 = vld [vmem:[%s3410_s0 + $0xd0] sm:$0xf0] }
  0x5e   :  { %1342 = vmatpush.bf16.msra.mxu2 %v2375_v36  ;;  %1293 = vmatpush.bf16.msra.mxu1 %v2367_v38  ;;  %v2266_v38 = vld [vmem:[%s3410_s0 + $0x5c] sm:$0xf] }
  0x60   :  { %1391 = vmatpush.bf16.msra.mxu3 %v2383_v37  ;;  %1440 = vmatpush.bf16.msra.mxu0 %v2391_v39  ;;  %v1735_v39 = vld [vmem:[%s3410_s0 + $0x7c] sm:$0xf0] }
  0x61   :  { %1108 = vmatmul.bf16.gmra.mxu1 %v1758_v48  ;;  %1157 = vmatmul.bf16.gmra.mxu2 %v1762_v49  ;;  %v1902_v48 = vor.u32 %v2309_v40, %v1899_v41  ;;  %v1906_v49 = vor.u32 %v2314_v43, %v1905_v42  ;;  %v1741_v41 = vld [vmem:[%s3410_s0 + $0x60] sm:$0xf]  ;;  %v2271_v42 = vld [vmem:[%s3410_s0 + $0x80] sm:$0xf0] }
  0x62   :  { %v2267_v43 = vld [vmem:[%s3410_s0 + $0x64] sm:$0xf] }
  0x63   :  { %1206 = vmatmul.bf16.gmra.mxu3 %v1766_v50  ;;  %1255 = vmatmul.bf16.gmra.mxu0 %v1770_v51  ;;  %v1910_v51 = vor.u32 %v2310_v44, %v1907_v45  ;;  %v1743_v44 = vld [vmem:[%s3410_s0 + $0x84] sm:$0xf0] }
  0x64   :  { %v1749_v45 = vld [vmem:[%s3410_s0 + $0x68] sm:$0xf] }
  0x65   :  { %v1750_v58 = vor.u32 %v2272_v46, %v1749_v45  ;;  %v1813_v45 = vld [vmem:[%s3410_s0 + $0xf0] sm:$0xf]  ;;  %v2289_v46 = vld [vmem:[%s3410_s0 + $0x110] sm:$0xf0] }
  0x71   :  { %1113 = vmatmul.bf16.gmra.mxu1 %v1794_v0  ;;  %1162 = vmatmul.bf16.gmra.mxu2 %v1798_v1  ;;  %v1949_v0 = vld [vmem:[%s3410_s0 + $0x208] sm:$0xf]  ;;  %v2324_v1 = vld [vmem:[%s3410_s0 + $0x228] sm:$0xf0] }
  0x72   :  { %v1950_v8 = vor.u32 %v2324_v1, %v1949_v0 }
  0x73   :  { %1211 = vmatmul.bf16.gmra.mxu3 %v1802_v2  ;;  %1260 = vmatmul.bf16.gmra.mxu0 %v1806_v3 }
  0x81   :  { %1118 = vmatmul.bf16.gmra.mxu1 %v1830_v16  ;;  %1167 = vmatmul.bf16.gmra.mxu2 %v1834_v17  ;;  %v1705_v16 = vld [vmem:[%s3410_s0 + $0x18] sm:$0xf]  ;;  %v2262_v17 = vld [vmem:[%s3410_s0 + $0x38] sm:$0xf0] }
  0x82   :  { %v1706_v25 = vor.u32 %v2262_v17, %v1705_v16  ;;  %v1777_v16 = vld [vmem:[%s3410_s0 + $0xa8] sm:$0xf]  ;;  %v2280_v17 = vld [vmem:[%s3410_s0 + $0xc8] sm:$0xf0] }
  0x83   :  { %1216 = vmatmul.bf16.gmra.mxu3 %v1838_v18  ;;  %1265 = vmatmul.bf16.gmra.mxu0 %v1842_v19  ;;  %v2258_v18 = vld [vmem:[%s3410_s0 + $0x1c] sm:$0xf]  ;;  %v1707_v19 = vld [vmem:[%s3410_s0 + $0x3c] sm:$0xf0] }
  0x84   :  { %v1710_v27 = vor.u32 %v2258_v18, %v1707_v19  ;;  %v1779_v18 = vld [vmem:[%s3410_s0 + $0xcc] sm:$0xf0] }
  0x85   :  { %v1785_v19 = vld [vmem:[%s3410_s0 + $0xb0] sm:$0xf] }
  0x91   :  { %1123 = vmatmul.bf16.gmra.mxu1 %v1866_v32  ;;  %1172 = vmatmul.bf16.gmra.mxu2 %v1870_v33 }
  0x93   :  { %1221 = vmatmul.bf16.gmra.mxu3 %v1874_v34  ;;  %1270 = vmatmul.bf16.gmra.mxu0 %v1878_v35 }
  0x9e   :  { %v2883_v50 = vpop.f32.mrf.mxu1 }
  0xa0   :  { %v1050_v53 = vpop.f32.mrf.mxu0 }
  0xa1   :  { %1128 = vmatmul.bf16.gmra.mxu1 %v1902_v48  ;;  %1177 = vmatmul.bf16.gmra.mxu2 %v1906_v49 }
  0xa3   :  { %1226 = vmatmul.bf16.gmra.mxu3 %v1910_v51  ;;  %1275 = vmatmul.bf16.gmra.mxu0 %v1914_v52  ;;  %v1738_v51 = vor.u32 %v2266_v38, %v1735_v39  ;;  %v1742_v52 = vor.u32 %v2271_v42, %v1741_v41 }
  0xa4   :  { %v2885_v54 = vpop.f32.mrf.mxu2 }
  0xa6   :  { %v2887_v55 = vpop.f32.mrf.mxu3  ;;  %v2889_v56 = vpop.f32.mrf.mxu1 }
  0xa8   :  { %v1052_v57 = vpop.f32.mrf.mxu0 }
  0xac   :  { %v2915_v2 = vpop.f32.mrf.mxu2 }
  0xae   :  { %v2917_v3 = vpop.f32.mrf.mxu3  ;;  %v2919_v6 = vpop.f32.mrf.mxu1 }
  0xb0   :  { %v1055_v9 = vpop.f32.mrf.mxu0 }
  0xb1   :  { %1133 = vmatmul.bf16.gmra.mxu1 %v1938_v4  ;;  %1182 = vmatmul.bf16.gmra.mxu2 %v1942_v5 }
  0xb3   :  { %1231 = vmatmul.bf16.gmra.mxu3 %v1946_v7  ;;  %1280 = vmatmul.bf16.gmra.mxu0 %v1950_v8 }
  0xb4   :  { %v2921_v10 = vpop.f32.mrf.mxu2 }
  0xb6   :  { %v2923_v11 = vpop.f32.mrf.mxu3  ;;  %v2925_v12 = vpop.f32.mrf.mxu1 }
  0xb8   :  { %v1057_v13 = vpop.f32.mrf.mxu0 }
  0xbc   :  { %v2951_v22 = vpop.f32.mrf.mxu2 }
  0xbe   :  { %v2953_v23 = vpop.f32.mrf.mxu3  ;;  %v1099_v26 = vpop.f32.mrf.mxu1 }
  0xbf   :  { %v1100_v29 = vadd.f32 %v1099_v26, %v1050_v53 }
  0xc0   :  { %v1246_v30 = vpop.f32.mrf.mxu0 }
  0xc1   :  { %1294 = vmatmul.bf16.vlgmr.msra.gmra.mxu1 %v1702_v24  ;;  %1343 = vmatmul.bf16.vlgmr.msra.gmra.mxu2 %v1706_v25 }
  0xc3   :  { %1392 = vmatmul.bf16.vlgmr.msra.gmra.mxu3 %v1710_v27  ;;  %1441 = vmatmul.bf16.vlgmr.msra.gmra.mxu0 %v1714_v28  ;;  %v1778_v27 = vor.u32 %v2280_v17, %v1777_v16 }
  0xc4   :  { %v1148_v31 = vpop.f32.mrf.mxu2 }
  0xc5   :  { %v1149_v32 = vadd.f32 %v1148_v31, %v1100_v29 }
  0xc6   :  { %v1197_v33 = vpop.f32.mrf.mxu3  ;;  %v1101_v34 = vpop.f32.mrf.mxu1 }
  0xc7   :  { %v1198_v35 = vadd.f32 %v1197_v33, %v1149_v32  ;;  %v1102_v36 = vadd.f32 %v1101_v34, %v1052_v57  ;;  %v1746_v57 = vor.u32 %v2267_v43, %v1743_v44  ;;  %v2284_v43 = vld [vmem:[%s3410_s0 + $0xec] sm:$0xf] }
  0xc8   :  { %v1248_v37 = vpop.f32.mrf.mxu0 }
  0xc9   :  { %v2961_v40 = vadd.f32 %v1246_v30, %v1198_v35  ;;  %v1786_v30 = vor.u32 %v2281_v20, %v1785_v19  ;;  %v1849_v19 = vld [vmem:[%s3410_s0 + $0x138] sm:$0xf]  ;;  %v2298_v20 = vld [vmem:[%s3410_s0 + $0x158] sm:$0xf0] }
  0xcc   :  { %v1150_v47 = vpop.f32.mrf.mxu2 }
  0xcd   :  { %v1151_v48 = vadd.f32 %v1150_v47, %v1102_v36  ;;  %v1815_v47 = vld [vmem:[%s3410_s0 + $0x114] sm:$0xf0] }
  0xce   :  { %v1199_v49 = vpop.f32.mrf.mxu3  ;;  %v1104_v53 = vpop.f32.mrf.mxu1 }
  0xcf   :  { %v1200_v59 = vadd.f32 %v1199_v49, %v1151_v48  ;;  %v1105_v60 = vadd.f32 %v1104_v53, %v1055_v9  ;;  %v1771_v9 = vld [vmem:[%s3410_s0 + $0xc4] sm:$0xf0]  ;;  %v1821_v48 = vld [vmem:[%s3410_s0 + $0xf8] sm:$0xf]  ;;  %v2290_v49 = vld [vmem:[%s3410_s0 + $0x118] sm:$0xf0] }
  0xd0   :  { %v1251_v61 = vpop.f32.mrf.mxu0  ;;  %v1774_v26 = vor.u32 %v2275_v14, %v1771_v9 }
  0xd1   :  { %1299 = vmatmul.bf16.gmra.mxu1 %v1738_v51  ;;  %1348 = vmatmul.bf16.gmra.mxu2 %v1742_v52  ;;  %v2981_v62 = vadd.f32 %v1248_v37, %v1200_v59 }
  0xd3   :  { %1397 = vmatmul.bf16.gmra.mxu3 %v1746_v57  ;;  %1446 = vmatmul.bf16.gmra.mxu0 %v1750_v58  ;;  %v1814_v58 = vor.u32 %v2289_v46, %v1813_v45  ;;  %v2302_v46 = vld [vmem:[%s3410_s0 + $0x17c] sm:$0xf] }
  0xd4   :  { %v1153_v63 = vpop.f32.mrf.mxu2 }
  0xd5   :  { %v1154_v0 = vadd.f32 %v1153_v63, %v1105_v60 }
  0xd6   :  { %v1202_v1 = vpop.f32.mrf.mxu3  ;;  %v1106_v4 = vpop.f32.mrf.mxu1 }
  0xd7   :  { %v1203_v5 = vadd.f32 %v1202_v1, %v1154_v0  ;;  %v1107_v7 = vadd.f32 %v1106_v4, %v1057_v13  ;;  %v2276_v13 = vld [vmem:[%s3410_s0 + $0xac] sm:$0xf] }
  0xd8   :  { %v1253_v8 = vpop.f32.mrf.mxu0  ;;  %v1782_v29 = vor.u32 %v2276_v13, %v1779_v18  ;;  %v2293_v13 = vld [vmem:[%s3410_s0 + $0x134] sm:$0xf] }
  0xd9   :  { %v2989_v15 = vadd.f32 %v1251_v61, %v1203_v5  ;;  %v1822_v61 = vor.u32 %v2290_v49, %v1821_v48  ;;  %v2307_v48 = vld [vmem:[%s3410_s0 + $0x1a0] sm:$0xf0] }
  0xda   :  { %v2303_v49 = vld [vmem:[%s3410_s0 + $0x184] sm:$0xf] }
  0xdc   :  { %v1155_v21 = vpop.f32.mrf.mxu2 }
  0xdd   :  { %v1156_v24 = vadd.f32 %v1155_v21, %v1107_v7  ;;  %v1851_v21 = vld [vmem:[%s3410_s0 + $0x15c] sm:$0xf0] }
  0xde   :  { %v1204_v25 = vpop.f32.mrf.mxu3  ;;  %v1109_v28 = vpop.f32.mrf.mxu1 }
  0xdf   :  { %v1205_v31 = vadd.f32 %v1204_v25, %v1156_v24  ;;  %v1110_v32 = vadd.f32 %v1109_v28, %v2883_v50  ;;  %v1807_v50 = vld [vmem:[%s3410_s0 + $0x10c] sm:$0xf0]  ;;  %v1857_v24 = vld [vmem:[%s3410_s0 + $0x140] sm:$0xf]  ;;  %v2299_v25 = vld [vmem:[%s3410_s0 + $0x160] sm:$0xf0] }
  0xe0   :  { %v1256_v33 = vpop.f32.mrf.mxu0  ;;  %v1810_v57 = vor.u32 %v2284_v43, %v1807_v50 }
  0xe1   :  { %1304 = vmatmul.bf16.gmra.mxu1 %v1774_v26  ;;  %1353 = vmatmul.bf16.gmra.mxu2 %v1778_v27  ;;  %v3010_v34 = vadd.f32 %v1253_v8, %v1205_v31 }
  0xe3   :  { %1402 = vmatmul.bf16.gmra.mxu3 %v1782_v29  ;;  %1451 = vmatmul.bf16.gmra.mxu0 %v1786_v30  ;;  %v1850_v30 = vor.u32 %v2298_v20, %v1849_v19  ;;  %v2311_v20 = vld [vmem:[%s3410_s0 + $0x1c4] sm:$0xf] }
  0xe4   :  { %v1158_v35 = vpop.f32.mrf.mxu2 }
  0xe5   :  { %v1159_v36 = vadd.f32 %v1158_v35, %v1110_v32 }
  0xe6   :  { %v1207_v37 = vpop.f32.mrf.mxu3  ;;  %v1111_v38 = vpop.f32.mrf.mxu1 }
  0xe7   :  { %v1208_v39 = vadd.f32 %v1207_v37, %v1159_v36  ;;  %v1112_v41 = vadd.f32 %v1111_v38, %v2889_v56  ;;  %v2285_v56 = vld [vmem:[%s3410_s0 + $0xf4] sm:$0xf] }
  0xe8   :  { %v1258_v42 = vpop.f32.mrf.mxu0  ;;  %v1818_v60 = vor.u32 %v2285_v56, %v1815_v47  ;;  %v1879_v56 = vld [vmem:[%s3410_s0 + $0x19c] sm:$0xf0] }
  0xe9   :  { %v3019_v44 = vadd.f32 %v1256_v33, %v1208_v39  ;;  %v1858_v33 = vor.u32 %v2299_v25, %v1857_v24  ;;  %v2316_v24 = vld [vmem:[%s3410_s0 + $0x1e8] sm:$0xf0] }
  0xea   :  { %v2312_v25 = vld [vmem:[%s3410_s0 + $0x1cc] sm:$0xf] }
  0xec   :  { %v1160_v51 = vpop.f32.mrf.mxu2 }
  0xed   :  { %v1161_v52 = vadd.f32 %v1160_v51, %v1112_v41 }
  0xee   :  { %v1209_v53 = vpop.f32.mrf.mxu3  ;;  %v1114_v59 = vpop.f32.mrf.mxu1 }
  0xef   :  { %v1210_v63 = vadd.f32 %v1209_v53, %v1161_v52  ;;  %v1115_v0 = vadd.f32 %v1114_v59, %v2919_v6  ;;  %v1843_v6 = vld [vmem:[%s3410_s0 + $0x154] sm:$0xf0]  ;;  %v1887_v52 = vld [vmem:[%s3410_s0 + $0x1a4] sm:$0xf0] }
  0xf0   :  { %v1261_v1 = vpop.f32.mrf.mxu0  ;;  %v1846_v29 = vor.u32 %v2293_v13, %v1843_v6  ;;  %v1893_v53 = vld [vmem:[%s3410_s0 + $0x188] sm:$0xf] }
  0xf1   :  { %1309 = vmatmul.bf16.gmra.mxu1 %v1810_v57  ;;  %1358 = vmatmul.bf16.gmra.mxu2 %v1814_v58  ;;  %v3040_v4 = vadd.f32 %v1258_v42, %v1210_v63  ;;  %v2308_v57 = vld [vmem:[%s3410_s0 + $0x1a8] sm:$0xf0] }
  0xf3   :  { %1407 = vmatmul.bf16.gmra.mxu3 %v1818_v60  ;;  %1456 = vmatmul.bf16.gmra.mxu0 %v1822_v61  ;;  %v1882_v61 = vor.u32 %v2302_v46, %v1879_v56 }
  0xf4   :  { %v1163_v5 = vpop.f32.mrf.mxu2 }
  0xf5   :  { %v1164_v7 = vadd.f32 %v1163_v5, %v1115_v0 }
  0xf6   :  { %v1212_v8 = vpop.f32.mrf.mxu3  ;;  %v1116_v14 = vpop.f32.mrf.mxu1 }
  0xf7   :  { %v1213_v9 = vadd.f32 %v1212_v8, %v1164_v7  ;;  %v1117_v16 = vadd.f32 %v1116_v14, %v2925_v12  ;;  %v2294_v12 = vld [vmem:[%s3410_s0 + $0x13c] sm:$0xf] }
  0xf8   :  { %v1263_v17 = vpop.f32.mrf.mxu0  ;;  %v1854_v32 = vor.u32 %v2294_v12, %v1851_v21  ;;  %v1915_v12 = vld [vmem:[%s3410_s0 + $0x1e4] sm:$0xf0] }
  0xf9   :  { %v3049_v18 = vadd.f32 %v1261_v1, %v1213_v9  ;;  %v1890_v1 = vor.u32 %v2303_v49, %v1887_v52  ;;  %v2320_v49 = vld [vmem:[%s3410_s0 + $0x20c] sm:$0xf] }
  0xfc   :  { %v1165_v26 = vpop.f32.mrf.mxu2 }
  0xfd   :  { %v1166_v27 = vadd.f32 %v1165_v26, %v1117_v16 }
  0xfe   :  { %v1214_v28 = vpop.f32.mrf.mxu3  ;;  %v1119_v31 = vpop.f32.mrf.mxu1 }
  0xff   :  { %v1215_v35 = vadd.f32 %v1214_v28, %v1166_v27  ;;  %v1120_v38 = vadd.f32 %v1119_v31, %v2885_v54  ;;  %v1885_v54 = vld [vmem:[%s3410_s0 + $0x180] sm:$0xf]  ;;  %v1923_v27 = vld [vmem:[%s3410_s0 + $0x1ec] sm:$0xf0] }
 0x100   :  { %v1266_v36 = vpop.f32.mrf.mxu0  ;;  %v1886_v63 = vor.u32 %v2307_v48, %v1885_v54  ;;  %v1929_v28 = vld [vmem:[%s3410_s0 + $0x1d0] sm:$0xf] }
 0x101   :  { %1314 = vmatmul.bf16.gmra.mxu1 %v1846_v29  ;;  %1363 = vmatmul.bf16.gmra.mxu2 %v1850_v30  ;;  %v3069_v37 = vadd.f32 %v1263_v17, %v1215_v35  ;;  %v2317_v29 = vld [vmem:[%s3410_s0 + $0x1f0] sm:$0xf0] }
 0x103   :  { %1412 = vmatmul.bf16.gmra.mxu3 %v1854_v32  ;;  %1461 = vmatmul.bf16.gmra.mxu0 %v1858_v33  ;;  %v1918_v33 = vor.u32 %v2311_v20, %v1915_v12 }
 0x104   :  { %v1168_v39 = vpop.f32.mrf.mxu2 }
 0x105   :  { %v1169_v41 = vadd.f32 %v1168_v39, %v1120_v38  ;;  %v1926_v38 = vor.u32 %v2312_v25, %v1923_v27 }
 0x106   :  { %v1217_v42 = vpop.f32.mrf.mxu3  ;;  %v1121_v43 = vpop.f32.mrf.mxu1 }
 0x107   :  { %v1218_v50 = vadd.f32 %v1217_v42, %v1169_v41  ;;  %v1122_v51 = vadd.f32 %v1121_v43, %v2915_v2  ;;  %v1894_v2 = vor.u32 %v2308_v57, %v1893_v53  ;;  %v2325_v53 = vld [vmem:[%s3410_s0 + $0x230] sm:$0xf0] }
 0x108   :  { %v1268_v45 = vpop.f32.mrf.mxu0  ;;  %v2321_v57 = vld [vmem:[%s3410_s0 + $0x214] sm:$0xf] }
 0x109   :  { %v3078_v47 = vadd.f32 %v1266_v36, %v1218_v50 }
 0x10c   :  { %v1170_v58 = vpop.f32.mrf.mxu2 }
 0x10d   :  { %v1171_v59 = vadd.f32 %v1170_v58, %v1122_v51  ;;  %v1951_v51 = vld [vmem:[%s3410_s0 + $0x22c] sm:$0xf0] }
 0x10e   :  { %v1219_v60 = vpop.f32.mrf.mxu3  ;;  %v1124_v0 = vpop.f32.mrf.mxu1 }
 0x10f   :  { %v1220_v5 = vadd.f32 %v1219_v60, %v1171_v59  ;;  %v1125_v14 = vadd.f32 %v1124_v0, %v2921_v10  ;;  %v1921_v10 = vld [vmem:[%s3410_s0 + $0x1c8] sm:$0xf]  ;;  %v1959_v59 = vld [vmem:[%s3410_s0 + $0x234] sm:$0xf0] }
 0x110   :  { %v1271_v7 = vpop.f32.mrf.mxu0  ;;  %v1922_v35 = vor.u32 %v2316_v24, %v1921_v10  ;;  %v1965_v60 = vld [vmem:[%s3410_s0 + $0x218] sm:$0xf] }
 0x111   :  { %1319 = vmatmul.bf16.gmra.mxu1 %v1882_v61  ;;  %1368 = vmatmul.bf16.gmra.mxu2 %v1886_v63  ;;  %v3099_v8 = vadd.f32 %v1268_v45, %v1220_v5  ;;  %v2326_v61 = vld [vmem:[%s3410_s0 + $0x238] sm:$0xf0] }
 0x113   :  { %1417 = vmatmul.bf16.gmra.mxu3 %v1890_v1  ;;  %1466 = vmatmul.bf16.gmra.mxu0 %v1894_v2  ;;  %v1954_v2 = vor.u32 %v2320_v49, %v1951_v51 }
 0x114   :  { %v1173_v9 = vpop.f32.mrf.mxu2 }
 0x115   :  { %v1174_v16 = vadd.f32 %v1173_v9, %v1125_v14  ;;  %v1962_v14 = vor.u32 %v2321_v57, %v1959_v59 }
 0x116   :  { %v1222_v17 = vpop.f32.mrf.mxu3  ;;  %v1126_v13 = vpop.f32.mrf.mxu1 }
 0x117   :  { %v1223_v6 = vadd.f32 %v1222_v17, %v1174_v16  ;;  %v1127_v26 = vadd.f32 %v1126_v13, %v2951_v22  ;;  %v1930_v22 = vor.u32 %v2317_v29, %v1929_v28 }
 0x118   :  { %v1273_v19 = vpop.f32.mrf.mxu0 }
 0x119   :  { %v3108_v21 = vadd.f32 %v1271_v7, %v1223_v6 }
 0x11c   :  { %v1175_v30 = vpop.f32.mrf.mxu2 }
 0x11d   :  { %v1176_v31 = vadd.f32 %v1175_v30, %v1127_v26 }
 0x11e   :  { %v1224_v32 = vpop.f32.mrf.mxu3  ;;  %v1129_v36 = vpop.f32.mrf.mxu1 }
 0x11f   :  { %v1225_v39 = vadd.f32 %v1224_v32, %v1176_v31  ;;  %v1130_v43 = vadd.f32 %v1129_v36, %v2887_v55  ;;  %v1957_v55 = vld [vmem:[%s3410_s0 + $0x210] sm:$0xf] }
 0x120   :  { %v1276_v41 = vpop.f32.mrf.mxu0  ;;  %v1958_v5 = vor.u32 %v2325_v53, %v1957_v55 }
 0x121   :  { %1324 = vmatmul.bf16.gmra.mxu1 %v1918_v33  ;;  %1373 = vmatmul.bf16.gmra.mxu2 %v1922_v35  ;;  %v3129_v42 = vadd.f32 %v1273_v19, %v1225_v39 }
 0x123   :  { %1422 = vmatmul.bf16.gmra.mxu3 %v1926_v38  ;;  %1471 = vmatmul.bf16.gmra.mxu0 %v1930_v22 }
 0x124   :  { %v1178_v50 = vpop.f32.mrf.mxu2 }
 0x125   :  { %v1179_v45 = vadd.f32 %v1178_v50, %v1130_v43 }
 0x126   :  { %v1227_v46 = vpop.f32.mrf.mxu3  ;;  %v1131_v56 = vpop.f32.mrf.mxu1 }
 0x127   :  { %v1228_v54 = vadd.f32 %v1227_v46, %v1179_v45  ;;  %v1132_v58 = vadd.f32 %v1131_v56, %v2917_v3  ;;  %v1966_v3 = vor.u32 %v2326_v61, %v1965_v60 }
 0x128   :  { %v1278_v48 = vpop.f32.mrf.mxu0 }
 0x129   :  { %v3138_v52 = vadd.f32 %v1276_v41, %v1228_v54 }
 0x12c   :  { %v1180_v63 = vpop.f32.mrf.mxu2 }
 0x12d   :  { %v1181_v0 = vadd.f32 %v1180_v63, %v1132_v58 }
 0x12e   :  { %v1229_v1 = vpop.f32.mrf.mxu3  ;;  %v1134_v7 = vpop.f32.mrf.mxu1 }
 0x12f   :  { %v1230_v9 = vadd.f32 %v1229_v1, %v1181_v0  ;;  %v1135_v13 = vadd.f32 %v1134_v7, %v2923_v11 }
 0x130   :  { %v1281_v16 = vpop.f32.mrf.mxu0 }
 0x131   :  { %1329 = vmatmul.bf16.gmra.mxu1 %v1954_v2  ;;  %1378 = vmatmul.bf16.gmra.mxu2 %v1958_v5  ;;  %v3159_v17 = vadd.f32 %v1278_v48, %v1230_v9 }
 0x133   :  { %1427 = vmatmul.bf16.gmra.mxu3 %v1962_v14  ;;  %1476 = vmatmul.bf16.gmra.mxu0 %v1966_v3 }
 0x134   :  { %v1183_v6 = vpop.f32.mrf.mxu2 }
 0x135   :  { %v1184_v19 = vadd.f32 %v1183_v6, %v1135_v13 }
 0x136   :  { %v1232_v20 = vpop.f32.mrf.mxu3  ;;  %v1136_v12 = vpop.f32.mrf.mxu1 }
 0x137   :  { %v1233_v10 = vadd.f32 %v1232_v20, %v1184_v19  ;;  %v1137_v26 = vadd.f32 %v1136_v12, %v2953_v23 }
 0x138   :  { %v1283_v24 = vpop.f32.mrf.mxu0 }
 0x139   :  { %v3162_v25 = vadd.f32 %v1281_v16, %v1233_v10 }
 0x13c   :  { %v1185_v27 = vpop.f32.mrf.mxu2 }
 0x13d   :  { %v1186_v28 = vadd.f32 %v1185_v27, %v1137_v26 }
 0x13e   :  { %v1234_v29 = vpop.f32.mrf.mxu3  ;;  %v1295_v30 = vpop.f32.mrf.mxu1 }
 0x13f   :  { %v1235_v31 = vadd.f32 %v1234_v29, %v1186_v28  ;;  %v1296_v32 = vadd.f32 %v1295_v30, %v2961_v40 }
 0x140   :  { %v1442_v33 = vpop.f32.mrf.mxu0 }
 0x141   :  { %v3166_v35 = vadd.f32 %v1283_v24, %v1235_v31 }
 0x144   :  { %v1344_v11 = vpop.f32.mrf.mxu2 }
 0x145   :  { %v1345_v36 = vadd.f32 %v1344_v11, %v1296_v32 }
 0x146   :  { %v1393_v38 = vpop.f32.mrf.mxu3  ;;  %v1297_v22 = vpop.f32.mrf.mxu1 }
 0x147   :  { %v1394_v39 = vadd.f32 %v1393_v38, %v1345_v36  ;;  %v1298_v41 = vadd.f32 %v1297_v22, %v2981_v62 }
 0x148   :  { %v1444_v43 = vpop.f32.mrf.mxu0 }
 0x149   :  { %v3169_v50 = vadd.f32 %v1442_v33, %v1394_v39 }
 0x14b   :  { %v1483_v51 = vsel %vm1482_vm0, %v3169_v50, 0.0 }
 0x14c   :  { %v1346_v23 = vpop.f32.mrf.mxu2 }
 0x14d   :  { %v1347_v45 = vadd.f32 %v1346_v23, %v1298_v41 }
 0x14e   :  { %v1395_v46 = vpop.f32.mrf.mxu3  ;;  %v1300_v56 = vpop.f32.mrf.mxu1 }
 0x14f   :  { %v1396_v54 = vadd.f32 %v1395_v46, %v1347_v45  ;;  %v1301_v40 = vadd.f32 %v1300_v56, %v2989_v15 }
 0x150   :  { %v1447_v48 = vpop.f32.mrf.mxu0 }
 0x151   :  { %v3172_v49 = vadd.f32 %v1444_v43, %v1396_v54 }
 0x153   :  { %v1484_v62 = vsel %vm1482_vm0, %v3172_v49, 0.0 }
 0x154   :  { %v1485_v55 = vadd.f32 %v1484_v62, %v1483_v51  ;;  %v1349_v53 = vpop.f32.mrf.mxu2 }
 0x155   :  { %v1350_v57 = vadd.f32 %v1349_v53, %v1301_v40 }
 0x156   :  { %v1398_v58 = vpop.f32.mrf.mxu3  ;;  %v1302_v59 = vpop.f32.mrf.mxu1 }
 0x157   :  { %v1399_v60 = vadd.f32 %v1398_v58, %v1350_v57  ;;  %v1303_v61 = vadd.f32 %v1302_v59, %v3010_v34 }
 0x158   :  { %v1449_v63 = vpop.f32.mrf.mxu0 }
 0x159   :  { %v3179_v15 = vadd.f32 %v1447_v48, %v1399_v60 }
 0x15b   :  { %v1486_v0 = vsel %vm1482_vm0, %v3179_v15, 0.0 }
 0x15c   :  { %v1487_v1 = vadd.f32 %v1486_v0, %v1485_v55  ;;  %v1351_v2 = vpop.f32.mrf.mxu2 }
 0x15d   :  { %v1352_v5 = vadd.f32 %v1351_v2, %v1303_v61 }
 0x15e   :  { %v1400_v7 = vpop.f32.mrf.mxu3  ;;  %v1305_v14 = vpop.f32.mrf.mxu1 }
 0x15f   :  { %v1401_v3 = vadd.f32 %v1400_v7, %v1352_v5  ;;  %v1306_v9 = vadd.f32 %v1305_v14, %v3019_v44 }
 0x160   :  { %v1452_v16 = vpop.f32.mrf.mxu0 }
 0x161   :  { %v3184_v13 = vadd.f32 %v1449_v63, %v1401_v3 }
 0x163   :  { %v1488_v34 = vsel %vm1482_vm0, %v3184_v13, 0.0 }
 0x164   :  { %v1489_v6 = vadd.f32 %v1488_v34, %v1487_v1  ;;  %v1354_v19 = vpop.f32.mrf.mxu2 }
 0x165   :  { %v1355_v20 = vadd.f32 %v1354_v19, %v1306_v9 }
 0x166   :  { %v1403_v12 = vpop.f32.mrf.mxu3  ;;  %v1307_v10 = vpop.f32.mrf.mxu1 }
 0x167   :  { %v1404_v24 = vadd.f32 %v1403_v12, %v1355_v20  ;;  %v1308_v44 = vadd.f32 %v1307_v10, %v3040_v4 }
 0x168   :  { %v1454_v26 = vpop.f32.mrf.mxu0 }
 0x169   :  { %v3188_v27 = vadd.f32 %v1452_v16, %v1404_v24 }
 0x16b   :  { %v1490_v28 = vsel %vm1482_vm0, %v3188_v27, 0.0 }
 0x16c   :  { %v1491_v29 = vadd.f32 %v1490_v28, %v1489_v6  ;;  %v1356_v30 = vpop.f32.mrf.mxu2 }
 0x16d   :  { %v1357_v31 = vadd.f32 %v1356_v30, %v1308_v44 }
 0x16e   :  { %v1405_v32 = vpop.f32.mrf.mxu3  ;;  %v1310_v33 = vpop.f32.mrf.mxu1 }
 0x16f   :  { %v1406_v11 = vadd.f32 %v1405_v32, %v1357_v31  ;;  %v1311_v39 = vadd.f32 %v1310_v33, %v3049_v18 }
 0x170   :  { %v1457_v36 = vpop.f32.mrf.mxu0 }
 0x171   :  { %v3193_v38 = vadd.f32 %v1454_v26, %v1406_v11 }
 0x173   :  { %v1492_v22 = vsel %vm1482_vm0, %v3193_v38, 0.0 }
 0x174   :  { %v1493_v41 = vadd.f32 %v1492_v22, %v1491_v29  ;;  %v1359_v43 = vpop.f32.mrf.mxu2 }
 0x175   :  { %v1360_v23 = vadd.f32 %v1359_v43, %v1311_v39 }
 0x176   :  { %v1408_v45 = vpop.f32.mrf.mxu3  ;;  %v1312_v46 = vpop.f32.mrf.mxu1 }
 0x177   :  { %v1409_v4 = vadd.f32 %v1408_v45, %v1360_v23  ;;  %v1313_v48 = vadd.f32 %v1312_v46, %v3069_v37 }
 0x178   :  { %v1459_v56 = vpop.f32.mrf.mxu0 }
 0x179   :  { %v3198_v54 = vadd.f32 %v1457_v36, %v1409_v4 }
 0x17b   :  { %v1494_v40 = vsel %vm1482_vm0, %v3198_v54, 0.0 }
 0x17c   :  { %v1495_v51 = vadd.f32 %v1494_v40, %v1493_v41  ;;  %v1361_v62 = vpop.f32.mrf.mxu2 }
 0x17d   :  { %v1362_v55 = vadd.f32 %v1361_v62, %v1313_v48 }
 0x17e   :  { %v1410_v53 = vpop.f32.mrf.mxu3  ;;  %v1315_v57 = vpop.f32.mrf.mxu1 }
 0x17f   :  { %v1411_v18 = vadd.f32 %v1410_v53, %v1362_v55  ;;  %v1316_v61 = vadd.f32 %v1315_v57, %v3078_v47 }
 0x180   :  { %v1462_v58 = vpop.f32.mrf.mxu0 }
 0x181   :  { %v3203_v59 = vadd.f32 %v1459_v56, %v1411_v18 }
 0x183   :  { %v1496_v60 = vsel %vm1482_vm0, %v3203_v59, 0.0 }
 0x184   :  { %v1497_v63 = vadd.f32 %v1496_v60, %v1495_v51  ;;  %v1364_v0 = vpop.f32.mrf.mxu2 }
 0x185   :  { %v1365_v1 = vadd.f32 %v1364_v0, %v1316_v61 }
 0x186   :  { %v1413_v2 = vpop.f32.mrf.mxu3  ;;  %v1317_v5 = vpop.f32.mrf.mxu1 }
 0x187   :  { %v1414_v37 = vadd.f32 %v1413_v2, %v1365_v1  ;;  %v1318_v9 = vadd.f32 %v1317_v5, %v3099_v8 }
 0x188   :  { %v1464_v7 = vpop.f32.mrf.mxu0 }
 0x189   :  { %v3208_v14 = vadd.f32 %v1462_v58, %v1414_v37 }
 0x18b   :  { %v1498_v3 = vsel %vm1482_vm0, %v3208_v14, 0.0 }
 0x18c   :  { %v1499_v16 = vadd.f32 %v1498_v3, %v1497_v63  ;;  %v1366_v34 = vpop.f32.mrf.mxu2 }
 0x18d   :  { %v1367_v6 = vadd.f32 %v1366_v34, %v1318_v9 }
 0x18e   :  { %v1415_v19 = vpop.f32.mrf.mxu3  ;;  %v1320_v20 = vpop.f32.mrf.mxu1 }
 0x18f   :  { %v1416_v47 = vadd.f32 %v1415_v19, %v1367_v6  ;;  %v1321_v26 = vadd.f32 %v1320_v20, %v3108_v21 }
 0x190   :  { %v1467_v12 = vpop.f32.mrf.mxu0 }
 0x191   :  { %v3213_v10 = vadd.f32 %v1464_v7, %v1416_v47 }
 0x193   :  { %v1500_v24 = vsel %vm1482_vm0, %v3213_v10, 0.0 }
 0x194   :  { %v1501_v28 = vadd.f32 %v1500_v24, %v1499_v16  ;;  %v1369_v44 = vpop.f32.mrf.mxu2 }
 0x195   :  { %v1370_v29 = vadd.f32 %v1369_v44, %v1321_v26 }
 0x196   :  { %v1418_v30 = vpop.f32.mrf.mxu3  ;;  %v1322_v31 = vpop.f32.mrf.mxu1 }
 0x197   :  { %v1419_v8 = vadd.f32 %v1418_v30, %v1370_v29  ;;  %v1323_v36 = vadd.f32 %v1322_v31, %v3129_v42 }
 0x198   :  { %v1469_v32 = vpop.f32.mrf.mxu0 }
 0x199   :  { %v3218_v33 = vadd.f32 %v1467_v12, %v1419_v8 }
 0x19b   :  { %v1502_v11 = vsel %vm1482_vm0, %v3218_v33, 0.0 }
 0x19c   :  { %v1503_v22 = vadd.f32 %v1502_v11, %v1501_v28  ;;  %v1371_v39 = vpop.f32.mrf.mxu2 }
 0x19d   :  { %v1372_v41 = vadd.f32 %v1371_v39, %v1323_v36 }
 0x19e   :  { %v1420_v43 = vpop.f32.mrf.mxu3  ;;  %v1325_v23 = vpop.f32.mrf.mxu1 }
 0x19f   :  { %v1421_v21 = vadd.f32 %v1420_v43, %v1372_v41  ;;  %v1326_v56 = vadd.f32 %v1325_v23, %v3138_v52 }
 0x1a0   :  { %v1472_v46 = vpop.f32.mrf.mxu0 }
 0x1a1   :  { %v1470_v45 = vadd.f32 %v1469_v32, %v1421_v21 }
 0x1a3   :  { %v1504_v4 = vsel %vm1482_vm0, %v1470_v45, 0.0 }
 0x1a4   :  { %v1505_v40 = vadd.f32 %v1504_v4, %v1503_v22  ;;  %v1374_v48 = vpop.f32.mrf.mxu2 }
 0x1a5   :  { %v1375_v51 = vadd.f32 %v1374_v48, %v1326_v56 }
 0x1a6   :  { %v1423_v62 = vpop.f32.mrf.mxu3  ;;  %v1327_v55 = vpop.f32.mrf.mxu1 }
 0x1a7   :  { %v1424_v53 = vadd.f32 %v1423_v62, %v1375_v51  ;;  %v1328_v18 = vadd.f32 %v1327_v55, %v3159_v17 }
 0x1a8   :  { %v1474_v60 = vpop.f32.mrf.mxu0 }
 0x1a9   :  { %v1473_v57 = vadd.f32 %v1472_v46, %v1424_v53 }
 0x1ab   :  { %v1506_v42 = vsel %vm1482_vm0, %v1473_v57, 0.0 }
 0x1ac   :  { %v1507_v58 = vadd.f32 %v1506_v42, %v1505_v40  ;;  %v1376_v61 = vpop.f32.mrf.mxu2 }
 0x1ad   :  { %v1377_v63 = vadd.f32 %v1376_v61, %v1328_v18 }
 0x1ae   :  { %v1425_v0 = vpop.f32.mrf.mxu3  ;;  %v1330_v1 = vpop.f32.mrf.mxu1 }
 0x1af   :  { %v1426_v2 = vadd.f32 %v1425_v0, %v1377_v63  ;;  %v1331_v37 = vadd.f32 %v1330_v1, %v3162_v25 }
 0x1b0   :  { %v1477_v34 = vpop.f32.mrf.mxu0 }
 0x1b1   :  { %v1475_v5 = vadd.f32 %v1474_v60, %v1426_v2 }
 0x1b3   :  { %v1508_v52 = vsel %vm1482_vm0, %v1475_v5, 0.0 }
 0x1b4   :  { %v1509_v7 = vadd.f32 %v1508_v52, %v1507_v58  ;;  %v1379_v3 = vpop.f32.mrf.mxu2 }
 0x1b5   :  { %v1380_v9 = vadd.f32 %v1379_v3, %v1331_v37 }
 0x1b6   :  { %v1428_v16 = vpop.f32.mrf.mxu3  ;;  %v1332_v19 = vpop.f32.mrf.mxu1 }
 0x1b7   :  { %v1429_v6 = vadd.f32 %v1428_v16, %v1380_v9  ;;  %v1333_v47 = vadd.f32 %v1332_v19, %v3166_v35 }
 0x1b8   :  { %v1479_v29 = vpop.f32.mrf.mxu0 }
 0x1b9   :  { %v1478_v17 = vadd.f32 %v1477_v34, %v1429_v6 }
 0x1bb   :  { %v1510_v20 = vsel %vm1482_vm0, %v1478_v17, 0.0 }
 0x1bc   :  { %v1511_v12 = vadd.f32 %v1510_v20, %v1509_v7  ;;  %v1381_v24 = vpop.f32.mrf.mxu2 }
 0x1bd   :  { %v1382_v26 = vadd.f32 %v1381_v24, %v1333_v47 }
 0x1be   :  { %v1430_v28 = vpop.f32.mrf.mxu3 }
 0x1bf   :  { %v1431_v44 = vadd.f32 %v1430_v28, %v1382_v26 }
 0x1c1   :  { %v1480_v30 = vadd.f32 %v1479_v29, %v1431_v44 }
 0x1c3   :  { %v1512_v25 = vsel %vm1482_vm0, %v1480_v30, 0.0 }
 0x1c4   :  { %v1513_v31 = vadd.f32 %v1512_v25, %v1511_v12 }
 0x1c6   :  { %v1514_v8 = vrot.slane %v1513_v31, 4 }
 0x1c8   :  { %v1515_v32 = vadd.f32 %v1514_v8, %v1513_v31 }
 0x1ca   :  { %v1516_v11 = vrot.slane %v1515_v32, 2 }
 0x1cc   :  { %v1517_v36 = vadd.f32 %v1516_v11, %v1515_v32 }
 0x1ce   :  { %v1518_v22 = vrot.slane %v1517_v36, 1 }
 0x1d0   :  { %v1519_v39 = vadd.f32 %v1518_v22, %v1517_v36 }
 0x1d2   :  { %v1520_v41 = vmul.f32 0.0078125, %v1519_v39 }
 0x1d4   :  { %v3233_v43 = vsub.f32 %v3169_v50, %v1520_v41  ;;  %v3236_v35 = vsub.f32 %v3172_v49, %v1520_v41  ;;  %v3239_v23 = vsub.f32 %v3179_v15, %v1520_v41  ;;  %v3242_v21 = vsub.f32 %v3184_v13, %v1520_v41 }
 0x1d5   :  { %v3245_v46 = vsub.f32 %v3188_v27, %v1520_v41  ;;  %v3248_v4 = vsub.f32 %v3193_v38, %v1520_v41  ;;  %v3251_v56 = vsub.f32 %v3198_v54, %v1520_v41  ;;  %v3254_v50 = vsub.f32 %v3203_v59, %v1520_v41 }
 0x1d6   :  { %v3257_v49 = vsub.f32 %v3208_v14, %v1520_v41  ;;  %v3260_v15 = vsub.f32 %v3213_v10, %v1520_v41  ;;  %v3263_v13 = vsub.f32 %v3218_v33, %v1520_v41  ;;  %v3265_v27 = vsub.f32 %v1470_v45, %v1520_v41 }
 0x1d7   :  { %v3267_v40 = vsub.f32 %v1473_v57, %v1520_v41  ;;  %v3269_v38 = vsub.f32 %v1475_v5, %v1520_v41  ;;  %v3271_v54 = vsub.f32 %v1478_v17, %v1520_v41  ;;  %v3273_v48 = vsub.f32 %v1480_v30, %v1520_v41 }
 0x1d8   :  { %v1537_v59 = vmul.f32 %v3233_v43, %v3233_v43  ;;  %v1538_v14 = vmul.f32 %v3236_v35, %v3236_v35  ;;  %v1539_v10 = vmul.f32 %v3239_v23, %v3239_v23  ;;  %v1540_v33 = vmul.f32 %v3242_v21, %v3242_v21 }
 0x1d9   :  { %v1541_v55 = vmul.f32 %v3245_v46, %v3245_v46  ;;  %v1542_v42 = vmul.f32 %v3248_v4, %v3248_v4  ;;  %v1543_v60 = vmul.f32 %v3251_v56, %v3251_v56  ;;  %v1544_v0 = vmul.f32 %v3254_v50, %v3254_v50 }
 0x1da   :  { %v1553_v45 = vsel %vm1482_vm0, %v1537_v59, 0.0  ;;  %v1554_v51 = vsel %vm1482_vm0, %v1538_v14, 0.0  ;;  %v1556_v53 = vsel %vm1482_vm0, %v1539_v10, 0.0  ;;  %v1558_v18 = vsel %vm1482_vm0, %v1540_v33, 0.0 }
 0x1db   :  { %v1555_v62 = vadd.f32 %v1554_v51, %v1553_v45  ;;  %v1560_v61 = vsel %vm1482_vm0, %v1541_v55, 0.0  ;;  %v1562_v1 = vsel %vm1482_vm0, %v1542_v42, 0.0  ;;  %v1545_v5 = vmul.f32 %v3257_v49, %v3257_v49 }
 0x1dc   :  { %v1564_v52 = vsel %vm1482_vm0, %v1543_v60, 0.0  ;;  %v1546_v7 = vmul.f32 %v3260_v15, %v3260_v15  ;;  %v1566_v3 = vsel %vm1482_vm0, %v1544_v0, 0.0  ;;  %v1547_v16 = vmul.f32 %v3263_v13, %v3263_v13 }
 0x1dd   :  { %v1557_v57 = vadd.f32 %v1556_v53, %v1555_v62  ;;  %v1568_v34 = vsel %vm1482_vm0, %v1545_v5, 0.0  ;;  %v1548_v19 = vmul.f32 %v3265_v27, %v3265_v27  ;;  %v1549_v47 = vmul.f32 %v3267_v40, %v3267_v40 }
 0x1de   :  { %v1570_v17 = vsel %vm1482_vm0, %v1546_v7, 0.0  ;;  %v1572_v12 = vsel %vm1482_vm0, %v1547_v16, 0.0  ;;  %v1550_v26 = vmul.f32 %v3269_v38, %v3269_v38  ;;  %v1551_v29 = vmul.f32 %v3271_v54, %v3271_v54 }
 0x1df   :  { %v1559_v58 = vadd.f32 %v1558_v18, %v1557_v57  ;;  %v1574_v28 = vsel %vm1482_vm0, %v1548_v19, 0.0  ;;  %v1576_v30 = vsel %vm1482_vm0, %v1549_v47, 0.0  ;;  %v1552_v31 = vmul.f32 %v3273_v48, %v3273_v48 }
 0x1e0   :  { %v1578_v8 = vsel %vm1482_vm0, %v1550_v26, 0.0  ;;  %v1580_v11 = vsel %vm1482_vm0, %v1551_v29, 0.0 }
 0x1e1   :  { %v1561_v63 = vadd.f32 %v1560_v61, %v1559_v58  ;;  %v1582_v22 = vsel %vm1482_vm0, %v1552_v31, 0.0  ;;  %v1591_v58 = vld [vmem:[%s3412_s2] sm:$0x1] }
 0x1e3   :  { %v1563_v2 = vadd.f32 %v1562_v1, %v1561_v63 }
 0x1e5   :  { %v1565_v37 = vadd.f32 %v1564_v52, %v1563_v2  ;;  %v2423_v52 = vld [vmem:[%s3411_s3] ss:$0 sm:$0xff] }
 0x1e7   :  { %v1567_v9 = vadd.f32 %v1566_v3, %v1565_v37 }
 0x1e9   :  { %v1569_v6 = vadd.f32 %v1568_v34, %v1567_v9 }
 0x1eb   :  { %v1571_v20 = vadd.f32 %v1570_v17, %v1569_v6 }
 0x1ed   :  { %v1573_v24 = vadd.f32 %v1572_v12, %v1571_v20 }
 0x1ef   :  { %v1575_v44 = vadd.f32 %v1574_v28, %v1573_v24 }
 0x1f1   :  { %v1577_v25 = vadd.f32 %v1576_v30, %v1575_v44 }
 0x1f3   :  { %v1579_v32 = vadd.f32 %v1578_v8, %v1577_v25 }
 0x1f5   :  { %v1581_v36 = vadd.f32 %v1580_v11, %v1579_v32 }
 0x1f7   :  { %v1583_v39 = vadd.f32 %v1582_v22, %v1581_v36 }
 0x1f9   :  { %v1584_v41 = vrot.slane %v1583_v39, 4 }
 0x1fb   :  { %v1585_v59 = vadd.f32 %v1584_v41, %v1583_v39 }
 0x1fd   :  { %v1586_v14 = vrot.slane %v1585_v59, 2 }
 0x1ff   :  { %v1587_v10 = vadd.f32 %v1586_v14, %v1585_v59 }
 0x201   :  { %v1588_v33 = vrot.slane %v1587_v10, 1 }
 0x203   :  { %v1589_v45 = vadd.f32 %v1588_v33, %v1587_v10 }
 0x205   :  { %v1590_v51 = vmul.f32 0.0078125, %v1589_v45 }
 0x207   :  { %v1592_v62 = vadd.f32 1e-05, %v1590_v51 }
 0x209   :  { %2424 = vrsqrt.f32 %v1592_v62  ;;  %vm1599_vm2 = vweird.f32 %v1592_v62 }
 0x20f   :  { %v2425_v55 = vpop.eup %2424 }
 0x210   :  { %v1594_v53 = vmul.f32 %v2425_v55, %v1592_v62  ;;  %vm1600_vm1 = vweird.f32 %v2425_v55 }
 0x211   :  { %vm1601_vm3 = vmor %vm1599_vm2, %vm1600_vm1 }
 0x212   :  { %v1595_v57 = vmul.f32 %v2425_v55, %v1594_v53 }
 0x214   :  { %v1596_v42 = vmul.f32 0.5, %v1595_v57 }
 0x216   :  { %v1597_v18 = vsub.f32 1.5, %v1596_v42 }
 0x218   :  { %v1598_v60 = vmul.f32 %v2425_v55, %v1597_v18 }
 0x21a   :  { %v1602_v61 = vsel %vm1601_vm3, %v2425_v55, %v1598_v60 }
 0x21b   :  { %v1603_v63 = vmul.f32 %v1602_v61, %v1591_v58 }
 0x21d   :  { %v1605_v0 = vperm.slane %v1603_v63, 0 }
 0x21f   :  { %v1607_v1 = vmul.f32 %v1605_v0, %v3233_v43  ;;  %v1608_v2 = vmul.f32 %v1605_v0, %v3236_v35  ;;  %v1609_v5 = vmul.f32 %v1605_v0, %v3239_v23  ;;  %v1610_v37 = vmul.f32 %v1605_v0, %v3242_v21 }
 0x220   :  { %v1611_v7 = vmul.f32 %v1605_v0, %v3245_v46  ;;  %v1612_v3 = vmul.f32 %v1605_v0, %v3248_v4  ;;  %v1616_v9 = vmul.f32 %v1605_v0, %v3260_v15  ;;  %v1617_v16 = vmul.f32 %v1605_v0, %v3263_v13 }
 0x221   :  { %v1618_v43 = vmul.f32 %v1605_v0, %v3265_v27  ;;  %v1619_v35 = vmul.f32 %v1605_v0, %v3267_v40  ;;  %v1620_v23 = vmul.f32 %v1605_v0, %v3269_v38  ;;  %v1621_v34 = vmul.f32 %v1605_v0, %v3271_v54 }
 0x222   :  { %v1622_v6 = vmul.f32 %v1605_v0, %v3273_v48  ;;  %v1613_v21 = vmul.f32 %v1605_v0, %v3251_v56  ;;  %v1627_v19 = vadd.f32 %v2423_v52, %v1607_v1  ;;  %v1628_v46 = vadd.f32 %v2423_v52, %v1608_v2 }
 0x223   :  { %v1629_v17 = vadd.f32 %v2423_v52, %v1609_v5  ;;  %v1614_v4 = vmul.f32 %v1605_v0, %v3254_v50  ;;  %v1630_v15 = vadd.f32 %v2423_v52, %v1610_v37  ;;  %v1615_v13 = vmul.f32 %v1605_v0, %v3257_v49 }
 0x224   :  { %v1631_v20 = vadd.f32 %v2423_v52, %v1611_v7  ;;  %v1632_v27 = vadd.f32 %v2423_v52, %v1612_v3  ;;  %v1633_v47 = vadd.f32 %v2423_v52, %v1613_v21  ;;  %v1643_v40 = vmax.f32 %v1627_v19, 0.0 }
 0x225   :  { %v1644_v12 = vmax.f32 %v1628_v46, 0.0  ;;  %v1645_v38 = vmax.f32 %v1629_v17, 0.0  ;;  %v1634_v24 = vadd.f32 %v2423_v52, %v1614_v4  ;;  %v1646_v54 = vmax.f32 %v1630_v15, 0.0 }
 0x226   :  { %v1635_v26 = vadd.f32 %v2423_v52, %v1615_v13  ;;  %v1647_v48 = vmax.f32 %v1631_v20, 0.0  ;;  %1659 = vst.msk [vmem:[%s3413_s4] sm:$0xff] %vm1482_vm0, %v1643_v40  ;;  %v1636_v56 = vadd.f32 %v2423_v52, %v1616_v9  ;;  %v1648_v50 = vmax.f32 %v1632_v27, 0.0 }
 0x227   :  { %1660 = vst.msk [vmem:[%s3413_s4 + $0x8] sm:$0xff] %vm1482_vm0, %v1644_v12  ;;  %v1637_v49 = vadd.f32 %v2423_v52, %v1617_v16  ;;  %v1649_v28 = vmax.f32 %v1633_v47, 0.0  ;;  %v1638_v44 = vadd.f32 %v2423_v52, %v1618_v43  ;;  %v1650_v29 = vmax.f32 %v1634_v24, 0.0 }
 0x228   :  { %1661 = vst.msk [vmem:[%s3413_s4 + $0x10] sm:$0xff] %vm1482_vm0, %v1645_v38  ;;  %v1639_v30 = vadd.f32 %v2423_v52, %v1619_v35  ;;  %v1651_v25 = vmax.f32 %v1635_v26, 0.0  ;;  %v1640_v31 = vadd.f32 %v2423_v52, %v1620_v23  ;;  %v1652_v8 = vmax.f32 %v1636_v56, 0.0 }
 0x229   :  { %1662 = vst.msk [vmem:[%s3413_s4 + $0x18] sm:$0xff] %vm1482_vm0, %v1646_v54  ;;  %v1641_v32 = vadd.f32 %v2423_v52, %v1621_v34  ;;  %v1653_v11 = vmax.f32 %v1637_v49, 0.0  ;;  %v1642_v36 = vadd.f32 %v2423_v52, %v1622_v6  ;;  %v1654_v22 = vmax.f32 %v1638_v44, 0.0 }
 0x22a   :  { %1663 = vst.msk [vmem:[%s3413_s4 + $0x20] sm:$0xff] %vm1482_vm0, %v1647_v48  ;;  %v1655_v39 = vmax.f32 %v1639_v30, 0.0  ;;  %v1656_v41 = vmax.f32 %v1640_v31, 0.0 }
 0x22b   :  { %1664 = vst.msk [vmem:[%s3413_s4 + $0x28] sm:$0xff] %vm1482_vm0, %v1648_v50  ;;  %v1657_v59 = vmax.f32 %v1641_v32, 0.0  ;;  %v1658_v14 = vmax.f32 %v1642_v36, 0.0 }
 0x22c   :  { %1665 = vst.msk [vmem:[%s3413_s4 + $0x30] sm:$0xff] %vm1482_vm0, %v1649_v28 }
 0x22d   :  { %1666 = vst.msk [vmem:[%s3413_s4 + $0x38] sm:$0xff] %vm1482_vm0, %v1650_v29 }
 0x22e   :  { %1667 = vst.msk [vmem:[%s3413_s4 + $0x40] sm:$0xff] %vm1482_vm0, %v1651_v25 }
 0x22f   :  { %1668 = vst.msk [vmem:[%s3413_s4 + $0x48] sm:$0xff] %vm1482_vm0, %v1652_v8 }
 0x230   :  { %1669 = vst.msk [vmem:[%s3413_s4 + $0x50] sm:$0xff] %vm1482_vm0, %v1653_v11 }
 0x231   :  { %1670 = vst.msk [vmem:[%s3413_s4 + $0x58] sm:$0xff] %vm1482_vm0, %v1654_v22 }
 0x232   :  { %1671 = vst.msk [vmem:[%s3413_s4 + $0x60] sm:$0xff] %vm1482_vm0, %v1655_v39 }
 0x233   :  { %1672 = vst.msk [vmem:[%s3413_s4 + $0x68] sm:$0xff] %vm1482_vm0, %v1656_v41 }
 0x234   :  { %1673 = vst.msk [vmem:[%s3413_s4 + $0x70] sm:$0xff] %vm1482_vm0, %v1657_v59 }
 0x235   :  { %1674 = vst.msk [vmem:[%s3413_s4 + $0x78] sm:$0xff] %vm1482_vm0, %v1658_v14 }

// kernel: epistemic_forward.19
= control target key start
LH: loop header
LB: loop body
LE: loop exit
PB: predicated region body
PF: predicated region fallthrough
CT: control target
= control target key end

     0   :  { %vm1299_vm0 = vcmask 523264   ;;  %s4925_s1 = inlined_call_operand.vmem [shape: bf16[576,128], index: 1, kind: input, shape index: {}]   ;;  %s4926_s2 = inlined_call_operand.vmem [shape: f32[1,128], index: 2, kind: input, shape index: {}]   ;;  %s4927_s0 = inlined_call_operand.vmem [shape: bf16[512,576], index: 0, kind: input, shape index: {}]   ;;  %s4928_s3 = inlined_call_operand.vmem [shape: f32[512,128], index: 3, kind: output, shape index: {}]  }
   0x1   :  { %v3292_v0 = vld [vmem:[%s4925_s1 + $0x38] sm:$0xff]  ;;  %v3291_v1 = vld [vmem:[%s4925_s1 + $0x30] sm:$0xff]  ;;  %v3290_v2 = vld [vmem:[%s4925_s1 + $0x28] sm:$0xff] }
   0x2   :  { %3321 = vmatpush.bf16.msra.mxu1 %v3292_v0  ;;  %3322 = vmatpush.bf16.msra.mxu2 %v3292_v0  ;;  %v3289_v3 = vld [vmem:[%s4925_s1 + $0x20] sm:$0xff]  ;;  %v3288_v4 = vld [vmem:[%s4925_s1 + $0x18] sm:$0xff]  ;;  %v3287_v5 = vld [vmem:[%s4925_s1 + $0x10] sm:$0xff] }
   0x3   :  { %3323 = vmatpush.bf16.msra.mxu3 %v3292_v0  ;;  %1396 = vmatpush.bf16.msra.mxu0 %v3292_v0  ;;  %v3286_v6 = vld [vmem:[%s4925_s1 + $0x8] sm:$0xff]  ;;  %v3285_v7 = vld [vmem:[%s4925_s1] sm:$0xff]  ;;  %v3167_v9 = vld [vmem:[%s4927_s0 + $0x150] sm:$0xf0] }
   0x4   :  { %v2471_v8 = vld [vmem:[%s4927_s0 + $0x140] sm:$0xf]  ;;  %v3207_v11 = vld [vmem:[%s4927_s0 + $0x290] sm:$0xf0]  ;;  %v3308_v16 = vld [vmem:[%s4925_s1 + $0xb8] sm:$0xff] }
   0x5   :  { %v2631_v10 = vld [vmem:[%s4927_s0 + $0x280] sm:$0xf]  ;;  %v3247_v13 = vld [vmem:[%s4927_s0 + $0x3d0] sm:$0xf0]  ;;  %v3316_v17 = vld [vmem:[%s4925_s1 + $0xf8] sm:$0xff]  ;;  %v2472_v18 = vor.u32 %v3167_v9, %v2471_v8 }
   0x6   :  { %3324 = vmatpush.bf16.msra.mxu1 %v3291_v1  ;;  %3325 = vmatpush.bf16.msra.mxu2 %v3291_v1  ;;  %v2791_v12 = vld [vmem:[%s4927_s0 + $0x3c0] sm:$0xf]  ;;  %v3127_v15 = vld [vmem:[%s4927_s0 + $0x10] sm:$0xf0]  ;;  %v2632_v19 = vor.u32 %v3207_v11, %v2631_v10  ;;  %v3300_v22 = vld [vmem:[%s4925_s1 + $0x78] sm:$0xff] }
   0x7   :  { %3326 = vmatpush.bf16.msra.mxu3 %v3291_v1  ;;  %1397 = vmatpush.bf16.msra.mxu0 %v3291_v1  ;;  %v2311_v14 = vld [vmem:[%s4927_s0] sm:$0xf]  ;;  %v2792_v20 = vor.u32 %v3247_v13, %v2791_v12  ;;  %v3320_v23 = vld [vmem:[%s4925_s1 + $0x118] sm:$0xff]  ;;  %v3307_v24 = vld [vmem:[%s4925_s1 + $0xb0] sm:$0xff] }
   0x8   :  { %v2312_v21 = vor.u32 %v3127_v15, %v2311_v14  ;;  %v3315_v25 = vld [vmem:[%s4925_s1 + $0xf0] sm:$0xff]  ;;  %v3306_v28 = vld [vmem:[%s4925_s1 + $0xa8] sm:$0xff]  ;;  %v3172_v32 = vld [vmem:[%s4927_s0 + $0x178] sm:$0xf0] }
   0x9   :  { %v3299_v26 = vld [vmem:[%s4925_s1 + $0x70] sm:$0xff]  ;;  %v3314_v29 = vld [vmem:[%s4925_s1 + $0xe8] sm:$0xff]  ;;  %v3212_v34 = vld [vmem:[%s4927_s0 + $0x2b8] sm:$0xf0] }
   0xa   :  { %3327 = vmatpush.bf16.msra.mxu1 %v3290_v2  ;;  %3328 = vmatpush.bf16.msra.mxu2 %v3290_v2  ;;  %v3319_v27 = vld [vmem:[%s4925_s1 + $0x110] sm:$0xff]  ;;  %v3298_v30 = vld [vmem:[%s4925_s1 + $0x68] sm:$0xff]  ;;  %v3252_v36 = vld [vmem:[%s4927_s0 + $0x3f8] sm:$0xf0] }
   0xb   :  { %3329 = vmatpush.bf16.msra.mxu3 %v3290_v2  ;;  %1398 = vmatpush.bf16.msra.mxu0 %v3290_v2  ;;  %v2491_v31 = vld [vmem:[%s4927_s0 + $0x168] sm:$0xf]  ;;  %v3132_v38 = vld [vmem:[%s4927_s0 + $0x38] sm:$0xf0]  ;;  %v3305_v43 = vld [vmem:[%s4925_s1 + $0xa0] sm:$0xff] }
   0xc   :  { %v2651_v33 = vld [vmem:[%s4927_s0 + $0x2a8] sm:$0xf]  ;;  %v2492_v39 = vor.u32 %v3172_v32, %v2491_v31  ;;  %v3313_v44 = vld [vmem:[%s4925_s1 + $0xe0] sm:$0xff]  ;;  %v2511_v46 = vld [vmem:[%s4927_s0 + $0x190] sm:$0xf] }
   0xd   :  { %v2811_v35 = vld [vmem:[%s4927_s0 + $0x3e8] sm:$0xf]  ;;  %v2652_v40 = vor.u32 %v3212_v34, %v2651_v33  ;;  %v3297_v45 = vld [vmem:[%s4925_s1 + $0x60] sm:$0xff]  ;;  %v2671_v48 = vld [vmem:[%s4927_s0 + $0x2d0] sm:$0xf] }
   0xe   :  { %3330 = vmatpush.bf16.msra.mxu1 %v3289_v3  ;;  %3331 = vmatpush.bf16.msra.mxu2 %v3289_v3  ;;  %v2331_v37 = vld [vmem:[%s4927_s0 + $0x28] sm:$0xf]  ;;  %v2812_v41 = vor.u32 %v3252_v36, %v2811_v35  ;;  %v3177_v47 = vld [vmem:[%s4927_s0 + $0x1a0] sm:$0xf0]  ;;  %v2831_v50 = vld [vmem:[%s4927_s0 + $0x410] sm:$0xf] }
   0xf   :  { %3332 = vmatpush.bf16.msra.mxu3 %v3289_v3  ;;  %1399 = vmatpush.bf16.msra.mxu0 %v3289_v3  ;;  %v2332_v42 = vor.u32 %v3132_v38, %v2331_v37  ;;  %v3217_v49 = vld [vmem:[%s4927_s0 + $0x2e0] sm:$0xf0]  ;;  %v2351_v52 = vld [vmem:[%s4927_s0 + $0x50] sm:$0xf]  ;;  %v2512_v54 = vor.u32 %v3177_v47, %v2511_v46  ;;  %v3304_v58 = vld [vmem:[%s4925_s1 + $0x98] sm:$0xff] }
  0x10   :  { %v3257_v51 = vld [vmem:[%s4927_s0 + $0x420] sm:$0xf0]  ;;  %v2672_v55 = vor.u32 %v3217_v49, %v2671_v48  ;;  %v3312_v59 = vld [vmem:[%s4925_s1 + $0xd8] sm:$0xff]  ;;  %v3318_v61 = vld [vmem:[%s4925_s1 + $0x108] sm:$0xff] }
  0x11   :  { %v3137_v53 = vld [vmem:[%s4927_s0 + $0x60] sm:$0xf0]  ;;  %v2832_v56 = vor.u32 %v3257_v51, %v2831_v50  ;;  %v3296_v60 = vld [vmem:[%s4925_s1 + $0x58] sm:$0xff]  ;;  %v3182_v63 = vld [vmem:[%s4927_s0 + $0x1c8] sm:$0xf0] }
  0x12   :  { %3333 = vmatpush.bf16.msra.mxu1 %v3288_v4  ;;  %3334 = vmatpush.bf16.msra.mxu2 %v3288_v4  ;;  %v2352_v57 = vor.u32 %v3137_v53, %v2351_v52  ;;  %v2531_v62 = vld [vmem:[%s4927_s0 + $0x1b8] sm:$0xf]  ;;  %v3222_v1 = vld [vmem:[%s4927_s0 + $0x308] sm:$0xf0]  ;;  %v3303_v10 = vld [vmem:[%s4925_s1 + $0x90] sm:$0xff] }
  0x13   :  { %3335 = vmatpush.bf16.msra.mxu3 %v3288_v4  ;;  %1400 = vmatpush.bf16.msra.mxu0 %v3288_v4  ;;  %v2691_v0 = vld [vmem:[%s4927_s0 + $0x2f8] sm:$0xf]  ;;  %v3262_v3 = vld [vmem:[%s4927_s0 + $0x448] sm:$0xf0]  ;;  %v3311_v11 = vld [vmem:[%s4925_s1 + $0xd0] sm:$0xff] }
  0x14   :  { %v2851_v2 = vld [vmem:[%s4927_s0 + $0x438] sm:$0xf]  ;;  %v3295_v12 = vld [vmem:[%s4925_s1 + $0x50] sm:$0xff]  ;;  %v2551_v13 = vld [vmem:[%s4927_s0 + $0x1e0] sm:$0xf] }
  0x15   :  { %v2371_v4 = vld [vmem:[%s4927_s0 + $0x78] sm:$0xf]  ;;  %v2852_v8 = vor.u32 %v3262_v3, %v2851_v2  ;;  %v3187_v14 = vld [vmem:[%s4927_s0 + $0x1f0] sm:$0xf0]  ;;  %v2711_v15 = vld [vmem:[%s4927_s0 + $0x320] sm:$0xf] }
  0x16   :  { %3336 = vmatpush.bf16.msra.mxu1 %v3287_v5  ;;  %3337 = vmatpush.bf16.msra.mxu2 %v3287_v5  ;;  %v2731_v31 = vld [vmem:[%s4927_s0 + $0x348] sm:$0xf]  ;;  %v3232_v32 = vld [vmem:[%s4927_s0 + $0x358] sm:$0xf0]  ;;  %v2751_v46 = vld [vmem:[%s4927_s0 + $0x370] sm:$0xf] }
  0x17   :  { %3338 = vmatpush.bf16.msra.mxu3 %v3287_v5  ;;  %1401 = vmatpush.bf16.msra.mxu0 %v3287_v5  ;;  %v3142_v5 = vld [vmem:[%s4927_s0 + $0x88] sm:$0xf0]  ;;  %v2891_v33 = vld [vmem:[%s4927_s0 + $0x488] sm:$0xf]  ;;  %v3272_v34 = vld [vmem:[%s4927_s0 + $0x498] sm:$0xf0]  ;;  %v2732_v38 = vor.u32 %v3232_v32, %v2731_v31 }
  0x18   :  { %v2372_v9 = vor.u32 %v3142_v5, %v2371_v4  ;;  %v2411_v35 = vld [vmem:[%s4927_s0 + $0xc8] sm:$0xf]  ;;  %v3152_v36 = vld [vmem:[%s4927_s0 + $0xd8] sm:$0xf0]  ;;  %v3237_v47 = vld [vmem:[%s4927_s0 + $0x380] sm:$0xf0] }
  0x19   :  { %v2911_v48 = vld [vmem:[%s4927_s0 + $0x4b0] sm:$0xf]  ;;  %v3277_v49 = vld [vmem:[%s4927_s0 + $0x4c0] sm:$0xf0]  ;;  %v2752_v53 = vor.u32 %v3237_v47, %v2751_v46  ;;  %v2313_v5 = vld [vmem:[%s4927_s0 + $0x14] sm:$0xf0] }
  0x1a   :  { %3339 = vmatpush.bf16.msra.mxu1 %v3286_v6  ;;  %3340 = vmatpush.bf16.msra.mxu2 %v3286_v6  ;;  %v2431_v50 = vld [vmem:[%s4927_s0 + $0xf0] sm:$0xf]  ;;  %v3157_v51 = vld [vmem:[%s4927_s0 + $0x100] sm:$0xf0]  ;;  %v3136_v46 = vld [vmem:[%s4927_s0 + $0x5c] sm:$0xf] }
  0x1b   :  { %3341 = vmatpush.bf16.msra.mxu3 %v3286_v6  ;;  %1402 = vmatpush.bf16.msra.mxu0 %v3286_v6  ;;  %v2532_v6 = vor.u32 %v3182_v63, %v2531_v62  ;;  %v2451_v62 = vld [vmem:[%s4927_s0 + $0x118] sm:$0xf]  ;;  %v3162_v63 = vld [vmem:[%s4927_s0 + $0x128] sm:$0xf0]  ;;  %v3125_v4 = vld [vmem:[%s4927_s0 + $0x4] sm:$0xf] }
  0x1c   :  { %v2452_v3 = vor.u32 %v3162_v63, %v2451_v62  ;;  %v2361_v47 = vld [vmem:[%s4927_s0 + $0x6c] sm:$0xf0]  ;;  %v3140_v62 = vld [vmem:[%s4927_s0 + $0x7c] sm:$0xf] }
  0x1d   :  { %v2373_v63 = vld [vmem:[%s4927_s0 + $0x8c] sm:$0xf0] }
  0x1e   :  { %3342 = vmatpush.bf16.msra.mxu1 %v3285_v7  ;;  %3343 = vmatpush.bf16.msra.mxu2 %v3285_v7 }
  0x1f   :  { %3344 = vmatpush.bf16.msra.mxu3 %v3285_v7  ;;  %1403 = vmatpush.bf16.msra.mxu0 %v3285_v7  ;;  %v2692_v7 = vor.u32 %v3222_v1, %v2691_v0 }
  0x21   :  { %1444 = vmatmul.bf16.vlgmr.msra.gmra.mxu1 %v2472_v18  ;;  %1484 = vmatmul.bf16.vlgmr.msra.gmra.mxu2 %v2632_v19  ;;  %v3267_v18 = vld [vmem:[%s4927_s0 + $0x470] sm:$0xf0]  ;;  %v2391_v19 = vld [vmem:[%s4927_s0 + $0xa0] sm:$0xf] }
  0x22   :  { %1734 = vmatpush.bf16.msrb.mxu2 %v3308_v16  ;;  %1524 = vmatmul.bf16.vlgmr.msra.gmra.mxu3 %v2792_v20  ;;  %v3227_v16 = vld [vmem:[%s4927_s0 + $0x330] sm:$0xf0] }
  0x23   :  { %1903 = vmatpush.bf16.msrb.mxu3 %v3316_v17  ;;  %1404 = vmatmul.bf16.vlgmr.msra.gmra.mxu0 %v2312_v21  ;;  %v2871_v17 = vld [vmem:[%s4927_s0 + $0x460] sm:$0xf]  ;;  %v3147_v20 = vld [vmem:[%s4927_s0 + $0xb0] sm:$0xf0]  ;;  %v2552_v21 = vor.u32 %v3187_v14, %v2551_v13 }
  0x24   :  { %1565 = vmatpush.bf16.msrb.mxu1 %v3300_v22  ;;  %2076 = vmatpush.bf16.msrb.mxu0 %v3320_v23  ;;  %v2712_v22 = vor.u32 %v3227_v16, %v2711_v15  ;;  %v2872_v23 = vor.u32 %v3267_v18, %v2871_v17 }
  0x26   :  { %1735 = vmatpush.bf16.msrb.mxu2 %v3307_v24  ;;  %v2392_v24 = vor.u32 %v3147_v20, %v2391_v19 }
  0x27   :  { %1904 = vmatpush.bf16.msrb.mxu3 %v3315_v25  ;;  %v3302_v25 = vld [vmem:[%s4925_s1 + $0x88] sm:$0xff] }
  0x28   :  { %1566 = vmatpush.bf16.msrb.mxu1 %v3299_v26  ;;  %2077 = vmatpush.bf16.msrb.mxu0 %v3319_v27  ;;  %v3310_v26 = vld [vmem:[%s4925_s1 + $0xc8] sm:$0xff] }
  0x29   :  { %v3294_v27 = vld [vmem:[%s4925_s1 + $0x48] sm:$0xff] }
  0x2a   :  { %1736 = vmatpush.bf16.msrb.mxu2 %v3306_v28  ;;  %v3317_v28 = vld [vmem:[%s4925_s1 + $0x100] sm:$0xff] }
  0x2b   :  { %1905 = vmatpush.bf16.msrb.mxu3 %v3314_v29  ;;  %v2571_v29 = vld [vmem:[%s4927_s0 + $0x208] sm:$0xf] }
  0x2c   :  { %1567 = vmatpush.bf16.msrb.mxu1 %v3298_v30  ;;  %2078 = vmatpush.bf16.msrb.mxu0 %v3318_v61  ;;  %v3192_v30 = vld [vmem:[%s4927_s0 + $0x218] sm:$0xf0]  ;;  %v3282_v61 = vld [vmem:[%s4927_s0 + $0x4e8] sm:$0xf0] }
  0x2d   :  { %v2572_v37 = vor.u32 %v3192_v30, %v2571_v29  ;;  %v3134_v29 = vld [vmem:[%s4927_s0 + $0x48] sm:$0xf0] }
  0x2e   :  { %1737 = vmatpush.bf16.msrb.mxu2 %v3305_v43  ;;  %v3293_v43 = vld [vmem:[%s4925_s1 + $0x40] sm:$0xff] }
  0x2f   :  { %1906 = vmatpush.bf16.msrb.mxu3 %v3313_v44  ;;  %v2591_v44 = vld [vmem:[%s4927_s0 + $0x230] sm:$0xf] }
  0x30   :  { %1568 = vmatpush.bf16.msrb.mxu1 %v3297_v45  ;;  %2079 = vmatpush.bf16.msrb.mxu0 %v3317_v28  ;;  %v3197_v45 = vld [vmem:[%s4927_s0 + $0x240] sm:$0xf0]  ;;  %v2347_v28 = vld [vmem:[%s4927_s0 + $0x38] sm:$0xf] }
  0x31   :  { %1449 = vmatmul.bf16.gmra.mxu1 %v2492_v39  ;;  %1489 = vmatmul.bf16.gmra.mxu2 %v2652_v40  ;;  %v2892_v39 = vor.u32 %v3272_v34, %v2891_v33  ;;  %v2412_v40 = vor.u32 %v3152_v36, %v2411_v35  ;;  %v2592_v52 = vor.u32 %v3197_v45, %v2591_v44  ;;  %v2359_v44 = vld [vmem:[%s4927_s0 + $0x58] sm:$0xf]  ;;  %v3138_v45 = vld [vmem:[%s4927_s0 + $0x68] sm:$0xf0] }
  0x32   :  { %1529 = vmatmul.bf16.gmra.mxu3 %v2812_v41  ;;  %1738 = vmatpush.bf16.msrb.mxu2 %v3304_v58  ;;  %v3301_v41 = vld [vmem:[%s4925_s1 + $0x80] sm:$0xff]  ;;  %v2771_v58 = vld [vmem:[%s4927_s0 + $0x398] sm:$0xf]  ;;  %v2348_v36 = vor.u32 %v3134_v29, %v2347_v28  ;;  %v3146_v28 = vld [vmem:[%s4927_s0 + $0xac] sm:$0xf] }
  0x33   :  { %1409 = vmatmul.bf16.gmra.mxu0 %v2332_v42  ;;  %1907 = vmatpush.bf16.msrb.mxu3 %v3312_v59  ;;  %v3309_v42 = vld [vmem:[%s4925_s1 + $0xc0] sm:$0xff]  ;;  %v3242_v59 = vld [vmem:[%s4927_s0 + $0x3a8] sm:$0xf0] }
  0x34   :  { %1569 = vmatpush.bf16.msrb.mxu1 %v3296_v60  ;;  %v2931_v60 = vld [vmem:[%s4927_s0 + $0x4d8] sm:$0xf]  ;;  %v2772_v1 = vor.u32 %v3242_v59, %v2771_v58  ;;  %v2401_v29 = vld [vmem:[%s4927_s0 + $0xbc] sm:$0xf0] }
  0x35   :  { %v2932_v2 = vor.u32 %v3282_v61, %v2931_v60 }
  0x36   :  { %1739 = vmatpush.bf16.msrb.mxu2 %v3303_v10  ;;  %v2327_v10 = vld [vmem:[%s4927_s0 + $0x10] sm:$0xf] }
  0x37   :  { %1908 = vmatpush.bf16.msrb.mxu3 %v3311_v11  ;;  %v3129_v11 = vld [vmem:[%s4927_s0 + $0x20] sm:$0xf0] }
  0x38   :  { %1570 = vmatpush.bf16.msrb.mxu1 %v3295_v12  ;;  %v2316_v12 = vor.u32 %v3125_v4, %v2313_v5  ;;  %v2328_v16 = vor.u32 %v3129_v11, %v2327_v10  ;;  %v2387_v4 = vld [vmem:[%s4927_s0 + $0x88] sm:$0xf]  ;;  %v3144_v5 = vld [vmem:[%s4927_s0 + $0x98] sm:$0xf0] }
  0x3a   :  { %1740 = vmatpush.bf16.msrb.mxu2 %v3302_v25  ;;  %v3133_v25 = vld [vmem:[%s4927_s0 + $0x40] sm:$0xf0] }
  0x3b   :  { %1909 = vmatpush.bf16.msrb.mxu3 %v3310_v26  ;;  %v3131_v26 = vld [vmem:[%s4927_s0 + $0x34] sm:$0xf] }
  0x3c   :  { %1571 = vmatpush.bf16.msrb.mxu1 %v3294_v27  ;;  %v2341_v27 = vld [vmem:[%s4927_s0 + $0x44] sm:$0xf0] }
  0x3d   :  { %v2344_v35 = vor.u32 %v3131_v26, %v2341_v27  ;;  %v2399_v26 = vld [vmem:[%s4927_s0 + $0xa8] sm:$0xf]  ;;  %v3148_v27 = vld [vmem:[%s4927_s0 + $0xb8] sm:$0xf0] }
  0x3e   :  { %1741 = vmatpush.bf16.msrb.mxu2 %v3301_v41 }
  0x3f   :  { %1910 = vmatpush.bf16.msrb.mxu3 %v3309_v42  ;;  %v3135_v42 = vld [vmem:[%s4927_s0 + $0x54] sm:$0xf] }
  0x40   :  { %1572 = vmatpush.bf16.msrb.mxu1 %v3293_v43  ;;  %v2353_v43 = vld [vmem:[%s4927_s0 + $0x64] sm:$0xf0] }
  0x41   :  { %1454 = vmatmul.bf16.gmra.mxu1 %v2512_v54  ;;  %1494 = vmatmul.bf16.gmra.mxu2 %v2672_v55  ;;  %v2912_v54 = vor.u32 %v3277_v49, %v2911_v48  ;;  %v2432_v55 = vor.u32 %v3157_v51, %v2431_v50  ;;  %v2367_v48 = vld [vmem:[%s4927_s0 + $0x60] sm:$0xf]  ;;  %v3139_v49 = vld [vmem:[%s4927_s0 + $0x70] sm:$0xf0] }
  0x42   :  { %1534 = vmatmul.bf16.gmra.mxu3 %v2832_v56  ;;  %v2611_v56 = vld [vmem:[%s4927_s0 + $0x258] sm:$0xf] }
  0x43   :  { %1414 = vmatmul.bf16.gmra.mxu0 %v2352_v57  ;;  %v3202_v57 = vld [vmem:[%s4927_s0 + $0x268] sm:$0xf0] }
  0x44   :  { %v2612_v0 = vor.u32 %v3202_v57, %v2611_v56  ;;  %v2368_v56 = vor.u32 %v3139_v49, %v2367_v48 }
  0x51   :  { %1459 = vmatmul.bf16.gmra.mxu1 %v2532_v6  ;;  %1499 = vmatmul.bf16.gmra.mxu2 %v2692_v7  ;;  %v2319_v6 = vld [vmem:[%s4927_s0 + $0x8] sm:$0xf]  ;;  %v3128_v7 = vld [vmem:[%s4927_s0 + $0x18] sm:$0xf0] }
  0x52   :  { %1539 = vmatmul.bf16.gmra.mxu3 %v2852_v8  ;;  %v3126_v8 = vld [vmem:[%s4927_s0 + $0xc] sm:$0xf]  ;;  %v2320_v13 = vor.u32 %v3128_v7, %v2319_v6 }
  0x53   :  { %1419 = vmatmul.bf16.gmra.mxu0 %v2372_v9  ;;  %v2321_v9 = vld [vmem:[%s4927_s0 + $0x1c] sm:$0xf0] }
  0x54   :  { %v2324_v15 = vor.u32 %v3126_v8, %v2321_v9  ;;  %v2376_v8 = vor.u32 %v3140_v62, %v2373_v63  ;;  %v2419_v62 = vld [vmem:[%s4927_s0 + $0xd0] sm:$0xf]  ;;  %v3153_v63 = vld [vmem:[%s4927_s0 + $0xe0] sm:$0xf0] }
  0x61   :  { %1464 = vmatmul.bf16.gmra.mxu1 %v2552_v21  ;;  %1504 = vmatmul.bf16.gmra.mxu2 %v2712_v22  ;;  %v3130_v22 = vld [vmem:[%s4927_s0 + $0x2c] sm:$0xf] }
  0x62   :  { %1544 = vmatmul.bf16.gmra.mxu3 %v2872_v23  ;;  %v2333_v23 = vld [vmem:[%s4927_s0 + $0x3c] sm:$0xf0] }
  0x63   :  { %1424 = vmatmul.bf16.gmra.mxu0 %v2392_v24  ;;  %v2339_v24 = vld [vmem:[%s4927_s0 + $0x30] sm:$0xf]  ;;  %v2336_v32 = vor.u32 %v3130_v22, %v2333_v23 }
  0x64   :  { %v2340_v33 = vor.u32 %v3133_v25, %v2339_v24  ;;  %v3145_v24 = vld [vmem:[%s4927_s0 + $0xa4] sm:$0xf]  ;;  %v2393_v25 = vld [vmem:[%s4927_s0 + $0xb4] sm:$0xf0] }
  0x71   :  { %1469 = vmatmul.bf16.gmra.mxu1 %v2572_v37  ;;  %1509 = vmatmul.bf16.gmra.mxu2 %v2732_v38 }
  0x72   :  { %1549 = vmatmul.bf16.gmra.mxu3 %v2892_v39 }
  0x73   :  { %1429 = vmatmul.bf16.gmra.mxu0 %v2412_v40 }
  0x81   :  { %1474 = vmatmul.bf16.gmra.mxu1 %v2592_v52  ;;  %1514 = vmatmul.bf16.gmra.mxu2 %v2752_v53  ;;  %v2356_v52 = vor.u32 %v3135_v42, %v2353_v43  ;;  %v2360_v53 = vor.u32 %v3138_v45, %v2359_v44  ;;  %v2396_v42 = vor.u32 %v3145_v24, %v2393_v25 }
  0x82   :  { %1554 = vmatmul.bf16.gmra.mxu3 %v2912_v54  ;;  %v2400_v43 = vor.u32 %v3148_v27, %v2399_v26  ;;  %v2404_v45 = vor.u32 %v3146_v28, %v2401_v29 }
  0x83   :  { %1434 = vmatmul.bf16.gmra.mxu0 %v2432_v55  ;;  %v2364_v55 = vor.u32 %v3136_v46, %v2361_v47 }
  0x91   :  { %1479 = vmatmul.bf16.gmra.mxu1 %v2612_v0  ;;  %1519 = vmatmul.bf16.gmra.mxu2 %v2772_v1  ;;  %v2379_v0 = vld [vmem:[%s4927_s0 + $0x80] sm:$0xf]  ;;  %v3143_v1 = vld [vmem:[%s4927_s0 + $0x90] sm:$0xf0] }
  0x92   :  { %1559 = vmatmul.bf16.gmra.mxu3 %v2932_v2  ;;  %v3141_v2 = vld [vmem:[%s4927_s0 + $0x84] sm:$0xf]  ;;  %v2380_v9 = vor.u32 %v3143_v1, %v2379_v0  ;;  %v3151_v0 = vld [vmem:[%s4927_s0 + $0xd4] sm:$0xf]  ;;  %v2421_v1 = vld [vmem:[%s4927_s0 + $0xe4] sm:$0xf0] }
  0x93   :  { %1439 = vmatmul.bf16.gmra.mxu0 %v2452_v3  ;;  %v2381_v3 = vld [vmem:[%s4927_s0 + $0x94] sm:$0xf0] }
  0x94   :  { %v2384_v11 = vor.u32 %v3141_v2, %v2381_v3  ;;  %v2427_v2 = vld [vmem:[%s4927_s0 + $0xd8] sm:$0xf]  ;;  %v3154_v3 = vld [vmem:[%s4927_s0 + $0xe8] sm:$0xf0] }
  0x95   :  { %v2428_v24 = vor.u32 %v3154_v3, %v2427_v2 }
  0x9e   :  { %v3691_v14 = vpop.f32.mrf.mxu1 }
  0xa0   :  { %v3693_v17 = vpop.f32.mrf.mxu0 }
  0xa1   :  { %1573 = vmatmul.bf16.vlgmr.msrb.gmra.mxu1 %v2316_v12  ;;  %1742 = vmatmul.bf16.vlgmr.msrb.gmra.mxu2 %v2320_v13  ;;  %v2388_v12 = vor.u32 %v3144_v5, %v2387_v4 }
  0xa2   :  { %1911 = vmatmul.bf16.vlgmr.msrb.gmra.mxu3 %v2324_v15 }
  0xa3   :  { %3093 = vmatmul.msk.bf16.vlgmr.msrb.gmra.mxu0 %vm1299_vm0, %v2328_v16 }
  0xa4   :  { %v3696_v18 = vpop.f32.mrf.mxu2 }
  0xa5   :  { %v3698_v19 = vpop.f32.mrf.mxu3 }
  0xa6   :  { %4929 = vst [vmem:[#allocation2_spill] sm:$0xff] %v3698_v19  ;;  %v3700_v20 = vpop.f32.mrf.mxu1 }
  0xa8   :  { %v3702_v21 = vpop.f32.mrf.mxu0 }
  0xac   :  { %v3728_v30 = vpop.f32.mrf.mxu2 }
  0xad   :  { %v3730_v31 = vpop.f32.mrf.mxu3 }
  0xae   :  { %4930 = vst [vmem:[#allocation3_spill] sm:$0xff] %v3730_v31  ;;  %v3732_v34 = vpop.f32.mrf.mxu1  ;;  %v4022_v31 = vld [vmem:[%s4926_s2] ss:$0 sm:$0xff] }
  0xb0   :  { %v3734_v37 = vpop.f32.mrf.mxu0 }
  0xb1   :  { %1578 = vmatmul.bf16.gmra.mxu1 %v2336_v32  ;;  %1747 = vmatmul.bf16.gmra.mxu2 %v2340_v33  ;;  %v2407_v32 = vld [vmem:[%s4927_s0 + $0xb0] sm:$0xf]  ;;  %v3149_v33 = vld [vmem:[%s4927_s0 + $0xc0] sm:$0xf0] }
  0xb2   :  { %1916 = vmatmul.bf16.gmra.mxu3 %v2344_v35  ;;  %v2408_v46 = vor.u32 %v3149_v33, %v2407_v32  ;;  %v3155_v32 = vld [vmem:[%s4927_s0 + $0xf4] sm:$0xf]  ;;  %v2433_v33 = vld [vmem:[%s4927_s0 + $0x104] sm:$0xf0] }
  0xb3   :  { %3094 = vmatmul.msk.bf16.gmra.mxu0 %vm1299_vm0, %v2348_v36 }
  0xb4   :  { %v3737_v38 = vpop.f32.mrf.mxu2 }
  0xb5   :  { %v3739_v39 = vpop.f32.mrf.mxu3 }
  0xb6   :  { %4931 = vst [vmem:[#allocation4_spill] sm:$0xff] %v3739_v39  ;;  %v3741_v40 = vpop.f32.mrf.mxu1 }
  0xb8   :  { %v3743_v41 = vpop.f32.mrf.mxu0 }
  0xbc   :  { %v3769_v50 = vpop.f32.mrf.mxu2 }
  0xbd   :  { %v3771_v51 = vpop.f32.mrf.mxu3 }
  0xbe   :  { %4932 = vst [vmem:[#allocation5_spill] sm:$0xff] %v3771_v51  ;;  %v3773_v54 = vpop.f32.mrf.mxu1 }
  0xc0   :  { %v3775_v57 = vpop.f32.mrf.mxu0 }
  0xc1   :  { %1583 = vmatmul.bf16.gmra.mxu1 %v2356_v52  ;;  %1752 = vmatmul.bf16.gmra.mxu2 %v2360_v53 }
  0xc2   :  { %1921 = vmatmul.bf16.gmra.mxu3 %v2364_v55  ;;  %v3150_v55 = vld [vmem:[%s4927_s0 + $0xcc] sm:$0xf] }
  0xc3   :  { %3095 = vmatmul.msk.bf16.gmra.mxu0 %vm1299_vm0, %v2368_v56  ;;  %v2413_v56 = vld [vmem:[%s4927_s0 + $0xdc] sm:$0xf0] }
  0xc4   :  { %v3778_v58 = vpop.f32.mrf.mxu2 }
  0xc5   :  { %v3780_v59 = vpop.f32.mrf.mxu3 }
  0xc6   :  { %4933 = vst [vmem:[#allocation6_spill] sm:$0xff] %v3780_v59  ;;  %v3782_v60 = vpop.f32.mrf.mxu1 }
  0xc8   :  { %v3784_v61 = vpop.f32.mrf.mxu0 }
  0xcc   :  { %v3810_v6 = vpop.f32.mrf.mxu2 }
  0xcd   :  { %v3812_v7 = vpop.f32.mrf.mxu3 }
  0xce   :  { %4934 = vst [vmem:[#allocation7_spill] sm:$0xff] %v3812_v7  ;;  %v3814_v10 = vpop.f32.mrf.mxu1 }
  0xd0   :  { %v3816_v13 = vpop.f32.mrf.mxu0 }
  0xd1   :  { %1588 = vmatmul.bf16.gmra.mxu1 %v2376_v8  ;;  %1757 = vmatmul.bf16.gmra.mxu2 %v2380_v9  ;;  %v2416_v8 = vor.u32 %v3150_v55, %v2413_v56  ;;  %v2420_v9 = vor.u32 %v3153_v63, %v2419_v62  ;;  %v2447_v55 = vld [vmem:[%s4927_s0 + $0x100] sm:$0xf]  ;;  %v3159_v56 = vld [vmem:[%s4927_s0 + $0x110] sm:$0xf0] }
  0xd2   :  { %1926 = vmatmul.bf16.gmra.mxu3 %v2384_v11 }
  0xd3   :  { %3096 = vmatmul.msk.bf16.gmra.mxu0 %vm1299_vm0, %v2388_v12  ;;  %v2424_v12 = vor.u32 %v3151_v0, %v2421_v1  ;;  %v2436_v0 = vor.u32 %v3155_v32, %v2433_v33  ;;  %v3160_v32 = vld [vmem:[%s4927_s0 + $0x11c] sm:$0xf]  ;;  %v2453_v33 = vld [vmem:[%s4927_s0 + $0x12c] sm:$0xf0] }
  0xd4   :  { %v3819_v15 = vpop.f32.mrf.mxu2 }
  0xd5   :  { %v3821_v16 = vpop.f32.mrf.mxu3 }
  0xd6   :  { %4935 = vst [vmem:[#allocation8_spill] sm:$0xff] %v3821_v16  ;;  %v3823_v22 = vpop.f32.mrf.mxu1 }
  0xd8   :  { %v3825_v23 = vpop.f32.mrf.mxu0 }
  0xdc   :  { %v3851_v35 = vpop.f32.mrf.mxu2 }
  0xdd   :  { %v3853_v36 = vpop.f32.mrf.mxu3 }
  0xde   :  { %4936 = vst [vmem:[#allocation9_spill] sm:$0xff] %v3853_v36  ;;  %v3855_v44 = vpop.f32.mrf.mxu1 }
  0xe0   :  { %v3857_v47 = vpop.f32.mrf.mxu0 }
  0xe1   :  { %1593 = vmatmul.bf16.gmra.mxu1 %v2396_v42  ;;  %1762 = vmatmul.bf16.gmra.mxu2 %v2400_v43  ;;  %v2439_v42 = vld [vmem:[%s4927_s0 + $0xf8] sm:$0xf]  ;;  %v3158_v43 = vld [vmem:[%s4927_s0 + $0x108] sm:$0xf0] }
  0xe2   :  { %1931 = vmatmul.bf16.gmra.mxu3 %v2404_v45  ;;  %v3156_v45 = vld [vmem:[%s4927_s0 + $0xfc] sm:$0xf]  ;;  %v2440_v1 = vor.u32 %v3158_v43, %v2439_v42  ;;  %v2459_v42 = vld [vmem:[%s4927_s0 + $0x120] sm:$0xf]  ;;  %v3163_v43 = vld [vmem:[%s4927_s0 + $0x130] sm:$0xf0] }
  0xe3   :  { %3097 = vmatmul.msk.bf16.gmra.mxu0 %vm1299_vm0, %v2408_v46  ;;  %v2441_v46 = vld [vmem:[%s4927_s0 + $0x10c] sm:$0xf0] }
  0xe4   :  { %v3860_v48 = vpop.f32.mrf.mxu2  ;;  %v2444_v3 = vor.u32 %v3156_v45, %v2441_v46  ;;  %v3161_v45 = vld [vmem:[%s4927_s0 + $0x124] sm:$0xf]  ;;  %v2461_v46 = vld [vmem:[%s4927_s0 + $0x134] sm:$0xf0] }
  0xe5   :  { %v3862_v49 = vpop.f32.mrf.mxu3 }
  0xe6   :  { %4937 = vst [vmem:[#allocation10_spill] sm:$0xff] %v3862_v49  ;;  %v3864_v52 = vpop.f32.mrf.mxu1 }
  0xe8   :  { %v3866_v53 = vpop.f32.mrf.mxu0 }
  0xec   :  { %v3892_v4 = vpop.f32.mrf.mxu2 }
  0xed   :  { %v3894_v5 = vpop.f32.mrf.mxu3 }
  0xee   :  { %4938 = vst [vmem:[#allocation11_spill] sm:$0xff] %v3894_v5  ;;  %v3896_v11 = vpop.f32.mrf.mxu1  ;;  %v2464_v5 = vor.u32 %v3161_v45, %v2461_v46  ;;  %v2487_v45 = vld [vmem:[%s4927_s0 + $0x150] sm:$0xf]  ;;  %v3169_v46 = vld [vmem:[%s4927_s0 + $0x160] sm:$0xf0] }
  0xef   :  { %v2488_v39 = vor.u32 %v3169_v46, %v2487_v45  ;;  %v1408_v45 = vadd.f32 %v4022_v31, %v3702_v21 }
  0xf0   :  { %v3898_v25 = vpop.f32.mrf.mxu0 }
  0xf1   :  { %1598 = vmatmul.bf16.gmra.mxu1 %v2416_v8  ;;  %1767 = vmatmul.bf16.gmra.mxu2 %v2420_v9  ;;  %v2448_v8 = vor.u32 %v3159_v56, %v2447_v55  ;;  %v2467_v55 = vld [vmem:[%s4927_s0 + $0x128] sm:$0xf]  ;;  %v3164_v56 = vld [vmem:[%s4927_s0 + $0x138] sm:$0xf0] }
  0xf2   :  { %1936 = vmatmul.bf16.gmra.mxu3 %v2424_v12  ;;  %v2468_v49 = vor.u32 %v3164_v56, %v2467_v55 }
  0xf3   :  { %3098 = vmatmul.msk.bf16.gmra.mxu0 %vm1299_vm0, %v2428_v24 }
  0xf4   :  { %v3901_v26 = vpop.f32.mrf.mxu2 }
  0xf5   :  { %v3903_v27 = vpop.f32.mrf.mxu3 }
  0xf6   :  { %4939 = vst [vmem:[#allocation12_spill] sm:$0xff] %v3903_v27  ;;  %v3905_v28 = vpop.f32.mrf.mxu1 }
  0xf8   :  { %v3907_v29 = vpop.f32.mrf.mxu0 }
  0xfc   :  { %v3933_v62 = vpop.f32.mrf.mxu2 }
  0xfd   :  { %4940 = vst [vmem:[#allocation13_spill] sm:$0xff] %v3933_v62  ;;  %v3935_v63 = vpop.f32.mrf.mxu3 }
  0xfe   :  { %4941 = vst [vmem:[#allocation14_spill] sm:$0xff] %v3935_v63  ;;  %v3937_v2 = vpop.f32.mrf.mxu1 }
 0x100   :  { %v3939_v9 = vpop.f32.mrf.mxu0 }
 0x101   :  { %1603 = vmatmul.bf16.gmra.mxu1 %v2436_v0  ;;  %1772 = vmatmul.bf16.gmra.mxu2 %v2440_v1 }
 0x102   :  { %1941 = vmatmul.bf16.gmra.mxu3 %v2444_v3  ;;  %v2456_v3 = vor.u32 %v3160_v32, %v2453_v33  ;;  %v3165_v32 = vld [vmem:[%s4927_s0 + $0x144] sm:$0xf]  ;;  %v2473_v33 = vld [vmem:[%s4927_s0 + $0x154] sm:$0xf0] }
 0x103   :  { %3099 = vmatmul.msk.bf16.gmra.mxu0 %vm1299_vm0, %v2448_v8  ;;  %v2460_v8 = vor.u32 %v3163_v43, %v2459_v42  ;;  %v3166_v42 = vld [vmem:[%s4927_s0 + $0x14c] sm:$0xf]  ;;  %v2481_v43 = vld [vmem:[%s4927_s0 + $0x15c] sm:$0xf0] }
 0x104   :  { %v3942_v12 = vpop.f32.mrf.mxu2  ;;  %v2484_v51 = vor.u32 %v3166_v42, %v2481_v43 }
 0x105   :  { %4942 = vst [vmem:[#allocation15_spill] sm:$0xff] %v3942_v12  ;;  %v3944_v24 = vpop.f32.mrf.mxu3  ;;  %v1411_v12 = vadd.f32 %v4022_v31, %v3734_v37  ;;  %v1413_v37 = vadd.f32 %v4022_v31, %v3743_v41  ;;  %v3176_v41 = vld [vmem:[%s4927_s0 + $0x19c] sm:$0xf] }
 0x106   :  { %4943 = vst [vmem:[#allocation16_spill] sm:$0xff] %v3944_v24  ;;  %v3946_v27 = vpop.f32.mrf.mxu1 }
 0x108   :  { %v3948_v63 = vpop.f32.mrf.mxu0 }
 0x10c   :  { %v3974_v0 = vpop.f32.mrf.mxu2 }
 0x10d   :  { %4944 = vst [vmem:[#allocation17_spill] sm:$0xff] %v3974_v0  ;;  %v3976_v1 = vpop.f32.mrf.mxu3 }
 0x10e   :  { %4945 = vst [vmem:[#allocation18_spill] sm:$0xff] %v3976_v1  ;;  %v3978_v24 = vpop.f32.mrf.mxu1 }
 0x110   :  { %v3980_v36 = vpop.f32.mrf.mxu0 }
 0x111   :  { %1608 = vmatmul.bf16.gmra.mxu1 %v2456_v3  ;;  %1777 = vmatmul.bf16.gmra.mxu2 %v2460_v8  ;;  %v2476_v3 = vor.u32 %v3165_v32, %v2473_v33 }
 0x112   :  { %1946 = vmatmul.bf16.gmra.mxu3 %v2464_v5  ;;  %v3168_v5 = vld [vmem:[%s4927_s0 + $0x158] sm:$0xf0] }
 0x113   :  { %3100 = vmatmul.msk.bf16.gmra.mxu0 %vm1299_vm0, %v2468_v49  ;;  %v2479_v49 = vld [vmem:[%s4927_s0 + $0x148] sm:$0xf] }
 0x114   :  { %v3983_v16 = vpop.f32.mrf.mxu2  ;;  %v2480_v8 = vor.u32 %v3168_v5, %v2479_v49 }
 0x115   :  { %4946 = vst [vmem:[#allocation19_spill] sm:$0xff] %v3983_v16  ;;  %v3985_v7 = vpop.f32.mrf.mxu3  ;;  %v1406_v16 = vadd.f32 %v4022_v31, %v3693_v17  ;;  %v3170_v17 = vld [vmem:[%s4927_s0 + $0x16c] sm:$0xf] }
 0x116   :  { %4947 = vst [vmem:[#allocation20_spill] sm:$0xff] %v3985_v7  ;;  %v3987_v59 = vpop.f32.mrf.mxu1 }
 0x118   :  { %v3989_v1 = vpop.f32.mrf.mxu0 }
 0x11c   :  { %v4015_v55 = vpop.f32.mrf.mxu2 }
 0x11d   :  { %4948 = vst [vmem:[#allocation21_spill] sm:$0xff] %v4015_v55  ;;  %v4017_v56 = vpop.f32.mrf.mxu3 }
 0x11e   :  { %4949 = vst [vmem:[#allocation22_spill] sm:$0xff] %v4017_v56  ;;  %v1574_v7 = vpop.f32.mrf.mxu1 }
 0x11f   :  { %v1575_v56 = vadd.f32 %v1574_v7, %v1406_v16  ;;  %v3173_v7 = vld [vmem:[%s4927_s0 + $0x180] sm:$0xf0]  ;;  %v2501_v16 = vld [vmem:[%s4927_s0 + $0x184] sm:$0xf0] }
 0x120   :  { %v2081_v19 = vpop.f32.mrf.mxu0 }
 0x121   :  { %1613 = vmatmul.bf16.gmra.mxu1 %v2476_v3  ;;  %1782 = vmatmul.bf16.gmra.mxu2 %v2480_v8  ;;  %v3174_v3 = vld [vmem:[%s4927_s0 + $0x188] sm:$0xf0] }
 0x122   :  { %1951 = vmatmul.bf16.gmra.mxu3 %v2484_v51  ;;  %v2493_v51 = vld [vmem:[%s4927_s0 + $0x17c] sm:$0xf0] }
 0x123   :  { %3101 = vmatmul.msk.bf16.gmra.mxu0 %vm1299_vm0, %v2488_v39  ;;  %v2499_v39 = vld [vmem:[%s4927_s0 + $0x170] sm:$0xf] }
 0x124   :  { %v1743_v32 = vpop.f32.mrf.mxu2 }
 0x125   :  { %v1744_v33 = vadd.f32 %v1743_v32, %v1575_v56  ;;  %v1912_v49 = vpop.f32.mrf.mxu3  ;;  %v2507_v56 = vld [vmem:[%s4927_s0 + $0x178] sm:$0xf] }
 0x126   :  { %v1576_v5 = vpop.f32.mrf.mxu1 }
 0x127   :  { %v1913_v42 = vadd.f32 %v1912_v49, %v1744_v33  ;;  %v1577_v21 = vadd.f32 %v1576_v5, %v1408_v45  ;;  %v2496_v49 = vor.u32 %v3170_v17, %v2493_v51  ;;  %v2508_v5 = vor.u32 %v3174_v3, %v2507_v56  ;;  %v3175_v56 = vld [vmem:[%s4927_s0 + $0x194] sm:$0xf]  ;;  %v2513_v3 = vld [vmem:[%s4927_s0 + $0x1a4] sm:$0xf0] }
 0x128   :  { %v2083_v43 = vpop.f32.mrf.mxu0 }
 0x129   :  { %v2082_v46 = vadd.f32 %v2081_v19, %v1913_v42  ;;  %v3171_v19 = vld [vmem:[%s4927_s0 + $0x174] sm:$0xf]  ;;  %v2500_v42 = vor.u32 %v3173_v7, %v2499_v39 }
 0x12b   :  { %2241 = vst [vmem:[%s4928_s3] sm:$0xff] %v2082_v46  ;;  %v2504_v46 = vor.u32 %v3171_v19, %v2501_v16 }
 0x12c   :  { %v1745_v8 = vpop.f32.mrf.mxu2 }
 0x12d   :  { %v1746_v32 = vadd.f32 %v1745_v8, %v1577_v21  ;;  %v1914_v33 = vpop.f32.mrf.mxu3  ;;  %v2527_v8 = vld [vmem:[%s4927_s0 + $0x1a0] sm:$0xf] }
 0x12e   :  { %v1579_v55 = vpop.f32.mrf.mxu1 }
 0x12f   :  { %v1915_v45 = vadd.f32 %v1914_v33, %v1746_v32  ;;  %v1580_v17 = vadd.f32 %v1579_v55, %v1411_v12  ;;  %v3178_v12 = vld [vmem:[%s4927_s0 + $0x1a8] sm:$0xf0]  ;;  %v3179_v32 = vld [vmem:[%s4927_s0 + $0x1b0] sm:$0xf0] }
 0x130   :  { %v2086_v0 = vpop.f32.mrf.mxu0 }
 0x131   :  { %v2084_v62 = vadd.f32 %v2083_v43, %v1915_v45  ;;  %1618 = vmatmul.bf16.gmra.mxu1 %v2496_v49  ;;  %1787 = vmatmul.bf16.gmra.mxu2 %v2500_v42 }
 0x132   :  { %1956 = vmatmul.bf16.gmra.mxu3 %v2504_v46  ;;  %v2516_v46 = vor.u32 %v3175_v56, %v2513_v3 }
 0x133   :  { %3102 = vmatmul.msk.bf16.gmra.mxu0 %vm1299_vm0, %v2508_v5  ;;  %2242 = vst [vmem:[%s4928_s3 + $0x8] sm:$0xff] %v2084_v62  ;;  %v2519_v62 = vld [vmem:[%s4927_s0 + $0x198] sm:$0xf] }
 0x134   :  { %v1748_v51 = vpop.f32.mrf.mxu2  ;;  %v2520_v5 = vor.u32 %v3178_v12, %v2519_v62 }
 0x135   :  { %v1749_v39 = vadd.f32 %v1748_v51, %v1580_v17  ;;  %v1917_v7 = vpop.f32.mrf.mxu3  ;;  %v2528_v51 = vor.u32 %v3179_v32, %v2527_v8  ;;  %v2539_v8 = vld [vmem:[%s4927_s0 + $0x1c0] sm:$0xf]  ;;  %v3183_v32 = vld [vmem:[%s4927_s0 + $0x1d0] sm:$0xf0] }
 0x136   :  { %v1581_v19 = vpop.f32.mrf.mxu1 }
 0x137   :  { %v1918_v21 = vadd.f32 %v1917_v7, %v1749_v39  ;;  %v1582_v55 = vadd.f32 %v1581_v19, %v1413_v37  ;;  %v1416_v19 = vadd.f32 %v4022_v31, %v3775_v57  ;;  %v1418_v57 = vadd.f32 %v4022_v31, %v3784_v61  ;;  %v3181_v61 = vld [vmem:[%s4927_s0 + $0x1c4] sm:$0xf] }
 0x138   :  { %v2088_v16 = vpop.f32.mrf.mxu0 }
 0x139   :  { %v2087_v43 = vadd.f32 %v2086_v0, %v1918_v21  ;;  %v2521_v0 = vld [vmem:[%s4927_s0 + $0x1ac] sm:$0xf0] }
 0x13a   :  { %v2524_v17 = vor.u32 %v3176_v41, %v2521_v0  ;;  %v3180_v0 = vld [vmem:[%s4927_s0 + $0x1bc] sm:$0xf] }
 0x13b   :  { %2243 = vst [vmem:[%s4928_s3 + $0x10] sm:$0xff] %v2087_v43 }
 0x13c   :  { %v1750_v33 = vpop.f32.mrf.mxu2 }
 0x13d   :  { %v1751_v49 = vadd.f32 %v1750_v33, %v1582_v55  ;;  %v1919_v42 = vpop.f32.mrf.mxu3  ;;  %v2533_v55 = vld [vmem:[%s4927_s0 + $0x1cc] sm:$0xf0]  ;;  %v2541_v33 = vld [vmem:[%s4927_s0 + $0x1d4] sm:$0xf0] }
 0x13e   :  { %v1584_v45 = vpop.f32.mrf.mxu1 }
 0x13f   :  { %v1920_v39 = vadd.f32 %v1919_v42, %v1751_v49  ;;  %v1585_v37 = vadd.f32 %v1584_v45, %v1416_v19  ;;  %v2547_v42 = vld [vmem:[%s4927_s0 + $0x1c8] sm:$0xf]  ;;  %v2544_v19 = vor.u32 %v3181_v61, %v2541_v33  ;;  %v2553_v61 = vld [vmem:[%s4927_s0 + $0x1f4] sm:$0xf0] }
 0x140   :  { %v2091_v7 = vpop.f32.mrf.mxu0  ;;  %v2559_v33 = vld [vmem:[%s4927_s0 + $0x1e8] sm:$0xf] }
 0x141   :  { %v2089_v21 = vadd.f32 %v2088_v16, %v1920_v39  ;;  %1623 = vmatmul.bf16.gmra.mxu1 %v2516_v46  ;;  %1792 = vmatmul.bf16.gmra.mxu2 %v2520_v5  ;;  %v3184_v46 = vld [vmem:[%s4927_s0 + $0x1d8] sm:$0xf0]  ;;  %v2540_v39 = vor.u32 %v3183_v32, %v2539_v8  ;;  %v3185_v32 = vld [vmem:[%s4927_s0 + $0x1e4] sm:$0xf] }
 0x142   :  { %1961 = vmatmul.bf16.gmra.mxu3 %v2524_v17 }
 0x143   :  { %3103 = vmatmul.msk.bf16.gmra.mxu0 %vm1299_vm0, %v2528_v51  ;;  %2244 = vst [vmem:[%s4928_s3 + $0x18] sm:$0xff] %v2089_v21  ;;  %v2536_v51 = vor.u32 %v3180_v0, %v2533_v55  ;;  %v2548_v21 = vor.u32 %v3184_v46, %v2547_v42  ;;  %v2561_v42 = vld [vmem:[%s4927_s0 + $0x1fc] sm:$0xf0] }
 0x144   :  { %v1753_v43 = vpop.f32.mrf.mxu2 }
 0x145   :  { %v1754_v56 = vadd.f32 %v1753_v43, %v1585_v37  ;;  %v1922_v3 = vpop.f32.mrf.mxu3 }
 0x146   :  { %v1586_v62 = vpop.f32.mrf.mxu1 }
 0x147   :  { %v1923_v12 = vadd.f32 %v1922_v3, %v1754_v56  ;;  %v1587_v49 = vadd.f32 %v1586_v62, %v1418_v57  ;;  %v1421_v56 = vadd.f32 %v4022_v31, %v3816_v13  ;;  %v1423_v13 = vadd.f32 %v4022_v31, %v3825_v23  ;;  %v3186_v23 = vld [vmem:[%s4927_s0 + $0x1ec] sm:$0xf] }
 0x148   :  { %v2093_v41 = vpop.f32.mrf.mxu0 }
 0x149   :  { %v2092_v16 = vadd.f32 %v2091_v7, %v1923_v12 }
 0x14b   :  { %2245 = vst [vmem:[%s4928_s3 + $0x20] sm:$0xff] %v2092_v16 }
 0x14c   :  { %v1755_v5 = vpop.f32.mrf.mxu2 }
 0x14d   :  { %v1756_v45 = vadd.f32 %v1755_v5, %v1587_v49  ;;  %v1924_v17 = vpop.f32.mrf.mxu3  ;;  %v3188_v49 = vld [vmem:[%s4927_s0 + $0x1f8] sm:$0xf0]  ;;  %v2567_v5 = vld [vmem:[%s4927_s0 + $0x1f0] sm:$0xf] }
 0x14e   :  { %v1589_v7 = vpop.f32.mrf.mxu1 }
 0x14f   :  { %v1925_v37 = vadd.f32 %v1924_v17, %v1756_v45  ;;  %v1590_v62 = vadd.f32 %v1589_v7, %v1421_v56  ;;  %v3189_v45 = vld [vmem:[%s4927_s0 + $0x200] sm:$0xf0]  ;;  %v2556_v7 = vor.u32 %v3185_v32, %v2553_v61  ;;  %v3190_v61 = vld [vmem:[%s4927_s0 + $0x20c] sm:$0xf] }
 0x150   :  { %v2096_v43 = vpop.f32.mrf.mxu0 }
 0x151   :  { %v2094_v3 = vadd.f32 %v2093_v41, %v1925_v37  ;;  %1628 = vmatmul.bf16.gmra.mxu1 %v2536_v51  ;;  %1797 = vmatmul.bf16.gmra.mxu2 %v2540_v39  ;;  %v2564_v37 = vor.u32 %v3186_v23, %v2561_v42  ;;  %v3193_v23 = vld [vmem:[%s4927_s0 + $0x220] sm:$0xf0]  ;;  %v2581_v42 = vld [vmem:[%s4927_s0 + $0x224] sm:$0xf0] }
 0x152   :  { %1966 = vmatmul.bf16.gmra.mxu3 %v2544_v19  ;;  %v2560_v19 = vor.u32 %v3188_v49, %v2559_v33  ;;  %v2573_v33 = vld [vmem:[%s4927_s0 + $0x21c] sm:$0xf0]  ;;  %v2579_v49 = vld [vmem:[%s4927_s0 + $0x210] sm:$0xf] }
 0x153   :  { %3104 = vmatmul.msk.bf16.gmra.mxu0 %vm1299_vm0, %v2548_v21  ;;  %2246 = vst [vmem:[%s4928_s3 + $0x28] sm:$0xff] %v2094_v3 }
 0x154   :  { %v1758_v12 = vpop.f32.mrf.mxu2 }
 0x155   :  { %v1759_v57 = vadd.f32 %v1758_v12, %v1590_v62  ;;  %v1927_v16 = vpop.f32.mrf.mxu3  ;;  %v1426_v62 = vadd.f32 %v4022_v31, %v3857_v47  ;;  %v1428_v47 = vadd.f32 %v4022_v31, %v3866_v53  ;;  %v3191_v53 = vld [vmem:[%s4927_s0 + $0x214] sm:$0xf] }
 0x156   :  { %v1591_v0 = vpop.f32.mrf.mxu1 }
 0x157   :  { %v1928_v55 = vadd.f32 %v1927_v16, %v1759_v57  ;;  %v1592_v46 = vadd.f32 %v1591_v0, %v1423_v13 }
 0x158   :  { %v2098_v8 = vpop.f32.mrf.mxu0 }
 0x159   :  { %v2097_v41 = vadd.f32 %v2096_v43, %v1928_v55  ;;  %v2568_v43 = vor.u32 %v3189_v45, %v2567_v5  ;;  %v2587_v5 = vld [vmem:[%s4927_s0 + $0x218] sm:$0xf]  ;;  %v3194_v45 = vld [vmem:[%s4927_s0 + $0x228] sm:$0xf0] }
 0x15b   :  { %2247 = vst [vmem:[%s4928_s3 + $0x30] sm:$0xff] %v2097_v41 }
 0x15c   :  { %v1760_v17 = vpop.f32.mrf.mxu2 }
 0x15d   :  { %v1761_v51 = vadd.f32 %v1760_v17, %v1592_v46  ;;  %v1929_v39 = vpop.f32.mrf.mxu3 }
 0x15e   :  { %v1594_v21 = vpop.f32.mrf.mxu1 }
 0x15f   :  { %v1930_v56 = vadd.f32 %v1929_v39, %v1761_v51  ;;  %v1595_v57 = vadd.f32 %v1594_v21, %v1426_v62  ;;  %v1431_v62 = vadd.f32 %v4022_v31, %v3898_v25  ;;  %v1433_v25 = vadd.f32 %v4022_v31, %v3907_v29  ;;  %v3196_v29 = vld [vmem:[%s4927_s0 + $0x23c] sm:$0xf] }
 0x160   :  { %v2101_v3 = vpop.f32.mrf.mxu0 }
 0x161   :  { %v2099_v12 = vadd.f32 %v2098_v8, %v1930_v56  ;;  %1633 = vmatmul.bf16.gmra.mxu1 %v2556_v7  ;;  %1802 = vmatmul.bf16.gmra.mxu2 %v2560_v19  ;;  %v2576_v7 = vor.u32 %v3190_v61, %v2573_v33  ;;  %v2580_v19 = vor.u32 %v3193_v23, %v2579_v49  ;;  %v2593_v61 = vld [vmem:[%s4927_s0 + $0x244] sm:$0xf0]  ;;  %v2599_v33 = vld [vmem:[%s4927_s0 + $0x238] sm:$0xf]  ;;  %v3198_v49 = vld [vmem:[%s4927_s0 + $0x248] sm:$0xf0] }
 0x162   :  { %1971 = vmatmul.bf16.gmra.mxu3 %v2564_v37  ;;  %v2584_v37 = vor.u32 %v3191_v53, %v2581_v42  ;;  %v2601_v23 = vld [vmem:[%s4927_s0 + $0x24c] sm:$0xf0]  ;;  %v2607_v42 = vld [vmem:[%s4927_s0 + $0x240] sm:$0xf] }
 0x163   :  { %3105 = vmatmul.msk.bf16.gmra.mxu0 %vm1299_vm0, %v2568_v43  ;;  %2248 = vst [vmem:[%s4928_s3 + $0x38] sm:$0xff] %v2099_v12  ;;  %v2588_v43 = vor.u32 %v3194_v45, %v2587_v5 }
 0x164   :  { %v1763_v16 = vpop.f32.mrf.mxu2 }
 0x165   :  { %v1764_v0 = vadd.f32 %v1763_v16, %v1595_v57  ;;  %v1932_v55 = vpop.f32.mrf.mxu3 }
 0x166   :  { %v1596_v13 = vpop.f32.mrf.mxu1 }
 0x167   :  { %v1933_v41 = vadd.f32 %v1932_v55, %v1764_v0  ;;  %v1597_v46 = vadd.f32 %v1596_v13, %v1428_v47 }
 0x168   :  { %v2103_v32 = vpop.f32.mrf.mxu0 }
 0x169   :  { %v2102_v8 = vadd.f32 %v2101_v3, %v1933_v41 }
 0x16b   :  { %2249 = vst [vmem:[%s4928_s3 + $0x40] sm:$0xff] %v2102_v8  ;;  %v3195_v8 = vld [vmem:[%s4927_s0 + $0x234] sm:$0xf] }
 0x16c   :  { %v1765_v17 = vpop.f32.mrf.mxu2 }
 0x16d   :  { %v1766_v51 = vadd.f32 %v1765_v17, %v1597_v46  ;;  %v1934_v39 = vpop.f32.mrf.mxu3  ;;  %v3199_v46 = vld [vmem:[%s4927_s0 + $0x250] sm:$0xf0] }
 0x16e   :  { %v1599_v21 = vpop.f32.mrf.mxu1 }
 0x16f   :  { %v1935_v56 = vadd.f32 %v1934_v39, %v1766_v51  ;;  %v1600_v57 = vadd.f32 %v1599_v21, %v1431_v62  ;;  %v2596_v51 = vor.u32 %v3195_v8, %v2593_v61  ;;  %v2600_v39 = vor.u32 %v3198_v49, %v2599_v33  ;;  %v3203_v8 = vld [vmem:[%s4927_s0 + $0x270] sm:$0xf0]  ;;  %v2621_v61 = vld [vmem:[%s4927_s0 + $0x274] sm:$0xf0]  ;;  %v2627_v49 = vld [vmem:[%s4927_s0 + $0x268] sm:$0xf] }
 0x170   :  { %v2106_v3 = vpop.f32.mrf.mxu0  ;;  %v2608_v21 = vor.u32 %v3199_v46, %v2607_v42 }
 0x171   :  { %v2104_v12 = vadd.f32 %v2103_v32, %v1935_v56  ;;  %1638 = vmatmul.bf16.gmra.mxu1 %v2576_v7  ;;  %1807 = vmatmul.bf16.gmra.mxu2 %v2580_v19  ;;  %v2604_v19 = vor.u32 %v3196_v29, %v2601_v23  ;;  %v1436_v56 = vadd.f32 %v4022_v31, %v3939_v9  ;;  %v3204_v29 = vld [vmem:[%s4927_s0 + $0x278] sm:$0xf0] }
 0x172   :  { %1976 = vmatmul.bf16.gmra.mxu3 %v2584_v37  ;;  %v1438_v9 = vadd.f32 %v4022_v31, %v3948_v63  ;;  %v3201_v63 = vld [vmem:[%s4927_s0 + $0x264] sm:$0xf] }
 0x173   :  { %3106 = vmatmul.msk.bf16.gmra.mxu0 %vm1299_vm0, %v2588_v43  ;;  %2250 = vst [vmem:[%s4928_s3 + $0x48] sm:$0xff] %v2104_v12 }
 0x174   :  { %v1768_v16 = vpop.f32.mrf.mxu2 }
 0x175   :  { %v1769_v0 = vadd.f32 %v1768_v16, %v1600_v57  ;;  %v1937_v55 = vpop.f32.mrf.mxu3 }
 0x176   :  { %v1601_v13 = vpop.f32.mrf.mxu1 }
 0x177   :  { %v1938_v41 = vadd.f32 %v1937_v55, %v1769_v0  ;;  %v1602_v53 = vadd.f32 %v1601_v13, %v1433_v25  ;;  %v2613_v25 = vld [vmem:[%s4927_s0 + $0x26c] sm:$0xf0] }
 0x178   :  { %v2108_v47 = vpop.f32.mrf.mxu0 }
 0x179   :  { %v2107_v32 = vadd.f32 %v2106_v3, %v1938_v41 }
 0x17b   :  { %2251 = vst [vmem:[%s4928_s3 + $0x50] sm:$0xff] %v2107_v32  ;;  %v2619_v32 = vld [vmem:[%s4927_s0 + $0x260] sm:$0xf] }
 0x17c   :  { %v1770_v5 = vpop.f32.mrf.mxu2 }
 0x17d   :  { %v1771_v45 = vadd.f32 %v1770_v5, %v1602_v53  ;;  %v1939_v17 = vpop.f32.mrf.mxu3  ;;  %v2620_v5 = vor.u32 %v3203_v8, %v2619_v32  ;;  %v3209_v32 = vld [vmem:[%s4927_s0 + $0x2a0] sm:$0xf0] }
 0x17e   :  { %v1604_v7 = vpop.f32.mrf.mxu1 }
 0x17f   :  { %v1940_v37 = vadd.f32 %v1939_v17, %v1771_v45  ;;  %v1605_v62 = vadd.f32 %v1604_v7, %v1436_v56  ;;  %v2624_v17 = vor.u32 %v3201_v63, %v2621_v61 }
 0x180   :  { %v2111_v43 = vpop.f32.mrf.mxu0 }
 0x181   :  { %v2109_v3 = vadd.f32 %v2108_v47, %v1940_v37  ;;  %1643 = vmatmul.bf16.gmra.mxu1 %v2596_v51  ;;  %1812 = vmatmul.bf16.gmra.mxu2 %v2600_v39  ;;  %v3200_v47 = vld [vmem:[%s4927_s0 + $0x25c] sm:$0xf]  ;;  %v2628_v51 = vor.u32 %v3204_v29, %v2627_v49 }
 0x182   :  { %1981 = vmatmul.bf16.gmra.mxu3 %v2604_v19  ;;  %v2616_v46 = vor.u32 %v3200_v47, %v2613_v25  ;;  %v1441_v19 = vadd.f32 %v4022_v31, %v3980_v36  ;;  %v1443_v36 = vadd.f32 %v4022_v31, %v3989_v1  ;;  %v3206_v1 = vld [vmem:[%s4927_s0 + $0x28c] sm:$0xf]  ;;  %v2647_v25 = vld [vmem:[%s4927_s0 + $0x290] sm:$0xf] }
 0x183   :  { %3107 = vmatmul.msk.bf16.gmra.mxu0 %vm1299_vm0, %v2608_v21  ;;  %2252 = vst [vmem:[%s4928_s3 + $0x58] sm:$0xff] %v2109_v3 }
 0x184   :  { %v1773_v12 = vpop.f32.mrf.mxu2 }
 0x185   :  { %v1774_v57 = vadd.f32 %v1773_v12, %v1605_v62  ;;  %v1942_v16 = vpop.f32.mrf.mxu3 }
 0x186   :  { %v1606_v0 = vpop.f32.mrf.mxu1 }
 0x187   :  { %v1943_v55 = vadd.f32 %v1942_v16, %v1774_v57  ;;  %v1607_v33 = vadd.f32 %v1606_v0, %v1438_v9  ;;  %v3205_v0 = vld [vmem:[%s4927_s0 + $0x284] sm:$0xf]  ;;  %v3208_v9 = vld [vmem:[%s4927_s0 + $0x298] sm:$0xf0] }
 0x188   :  { %v2113_v13 = vpop.f32.mrf.mxu0 }
 0x189   :  { %v2112_v41 = vadd.f32 %v2111_v43, %v1943_v55  ;;  %v2633_v55 = vld [vmem:[%s4927_s0 + $0x294] sm:$0xf0] }
 0x18b   :  { %2253 = vst [vmem:[%s4928_s3 + $0x60] sm:$0xff] %v2112_v41  ;;  %v2641_v41 = vld [vmem:[%s4927_s0 + $0x29c] sm:$0xf0] }
 0x18c   :  { %v1775_v23 = vpop.f32.mrf.mxu2 }
 0x18d   :  { %v1776_v53 = vadd.f32 %v1775_v23, %v1607_v33  ;;  %v1944_v42 = vpop.f32.mrf.mxu3  ;;  %v2636_v33 = vor.u32 %v3205_v0, %v2633_v55  ;;  %v2644_v23 = vor.u32 %v3206_v1, %v2641_v41  ;;  %v3214_v0 = vld [vmem:[%s4927_s0 + $0x2c8] sm:$0xf0] }
 0x18e   :  { %v1609_v45 = vpop.f32.mrf.mxu1 }
 0x18f   :  { %v1945_v39 = vadd.f32 %v1944_v42, %v1776_v53  ;;  %v1610_v37 = vadd.f32 %v1609_v45, %v1441_v19  ;;  %v2648_v53 = vor.u32 %v3209_v32, %v2647_v25 }
 0x190   :  { %v2116_v7 = vpop.f32.mrf.mxu0 }
 0x191   :  { %v2114_v21 = vadd.f32 %v2113_v13, %v1945_v39  ;;  %1648 = vmatmul.bf16.gmra.mxu1 %v2616_v46  ;;  %1817 = vmatmul.bf16.gmra.mxu2 %v2620_v5  ;;  %v2639_v13 = vld [vmem:[%s4927_s0 + $0x288] sm:$0xf]  ;;  %v1446_v5 = vadd.f32 %v4022_v31, %v3691_v14  ;;  %v1448_v14 = vadd.f32 %v4022_v31, %v3700_v20  ;;  %v3211_v20 = vld [vmem:[%s4927_s0 + $0x2b4] sm:$0xf] }
 0x192   :  { %1986 = vmatmul.bf16.gmra.mxu3 %v2624_v17  ;;  %v2640_v49 = vor.u32 %v3208_v9, %v2639_v13 }
 0x193   :  { %3108 = vmatmul.msk.bf16.gmra.mxu0 %vm1299_vm0, %v2628_v51  ;;  %2254 = vst [vmem:[%s4928_s3 + $0x68] sm:$0xff] %v2114_v21 }
 0x194   :  { %v1778_v43 = vpop.f32.mrf.mxu2 }
 0x195   :  { %v1779_v56 = vadd.f32 %v1778_v43, %v1610_v37  ;;  %v1947_v3 = vpop.f32.mrf.mxu3 }
 0x196   :  { %v1611_v62 = vpop.f32.mrf.mxu1 }
 0x197   :  { %v1948_v12 = vadd.f32 %v1947_v3, %v1779_v56  ;;  %v1612_v47 = vadd.f32 %v1611_v62, %v1443_v36  ;;  %v3210_v56 = vld [vmem:[%s4927_s0 + $0x2ac] sm:$0xf]  ;;  %v2653_v3 = vld [vmem:[%s4927_s0 + $0x2bc] sm:$0xf0]  ;;  %v2659_v62 = vld [vmem:[%s4927_s0 + $0x2b0] sm:$0xf] }
 0x198   :  { %v2118_v57 = vpop.f32.mrf.mxu0  ;;  %v2656_v1 = vor.u32 %v3210_v56, %v2653_v3 }
 0x199   :  { %v2117_v16 = vadd.f32 %v2116_v7, %v1948_v12  ;;  %v3213_v12 = vld [vmem:[%s4927_s0 + $0x2c0] sm:$0xf0] }
 0x19a   :  { %v2660_v41 = vor.u32 %v3213_v12, %v2659_v62 }
 0x19b   :  { %2255 = vst [vmem:[%s4928_s3 + $0x70] sm:$0xff] %v2117_v16  ;;  %v2667_v16 = vld [vmem:[%s4927_s0 + $0x2b8] sm:$0xf] }
 0x19c   :  { %v1780_v8 = vpop.f32.mrf.mxu2  ;;  %v2668_v32 = vor.u32 %v3214_v0, %v2667_v16 }
 0x19d   :  { %v1781_v63 = vadd.f32 %v1780_v8, %v1612_v47  ;;  %v1949_v61 = vpop.f32.mrf.mxu3 }
 0x19e   :  { %v1614_v29 = vpop.f32.mrf.mxu1 }
 0x19f   :  { %v1950_v42 = vadd.f32 %v1949_v61, %v1781_v63  ;;  %v1615_v17 = vadd.f32 %v1614_v29, %v1446_v5  ;;  %v1451_v61 = vadd.f32 %v4022_v31, %v3732_v34  ;;  %v1453_v34 = vadd.f32 %v4022_v31, %v3741_v40  ;;  %v3216_v40 = vld [vmem:[%s4927_s0 + $0x2dc] sm:$0xf] }
 0x1a0   :  { %v2121_v46 = vpop.f32.mrf.mxu0 }
 0x1a1   :  { %v2119_v45 = vadd.f32 %v2118_v57, %v1950_v42  ;;  %1653 = vmatmul.bf16.gmra.mxu1 %v2636_v33  ;;  %1822 = vmatmul.bf16.gmra.mxu2 %v2640_v49  ;;  %v2661_v57 = vld [vmem:[%s4927_s0 + $0x2c4] sm:$0xf0] }
 0x1a2   :  { %1991 = vmatmul.bf16.gmra.mxu3 %v2644_v23  ;;  %v2664_v25 = vor.u32 %v3211_v20, %v2661_v57 }
 0x1a3   :  { %3109 = vmatmul.msk.bf16.gmra.mxu0 %vm1299_vm0, %v2648_v53  ;;  %2256 = vst [vmem:[%s4928_s3 + $0x78] sm:$0xff] %v2119_v45 }
 0x1a4   :  { %v1783_v51 = vpop.f32.mrf.mxu2 }
 0x1a5   :  { %v1784_v39 = vadd.f32 %v1783_v51, %v1615_v17  ;;  %v1952_v7 = vpop.f32.mrf.mxu3  ;;  %v3215_v17 = vld [vmem:[%s4927_s0 + $0x2d4] sm:$0xf]  ;;  %v2673_v51 = vld [vmem:[%s4927_s0 + $0x2e4] sm:$0xf0] }
 0x1a6   :  { %v1616_v19 = vpop.f32.mrf.mxu1  ;;  %v2676_v62 = vor.u32 %v3215_v17, %v2673_v51 }
 0x1a7   :  { %v1953_v21 = vadd.f32 %v1952_v7, %v1784_v39  ;;  %v1617_v36 = vadd.f32 %v1616_v19, %v1448_v14  ;;  %v2679_v39 = vld [vmem:[%s4927_s0 + $0x2d8] sm:$0xf]  ;;  %v3218_v7 = vld [vmem:[%s4927_s0 + $0x2e8] sm:$0xf0]  ;;  %v2681_v19 = vld [vmem:[%s4927_s0 + $0x2ec] sm:$0xf0] }
 0x1a8   :  { %v2123_v37 = vpop.f32.mrf.mxu0  ;;  %v3219_v14 = vld [vmem:[%s4927_s0 + $0x2f0] sm:$0xf0]  ;;  %v2680_v12 = vor.u32 %v3218_v7, %v2679_v39  ;;  %v2684_v57 = vor.u32 %v3216_v40, %v2681_v19 }
 0x1a9   :  { %v2122_v43 = vadd.f32 %v2121_v46, %v1953_v21 }
 0x1ab   :  { %2257 = vst [vmem:[%s4928_s3 + $0x80] sm:$0xff] %v2122_v43 }
 0x1ac   :  { %v1785_v55 = vpop.f32.mrf.mxu2 }
 0x1ad   :  { %v1786_v13 = vadd.f32 %v1785_v55, %v1617_v36  ;;  %v1954_v9 = vpop.f32.mrf.mxu3  ;;  %v1456_v55 = vadd.f32 %v4022_v31, %v3773_v54  ;;  %v1458_v54 = vadd.f32 %v4022_v31, %v3782_v60  ;;  %v3221_v60 = vld [vmem:[%s4927_s0 + $0x304] sm:$0xf] }
 0x1ae   :  { %v1619_v47 = vpop.f32.mrf.mxu1 }
 0x1af   :  { %v1955_v8 = vadd.f32 %v1954_v9, %v1786_v13  ;;  %v1620_v49 = vadd.f32 %v1619_v47, %v1451_v61  ;;  %v3220_v61 = vld [vmem:[%s4927_s0 + $0x2fc] sm:$0xf] }
 0x1b0   :  { %v2126_v63 = vpop.f32.mrf.mxu0 }
 0x1b1   :  { %v2124_v33 = vadd.f32 %v2123_v37, %v1955_v8  ;;  %1658 = vmatmul.bf16.gmra.mxu1 %v2656_v1  ;;  %1827 = vmatmul.bf16.gmra.mxu2 %v2660_v41  ;;  %v2687_v37 = vld [vmem:[%s4927_s0 + $0x2e0] sm:$0xf] }
 0x1b2   :  { %1996 = vmatmul.bf16.gmra.mxu3 %v2664_v25  ;;  %v2688_v36 = vor.u32 %v3219_v14, %v2687_v37  ;;  %v1461_v37 = vadd.f32 %v4022_v31, %v3814_v10  ;;  %v1463_v10 = vadd.f32 %v4022_v31, %v3823_v22  ;;  %v3226_v22 = vld [vmem:[%s4927_s0 + $0x32c] sm:$0xf] }
 0x1b3   :  { %3110 = vmatmul.msk.bf16.gmra.mxu0 %vm1299_vm0, %v2668_v32  ;;  %2258 = vst [vmem:[%s4928_s3 + $0x88] sm:$0xff] %v2124_v33  ;;  %v2693_v33 = vld [vmem:[%s4927_s0 + $0x30c] sm:$0xf0] }
 0x1b4   :  { %v1788_v29 = vpop.f32.mrf.mxu2  ;;  %v2696_v17 = vor.u32 %v3220_v61, %v2693_v33 }
 0x1b5   :  { %v1789_v23 = vadd.f32 %v1788_v29, %v1620_v49  ;;  %v1957_v53 = vpop.f32.mrf.mxu3  ;;  %v2699_v49 = vld [vmem:[%s4927_s0 + $0x300] sm:$0xf]  ;;  %v3223_v29 = vld [vmem:[%s4927_s0 + $0x310] sm:$0xf0] }
 0x1b6   :  { %v1621_v42 = vpop.f32.mrf.mxu1  ;;  %v2700_v51 = vor.u32 %v3223_v29, %v2699_v49 }
 0x1b7   :  { %v1958_v46 = vadd.f32 %v1957_v53, %v1789_v23  ;;  %v1622_v21 = vadd.f32 %v1621_v42, %v1453_v34  ;;  %v2701_v23 = vld [vmem:[%s4927_s0 + $0x314] sm:$0xf0]  ;;  %v2707_v42 = vld [vmem:[%s4927_s0 + $0x308] sm:$0xf] }
 0x1b8   :  { %v2128_v5 = vpop.f32.mrf.mxu0  ;;  %v2704_v7 = vor.u32 %v3221_v60, %v2701_v23  ;;  %v1466_v23 = vadd.f32 %v4022_v31, %v3855_v44  ;;  %v1468_v44 = vadd.f32 %v4022_v31, %v3864_v52  ;;  %v3231_v52 = vld [vmem:[%s4927_s0 + $0x354] sm:$0xf] }
 0x1b9   :  { %v2127_v45 = vadd.f32 %v2126_v63, %v1958_v46  ;;  %v3224_v46 = vld [vmem:[%s4927_s0 + $0x318] sm:$0xf0] }
 0x1ba   :  { %v2708_v40 = vor.u32 %v3224_v46, %v2707_v42 }
 0x1bb   :  { %2259 = vst [vmem:[%s4928_s3 + $0x90] sm:$0xff] %v2127_v45 }
 0x1bc   :  { %v1790_v43 = vpop.f32.mrf.mxu2 }
 0x1bd   :  { %v1791_v56 = vadd.f32 %v1790_v43, %v1622_v21  ;;  %v1959_v3 = vpop.f32.mrf.mxu3 }
 0x1be   :  { %v1624_v20 = vpop.f32.mrf.mxu1 }
 0x1bf   :  { %v1960_v16 = vadd.f32 %v1959_v3, %v1791_v56  ;;  %v1625_v9 = vadd.f32 %v1624_v20, %v1456_v55  ;;  %v2719_v55 = vld [vmem:[%s4927_s0 + $0x328] sm:$0xf] }
 0x1c0   :  { %v2131_v0 = vpop.f32.mrf.mxu0 }
 0x1c1   :  { %v2129_v13 = vadd.f32 %v2128_v5, %v1960_v16  ;;  %1663 = vmatmul.bf16.gmra.mxu1 %v2676_v62  ;;  %1832 = vmatmul.bf16.gmra.mxu2 %v2680_v12  ;;  %v3225_v16 = vld [vmem:[%s4927_s0 + $0x324] sm:$0xf] }
 0x1c2   :  { %2001 = vmatmul.bf16.gmra.mxu3 %v2684_v57 }
 0x1c3   :  { %3111 = vmatmul.msk.bf16.gmra.mxu0 %vm1299_vm0, %v2688_v36  ;;  %2260 = vst [vmem:[%s4928_s3 + $0x98] sm:$0xff] %v2129_v13  ;;  %v3228_v13 = vld [vmem:[%s4927_s0 + $0x338] sm:$0xf0] }
 0x1c4   :  { %v1793_v1 = vpop.f32.mrf.mxu2 }
 0x1c5   :  { %v1794_v41 = vadd.f32 %v1793_v1, %v1625_v9  ;;  %v1962_v47 = vpop.f32.mrf.mxu3  ;;  %v2721_v9 = vld [vmem:[%s4927_s0 + $0x33c] sm:$0xf0] }
 0x1c6   :  { %v1626_v25 = vpop.f32.mrf.mxu1  ;;  %v2724_v33 = vor.u32 %v3226_v22, %v2721_v9 }
 0x1c7   :  { %v1963_v32 = vadd.f32 %v1962_v47, %v1794_v41  ;;  %v1627_v53 = vadd.f32 %v1626_v25, %v1458_v54  ;;  %v2727_v41 = vld [vmem:[%s4927_s0 + $0x330] sm:$0xf]  ;;  %v3229_v47 = vld [vmem:[%s4927_s0 + $0x340] sm:$0xf0] }
 0x1c8   :  { %v2133_v8 = vpop.f32.mrf.mxu0  ;;  %v2728_v49 = vor.u32 %v3229_v47, %v2727_v41 }
 0x1c9   :  { %v2132_v63 = vadd.f32 %v2131_v0, %v1963_v32  ;;  %v2713_v0 = vld [vmem:[%s4927_s0 + $0x334] sm:$0xf0] }
 0x1ca   :  { %v2716_v54 = vor.u32 %v3225_v16, %v2713_v0 }
 0x1cb   :  { %2261 = vst [vmem:[%s4928_s3 + $0xa0] sm:$0xff] %v2132_v63  ;;  %v2720_v63 = vor.u32 %v3228_v13, %v2719_v55  ;;  %v1471_v13 = vadd.f32 %v4022_v31, %v3896_v11  ;;  %v1473_v11 = vadd.f32 %v4022_v31, %v3905_v28  ;;  %v3236_v28 = vld [vmem:[%s4927_s0 + $0x37c] sm:$0xf] }
 0x1cc   :  { %v1795_v5 = vpop.f32.mrf.mxu2 }
 0x1cd   :  { %v1796_v34 = vadd.f32 %v1795_v5, %v1627_v53  ;;  %v1964_v45 = vpop.f32.mrf.mxu3 }
 0x1ce   :  { %v1629_v39 = vpop.f32.mrf.mxu1 }
 0x1cf   :  { %v1965_v19 = vadd.f32 %v1964_v45, %v1796_v34  ;;  %v1630_v43 = vadd.f32 %v1629_v39, %v1461_v37  ;;  %v2741_v37 = vld [vmem:[%s4927_s0 + $0x364] sm:$0xf0] }
 0x1d0   :  { %v2136_v21 = vpop.f32.mrf.mxu0 }
 0x1d1   :  { %v2134_v14 = vadd.f32 %v2133_v8, %v1965_v19  ;;  %1668 = vmatmul.bf16.gmra.mxu1 %v2696_v17  ;;  %1837 = vmatmul.bf16.gmra.mxu2 %v2700_v51  ;;  %v2739_v19 = vld [vmem:[%s4927_s0 + $0x350] sm:$0xf] }
 0x1d2   :  { %2006 = vmatmul.bf16.gmra.mxu3 %v2704_v7  ;;  %v3230_v7 = vld [vmem:[%s4927_s0 + $0x34c] sm:$0xf] }
 0x1d3   :  { %3112 = vmatmul.msk.bf16.gmra.mxu0 %vm1299_vm0, %v2708_v40  ;;  %2262 = vst [vmem:[%s4928_s3 + $0xa8] sm:$0xff] %v2134_v14  ;;  %v2733_v40 = vld [vmem:[%s4927_s0 + $0x35c] sm:$0xf0] }
 0x1d4   :  { %v1798_v56 = vpop.f32.mrf.mxu2 }
 0x1d5   :  { %v1799_v3 = vadd.f32 %v1798_v56, %v1630_v43  ;;  %v1967_v62 = vpop.f32.mrf.mxu3  ;;  %v2747_v43 = vld [vmem:[%s4927_s0 + $0x358] sm:$0xf]  ;;  %v3234_v56 = vld [vmem:[%s4927_s0 + $0x368] sm:$0xf0] }
 0x1d6   :  { %v1631_v12 = vpop.f32.mrf.mxu1  ;;  %v2748_v16 = vor.u32 %v3234_v56, %v2747_v43 }
 0x1d7   :  { %v1968_v20 = vadd.f32 %v1967_v62, %v1799_v3  ;;  %v1632_v1 = vadd.f32 %v1631_v12, %v1463_v10 }
 0x1d8   :  { %v2138_v57 = vpop.f32.mrf.mxu0 }
 0x1d9   :  { %v2137_v36 = vadd.f32 %v2136_v21, %v1968_v20  ;;  %v3233_v21 = vld [vmem:[%s4927_s0 + $0x360] sm:$0xf0]  ;;  %v2736_v20 = vor.u32 %v3230_v7, %v2733_v40  ;;  %v1476_v40 = vadd.f32 %v4022_v31, %v3937_v2  ;;  %v4520_v31 = vld [vmem:[%s4926_s2] ss:$0 sm:$0xff] }
 0x1da   :  { %v1478_v2 = vadd.f32 %v4520_v31, %v3946_v27  ;;  %v3241_v27 = vld [vmem:[%s4927_s0 + $0x3a4] sm:$0xf] }
 0x1db   :  { %2263 = vst [vmem:[%s4928_s3 + $0xb0] sm:$0xff] %v2137_v36  ;;  %v2744_v36 = vor.u32 %v3231_v52, %v2741_v37 }
 0x1dc   :  { %v1800_v25 = vpop.f32.mrf.mxu2 }
 0x1dd   :  { %v1801_v32 = vadd.f32 %v1800_v25, %v1632_v1  ;;  %v1969_v8 = vpop.f32.mrf.mxu3 }
 0x1de   :  { %v1634_v61 = vpop.f32.mrf.mxu1 }
 0x1df   :  { %v1970_v29 = vadd.f32 %v1969_v8, %v1801_v32  ;;  %v1635_v42 = vadd.f32 %v1634_v61, %v1466_v23  ;;  %v2753_v61 = vld [vmem:[%s4927_s0 + $0x384] sm:$0xf0]  ;;  %v2767_v23 = vld [vmem:[%s4927_s0 + $0x380] sm:$0xf] }
 0x1e0   :  { %v2141_v60 = vpop.f32.mrf.mxu0 }
 0x1e1   :  { %v2139_v53 = vadd.f32 %v2138_v57, %v1970_v29  ;;  %1673 = vmatmul.bf16.gmra.mxu1 %v2716_v54  ;;  %1842 = vmatmul.bf16.gmra.mxu2 %v2720_v63  ;;  %v2740_v57 = vor.u32 %v3233_v21, %v2739_v19  ;;  %v3235_v63 = vld [vmem:[%s4927_s0 + $0x374] sm:$0xf]  ;;  %v2761_v29 = vld [vmem:[%s4927_s0 + $0x38c] sm:$0xf0] }
 0x1e2   :  { %2011 = vmatmul.bf16.gmra.mxu3 %v2724_v33  ;;  %v2759_v33 = vld [vmem:[%s4927_s0 + $0x378] sm:$0xf] }
 0x1e3   :  { %3113 = vmatmul.msk.bf16.gmra.mxu0 %vm1299_vm0, %v2728_v49  ;;  %2264 = vst [vmem:[%s4928_s3 + $0xb8] sm:$0xff] %v2139_v53  ;;  %v3238_v49 = vld [vmem:[%s4927_s0 + $0x388] sm:$0xf0]  ;;  %v3239_v53 = vld [vmem:[%s4927_s0 + $0x390] sm:$0xf0] }
 0x1e4   :  { %v1803_v46 = vpop.f32.mrf.mxu2 }
 0x1e5   :  { %v1804_v5 = vadd.f32 %v1803_v46, %v1635_v42  ;;  %v1972_v34 = vpop.f32.mrf.mxu3 }
 0x1e6   :  { %v1636_v45 = vpop.f32.mrf.mxu1 }
 0x1e7   :  { %v1973_v17 = vadd.f32 %v1972_v34, %v1804_v5  ;;  %v1637_v14 = vadd.f32 %v1636_v45, %v1468_v44  ;;  %v2756_v34 = vor.u32 %v3235_v63, %v2753_v61  ;;  %v2760_v45 = vor.u32 %v3238_v49, %v2759_v33 }
 0x1e8   :  { %v2143_v51 = vpop.f32.mrf.mxu0  ;;  %v2768_v44 = vor.u32 %v3239_v53, %v2767_v23 }
 0x1e9   :  { %v2142_v39 = vadd.f32 %v2141_v60, %v1973_v17 }
 0x1eb   :  { %2265 = vst [vmem:[%s4928_s3 + $0xc0] sm:$0xff] %v2142_v39 }
 0x1ec   :  { %v1805_v3 = vpop.f32.mrf.mxu2 }
 0x1ed   :  { %v1806_v62 = vadd.f32 %v1805_v3, %v1637_v14  ;;  %v1974_v12 = vpop.f32.mrf.mxu3 }
 0x1ee   :  { %v1639_v10 = vpop.f32.mrf.mxu1 }
 0x1ef   :  { %v1975_v0 = vadd.f32 %v1974_v12, %v1806_v62  ;;  %v1640_v9 = vadd.f32 %v1639_v10, %v1471_v13  ;;  %v3240_v12 = vld [vmem:[%s4927_s0 + $0x39c] sm:$0xf]  ;;  %v3243_v10 = vld [vmem:[%s4927_s0 + $0x3b0] sm:$0xf0] }
 0x1f0   :  { %v2146_v55 = vpop.f32.mrf.mxu0 }
 0x1f1   :  { %v2144_v22 = vadd.f32 %v2143_v51, %v1975_v0  ;;  %1678 = vmatmul.bf16.gmra.mxu1 %v2736_v20  ;;  %1847 = vmatmul.bf16.gmra.mxu2 %v2740_v57  ;;  %v2764_v51 = vor.u32 %v3236_v28, %v2761_v29  ;;  %v2773_v20 = vld [vmem:[%s4927_s0 + $0x3ac] sm:$0xf0]  ;;  %v2779_v57 = vld [vmem:[%s4927_s0 + $0x3a0] sm:$0xf]  ;;  %v2787_v0 = vld [vmem:[%s4927_s0 + $0x3a8] sm:$0xf] }
 0x1f2   :  { %2016 = vmatmul.bf16.gmra.mxu3 %v2744_v36  ;;  %v2781_v36 = vld [vmem:[%s4927_s0 + $0x3b4] sm:$0xf0] }
 0x1f3   :  { %3114 = vmatmul.msk.bf16.gmra.mxu0 %vm1299_vm0, %v2748_v16  ;;  %2266 = vst [vmem:[%s4928_s3 + $0xc8] sm:$0xff] %v2144_v22 }
 0x1f4   :  { %v1808_v1 = vpop.f32.mrf.mxu2 }
 0x1f5   :  { %v1809_v41 = vadd.f32 %v1808_v1, %v1640_v9  ;;  %v1977_v47 = vpop.f32.mrf.mxu3  ;;  %v2776_v1 = vor.u32 %v3240_v12, %v2773_v20 }
 0x1f6   :  { %v1641_v25 = vpop.f32.mrf.mxu1 }
 0x1f7   :  { %v1978_v32 = vadd.f32 %v1977_v47, %v1809_v41  ;;  %v1642_v60 = vadd.f32 %v1641_v25, %v1473_v11  ;;  %v2780_v41 = vor.u32 %v3243_v10, %v2779_v57  ;;  %v2784_v25 = vor.u32 %v3241_v27, %v2781_v36 }
 0x1f8   :  { %v2148_v8 = vpop.f32.mrf.mxu0 }
 0x1f9   :  { %v2147_v54 = vadd.f32 %v2146_v55, %v1978_v32  ;;  %v3244_v55 = vld [vmem:[%s4927_s0 + $0x3b8] sm:$0xf0] }
 0x1fa   :  { %v2788_v32 = vor.u32 %v3244_v55, %v2787_v0  ;;  %v3250_v0 = vld [vmem:[%s4927_s0 + $0x3ec] sm:$0xf]  ;;  %v2813_v55 = vld [vmem:[%s4927_s0 + $0x3fc] sm:$0xf0] }
 0x1fb   :  { %2267 = vst [vmem:[%s4928_s3 + $0xd0] sm:$0xff] %v2147_v54  ;;  %v1481_v54 = vadd.f32 %v4520_v31, %v3978_v24  ;;  %v1483_v24 = vadd.f32 %v4520_v31, %v3987_v59  ;;  %v3246_v59 = vld [vmem:[%s4927_s0 + $0x3cc] sm:$0xf] }
 0x1fc   :  { %v1810_v42 = vpop.f32.mrf.mxu2 }
 0x1fd   :  { %v1811_v46 = vadd.f32 %v1810_v42, %v1642_v60  ;;  %v1979_v5 = vpop.f32.mrf.mxu3  ;;  %v3245_v42 = vld [vmem:[%s4927_s0 + $0x3c4] sm:$0xf] }
 0x1fe   :  { %v1644_v17 = vpop.f32.mrf.mxu1 }
 0x1ff   :  { %v1980_v39 = vadd.f32 %v1979_v5, %v1811_v46  ;;  %v1645_v21 = vadd.f32 %v1644_v17, %v1476_v40  ;;  %v2793_v46 = vld [vmem:[%s4927_s0 + $0x3d4] sm:$0xf0]  ;;  %v2799_v5 = vld [vmem:[%s4927_s0 + $0x3c8] sm:$0xf] }
 0x200   :  { %v2151_v7 = vpop.f32.mrf.mxu0 }
 0x201   :  { %v2149_v19 = vadd.f32 %v2148_v8, %v1980_v39  ;;  %1683 = vmatmul.bf16.gmra.mxu1 %v2756_v34  ;;  %1852 = vmatmul.bf16.gmra.mxu2 %v2760_v45  ;;  %v3248_v34 = vld [vmem:[%s4927_s0 + $0x3d8] sm:$0xf0]  ;;  %v2801_v45 = vld [vmem:[%s4927_s0 + $0x3dc] sm:$0xf0] }
 0x202   :  { %2021 = vmatmul.bf16.gmra.mxu3 %v2764_v51  ;;  %v2807_v51 = vld [vmem:[%s4927_s0 + $0x3d0] sm:$0xf] }
 0x203   :  { %3115 = vmatmul.msk.bf16.gmra.mxu0 %vm1299_vm0, %v2768_v44  ;;  %2268 = vst [vmem:[%s4928_s3 + $0xd8] sm:$0xff] %v2149_v19  ;;  %v3249_v44 = vld [vmem:[%s4927_s0 + $0x3e0] sm:$0xf0]  ;;  %v2796_v19 = vor.u32 %v3245_v42, %v2793_v46 }
 0x204   :  { %v1813_v52 = vpop.f32.mrf.mxu2 }
 0x205   :  { %v1814_v37 = vadd.f32 %v1813_v52, %v1645_v21  ;;  %v1982_v14 = vpop.f32.mrf.mxu3  ;;  %v2800_v21 = vor.u32 %v3248_v34, %v2799_v5 }
 0x206   :  { %v1646_v43 = vpop.f32.mrf.mxu1 }
 0x207   :  { %v1983_v56 = vadd.f32 %v1982_v14, %v1814_v37  ;;  %v1647_v16 = vadd.f32 %v1646_v43, %v1478_v2  ;;  %v2804_v37 = vor.u32 %v3246_v59, %v2801_v45  ;;  %v2808_v14 = vor.u32 %v3249_v44, %v2807_v51  ;;  %v3255_v45 = vld [vmem:[%s4927_s0 + $0x414] sm:$0xf]  ;;  %v2839_v51 = vld [vmem:[%s4927_s0 + $0x418] sm:$0xf]  ;;  %v3258_v44 = vld [vmem:[%s4927_s0 + $0x428] sm:$0xf0] }
 0x208   :  { %v2153_v3 = vpop.f32.mrf.mxu0 }
 0x209   :  { %v2152_v62 = vadd.f32 %v2151_v7, %v1983_v56 }
 0x20b   :  { %2269 = vst [vmem:[%s4928_s3 + $0xe0] sm:$0xff] %v2152_v62 }
 0x20c   :  { %v1815_v13 = vpop.f32.mrf.mxu2 }
 0x20d   :  { %v1816_v22 = vadd.f32 %v1815_v13, %v1647_v16  ;;  %v1984_v9 = vpop.f32.mrf.mxu3  ;;  %v2819_v13 = vld [vmem:[%s4927_s0 + $0x3f0] sm:$0xf] }
 0x20e   :  { %v1649_v47 = vpop.f32.mrf.mxu1 }
 0x20f   :  { %v1985_v8 = vadd.f32 %v1984_v9, %v1816_v22  ;;  %v1650_v61 = vadd.f32 %v1649_v47, %v1481_v54  ;;  %v3253_v22 = vld [vmem:[%s4927_s0 + $0x400] sm:$0xf0]  ;;  %v2821_v9 = vld [vmem:[%s4927_s0 + $0x404] sm:$0xf0]  ;;  %v3254_v47 = vld [vmem:[%s4927_s0 + $0x408] sm:$0xf0] }
 0x210   :  { %v2156_v11 = vpop.f32.mrf.mxu0  ;;  %v2820_v54 = vor.u32 %v3253_v22, %v2819_v13  ;;  %v3260_v22 = vld [vmem:[%s4927_s0 + $0x43c] sm:$0xf] }
 0x211   :  { %v2154_v63 = vadd.f32 %v2153_v3, %v1985_v8  ;;  %1688 = vmatmul.bf16.gmra.mxu1 %v2776_v1  ;;  %1857 = vmatmul.bf16.gmra.mxu2 %v2780_v41  ;;  %v1486_v3 = vadd.f32 %v4520_v31, %v3696_v18  ;;  %v1488_v18 = vadd.f32 %v4520_v31, %v3728_v30  ;;  %v3251_v30 = vld [vmem:[%s4927_s0 + $0x3f4] sm:$0xf]  ;;  %v2827_v41 = vld [vmem:[%s4927_s0 + $0x3f8] sm:$0xf] }
 0x212   :  { %2026 = vmatmul.bf16.gmra.mxu3 %v2784_v25 }
 0x213   :  { %3116 = vmatmul.msk.bf16.gmra.mxu0 %vm1299_vm0, %v2788_v32  ;;  %2270 = vst [vmem:[%s4928_s3 + $0xe8] sm:$0xff] %v2154_v63 }
 0x214   :  { %v1818_v33 = vpop.f32.mrf.mxu2 }
 0x215   :  { %v1819_v49 = vadd.f32 %v1818_v33, %v1650_v61  ;;  %v1987_v28 = vpop.f32.mrf.mxu3  ;;  %v2824_v61 = vor.u32 %v3251_v30, %v2821_v9  ;;  %v2828_v33 = vor.u32 %v3254_v47, %v2827_v41  ;;  %v2853_v30 = vld [vmem:[%s4927_s0 + $0x44c] sm:$0xf0]  ;;  %v2859_v9 = vld [vmem:[%s4927_s0 + $0x440] sm:$0xf]  ;;  %v2861_v41 = vld [vmem:[%s4927_s0 + $0x454] sm:$0xf0] }
 0x216   :  { %v1651_v29 = vpop.f32.mrf.mxu1 }
 0x217   :  { %v1988_v60 = vadd.f32 %v1987_v28, %v1819_v49  ;;  %v1652_v17 = vadd.f32 %v1651_v29, %v1483_v24  ;;  %v1491_v29 = vadd.f32 %v4520_v31, %v3737_v38  ;;  %v1493_v38 = vadd.f32 %v4520_v31, %v3769_v50  ;;  %v3256_v50 = vld [vmem:[%s4927_s0 + $0x41c] sm:$0xf] }
 0x218   :  { %v2158_v23 = vpop.f32.mrf.mxu0 }
 0x219   :  { %v2157_v53 = vadd.f32 %v2156_v11, %v1988_v60  ;;  %v2816_v11 = vor.u32 %v3250_v0, %v2813_v55 }
 0x21b   :  { %2271 = vst [vmem:[%s4928_s3 + $0xf0] sm:$0xff] %v2157_v53 }
 0x21c   :  { %v1820_v39 = vpop.f32.mrf.mxu2 }
 0x21d   :  { %v1821_v7 = vadd.f32 %v1820_v39, %v1652_v17  ;;  %v1989_v40 = vpop.f32.mrf.mxu3  ;;  %v2833_v17 = vld [vmem:[%s4927_s0 + $0x424] sm:$0xf0]  ;;  %v2841_v39 = vld [vmem:[%s4927_s0 + $0x42c] sm:$0xf0] }
 0x21e   :  { %v1654_v52 = vpop.f32.mrf.mxu1 }
 0x21f   :  { %v1990_v43 = vadd.f32 %v1989_v40, %v1821_v7  ;;  %v1655_v62 = vadd.f32 %v1654_v52, %v1486_v3  ;;  %v2847_v40 = vld [vmem:[%s4927_s0 + $0x420] sm:$0xf]  ;;  %v2844_v3 = vor.u32 %v3256_v50, %v2841_v39  ;;  %v3268_v50 = vld [vmem:[%s4927_s0 + $0x478] sm:$0xf0] }
 0x220   :  { %v2161_v56 = vpop.f32.mrf.mxu0  ;;  %v2881_v39 = vld [vmem:[%s4927_s0 + $0x47c] sm:$0xf0] }
 0x221   :  { %v2159_v2 = vadd.f32 %v2158_v23, %v1990_v43  ;;  %1693 = vmatmul.bf16.gmra.mxu1 %v2796_v19  ;;  %1862 = vmatmul.bf16.gmra.mxu2 %v2800_v21  ;;  %v3259_v19 = vld [vmem:[%s4927_s0 + $0x430] sm:$0xf0]  ;;  %v2840_v43 = vor.u32 %v3258_v44, %v2839_v51  ;;  %v2873_v51 = vld [vmem:[%s4927_s0 + $0x474] sm:$0xf0]  ;;  %v2879_v44 = vld [vmem:[%s4927_s0 + $0x468] sm:$0xf] }
 0x222   :  { %2031 = vmatmul.bf16.gmra.mxu3 %v2804_v37 }
 0x223   :  { %3117 = vmatmul.msk.bf16.gmra.mxu0 %vm1299_vm0, %v2808_v14  ;;  %2272 = vst [vmem:[%s4928_s3 + $0xf8] sm:$0xff] %v2159_v2  ;;  %v2836_v14 = vor.u32 %v3255_v45, %v2833_v17  ;;  %v2848_v2 = vor.u32 %v3259_v19, %v2847_v40  ;;  %v3265_v17 = vld [vmem:[%s4927_s0 + $0x464] sm:$0xf]  ;;  %v2887_v40 = vld [vmem:[%s4927_s0 + $0x470] sm:$0xf] }
 0x224   :  { %v1823_v12 = vpop.f32.mrf.mxu2  ;;  %v3269_v19 = vld [vmem:[%s4927_s0 + $0x480] sm:$0xf0] }
 0x225   :  { %v1824_v20 = vadd.f32 %v1823_v12, %v1655_v62  ;;  %v1992_v57 = vpop.f32.mrf.mxu3 }
 0x226   :  { %v1656_v10 = vpop.f32.mrf.mxu1 }
 0x227   :  { %v1993_v27 = vadd.f32 %v1992_v57, %v1824_v20  ;;  %v1657_v1 = vadd.f32 %v1656_v10, %v1488_v18  ;;  %v1496_v20 = vadd.f32 %v4520_v31, %v3778_v58  ;;  %v1498_v58 = vadd.f32 %v4520_v31, %v3810_v6  ;;  %v3261_v6 = vld [vmem:[%s4927_s0 + $0x444] sm:$0xf] }
 0x228   :  { %v2163_v36 = vpop.f32.mrf.mxu0 }
 0x229   :  { %v2162_v16 = vadd.f32 %v2161_v56, %v1993_v27 }
 0x22b   :  { %2273 = vst [vmem:[%s4928_s3 + $0x100] sm:$0xff] %v2162_v16 }
 0x22c   :  { %v1825_v25 = vpop.f32.mrf.mxu2 }
 0x22d   :  { %v1826_v32 = vadd.f32 %v1825_v25, %v1657_v1  ;;  %v1994_v8 = vpop.f32.mrf.mxu3  ;;  %v3263_v1 = vld [vmem:[%s4927_s0 + $0x450] sm:$0xf0]  ;;  %v2867_v25 = vld [vmem:[%s4927_s0 + $0x448] sm:$0xf] }
 0x22e   :  { %v1659_v63 = vpop.f32.mrf.mxu1 }
 0x22f   :  { %v1995_v49 = vadd.f32 %v1994_v8, %v1826_v32  ;;  %v1660_v23 = vadd.f32 %v1659_v63, %v1491_v29  ;;  %v3264_v32 = vld [vmem:[%s4927_s0 + $0x458] sm:$0xf0]  ;;  %v2856_v63 = vor.u32 %v3260_v22, %v2853_v30  ;;  %v2893_v22 = vld [vmem:[%s4927_s0 + $0x49c] sm:$0xf0]  ;;  %v2899_v30 = vld [vmem:[%s4927_s0 + $0x490] sm:$0xf] }
 0x230   :  { %v2166_v28 = vpop.f32.mrf.mxu0 }
 0x231   :  { %v2164_v60 = vadd.f32 %v2163_v36, %v1995_v49  ;;  %1698 = vmatmul.bf16.gmra.mxu1 %v2816_v11  ;;  %1867 = vmatmul.bf16.gmra.mxu2 %v2820_v54  ;;  %v2864_v49 = vor.u32 %v3261_v6, %v2861_v41  ;;  %v2907_v41 = vld [vmem:[%s4927_s0 + $0x498] sm:$0xf] }
 0x232   :  { %2036 = vmatmul.bf16.gmra.mxu3 %v2824_v61  ;;  %v2860_v61 = vor.u32 %v3263_v1, %v2859_v9  ;;  %v3273_v9 = vld [vmem:[%s4927_s0 + $0x4a0] sm:$0xf0]  ;;  %v2901_v1 = vld [vmem:[%s4927_s0 + $0x4a4] sm:$0xf0] }
 0x233   :  { %3118 = vmatmul.msk.bf16.gmra.mxu0 %vm1299_vm0, %v2828_v33  ;;  %2274 = vst [vmem:[%s4928_s3 + $0x108] sm:$0xff] %v2164_v60 }
 0x234   :  { %v1828_v24 = vpop.f32.mrf.mxu2 }
 0x235   :  { %v1829_v53 = vadd.f32 %v1828_v24, %v1660_v23  ;;  %v1997_v42 = vpop.f32.mrf.mxu3  ;;  %v1501_v23 = vadd.f32 %v4520_v31, %v3819_v15  ;;  %v1503_v15 = vadd.f32 %v4520_v31, %v3851_v35  ;;  %v3266_v35 = vld [vmem:[%s4927_s0 + $0x46c] sm:$0xf] }
 0x236   :  { %v1661_v46 = vpop.f32.mrf.mxu1 }
 0x237   :  { %v1998_v5 = vadd.f32 %v1997_v42, %v1829_v53  ;;  %v1662_v7 = vadd.f32 %v1661_v46, %v1493_v38 }
 0x238   :  { %v2168_v34 = vpop.f32.mrf.mxu0 }
 0x239   :  { %v2167_v59 = vadd.f32 %v2166_v28, %v1998_v5  ;;  %v2868_v28 = vor.u32 %v3264_v32, %v2867_v25 }
 0x23b   :  { %2275 = vst [vmem:[%s4928_s3 + $0x110] sm:$0xff] %v2167_v59 }
 0x23c   :  { %v1830_v21 = vpop.f32.mrf.mxu2 }
 0x23d   :  { %v1831_v52 = vadd.f32 %v1830_v21, %v1662_v7  ;;  %v1999_v37 = vpop.f32.mrf.mxu3 }
 0x23e   :  { %v1664_v56 = vpop.f32.mrf.mxu1 }
 0x23f   :  { %v2000_v62 = vadd.f32 %v1999_v37, %v1831_v52  ;;  %v1665_v10 = vadd.f32 %v1664_v56, %v1496_v20  ;;  %v1506_v20 = vadd.f32 %v4520_v31, %v3860_v48  ;;  %v1508_v48 = vadd.f32 %v4520_v31, %v3892_v4  ;;  %v3271_v4 = vld [vmem:[%s4927_s0 + $0x494] sm:$0xf] }
 0x240   :  { %v2171_v12 = vpop.f32.mrf.mxu0 }
 0x241   :  { %v2169_v57 = vadd.f32 %v2168_v34, %v2000_v62  ;;  %1703 = vmatmul.bf16.gmra.mxu1 %v2836_v14  ;;  %1872 = vmatmul.bf16.gmra.mxu2 %v2840_v43  ;;  %v2876_v14 = vor.u32 %v3265_v17, %v2873_v51  ;;  %v2880_v43 = vor.u32 %v3268_v50, %v2879_v44  ;;  %v2919_v17 = vld [vmem:[%s4927_s0 + $0x4b8] sm:$0xf]  ;;  %v3278_v51 = vld [vmem:[%s4927_s0 + $0x4c8] sm:$0xf0]  ;;  %v3276_v44 = vld [vmem:[%s4927_s0 + $0x4bc] sm:$0xf] }
 0x242   :  { %2041 = vmatmul.bf16.gmra.mxu3 %v2844_v3  ;;  %v2884_v3 = vor.u32 %v3266_v35, %v2881_v39  ;;  %v2921_v50 = vld [vmem:[%s4927_s0 + $0x4cc] sm:$0xf0]  ;;  %v2927_v39 = vld [vmem:[%s4927_s0 + $0x4c0] sm:$0xf] }
 0x243   :  { %3119 = vmatmul.msk.bf16.gmra.mxu0 %vm1299_vm0, %v2848_v2  ;;  %2276 = vst [vmem:[%s4928_s3 + $0x118] sm:$0xff] %v2169_v57  ;;  %v2888_v2 = vor.u32 %v3269_v19, %v2887_v40 }
 0x244   :  { %v1833_v27 = vpop.f32.mrf.mxu2 }
 0x245   :  { %v1834_v36 = vadd.f32 %v1833_v27, %v1665_v10  ;;  %v2002_v18 = vpop.f32.mrf.mxu3 }
 0x246   :  { %v1666_v16 = vpop.f32.mrf.mxu1 }
 0x247   :  { %v2003_v0 = vadd.f32 %v2002_v18, %v1834_v36  ;;  %v1667_v47 = vadd.f32 %v1666_v16, %v1498_v58 }
 0x248   :  { %v2173_v55 = vpop.f32.mrf.mxu0 }
 0x249   :  { %v2172_v13 = vadd.f32 %v2171_v12, %v2003_v0 }
 0x24b   :  { %2277 = vst [vmem:[%s4928_s3 + $0x120] sm:$0xff] %v2172_v13  ;;  %v3270_v13 = vld [vmem:[%s4927_s0 + $0x48c] sm:$0xf] }
 0x24c   :  { %v1835_v8 = vpop.f32.mrf.mxu2 }
 0x24d   :  { %v1836_v11 = vadd.f32 %v1835_v8, %v1667_v47  ;;  %v2004_v54 = vpop.f32.mrf.mxu3  ;;  %v3274_v47 = vld [vmem:[%s4927_s0 + $0x4a8] sm:$0xf0] }
 0x24e   :  { %v1669_v33 = vpop.f32.mrf.mxu1 }
 0x24f   :  { %v2005_v29 = vadd.f32 %v2004_v54, %v1836_v11  ;;  %v1670_v53 = vadd.f32 %v1669_v33, %v1501_v23  ;;  %v2896_v11 = vor.u32 %v3270_v13, %v2893_v22  ;;  %v2900_v54 = vor.u32 %v3273_v9, %v2899_v30  ;;  %v3280_v13 = vld [vmem:[%s4927_s0 + $0x4dc] sm:$0xf]  ;;  %v2933_v22 = vld [vmem:[%s4927_s0 + $0x4ec] sm:$0xf0]  ;;  %v2939_v30 = vld [vmem:[%s4927_s0 + $0x4e0] sm:$0xf] }
 0x250   :  { %v2176_v60 = vpop.f32.mrf.mxu0  ;;  %v2908_v33 = vor.u32 %v3274_v47, %v2907_v41  ;;  %v3283_v9 = vld [vmem:[%s4927_s0 + $0x4f0] sm:$0xf0]  ;;  %v2947_v41 = vld [vmem:[%s4927_s0 + $0x4e8] sm:$0xf]  ;;  %v3284_v47 = vld [vmem:[%s4927_s0 + $0x4f8] sm:$0xf0] }
 0x251   :  { %v2174_v24 = vadd.f32 %v2173_v55, %v2005_v29  ;;  %1708 = vmatmul.bf16.gmra.mxu1 %v2856_v63  ;;  %1877 = vmatmul.bf16.gmra.mxu2 %v2860_v61  ;;  %v2904_v61 = vor.u32 %v3271_v4, %v2901_v1  ;;  %v1511_v29 = vadd.f32 %v4520_v31, %v3901_v26  ;;  %v3281_v4 = vld [vmem:[%s4927_s0 + $0x4e4] sm:$0xf]  ;;  %v2941_v1 = vld [vmem:[%s4927_s0 + $0x4f4] sm:$0xf0] }
 0x252   :  { %2046 = vmatmul.bf16.gmra.mxu3 %v2864_v49 }
 0x253   :  { %3120 = vmatmul.msk.bf16.gmra.mxu0 %vm1299_vm0, %v2868_v28  ;;  %2278 = vst [vmem:[%s4928_s3 + $0x128] sm:$0xff] %v2174_v24 }
 0x254   :  { %v1838_v42 = vpop.f32.mrf.mxu2 }
 0x255   :  { %v1839_v46 = vadd.f32 %v1838_v42, %v1670_v53  ;;  %v2007_v5 = vpop.f32.mrf.mxu3 }
 0x256   :  { %v1671_v34 = vpop.f32.mrf.mxu1 }
 0x257   :  { %v2008_v38 = vadd.f32 %v2007_v5, %v1839_v46  ;;  %v1672_v7 = vadd.f32 %v1671_v34, %v1503_v15  ;;  %v3275_v15 = vld [vmem:[%s4927_s0 + $0x4b4] sm:$0xf] }
 0x258   :  { %v2178_v59 = vpop.f32.mrf.mxu0 }
 0x259   :  { %v2177_v45 = vadd.f32 %v2176_v60, %v2008_v38  ;;  %v4950_v38 = vld [vmem:[#allocation13_spill] sm:$0xff] }
 0x25a   :  { %v1513_v26 = vadd.f32 %v4520_v31, %v4950_v38 }
 0x25b   :  { %2279 = vst [vmem:[%s4928_s3 + $0x130] sm:$0xff] %v2177_v45  ;;  %v2913_v45 = vld [vmem:[%s4927_s0 + $0x4c4] sm:$0xf0] }
 0x25c   :  { %v1840_v21 = vpop.f32.mrf.mxu2 }
 0x25d   :  { %v1841_v52 = vadd.f32 %v1840_v21, %v1672_v7  ;;  %v2009_v37 = vpop.f32.mrf.mxu3  ;;  %v3279_v7 = vld [vmem:[%s4927_s0 + $0x4d0] sm:$0xf0] }
 0x25e   :  { %v1674_v56 = vpop.f32.mrf.mxu1 }
 0x25f   :  { %v2010_v62 = vadd.f32 %v2009_v37, %v1841_v52  ;;  %v1675_v10 = vadd.f32 %v1674_v56, %v1506_v20  ;;  %v2916_v52 = vor.u32 %v3275_v15, %v2913_v45  ;;  %v2920_v37 = vor.u32 %v3278_v51, %v2919_v17 }
 0x260   :  { %v2181_v12 = vpop.f32.mrf.mxu0  ;;  %v2928_v56 = vor.u32 %v3279_v7, %v2927_v39  ;;  %v4955_v7 = vld [vmem:[#allocation2_spill] sm:$0xff] }
 0x261   :  { %v2179_v57 = vadd.f32 %v2178_v59, %v2010_v62  ;;  %1713 = vmatmul.bf16.gmra.mxu1 %v2876_v14  ;;  %1882 = vmatmul.bf16.gmra.mxu2 %v2880_v43  ;;  %v2924_v43 = vor.u32 %v3276_v44, %v2921_v50  ;;  %v4951_v62 = vld [vmem:[#allocation15_spill] sm:$0xff] }
 0x262   :  { %2051 = vmatmul.bf16.gmra.mxu3 %v2884_v3 }
 0x263   :  { %3121 = vmatmul.msk.bf16.gmra.mxu0 %vm1299_vm0, %v2888_v2  ;;  %2280 = vst [vmem:[%s4928_s3 + $0x138] sm:$0xff] %v2179_v57 }
 0x264   :  { %v1843_v27 = vpop.f32.mrf.mxu2 }
 0x265   :  { %v1844_v36 = vadd.f32 %v1843_v27, %v1675_v10  ;;  %v2012_v18 = vpop.f32.mrf.mxu3 }
 0x266   :  { %v1676_v16 = vpop.f32.mrf.mxu1 }
 0x267   :  { %v2013_v0 = vadd.f32 %v2012_v18, %v1844_v36  ;;  %v1677_v6 = vadd.f32 %v1676_v16, %v1508_v48 }
 0x268   :  { %v2183_v55 = vpop.f32.mrf.mxu0 }
 0x269   :  { %v2182_v58 = vadd.f32 %v2181_v12, %v2013_v0  ;;  %v1516_v12 = vadd.f32 %v4520_v31, %v4951_v62 }
 0x26b   :  { %2281 = vst [vmem:[%s4928_s3 + $0x140] sm:$0xff] %v2182_v58 }
 0x26c   :  { %v1845_v25 = vpop.f32.mrf.mxu2 }
 0x26d   :  { %v1846_v32 = vadd.f32 %v1845_v25, %v1677_v6  ;;  %v2014_v8 = vpop.f32.mrf.mxu3 }
 0x26e   :  { %v1679_v63 = vpop.f32.mrf.mxu1 }
 0x26f   :  { %v2015_v49 = vadd.f32 %v2014_v8, %v1846_v32  ;;  %v1680_v23 = vadd.f32 %v1679_v63, %v1511_v29  ;;  %v4953_v29 = vld [vmem:[#allocation19_spill] sm:$0xff] }
 0x270   :  { %v2186_v28 = vpop.f32.mrf.mxu0 }
 0x271   :  { %v2184_v60 = vadd.f32 %v2183_v55, %v2015_v49  ;;  %1718 = vmatmul.bf16.gmra.mxu1 %v2896_v11  ;;  %1887 = vmatmul.bf16.gmra.mxu2 %v2900_v54  ;;  %v4952_v55 = vld [vmem:[#allocation17_spill] sm:$0xff]  ;;  %v2936_v11 = vor.u32 %v3280_v13, %v2933_v22  ;;  %v2940_v54 = vor.u32 %v3283_v9, %v2939_v30 }
 0x272   :  { %2056 = vmatmul.bf16.gmra.mxu3 %v2904_v61  ;;  %v1518_v48 = vadd.f32 %v4520_v31, %v4952_v55  ;;  %v2944_v61 = vor.u32 %v3281_v4, %v2941_v1 }
 0x273   :  { %3122 = vmatmul.msk.bf16.gmra.mxu0 %vm1299_vm0, %v2908_v33  ;;  %2282 = vst [vmem:[%s4928_s3 + $0x148] sm:$0xff] %v2184_v60  ;;  %v2948_v33 = vor.u32 %v3284_v47, %v2947_v41  ;;  %v1521_v60 = vadd.f32 %v4520_v31, %v4953_v29 }
 0x274   :  { %v1848_v24 = vpop.f32.mrf.mxu2 }
 0x275   :  { %v1849_v53 = vadd.f32 %v1848_v24, %v1680_v23  ;;  %v2017_v42 = vpop.f32.mrf.mxu3 }
 0x276   :  { %v1681_v46 = vpop.f32.mrf.mxu1 }
 0x277   :  { %v2018_v5 = vadd.f32 %v2017_v42, %v1849_v53  ;;  %v1682_v35 = vadd.f32 %v1681_v46, %v1513_v26  ;;  %v4954_v26 = vld [vmem:[#allocation21_spill] sm:$0xff] }
 0x278   :  { %v2188_v34 = vpop.f32.mrf.mxu0 }
 0x279   :  { %v2187_v59 = vadd.f32 %v2186_v28, %v2018_v5 }
 0x27b   :  { %2283 = vst [vmem:[%s4928_s3 + $0x150] sm:$0xff] %v2187_v59  ;;  %v1523_v59 = vadd.f32 %v4520_v31, %v4954_v26 }
 0x27c   :  { %v1850_v40 = vpop.f32.mrf.mxu2 }
 0x27d   :  { %v1851_v19 = vadd.f32 %v1850_v40, %v1682_v35  ;;  %v2019_v21 = vpop.f32.mrf.mxu3  ;;  %v1526_v40 = vadd.f32 %v4520_v31, %v4955_v7 }
 0x27e   :  { %v1684_v14 = vpop.f32.mrf.mxu1 }
 0x27f   :  { %v2020_v3 = vadd.f32 %v2019_v21, %v1851_v19  ;;  %v1685_v57 = vadd.f32 %v1684_v14, %v1516_v12 }
 0x280   :  { %v2191_v2 = vpop.f32.mrf.mxu0 }
 0x281   :  { %v2189_v20 = vadd.f32 %v2188_v34, %v2020_v3  ;;  %1723 = vmatmul.bf16.gmra.mxu1 %v2916_v52  ;;  %1892 = vmatmul.bf16.gmra.mxu2 %v2920_v37 }
 0x282   :  { %2061 = vmatmul.bf16.gmra.mxu3 %v2924_v43 }
 0x283   :  { %3123 = vmatmul.msk.bf16.gmra.mxu0 %vm1299_vm0, %v2928_v56  ;;  %2284 = vst [vmem:[%s4928_s3 + $0x158] sm:$0xff] %v2189_v20 }
 0x284   :  { %v1853_v10 = vpop.f32.mrf.mxu2 }
 0x285   :  { %v1854_v27 = vadd.f32 %v1853_v10, %v1685_v57  ;;  %v2022_v36 = vpop.f32.mrf.mxu3 }
 0x286   :  { %v1686_v18 = vpop.f32.mrf.mxu1 }
 0x287   :  { %v2023_v16 = vadd.f32 %v2022_v36, %v1854_v27  ;;  %v1687_v6 = vadd.f32 %v1686_v18, %v1518_v48 }
 0x288   :  { %v2193_v0 = vpop.f32.mrf.mxu0 }
 0x289   :  { %v2192_v58 = vadd.f32 %v2191_v2, %v2023_v16  ;;  %v4956_v2 = vld [vmem:[#allocation3_spill] sm:$0xff] }
 0x28a   :  { %v1528_v62 = vadd.f32 %v4520_v31, %v4956_v2 }
 0x28b   :  { %2285 = vst [vmem:[%s4928_s3 + $0x160] sm:$0xff] %v2192_v58 }
 0x28c   :  { %v1855_v25 = vpop.f32.mrf.mxu2 }
 0x28d   :  { %v1856_v32 = vadd.f32 %v1855_v25, %v1687_v6  ;;  %v2024_v8 = vpop.f32.mrf.mxu3  ;;  %v4958_v6 = vld [vmem:[#allocation5_spill] sm:$0xff] }
 0x28e   :  { %v1689_v63 = vpop.f32.mrf.mxu1  ;;  %v1533_v41 = vadd.f32 %v4520_v31, %v4958_v6 }
 0x28f   :  { %v2025_v49 = vadd.f32 %v2024_v8, %v1856_v32  ;;  %v1690_v24 = vadd.f32 %v1689_v63, %v1521_v60 }
 0x290   :  { %v2196_v28 = vpop.f32.mrf.mxu0 }
 0x291   :  { %v2194_v23 = vadd.f32 %v2193_v0, %v2025_v49  ;;  %1728 = vmatmul.bf16.gmra.mxu1 %v2936_v11  ;;  %1897 = vmatmul.bf16.gmra.mxu2 %v2940_v54  ;;  %v4957_v0 = vld [vmem:[#allocation4_spill] sm:$0xff] }
 0x292   :  { %2066 = vmatmul.bf16.gmra.mxu3 %v2944_v61  ;;  %v1531_v55 = vadd.f32 %v4520_v31, %v4957_v0 }
 0x293   :  { %3124 = vmatmul.msk.bf16.gmra.mxu0 %vm1299_vm0, %v2948_v33  ;;  %2286 = vst [vmem:[%s4928_s3 + $0x168] sm:$0xff] %v2194_v23  ;;  %v4959_v33 = vld [vmem:[#allocation6_spill] sm:$0xff] }
 0x294   :  { %v1858_v53 = vpop.f32.mrf.mxu2  ;;  %v1536_v49 = vadd.f32 %v4520_v31, %v4959_v33 }
 0x295   :  { %v1859_v42 = vadd.f32 %v1858_v53, %v1690_v24  ;;  %v2027_v46 = vpop.f32.mrf.mxu3 }
 0x296   :  { %v1691_v5 = vpop.f32.mrf.mxu1 }
 0x297   :  { %v2028_v34 = vadd.f32 %v2027_v46, %v1859_v42  ;;  %v1692_v45 = vadd.f32 %v1691_v5, %v1523_v59  ;;  %v4960_v5 = vld [vmem:[#allocation7_spill] sm:$0xff] }
 0x298   :  { %v2198_v38 = vpop.f32.mrf.mxu0 }
 0x299   :  { %v2197_v15 = vadd.f32 %v2196_v28, %v2028_v34  ;;  %v1538_v34 = vadd.f32 %v4520_v31, %v4960_v5 }
 0x29b   :  { %2287 = vst [vmem:[%s4928_s3 + $0x170] sm:$0xff] %v2197_v15 }
 0x29c   :  { %v1860_v17 = vpop.f32.mrf.mxu2 }
 0x29d   :  { %v1861_v51 = vadd.f32 %v1860_v17, %v1692_v45  ;;  %v2029_v44 = vpop.f32.mrf.mxu3 }
 0x29e   :  { %v1694_v50 = vpop.f32.mrf.mxu1 }
 0x29f   :  { %v2030_v35 = vadd.f32 %v2029_v44, %v1861_v51  ;;  %v1695_v21 = vadd.f32 %v1694_v50, %v1526_v40  ;;  %v4961_v50 = vld [vmem:[#allocation8_spill] sm:$0xff] }
 0x2a0   :  { %v2201_v39 = vpop.f32.mrf.mxu0 }
 0x2a1   :  { %v2199_v19 = vadd.f32 %v2198_v38, %v2030_v35  ;;  %v1541_v35 = vadd.f32 %v4520_v31, %v4961_v50 }
 0x2a3   :  { %2288 = vst [vmem:[%s4928_s3 + $0x178] sm:$0xff] %v2199_v19 }
 0x2a4   :  { %v1863_v52 = vpop.f32.mrf.mxu2 }
 0x2a5   :  { %v1864_v37 = vadd.f32 %v1863_v52, %v1695_v21  ;;  %v2032_v14 = vpop.f32.mrf.mxu3 }
 0x2a6   :  { %v1696_v43 = vpop.f32.mrf.mxu1 }
 0x2a7   :  { %v2033_v56 = vadd.f32 %v2032_v14, %v1864_v37  ;;  %v1697_v20 = vadd.f32 %v1696_v43, %v1528_v62  ;;  %v4962_v43 = vld [vmem:[#allocation9_spill] sm:$0xff] }
 0x2a8   :  { %v2203_v3 = vpop.f32.mrf.mxu0 }
 0x2a9   :  { %v2202_v12 = vadd.f32 %v2201_v39, %v2033_v56  ;;  %v1543_v56 = vadd.f32 %v4520_v31, %v4962_v43 }
 0x2ab   :  { %2289 = vst [vmem:[%s4928_s3 + $0x180] sm:$0xff] %v2202_v12 }
 0x2ac   :  { %v1865_v57 = vpop.f32.mrf.mxu2 }
 0x2ad   :  { %v1866_v10 = vadd.f32 %v1865_v57, %v1697_v20  ;;  %v2034_v27 = vpop.f32.mrf.mxu3 }
 0x2ae   :  { %v1699_v36 = vpop.f32.mrf.mxu1 }
 0x2af   :  { %v2035_v18 = vadd.f32 %v2034_v27, %v1866_v10  ;;  %v1700_v58 = vadd.f32 %v1699_v36, %v1531_v55  ;;  %v4963_v36 = vld [vmem:[#allocation10_spill] sm:$0xff] }
 0x2b0   :  { %v2206_v16 = vpop.f32.mrf.mxu0 }
 0x2b1   :  { %v2204_v48 = vadd.f32 %v2203_v3, %v2035_v18  ;;  %v1546_v18 = vadd.f32 %v4520_v31, %v4963_v36 }
 0x2b3   :  { %2290 = vst [vmem:[%s4928_s3 + $0x188] sm:$0xff] %v2204_v48 }
 0x2b4   :  { %v1868_v13 = vpop.f32.mrf.mxu2 }
 0x2b5   :  { %v1869_v22 = vadd.f32 %v1868_v13, %v1700_v58  ;;  %v2037_v30 = vpop.f32.mrf.mxu3 }
 0x2b6   :  { %v1701_v9 = vpop.f32.mrf.mxu1 }
 0x2b7   :  { %v2038_v4 = vadd.f32 %v2037_v30, %v1869_v22  ;;  %v1702_v25 = vadd.f32 %v1701_v9, %v1533_v41  ;;  %v4964_v9 = vld [vmem:[#allocation11_spill] sm:$0xff] }
 0x2b8   :  { %v2208_v1 = vpop.f32.mrf.mxu0 }
 0x2b9   :  { %v2207_v47 = vadd.f32 %v2206_v16, %v2038_v4  ;;  %v1548_v4 = vadd.f32 %v4520_v31, %v4964_v9 }
 0x2bb   :  { %2291 = vst [vmem:[%s4928_s3 + $0x190] sm:$0xff] %v2207_v47 }
 0x2bc   :  { %v1870_v32 = vpop.f32.mrf.mxu2 }
 0x2bd   :  { %v1871_v8 = vadd.f32 %v1870_v32, %v1702_v25  ;;  %v2039_v11 = vpop.f32.mrf.mxu3 }
 0x2be   :  { %v1704_v54 = vpop.f32.mrf.mxu1 }
 0x2bf   :  { %v2040_v63 = vadd.f32 %v2039_v11, %v1871_v8  ;;  %v1705_v29 = vadd.f32 %v1704_v54, %v1536_v49  ;;  %v4965_v54 = vld [vmem:[#allocation12_spill] sm:$0xff] }
 0x2c0   :  { %v2211_v61 = vpop.f32.mrf.mxu0 }
 0x2c1   :  { %v2209_v28 = vadd.f32 %v2208_v1, %v2040_v63  ;;  %v1551_v63 = vadd.f32 %v4520_v31, %v4965_v54 }
 0x2c3   :  { %2292 = vst [vmem:[%s4928_s3 + $0x198] sm:$0xff] %v2209_v28 }
 0x2c4   :  { %v1873_v60 = vpop.f32.mrf.mxu2 }
 0x2c5   :  { %v1874_v23 = vadd.f32 %v1873_v60, %v1705_v29  ;;  %v2042_v24 = vpop.f32.mrf.mxu3 }
 0x2c6   :  { %v1706_v53 = vpop.f32.mrf.mxu1 }
 0x2c7   :  { %v2043_v42 = vadd.f32 %v2042_v24, %v1874_v23  ;;  %v1707_v26 = vadd.f32 %v1706_v53, %v1538_v34  ;;  %v4966_v53 = vld [vmem:[#allocation14_spill] sm:$0xff] }
 0x2c8   :  { %v2213_v46 = vpop.f32.mrf.mxu0 }
 0x2c9   :  { %v2212_v38 = vadd.f32 %v2211_v61, %v2043_v42  ;;  %v1553_v42 = vadd.f32 %v4520_v31, %v4966_v53 }
 0x2cb   :  { %2293 = vst [vmem:[%s4928_s3 + $0x1a0] sm:$0xff] %v2212_v38 }
 0x2cc   :  { %v1875_v59 = vpop.f32.mrf.mxu2 }
 0x2cd   :  { %v1876_v15 = vadd.f32 %v1875_v59, %v1707_v26  ;;  %v2044_v45 = vpop.f32.mrf.mxu3 }
 0x2ce   :  { %v1709_v17 = vpop.f32.mrf.mxu1 }
 0x2cf   :  { %v2045_v51 = vadd.f32 %v2044_v45, %v1876_v15  ;;  %v1710_v7 = vadd.f32 %v1709_v17, %v1541_v35  ;;  %v4967_v45 = vld [vmem:[#allocation16_spill] sm:$0xff] }
 0x2d0   :  { %v2216_v44 = vpop.f32.mrf.mxu0  ;;  %v1556_v17 = vadd.f32 %v4520_v31, %v4967_v45 }
 0x2d1   :  { %v2214_v39 = vadd.f32 %v2213_v46, %v2045_v51 }
 0x2d3   :  { %2294 = vst [vmem:[%s4928_s3 + $0x1a8] sm:$0xff] %v2214_v39 }
 0x2d4   :  { %v1878_v40 = vpop.f32.mrf.mxu2 }
 0x2d5   :  { %v1879_v19 = vadd.f32 %v1878_v40, %v1710_v7  ;;  %v2047_v21 = vpop.f32.mrf.mxu3 }
 0x2d6   :  { %v1711_v52 = vpop.f32.mrf.mxu1 }
 0x2d7   :  { %v2048_v37 = vadd.f32 %v2047_v21, %v1879_v19  ;;  %v1712_v2 = vadd.f32 %v1711_v52, %v1543_v56  ;;  %v4968_v21 = vld [vmem:[#allocation18_spill] sm:$0xff] }
 0x2d8   :  { %v2218_v14 = vpop.f32.mrf.mxu0  ;;  %v1558_v52 = vadd.f32 %v4520_v31, %v4968_v21 }
 0x2d9   :  { %v2217_v3 = vadd.f32 %v2216_v44, %v2048_v37 }
 0x2db   :  { %2295 = vst [vmem:[%s4928_s3 + $0x1b0] sm:$0xff] %v2217_v3 }
 0x2dc   :  { %v1880_v62 = vpop.f32.mrf.mxu2 }
 0x2dd   :  { %v1881_v12 = vadd.f32 %v1880_v62, %v1712_v2  ;;  %v2049_v20 = vpop.f32.mrf.mxu3 }
 0x2de   :  { %v1714_v57 = vpop.f32.mrf.mxu1 }
 0x2df   :  { %v2050_v10 = vadd.f32 %v2049_v20, %v1881_v12  ;;  %v1715_v0 = vadd.f32 %v1714_v57, %v1546_v18  ;;  %v4969_v20 = vld [vmem:[#allocation20_spill] sm:$0xff] }
 0x2e0   :  { %v2221_v27 = vpop.f32.mrf.mxu0  ;;  %v1561_v57 = vadd.f32 %v4520_v31, %v4969_v20 }
 0x2e1   :  { %v2219_v16 = vadd.f32 %v2218_v14, %v2050_v10 }
 0x2e3   :  { %2296 = vst [vmem:[%s4928_s3 + $0x1b8] sm:$0xff] %v2219_v16 }
 0x2e4   :  { %v1883_v55 = vpop.f32.mrf.mxu2 }
 0x2e5   :  { %v1884_v48 = vadd.f32 %v1883_v55, %v1715_v0  ;;  %v2052_v58 = vpop.f32.mrf.mxu3 }
 0x2e6   :  { %v1716_v13 = vpop.f32.mrf.mxu1 }
 0x2e7   :  { %v2053_v22 = vadd.f32 %v2052_v58, %v1884_v48  ;;  %v1717_v6 = vadd.f32 %v1716_v13, %v1548_v4  ;;  %v4970_v58 = vld [vmem:[#allocation22_spill] sm:$0xff] }
 0x2e8   :  { %v2223_v30 = vpop.f32.mrf.mxu0  ;;  %v1563_v13 = vadd.f32 %v4520_v31, %v4970_v58 }
 0x2e9   :  { %v2222_v1 = vadd.f32 %v2221_v27, %v2053_v22 }
 0x2eb   :  { %2297 = vst [vmem:[%s4928_s3 + $0x1c0] sm:$0xff] %v2222_v1 }
 0x2ec   :  { %v1885_v41 = vpop.f32.mrf.mxu2 }
 0x2ed   :  { %v1886_v47 = vadd.f32 %v1885_v41, %v1717_v6  ;;  %v2054_v25 = vpop.f32.mrf.mxu3 }
 0x2ee   :  { %v1719_v32 = vpop.f32.mrf.mxu1 }
 0x2ef   :  { %v2055_v8 = vadd.f32 %v2054_v25, %v1886_v47  ;;  %v1720_v33 = vadd.f32 %v1719_v32, %v1551_v63 }
 0x2f0   :  { %v2226_v11 = vpop.f32.mrf.mxu0 }
 0x2f1   :  { %v2224_v61 = vadd.f32 %v2223_v30, %v2055_v8 }
 0x2f3   :  { %2298 = vst [vmem:[%s4928_s3 + $0x1c8] sm:$0xff] %v2224_v61 }
 0x2f4   :  { %v1888_v49 = vpop.f32.mrf.mxu2 }
 0x2f5   :  { %v1889_v28 = vadd.f32 %v1888_v49, %v1720_v33  ;;  %v2057_v29 = vpop.f32.mrf.mxu3 }
 0x2f6   :  { %v1721_v60 = vpop.f32.mrf.mxu1 }
 0x2f7   :  { %v2058_v23 = vadd.f32 %v2057_v29, %v1889_v28  ;;  %v1722_v5 = vadd.f32 %v1721_v60, %v1553_v42 }
 0x2f8   :  { %v2228_v24 = vpop.f32.mrf.mxu0 }
 0x2f9   :  { %v2227_v46 = vadd.f32 %v2226_v11, %v2058_v23 }
 0x2fb   :  { %2299 = vst [vmem:[%s4928_s3 + $0x1d0] sm:$0xff] %v2227_v46 }
 0x2fc   :  { %v1890_v34 = vpop.f32.mrf.mxu2 }
 0x2fd   :  { %v1891_v38 = vadd.f32 %v1890_v34, %v1722_v5  ;;  %v2059_v26 = vpop.f32.mrf.mxu3 }
 0x2fe   :  { %v1724_v59 = vpop.f32.mrf.mxu1 }
 0x2ff   :  { %v2060_v15 = vadd.f32 %v2059_v26, %v1891_v38  ;;  %v1725_v50 = vadd.f32 %v1724_v59, %v1556_v17 }
 0x300   :  { %v2231_v44 = vpop.f32.mrf.mxu0 }
 0x301   :  { %v2229_v51 = vadd.f32 %v2228_v24, %v2060_v15 }
 0x303   :  { %2300 = vst [vmem:[%s4928_s3 + $0x1d8] sm:$0xff] %v2229_v51 }
 0x304   :  { %v1893_v35 = vpop.f32.mrf.mxu2 }
 0x305   :  { %v1894_v39 = vadd.f32 %v1893_v35, %v1725_v50  ;;  %v2062_v7 = vpop.f32.mrf.mxu3 }
 0x306   :  { %v1726_v40 = vpop.f32.mrf.mxu1 }
 0x307   :  { %v2063_v19 = vadd.f32 %v2062_v7, %v1894_v39  ;;  %v1727_v14 = vadd.f32 %v1726_v40, %v1558_v52 }
 0x308   :  { %v2233_v43 = vpop.f32.mrf.mxu0 }
 0x309   :  { %v2232_v37 = vadd.f32 %v2231_v44, %v2063_v19 }
 0x30b   :  { %2301 = vst [vmem:[%s4928_s3 + $0x1e0] sm:$0xff] %v2232_v37 }
 0x30c   :  { %v1895_v56 = vpop.f32.mrf.mxu2 }
 0x30d   :  { %v1896_v3 = vadd.f32 %v1895_v56, %v1727_v14  ;;  %v2064_v2 = vpop.f32.mrf.mxu3 }
 0x30e   :  { %v1729_v62 = vpop.f32.mrf.mxu1 }
 0x30f   :  { %v2065_v12 = vadd.f32 %v2064_v2, %v1896_v3  ;;  %v1730_v27 = vadd.f32 %v1729_v62, %v1561_v57 }
 0x310   :  { %v2236_v0 = vpop.f32.mrf.mxu0 }
 0x311   :  { %v2234_v10 = vadd.f32 %v2233_v43, %v2065_v12 }
 0x313   :  { %2302 = vst [vmem:[%s4928_s3 + $0x1e8] sm:$0xff] %v2234_v10 }
 0x314   :  { %v1898_v36 = vpop.f32.mrf.mxu2 }
 0x315   :  { %v1899_v18 = vadd.f32 %v1898_v36, %v1730_v27  ;;  %v2067_v16 = vpop.f32.mrf.mxu3 }
 0x316   :  { %v1731_v48 = vpop.f32.mrf.mxu1 }
 0x317   :  { %v2068_v55 = vadd.f32 %v2067_v16, %v1899_v18  ;;  %v1732_v30 = vadd.f32 %v1731_v48, %v1563_v13 }
 0x318   :  { %v2238_v41 = vpop.f32.mrf.mxu0 }
 0x319   :  { %v2237_v22 = vadd.f32 %v2236_v0, %v2068_v55 }
 0x31b   :  { %2303 = vst [vmem:[%s4928_s3 + $0x1f0] sm:$0xff] %v2237_v22 }
 0x31c   :  { %v1900_v9 = vpop.f32.mrf.mxu2 }
 0x31d   :  { %v1901_v4 = vadd.f32 %v1900_v9, %v1732_v30  ;;  %v2069_v1 = vpop.f32.mrf.mxu3 }
 0x31f   :  { %v2070_v6 = vadd.f32 %v2069_v1, %v1901_v4 }
 0x321   :  { %v2239_v47 = vadd.f32 %v2238_v41, %v2070_v6 }
 0x323   :  { %2304 = vst [vmem:[%s4928_s3 + $0x1f8] sm:$0xff] %v2239_v47 }

</bundles_post_ra>
